<compile_context>
chip_gen: v7x
topology: tpu7x:2x2x1
jax: 0.10.0
libtpu: 0.0.40
codegen_flags: <defaults>
</compile_context>

<pallas_src>
import functools

import jax
import jax.numpy as jnp
from jax import lax
from jax.experimental import pallas as pl
from jax.experimental.pallas import tpu as pltpu
from jax.scipy.linalg import block_diag


def _full_spec(shape):
    # whole-array block (block_shape == array shape satisfies the (8,128) rule)
    return pl.BlockSpec(shape, lambda *_: (0,) * len(shape))


# fp32-exact matmuls (GCN, hoisted input projections, MLP head, reference).
_HI_DOT = functools.partial(jnp.dot, preferred_element_type=jnp.float32,
                            precision=lax.Precision.HIGHEST)
# single-pass MXU matmuls for the serial GRU recurrence: HIGHEST's multi-pass
# lowering sits directly on the T-step dependency chain; values are
# sigmoid/tanh-bounded, so single-pass is accurate (checked vs fp32 reference).
_FAST_DOT = functools.partial(jnp.dot, preferred_element_type=jnp.float32)


# ---------------- single fused forward kernel --------------------------------------
def _gcngru_kernel(aT_ref, xT_ref, w1T_ref, b1c_ref, w2T_ref, b2c_ref,
                   w0_ref, bi0_ref, u0_ref, bhn0_ref,
                   w1g_ref, bi1_ref, u1_ref, bhn1_ref,
                   wl1_ref, bl1_ref, wl2_ref, bl2_ref,
                   out_ref, *, B, G, E, H, T):
    GH = G * H

    # ---- 2-layer GCN, computed transposed:
    #      out.T = W2.T @ ((W1.T @ (X.T @ A.T) + b1) @ A.T) + b2
    #      rows = GCN feature (== GRU time step), cols = node (b*G*E + g*E + e)
    aT = aT_ref[...]
    t1 = _HI_DOT(xT_ref[...], aT)                       # [Cin, N]
    h1T = _HI_DOT(w1T_ref[...], t1) + b1c_ref[...]      # [2H,  N]
    t2 = _HI_DOT(h1T, aT)                               # [2H,  N]
    gcnT = _HI_DOT(w2T_ref[...], t2) + b2c_ref[...]     # [T(=H), N]

    # ---- band-fused 2-layer GRU ----
    # Hoisted layer-0 input projections: each batch element's [T, G*E] slab is a
    # plain lane slice of gcnT; one matmul covers all T steps, all bands, all
    # three gates.  Column layout: [r | z | n], each G*H wide, band-major.
    w0 = w0_ref[...]
    bi0 = bi0_ref[...]
    gi0 = [_HI_DOT(gcnT[:, b * G * E:(b + 1) * G * E], w0) + bi0
           for b in range(B)]                           # B x [T, 3*G*H]

    u0 = u0_ref[...]        # [G*H, 3*G*H] block-diag hidden weights, layer 0
    bhn0 = bhn0_ref[...]    # [1, G*H]     b_hh_n (stays inside r * (.))
    w1g = w1g_ref[...]      # [G*H, 3*G*H] block-diag input weights, layer 1
    bi1 = bi1_ref[...]      # [1, 3*G*H]
    u1 = u1_ref[...]        # [G*H, 3*G*H]
    bhn1 = bhn1_ref[...]    # [1, G*H]

    h0 = jnp.zeros((B, GH), jnp.float32)
    h1 = jnp.zeros((B, GH), jnp.float32)
    # Both layers advance inside ONE fully unrolled loop (T is static), so the
    # serial chain is ~T steps, not 2*T.
    for t in range(T):
        # [B, 3*G*H]; depends only on the precomputed gi0 -> off the serial chain
        gi0_t = jnp.concatenate([gi0[b][t:t + 1, :] for b in range(B)], axis=0)

        # layer 0
        gh0 = _FAST_DOT(h0, u0)
        r0 = jax.nn.sigmoid(gi0_t[:, :GH] + gh0[:, :GH])
        z0 = jax.nn.sigmoid(gi0_t[:, GH:2 * GH] + gh0[:, GH:2 * GH])
        n0 = jnp.tanh(gi0_t[:, 2 * GH:] + r0 * (gh0[:, 2 * GH:] + bhn0))
        h0 = (1.0 - z0) * n0 + z0 * h0

        # layer 1 (input = layer-0 hidden of this step)
        gi1 = _FAST_DOT(h0, w1g) + bi1
        gh1 = _FAST_DOT(h1, u1)
        r1 = jax.nn.sigmoid(gi1[:, :GH] + gh1[:, :GH])
        z1 = jax.nn.sigmoid(gi1[:, GH:2 * GH] + gh1[:, GH:2 * GH])
        n1 = jnp.tanh(gi1[:, 2 * GH:] + r1 * (gh1[:, 2 * GH:] + bhn1))
        h1 = (1.0 - z1) * n1 + z1 * h1

    # h1 is already laid out as 'bs (g hc)' -- exactly what lin1 expects.
    # ---- MLP head + softmax ----
    hid = jnp.maximum(_HI_DOT(h1, wl1_ref[...]) + bl1_ref[...], 0.0)
    logits = _HI_DOT(hid, wl2_ref[...]) + bl2_ref[...]
    m = jnp.max(logits, axis=-1, keepdims=True)
    e = jnp.exp(logits - m)
    out_ref[...] = e / jnp.sum(e, axis=-1, keepdims=True)


# ---------------- glue: PyG-style symmetric GCN normalization (dense A_hat) --------
# NOTE: computed ONCE outside the jitted forward (static edge structure).
def gcn_norm_dense(edge_index, edge_weight, num_nodes):
    src, dst = edge_index[0], edge_index[1]
    loop = jnp.arange(num_nodes, dtype=src.dtype)
    src = jnp.concatenate([src, loop])
    dst = jnp.concatenate([dst, loop])
    ew = jnp.concatenate([edge_weight, jnp.ones((num_nodes,), jnp.float32)])
    deg = jnp.zeros((num_nodes,), jnp.float32).at[dst].add(ew)
    dinv = jnp.where(deg > 0, lax.rsqrt(deg), 0.0)
    norm = dinv[src] * ew * dinv[dst]
    # out[dst] += norm * x[src]  =>  A_hat[dst, src] = norm
    return jnp.zeros((num_nodes, num_nodes), jnp.float32).at[dst, src].add(norm)


# ---------------- GRU parameter packing (torch layout -> fused block-diag) ---------
def _pack_gru_layer(per_band, H):
    """per_band: list over bands of (w_ih [3H,Din], w_hh [3H,H], b_ih, b_hh),
    torch row order (r|z|n).  Returns:
      W_bd [G*Din, 3*G*H]  input weights  (cols: [r|z|n], band-major in a gate)
      U_bd [G*H,   3*G*H]  hidden weights (block-diagonal per band)
      bi   [1, 3*G*H]      gi bias: r,z folded (b_ih+b_hh), n = b_ih only
      bhn  [1, G*H]        b_hh_n (applied inside r * (W_hn h + b_hn))
    """
    G = len(per_band)
    W_cols, U_cols, bi_parts = [], [], []
    for gate in range(3):                       # 0=r, 1=z, 2=n
        sl = slice(gate * H, (gate + 1) * H)
        W_cols.append(block_diag(*[w_ih[sl].T for (w_ih, _, _, _) in per_band]))
        U_cols.append(block_diag(*[w_hh[sl].T for (_, w_hh, _, _) in per_band]))
        if gate < 2:
            bi_parts.append(jnp.concatenate(
                [b_ih[sl] + b_hh[sl] for (_, _, b_ih, b_hh) in per_band]))
        else:
            bi_parts.append(jnp.concatenate(
                [b_ih[sl] for (_, _, b_ih, _) in per_band]))
    W_bd = jnp.concatenate(W_cols, axis=1)
    U_bd = jnp.concatenate(U_cols, axis=1)
    bi = jnp.concatenate(bi_parts).reshape(1, 3 * G * H)
    bhn = jnp.concatenate(
        [b_hh[2 * H:] for (_, _, _, b_hh) in per_band]).reshape(1, G * H)
    return W_bd, U_bd, bi, bhn


def prepare_params(raw, *, H):
    """One-time packing of torch-layout params into the fused-kernel layout."""
    l0 = [band[0] for band in raw["gru"]]
    l1 = [band[1] for band in raw["gru"]]
    w0, u0, bi0, bhn0 = _pack_gru_layer(l0, H)
    w1g, u1, bi1, bhn1 = _pack_gru_layer(l1, H)
    return {
        "w1T": raw["w_g1"].T, "b1c": raw["b_g1"].reshape(-1, 1),
        "w2T": raw["w_g2"].T, "b2c": raw["b_g2"].reshape(-1, 1),
        "gru_w0": w0, "gru_u0": u0, "gru_bi0": bi0, "gru_bhn0": bhn0,
        "gru_w1": w1g, "gru_u1": u1, "gru_bi1": bi1, "gru_bhn1": bhn1,
        "wl1": raw["w_l1"], "bl1": raw["b_l1"].reshape(1, -1),
        "wl2": raw["w_l2"], "bl2": raw["b_l2"].reshape(1, -1),
    }


# ---------------- full forward (GCNGRU.forward semantics, eval mode) ---------------
def gcngru_forward(x, a_hat_T, p, *, bs, n_freq_bands, hidden_channels, n_classes):
    H = hidden_channels
    G = n_freq_bands
    E = 32          # GRU input size, fixed by the module (rearrange e=32)
    T = H           # GRU sequence length = GCN output feature dim

    # Only wrapper-side op: trivial [N, Cin] -> [Cin, N] transpose of the input
    # so the fused kernel runs the whole GCN in transposed form (keeps the GRU's
    # time-major inputs as plain lane slices, no in-kernel transpose).
    xT = x.T

    args = (a_hat_T, xT,
            p["w1T"], p["b1c"], p["w2T"], p["b2c"],
            p["gru_w0"], p["gru_bi0"], p["gru_u0"], p["gru_bhn0"],
            p["gru_w1"], p["gru_bi1"], p["gru_u1"], p["gru_bhn1"],
            p["wl1"], p["bl1"], p["wl2"], p["bl2"])

    kernel = functools.partial(_gcngru_kernel, B=bs, G=G, E=E, H=H, T=T)
    return pl.pallas_call(
        kernel,
        grid=(1,),
        in_specs=[_full_spec(a.shape) for a in args],
        out_specs=_full_spec((bs, n_classes)),
        out_shape=jax.ShapeDtypeStruct((bs, n_classes), jnp.float32),
        compiler_params=pltpu.CompilerParams(
            dimension_semantics=("arbitrary",)),
    )(*args)


# ---------------- pure-JAX fp32 reference (mirrors the PyTorch module, eval) -------
def reference_forward(x, a_hat, raw, *, bs, G, H):
    E = 32
    h1 = _HI_DOT(a_hat, _HI_DOT(x, raw["w_g1"])) + raw["b_g1"]
    h2 = _HI_DOT(a_hat, _HI_DOT(h1, raw["w_g2"])) + raw["b_g2"]        # [N, H]
    xg = h2.reshape(bs, G, E, H).transpose(1, 0, 3, 2)                 # 'g bs f e'

    def gru_layer(inp, w_ih, w_hh, b_ih, b_hh):                        # [bs, T, Din]
        h = jnp.zeros((inp.shape[0], H), jnp.float32)
        outs = []
        for t in range(inp.shape[1]):
            gi = _HI_DOT(inp[:, t], w_ih.T) + b_ih
            gh = _HI_DOT(h, w_hh.T) + b_hh
            r = jax.nn.sigmoid(gi[:, :H] + gh[:, :H])
            z = jax.nn.sigmoid(gi[:, H:2 * H] + gh[:, H:2 * H])
            n = jnp.tanh(gi[:, 2 * H:] + r * gh[:, 2 * H:])
            h = (1.0 - z) * n + z * h
            outs.append(h)
        return jnp.stack(outs, axis=1), h

    feats = []
    for g in range(G):
        l0, l1 = raw["gru"][g]
        seq0, _ = gru_layer(xg[g], *l0)
        _, h_last = gru_layer(seq0, *l1)
        feats.append(h_last)
    feat = jnp.stack(feats).transpose(1, 0, 2).reshape(bs, G * H)
    hid = jnp.maximum(_HI_DOT(feat, raw["w_l1"]) + raw["b_l1"], 0.0)
    logits = _HI_DOT(hid, raw["w_l2"]) + raw["b_l2"]
    return jax.nn.softmax(logits, axis=-1)


if __name__ == "__main__":
    key = jax.random.PRNGKey(0)
    bs = 2
    n_freq_bands = 3
    e_nodes = 32            # fixed by the module (rearrange e=32, GRU input size 32)
    in_channels = 8
    hidden_channels = 16    # GRU hidden size; also the GRU sequence length
    n_classes = 4
    N = bs * n_freq_bands * e_nodes   # 192 nodes

    keys = jax.random.split(key, 12)

    # ---- deterministic inputs (a "batch" of graphs flattened into one graph) ----
    x = jax.random.normal(keys[0], (N, in_channels), jnp.float32)
    src = jnp.arange(N, dtype=jnp.int32)
    dst = (src + 1) % N
    edge_index = jnp.stack(
        [jnp.concatenate([src, dst]), jnp.concatenate([dst, src])])      # [2, 2N]
    edge_attr = jax.random.uniform(
        keys[1], (edge_index.shape[1],), jnp.float32, 0.1, 1.0)

    # ---- deterministic synthetic parameters (torch layouts) ----
    def u(k, shape, scale=0.1):
        return jax.random.uniform(k, shape, jnp.float32, -scale, scale)

    H = hidden_channels
    gru_raw = []
    gk = jax.random.split(keys[6], n_freq_bands * 8).reshape(n_freq_bands, 8, 2)
    for g in range(n_freq_bands):
        layer0 = (u(gk[g, 0], (3 * H, 32)),   # w_ih_l0
                  u(gk[g, 1], (3 * H, H)),    # w_hh_l0
                  u(gk[g, 2], (3 * H,)),      # b_ih_l0
                  u(gk[g, 3], (3 * H,)))      # b_hh_l0
        layer1 = (u(gk[g, 4], (3 * H, H)),    # w_ih_l1
                  u(gk[g, 5], (3 * H, H)),    # w_hh_l1
                  u(gk[g, 6], (3 * H,)),      # b_ih_l1
                  u(gk[g, 7], (3 * H,)))      # b_hh_l1
        gru_raw.append((layer0, layer1))

    raw = {
        "w_g1": u(keys[2], (in_channels, 2 * H)),    # gconv1 weight (stored [in,out])
        "b_g1": u(keys[3], (2 * H,)),
        "w_g2": u(keys[4], (2 * H, H)),              # gconv2 weight
        "b_g2": u(keys[5], (H,)),
        "w_l1": u(keys[7], (n_freq_bands * H, H)),   # lin1 weight (stored transposed)
        "b_l1": u(keys[8], (H,)),
        "w_l2": u(keys[9], (H, n_classes)),          # lin2 weight (stored transposed)
        "b_l2": u(keys[10], (n_classes,)),
        "gru": gru_raw,
    }

    # Static graph -> build normalized dense adjacency (and its transpose) ONCE,
    # outside the jitted forward.
    a_hat = jax.block_until_ready(gcn_norm_dense(edge_index, edge_attr, N))
    a_hat_T = jnp.transpose(a_hat)
    params = prepare_params(raw, H=H)   # one-time block-diag / bias packing

    fwd = jax.jit(functools.partial(
        gcngru_forward, bs=bs, n_freq_bands=n_freq_bands,
        hidden_channels=hidden_channels, n_classes=n_classes))

    out = jax.block_until_ready(fwd(x, a_hat_T, params))

    assert out.shape == (bs, n_classes), out.shape
    assert bool(jnp.all(jnp.isfinite(out)))
    assert bool(jnp.allclose(jnp.sum(out, axis=-1), 1.0, atol=1e-5))

    # numerical parity vs. a pure-JAX fp32 reference of the original module
    ref = reference_forward(x, a_hat, raw, bs=bs, G=n_freq_bands, H=H)
    assert bool(jnp.allclose(out, ref, atol=1e-2)), (out, ref)

    print("KERNEL_OK")
</pallas_src>

<mosaic_0001>
module attributes {stable_mosaic.version = 11 : i64} {
  func.func @_gcngru_kernel(%arg0: i32, %arg1: memref<192x192xf32, #tpu.memory_space<vmem>>, %arg2: memref<8x192xf32, #tpu.memory_space<vmem>>, %arg3: memref<32x8xf32, #tpu.memory_space<vmem>>, %arg4: memref<32x1xf32, #tpu.memory_space<vmem>>, %arg5: memref<16x32xf32, #tpu.memory_space<vmem>>, %arg6: memref<16x1xf32, #tpu.memory_space<vmem>>, %arg7: memref<96x144xf32, #tpu.memory_space<vmem>>, %arg8: memref<1x144xf32, #tpu.memory_space<vmem>>, %arg9: memref<48x144xf32, #tpu.memory_space<vmem>>, %arg10: memref<1x48xf32, #tpu.memory_space<vmem>>, %arg11: memref<48x144xf32, #tpu.memory_space<vmem>>, %arg12: memref<1x144xf32, #tpu.memory_space<vmem>>, %arg13: memref<48x144xf32, #tpu.memory_space<vmem>>, %arg14: memref<1x48xf32, #tpu.memory_space<vmem>>, %arg15: memref<48x16xf32, #tpu.memory_space<vmem>>, %arg16: memref<1x16xf32, #tpu.memory_space<vmem>>, %arg17: memref<16x4xf32, #tpu.memory_space<vmem>>, %arg18: memref<1x4xf32, #tpu.memory_space<vmem>>, %arg19: memref<2x4xf32, #tpu.memory_space<vmem>>) attributes {dimension_semantics = [#tpu.dimension_semantics<arbitrary>], iteration_bounds = array<i64: 1>, scalar_prefetch = 0 : i64, scratch_operands = 0 : i64, tpu.core_type = #tpu.core_type<tc>, window_params = [{pipeline_mode = #tpu.pipeline_mode<synchronous>, transform_indices = @transform_0, window_bounds = array<i64: 192, 192>}, {pipeline_mode = #tpu.pipeline_mode<synchronous>, transform_indices = @transform_1, window_bounds = array<i64: 8, 192>}, {pipeline_mode = #tpu.pipeline_mode<synchronous>, transform_indices = @transform_2, window_bounds = array<i64: 32, 8>}, {pipeline_mode = #tpu.pipeline_mode<synchronous>, transform_indices = @transform_3, window_bounds = array<i64: 32, 1>}, {pipeline_mode = #tpu.pipeline_mode<synchronous>, transform_indices = @transform_4, window_bounds = array<i64: 16, 32>}, {pipeline_mode = #tpu.pipeline_mode<synchronous>, transform_indices = @transform_5, window_bounds = array<i64: 16, 1>}, {pipeline_mode = #tpu.pipeline_mode<synchronous>, transform_indices = @transform_6, window_bounds = array<i64: 96, 144>}, {pipeline_mode = #tpu.pipeline_mode<synchronous>, transform_indices = @transform_7, window_bounds = array<i64: 1, 144>}, {pipeline_mode = #tpu.pipeline_mode<synchronous>, transform_indices = @transform_8, window_bounds = array<i64: 48, 144>}, {pipeline_mode = #tpu.pipeline_mode<synchronous>, transform_indices = @transform_9, window_bounds = array<i64: 1, 48>}, {pipeline_mode = #tpu.pipeline_mode<synchronous>, transform_indices = @transform_10, window_bounds = array<i64: 48, 144>}, {pipeline_mode = #tpu.pipeline_mode<synchronous>, transform_indices = @transform_11, window_bounds = array<i64: 1, 144>}, {pipeline_mode = #tpu.pipeline_mode<synchronous>, transform_indices = @transform_12, window_bounds = array<i64: 48, 144>}, {pipeline_mode = #tpu.pipeline_mode<synchronous>, transform_indices = @transform_13, window_bounds = array<i64: 1, 48>}, {pipeline_mode = #tpu.pipeline_mode<synchronous>, transform_indices = @transform_14, window_bounds = array<i64: 48, 16>}, {pipeline_mode = #tpu.pipeline_mode<synchronous>, transform_indices = @transform_15, window_bounds = array<i64: 1, 16>}, {pipeline_mode = #tpu.pipeline_mode<synchronous>, transform_indices = @transform_16, window_bounds = array<i64: 16, 4>}, {pipeline_mode = #tpu.pipeline_mode<synchronous>, transform_indices = @transform_17, window_bounds = array<i64: 1, 4>}, {pipeline_mode = #tpu.pipeline_mode<synchronous>, transform_indices = @transform_18, window_bounds = array<i64: 2, 4>}]} {
    %c0 = arith.constant 0 : index
    %c0_0 = arith.constant 0 : index
    %0 = vector.load %arg1[%c0, %c0_0] : memref<192x192xf32, #tpu.memory_space<vmem>>, vector<192x192xf32>
    %c0_1 = arith.constant 0 : index
    %c0_2 = arith.constant 0 : index
    %1 = vector.load %arg2[%c0_1, %c0_2] : memref<8x192xf32, #tpu.memory_space<vmem>>, vector<8x192xf32>
    %cst = arith.constant dense<0.000000e+00> : vector<8x192xf32>
    %2 = tpu.matmul %1, %0, %cst {dimension_numbers = #tpu.dot_dimension_numbers<[1], [0], [0], [1], [0, 0, 1, 1], [], []>, precision = #tpu.contract_precision<fp32>} : vector<8x192xf32>, vector<192x192xf32>, vector<8x192xf32> -> vector<8x192xf32>
    %c0_3 = arith.constant 0 : index
    %c0_4 = arith.constant 0 : index
    %3 = vector.load %arg3[%c0_3, %c0_4] : memref<32x8xf32, #tpu.memory_space<vmem>>, vector<32x8xf32>
    %cst_5 = arith.constant dense<0.000000e+00> : vector<32x192xf32>
    %4 = tpu.matmul %3, %2, %cst_5 {dimension_numbers = #tpu.dot_dimension_numbers<[1], [0], [0], [1], [0, 0, 1, 1], [], []>, precision = #tpu.contract_precision<fp32>} : vector<32x8xf32>, vector<8x192xf32>, vector<32x192xf32> -> vector<32x192xf32>
    %c0_6 = arith.constant 0 : index
    %c0_7 = arith.constant 0 : index
    %5 = vector.load %arg4[%c0_6, %c0_7] : memref<32x1xf32, #tpu.memory_space<vmem>>, vector<32x1xf32>
    %6 = vector.broadcast %5 : vector<32x1xf32> to vector<32x192xf32>
    %7 = arith.addf %4, %6 : vector<32x192xf32>
    %cst_8 = arith.constant dense<0.000000e+00> : vector<32x192xf32>
    %8 = tpu.matmul %7, %0, %cst_8 {dimension_numbers = #tpu.dot_dimension_numbers<[1], [0], [0], [1], [0, 0, 1, 1], [], []>, precision = #tpu.contract_precision<fp32>} : vector<32x192xf32>, vector<192x192xf32>, vector<32x192xf32> -> vector<32x192xf32>
    %c0_9 = arith.constant 0 : index
    %c0_10 = arith.constant 0 : index
    %9 = vector.load %arg5[%c0_9, %c0_10] : memref<16x32xf32, #tpu.memory_space<vmem>>, vector<16x32xf32>
    %cst_11 = arith.constant dense<0.000000e+00> : vector<16x192xf32>
    %10 = tpu.matmul %9, %8, %cst_11 {dimension_numbers = #tpu.dot_dimension_numbers<[1], [0], [0], [1], [0, 0, 1, 1], [], []>, precision = #tpu.contract_precision<fp32>} : vector<16x32xf32>, vector<32x192xf32>, vector<16x192xf32> -> vector<16x192xf32>
    %c0_12 = arith.constant 0 : index
    %c0_13 = arith.constant 0 : index
    %11 = vector.load %arg6[%c0_12, %c0_13] : memref<16x1xf32, #tpu.memory_space<vmem>>, vector<16x1xf32>
    %12 = vector.broadcast %11 : vector<16x1xf32> to vector<16x192xf32>
    %13 = arith.addf %10, %12 : vector<16x192xf32>
    %c0_14 = arith.constant 0 : index
    %c0_15 = arith.constant 0 : index
    %14 = vector.load %arg7[%c0_14, %c0_15] : memref<96x144xf32, #tpu.memory_space<vmem>>, vector<96x144xf32>
    %c0_16 = arith.constant 0 : index
    %c0_17 = arith.constant 0 : index
    %15 = vector.load %arg8[%c0_16, %c0_17] : memref<1x144xf32, #tpu.memory_space<vmem>>, vector<1x144xf32>
    %16 = vector.extract_strided_slice %13 {offsets = [0, 0], sizes = [16, 96], strides = [1, 1]} : vector<16x192xf32> to vector<16x96xf32>
    %cst_18 = arith.constant dense<0.000000e+00> : vector<16x144xf32>
    %17 = tpu.matmul %16, %14, %cst_18 {dimension_numbers = #tpu.dot_dimension_numbers<[1], [0], [0], [1], [0, 0, 1, 1], [], []>, precision = #tpu.contract_precision<fp32>} : vector<16x96xf32>, vector<96x144xf32>, vector<16x144xf32> -> vector<16x144xf32>
    %18 = vector.broadcast %15 : vector<1x144xf32> to vector<16x144xf32>
    %19 = arith.addf %17, %18 : vector<16x144xf32>
    %20 = vector.extract_strided_slice %13 {offsets = [0, 96], sizes = [16, 96], strides = [1, 1]} : vector<16x192xf32> to vector<16x96xf32>
    %cst_19 = arith.constant dense<0.000000e+00> : vector<16x144xf32>
    %21 = tpu.matmul %20, %14, %cst_19 {dimension_numbers = #tpu.dot_dimension_numbers<[1], [0], [0], [1], [0, 0, 1, 1], [], []>, precision = #tpu.contract_precision<fp32>} : vector<16x96xf32>, vector<96x144xf32>, vector<16x144xf32> -> vector<16x144xf32>
    %22 = vector.broadcast %15 : vector<1x144xf32> to vector<16x144xf32>
    %23 = arith.addf %21, %22 : vector<16x144xf32>
    %c0_20 = arith.constant 0 : index
    %c0_21 = arith.constant 0 : index
    %24 = vector.load %arg9[%c0_20, %c0_21] : memref<48x144xf32, #tpu.memory_space<vmem>>, vector<48x144xf32>
    %c0_22 = arith.constant 0 : index
    %c0_23 = arith.constant 0 : index
    %25 = vector.load %arg10[%c0_22, %c0_23] : memref<1x48xf32, #tpu.memory_space<vmem>>, vector<1x48xf32>
    %c0_24 = arith.constant 0 : index
    %c0_25 = arith.constant 0 : index
    %26 = vector.load %arg11[%c0_24, %c0_25] : memref<48x144xf32, #tpu.memory_space<vmem>>, vector<48x144xf32>
    %c0_26 = arith.constant 0 : index
    %c0_27 = arith.constant 0 : index
    %27 = vector.load %arg12[%c0_26, %c0_27] : memref<1x144xf32, #tpu.memory_space<vmem>>, vector<1x144xf32>
    %c0_28 = arith.constant 0 : index
    %c0_29 = arith.constant 0 : index
    %28 = vector.load %arg13[%c0_28, %c0_29] : memref<48x144xf32, #tpu.memory_space<vmem>>, vector<48x144xf32>
    %c0_30 = arith.constant 0 : index
    %c0_31 = arith.constant 0 : index
    %29 = vector.load %arg14[%c0_30, %c0_31] : memref<1x48xf32, #tpu.memory_space<vmem>>, vector<1x48xf32>
    %cst_32 = arith.constant 0.000000e+00 : f32
    %30 = vector.broadcast %cst_32 : f32 to vector<2x48xf32>
    %cst_33 = arith.constant 0.000000e+00 : f32
    %31 = vector.broadcast %cst_33 : f32 to vector<2x48xf32>
    %32 = vector.extract_strided_slice %19 {offsets = [0, 0], sizes = [1, 144], strides = [1, 1]} : vector<16x144xf32> to vector<1x144xf32>
    %33 = vector.extract_strided_slice %23 {offsets = [0, 0], sizes = [1, 144], strides = [1, 1]} : vector<16x144xf32> to vector<1x144xf32>
    %34 = tpu.concatenate %32, %33 in 0 : vector<1x144xf32>, vector<1x144xf32> -> vector<2x144xf32>
    %cst_34 = arith.constant dense<0.000000e+00> : vector<2x144xf32>
    %35 = tpu.matmul %30, %24, %cst_34 {dimension_numbers = #tpu.dot_dimension_numbers<[1], [0], [0], [1], [0, 0, 1, 1], [], []>} : vector<2x48xf32>, vector<48x144xf32>, vector<2x144xf32> -> vector<2x144xf32>
    %36 = vector.extract_strided_slice %34 {offsets = [0, 0], sizes = [2, 48], strides = [1, 1]} : vector<2x144xf32> to vector<2x48xf32>
    %37 = vector.extract_strided_slice %35 {offsets = [0, 0], sizes = [2, 48], strides = [1, 1]} : vector<2x144xf32> to vector<2x48xf32>
    %38 = arith.addf %36, %37 : vector<2x48xf32>
    %39 = arith.negf %38 : vector<2x48xf32>
    %40 = math.exp %39 : vector<2x48xf32>
    %cst_35 = arith.constant 1.000000e+00 : f32
    %41 = vector.broadcast %cst_35 : f32 to vector<2x48xf32>
    %42 = arith.addf %41, %40 : vector<2x48xf32>
    %43 = arith.divf %41, %42 : vector<2x48xf32>
    %44 = vector.extract_strided_slice %34 {offsets = [0, 48], sizes = [2, 48], strides = [1, 1]} : vector<2x144xf32> to vector<2x48xf32>
    %45 = vector.extract_strided_slice %35 {offsets = [0, 48], sizes = [2, 48], strides = [1, 1]} : vector<2x144xf32> to vector<2x48xf32>
    %46 = arith.addf %44, %45 : vector<2x48xf32>
    %47 = arith.negf %46 : vector<2x48xf32>
    %48 = math.exp %47 : vector<2x48xf32>
    %cst_36 = arith.constant 1.000000e+00 : f32
    %49 = vector.broadcast %cst_36 : f32 to vector<2x48xf32>
    %50 = arith.addf %49, %48 : vector<2x48xf32>
    %51 = arith.divf %49, %50 : vector<2x48xf32>
    %52 = vector.extract_strided_slice %34 {offsets = [0, 96], sizes = [2, 48], strides = [1, 1]} : vector<2x144xf32> to vector<2x48xf32>
    %53 = vector.extract_strided_slice %35 {offsets = [0, 96], sizes = [2, 48], strides = [1, 1]} : vector<2x144xf32> to vector<2x48xf32>
    %54 = vector.broadcast %25 : vector<1x48xf32> to vector<2x48xf32>
    %55 = arith.addf %53, %54 : vector<2x48xf32>
    %56 = arith.mulf %43, %55 : vector<2x48xf32>
    %57 = arith.addf %52, %56 : vector<2x48xf32>
    %58 = math.tanh %57 : vector<2x48xf32>
    %cst_37 = arith.constant 1.000000e+00 : f32
    %59 = vector.broadcast %cst_37 : f32 to vector<2x48xf32>
    %60 = arith.subf %59, %51 : vector<2x48xf32>
    %61 = arith.mulf %60, %58 : vector<2x48xf32>
    %62 = arith.mulf %51, %30 : vector<2x48xf32>
    %63 = arith.addf %61, %62 : vector<2x48xf32>
    %cst_38 = arith.constant dense<0.000000e+00> : vector<2x144xf32>
    %64 = tpu.matmul %63, %26, %cst_38 {dimension_numbers = #tpu.dot_dimension_numbers<[1], [0], [0], [1], [0, 0, 1, 1], [], []>} : vector<2x48xf32>, vector<48x144xf32>, vector<2x144xf32> -> vector<2x144xf32>
    %65 = vector.broadcast %27 : vector<1x144xf32> to vector<2x144xf32>
    %66 = arith.addf %64, %65 : vector<2x144xf32>
    %cst_39 = arith.constant dense<0.000000e+00> : vector<2x144xf32>
    %67 = tpu.matmul %31, %28, %cst_39 {dimension_numbers = #tpu.dot_dimension_numbers<[1], [0], [0], [1], [0, 0, 1, 1], [], []>} : vector<2x48xf32>, vector<48x144xf32>, vector<2x144xf32> -> vector<2x144xf32>
    %68 = vector.extract_strided_slice %66 {offsets = [0, 0], sizes = [2, 48], strides = [1, 1]} : vector<2x144xf32> to vector<2x48xf32>
    %69 = vector.extract_strided_slice %67 {offsets = [0, 0], sizes = [2, 48], strides = [1, 1]} : vector<2x144xf32> to vector<2x48xf32>
    %70 = arith.addf %68, %69 : vector<2x48xf32>
    %71 = arith.negf %70 : vector<2x48xf32>
    %72 = math.exp %71 : vector<2x48xf32>
    %cst_40 = arith.constant 1.000000e+00 : f32
    %73 = vector.broadcast %cst_40 : f32 to vector<2x48xf32>
    %74 = arith.addf %73, %72 : vector<2x48xf32>
    %75 = arith.divf %73, %74 : vector<2x48xf32>
    %76 = vector.extract_strided_slice %66 {offsets = [0, 48], sizes = [2, 48], strides = [1, 1]} : vector<2x144xf32> to vector<2x48xf32>
    %77 = vector.extract_strided_slice %67 {offsets = [0, 48], sizes = [2, 48], strides = [1, 1]} : vector<2x144xf32> to vector<2x48xf32>
    %78 = arith.addf %76, %77 : vector<2x48xf32>
    %79 = arith.negf %78 : vector<2x48xf32>
    %80 = math.exp %79 : vector<2x48xf32>
    %cst_41 = arith.constant 1.000000e+00 : f32
    %81 = vector.broadcast %cst_41 : f32 to vector<2x48xf32>
    %82 = arith.addf %81, %80 : vector<2x48xf32>
    %83 = arith.divf %81, %82 : vector<2x48xf32>
    %84 = vector.extract_strided_slice %66 {offsets = [0, 96], sizes = [2, 48], strides = [1, 1]} : vector<2x144xf32> to vector<2x48xf32>
    %85 = vector.extract_strided_slice %67 {offsets = [0, 96], sizes = [2, 48], strides = [1, 1]} : vector<2x144xf32> to vector<2x48xf32>
    %86 = vector.broadcast %29 : vector<1x48xf32> to vector<2x48xf32>
    %87 = arith.addf %85, %86 : vector<2x48xf32>
    %88 = arith.mulf %75, %87 : vector<2x48xf32>
    %89 = arith.addf %84, %88 : vector<2x48xf32>
    %90 = math.tanh %89 : vector<2x48xf32>
    %cst_42 = arith.constant 1.000000e+00 : f32
    %91 = vector.broadcast %cst_42 : f32 to vector<2x48xf32>
    %92 = arith.subf %91, %83 : vector<2x48xf32>
    %93 = arith.mulf %92, %90 : vector<2x48xf32>
    %94 = arith.mulf %83, %31 : vector<2x48xf32>
    %95 = arith.addf %93, %94 : vector<2x48xf32>
    %96 = vector.extract_strided_slice %19 {offsets = [1, 0], sizes = [1, 144], strides = [1, 1]} : vector<16x144xf32> to vector<1x144xf32>
    %97 = vector.extract_strided_slice %23 {offsets = [1, 0], sizes = [1, 144], strides = [1, 1]} : vector<16x144xf32> to vector<1x144xf32>
    %98 = tpu.concatenate %96, %97 in 0 : vector<1x144xf32>, vector<1x144xf32> -> vector<2x144xf32>
    %cst_43 = arith.constant dense<0.000000e+00> : vector<2x144xf32>
    %99 = tpu.matmul %63, %24, %cst_43 {dimension_numbers = #tpu.dot_dimension_numbers<[1], [0], [0], [1], [0, 0, 1, 1], [], []>} : vector<2x48xf32>, vector<48x144xf32>, vector<2x144xf32> -> vector<2x144xf32>
    %100 = vector.extract_strided_slice %98 {offsets = [0, 0], sizes = [2, 48], strides = [1, 1]} : vector<2x144xf32> to vector<2x48xf32>
    %101 = vector.extract_strided_slice %99 {offsets = [0, 0], sizes = [2, 48], strides = [1, 1]} : vector<2x144xf32> to vector<2x48xf32>
    %102 = arith.addf %100, %101 : vector<2x48xf32>
    %103 = arith.negf %102 : vector<2x48xf32>
    %104 = math.exp %103 : vector<2x48xf32>
    %cst_44 = arith.constant 1.000000e+00 : f32
    %105 = vector.broadcast %cst_44 : f32 to vector<2x48xf32>
    %106 = arith.addf %105, %104 : vector<2x48xf32>
    %107 = arith.divf %105, %106 : vector<2x48xf32>
    %108 = vector.extract_strided_slice %98 {offsets = [0, 48], sizes = [2, 48], strides = [1, 1]} : vector<2x144xf32> to vector<2x48xf32>
    %109 = vector.extract_strided_slice %99 {offsets = [0, 48], sizes = [2, 48], strides = [1, 1]} : vector<2x144xf32> to vector<2x48xf32>
    %110 = arith.addf %108, %109 : vector<2x48xf32>
    %111 = arith.negf %110 : vector<2x48xf32>
    %112 = math.exp %111 : vector<2x48xf32>
    %cst_45 = arith.constant 1.000000e+00 : f32
    %113 = vector.broadcast %cst_45 : f32 to vector<2x48xf32>
    %114 = arith.addf %113, %112 : vector<2x48xf32>
    %115 = arith.divf %113, %114 : vector<2x48xf32>
    %116 = vector.extract_strided_slice %98 {offsets = [0, 96], sizes = [2, 48], strides = [1, 1]} : vector<2x144xf32> to vector<2x48xf32>
    %117 = vector.extract_strided_slice %99 {offsets = [0, 96], sizes = [2, 48], strides = [1, 1]} : vector<2x144xf32> to vector<2x48xf32>
    %118 = vector.broadcast %25 : vector<1x48xf32> to vector<2x48xf32>
    %119 = arith.addf %117, %118 : vector<2x48xf32>
    %120 = arith.mulf %107, %119 : vector<2x48xf32>
    %121 = arith.addf %116, %120 : vector<2x48xf32>
    %122 = math.tanh %121 : vector<2x48xf32>
    %cst_46 = arith.constant 1.000000e+00 : f32
    %123 = vector.broadcast %cst_46 : f32 to vector<2x48xf32>
    %124 = arith.subf %123, %115 : vector<2x48xf32>
    %125 = arith.mulf %124, %122 : vector<2x48xf32>
    %126 = arith.mulf %115, %63 : vector<2x48xf32>
    %127 = arith.addf %125, %126 : vector<2x48xf32>
    %cst_47 = arith.constant dense<0.000000e+00> : vector<2x144xf32>
    %128 = tpu.matmul %127, %26, %cst_47 {dimension_numbers = #tpu.dot_dimension_numbers<[1], [0], [0], [1], [0, 0, 1, 1], [], []>} : vector<2x48xf32>, vector<48x144xf32>, vector<2x144xf32> -> vector<2x144xf32>
    %129 = vector.broadcast %27 : vector<1x144xf32> to vector<2x144xf32>
    %130 = arith.addf %128, %129 : vector<2x144xf32>
    %cst_48 = arith.constant dense<0.000000e+00> : vector<2x144xf32>
    %131 = tpu.matmul %95, %28, %cst_48 {dimension_numbers = #tpu.dot_dimension_numbers<[1], [0], [0], [1], [0, 0, 1, 1], [], []>} : vector<2x48xf32>, vector<48x144xf32>, vector<2x144xf32> -> vector<2x144xf32>
    %132 = vector.extract_strided_slice %130 {offsets = [0, 0], sizes = [2, 48], strides = [1, 1]} : vector<2x144xf32> to vector<2x48xf32>
    %133 = vector.extract_strided_slice %131 {offsets = [0, 0], sizes = [2, 48], strides = [1, 1]} : vector<2x144xf32> to vector<2x48xf32>
    %134 = arith.addf %132, %133 : vector<2x48xf32>
    %135 = arith.negf %134 : vector<2x48xf32>
    %136 = math.exp %135 : vector<2x48xf32>
    %cst_49 = arith.constant 1.000000e+00 : f32
    %137 = vector.broadcast %cst_49 : f32 to vector<2x48xf32>
    %138 = arith.addf %137, %136 : vector<2x48xf32>
    %139 = arith.divf %137, %138 : vector<2x48xf32>
    %140 = vector.extract_strided_slice %130 {offsets = [0, 48], sizes = [2, 48], strides = [1, 1]} : vector<2x144xf32> to vector<2x48xf32>
    %141 = vector.extract_strided_slice %131 {offsets = [0, 48], sizes = [2, 48], strides = [1, 1]} : vector<2x144xf32> to vector<2x48xf32>
    %142 = arith.addf %140, %141 : vector<2x48xf32>
    %143 = arith.negf %142 : vector<2x48xf32>
    %144 = math.exp %143 : vector<2x48xf32>
    %cst_50 = arith.constant 1.000000e+00 : f32
    %145 = vector.broadcast %cst_50 : f32 to vector<2x48xf32>
    %146 = arith.addf %145, %144 : vector<2x48xf32>
    %147 = arith.divf %145, %146 : vector<2x48xf32>
    %148 = vector.extract_strided_slice %130 {offsets = [0, 96], sizes = [2, 48], strides = [1, 1]} : vector<2x144xf32> to vector<2x48xf32>
    %149 = vector.extract_strided_slice %131 {offsets = [0, 96], sizes = [2, 48], strides = [1, 1]} : vector<2x144xf32> to vector<2x48xf32>
    %150 = vector.broadcast %29 : vector<1x48xf32> to vector<2x48xf32>
    %151 = arith.addf %149, %150 : vector<2x48xf32>
    %152 = arith.mulf %139, %151 : vector<2x48xf32>
    %153 = arith.addf %148, %152 : vector<2x48xf32>
    %154 = math.tanh %153 : vector<2x48xf32>
    %cst_51 = arith.constant 1.000000e+00 : f32
    %155 = vector.broadcast %cst_51 : f32 to vector<2x48xf32>
    %156 = arith.subf %155, %147 : vector<2x48xf32>
    %157 = arith.mulf %156, %154 : vector<2x48xf32>
    %158 = arith.mulf %147, %95 : vector<2x48xf32>
    %159 = arith.addf %157, %158 : vector<2x48xf32>
    %160 = vector.extract_strided_slice %19 {offsets = [2, 0], sizes = [1, 144], strides = [1, 1]} : vector<16x144xf32> to vector<1x144xf32>
    %161 = vector.extract_strided_slice %23 {offsets = [2, 0], sizes = [1, 144], strides = [1, 1]} : vector<16x144xf32> to vector<1x144xf32>
    %162 = tpu.concatenate %160, %161 in 0 : vector<1x144xf32>, vector<1x144xf32> -> vector<2x144xf32>
    %cst_52 = arith.constant dense<0.000000e+00> : vector<2x144xf32>
    %163 = tpu.matmul %127, %24, %cst_52 {dimension_numbers = #tpu.dot_dimension_numbers<[1], [0], [0], [1], [0, 0, 1, 1], [], []>} : vector<2x48xf32>, vector<48x144xf32>, vector<2x144xf32> -> vector<2x144xf32>
    %164 = vector.extract_strided_slice %162 {offsets = [0, 0], sizes = [2, 48], strides = [1, 1]} : vector<2x144xf32> to vector<2x48xf32>
    %165 = vector.extract_strided_slice %163 {offsets = [0, 0], sizes = [2, 48], strides = [1, 1]} : vector<2x144xf32> to vector<2x48xf32>
    %166 = arith.addf %164, %165 : vector<2x48xf32>
    %167 = arith.negf %166 : vector<2x48xf32>
    %168 = math.exp %167 : vector<2x48xf32>
    %cst_53 = arith.constant 1.000000e+00 : f32
    %169 = vector.broadcast %cst_53 : f32 to vector<2x48xf32>
    %170 = arith.addf %169, %168 : vector<2x48xf32>
    %171 = arith.divf %169, %170 : vector<2x48xf32>
    %172 = vector.extract_strided_slice %162 {offsets = [0, 48], sizes = [2, 48], strides = [1, 1]} : vector<2x144xf32> to vector<2x48xf32>
    %173 = vector.extract_strided_slice %163 {offsets = [0, 48], sizes = [2, 48], strides = [1, 1]} : vector<2x144xf32> to vector<2x48xf32>
    %174 = arith.addf %172, %173 : vector<2x48xf32>
    %175 = arith.negf %174 : vector<2x48xf32>
    %176 = math.exp %175 : vector<2x48xf32>
    %cst_54 = arith.constant 1.000000e+00 : f32
    %177 = vector.broadcast %cst_54 : f32 to vector<2x48xf32>
    %178 = arith.addf %177, %176 : vector<2x48xf32>
    %179 = arith.divf %177, %178 : vector<2x48xf32>
    %180 = vector.extract_strided_slice %162 {offsets = [0, 96], sizes = [2, 48], strides = [1, 1]} : vector<2x144xf32> to vector<2x48xf32>
    %181 = vector.extract_strided_slice %163 {offsets = [0, 96], sizes = [2, 48], strides = [1, 1]} : vector<2x144xf32> to vector<2x48xf32>
    %182 = vector.broadcast %25 : vector<1x48xf32> to vector<2x48xf32>
    %183 = arith.addf %181, %182 : vector<2x48xf32>
    %184 = arith.mulf %171, %183 : vector<2x48xf32>
    %185 = arith.addf %180, %184 : vector<2x48xf32>
    %186 = math.tanh %185 : vector<2x48xf32>
    %cst_55 = arith.constant 1.000000e+00 : f32
    %187 = vector.broadcast %cst_55 : f32 to vector<2x48xf32>
    %188 = arith.subf %187, %179 : vector<2x48xf32>
    %189 = arith.mulf %188, %186 : vector<2x48xf32>
    %190 = arith.mulf %179, %127 : vector<2x48xf32>
    %191 = arith.addf %189, %190 : vector<2x48xf32>
    %cst_56 = arith.constant dense<0.000000e+00> : vector<2x144xf32>
    %192 = tpu.matmul %191, %26, %cst_56 {dimension_numbers = #tpu.dot_dimension_numbers<[1], [0], [0], [1], [0, 0, 1, 1], [], []>} : vector<2x48xf32>, vector<48x144xf32>, vector<2x144xf32> -> vector<2x144xf32>
    %193 = vector.broadcast %27 : vector<1x144xf32> to vector<2x144xf32>
    %194 = arith.addf %192, %193 : vector<2x144xf32>
    %cst_57 = arith.constant dense<0.000000e+00> : vector<2x144xf32>
    %195 = tpu.matmul %159, %28, %cst_57 {dimension_numbers = #tpu.dot_dimension_numbers<[1], [0], [0], [1], [0, 0, 1, 1], [], []>} : vector<2x48xf32>, vector<48x144xf32>, vector<2x144xf32> -> vector<2x144xf32>
    %196 = vector.extract_strided_slice %194 {offsets = [0, 0], sizes = [2, 48], strides = [1, 1]} : vector<2x144xf32> to vector<2x48xf32>
    %197 = vector.extract_strided_slice %195 {offsets = [0, 0], sizes = [2, 48], strides = [1, 1]} : vector<2x144xf32> to vector<2x48xf32>
    %198 = arith.addf %196, %197 : vector<2x48xf32>
    %199 = arith.negf %198 : vector<2x48xf32>
    %200 = math.exp %199 : vector<2x48xf32>
    %cst_58 = arith.constant 1.000000e+00 : f32
    %201 = vector.broadcast %cst_58 : f32 to vector<2x48xf32>
    %202 = arith.addf %201, %200 : vector<2x48xf32>
    %203 = arith.divf %201, %202 : vector<2x48xf32>
    %204 = vector.extract_strided_slice %194 {offsets = [0, 48], sizes = [2, 48], strides = [1, 1]} : vector<2x144xf32> to vector<2x48xf32>
    %205 = vector.extract_strided_slice %195 {offsets = [0, 48], sizes = [2, 48], strides = [1, 1]} : vector<2x144xf32> to vector<2x48xf32>
    %206 = arith.addf %204, %205 : vector<2x48xf32>
    %207 = arith.negf %206 : vector<2x48xf32>
    %208 = math.exp %207 : vector<2x48xf32>
    %cst_59 = arith.constant 1.000000e+00 : f32
    %209 = vector.broadcast %cst_59 : f32 to vector<2x48xf32>
    %210 = arith.addf %209, %208 : vector<2x48xf32>
    %211 = arith.divf %209, %210 : vector<2x48xf32>
    %212 = vector.extract_strided_slice %194 {offsets = [0, 96], sizes = [2, 48], strides = [1, 1]} : vector<2x144xf32> to vector<2x48xf32>
    %213 = vector.extract_strided_slice %195 {offsets = [0, 96], sizes = [2, 48], strides = [1, 1]} : vector<2x144xf32> to vector<2x48xf32>
    %214 = vector.broadcast %29 : vector<1x48xf32> to vector<2x48xf32>
    %215 = arith.addf %213, %214 : vector<2x48xf32>
    %216 = arith.mulf %203, %215 : vector<2x48xf32>
    %217 = arith.addf %212, %216 : vector<2x48xf32>
    %218 = math.tanh %217 : vector<2x48xf32>
    %cst_60 = arith.constant 1.000000e+00 : f32
    %219 = vector.broadcast %cst_60 : f32 to vector<2x48xf32>
    %220 = arith.subf %219, %211 : vector<2x48xf32>
    %221 = arith.mulf %220, %218 : vector<2x48xf32>
    %222 = arith.mulf %211, %159 : vector<2x48xf32>
    %223 = arith.addf %221, %222 : vector<2x48xf32>
    %224 = vector.extract_strided_slice %19 {offsets = [3, 0], sizes = [1, 144], strides = [1, 1]} : vector<16x144xf32> to vector<1x144xf32>
    %225 = vector.extract_strided_slice %23 {offsets = [3, 0], sizes = [1, 144], strides = [1, 1]} : vector<16x144xf32> to vector<1x144xf32>
    %226 = tpu.concatenate %224, %225 in 0 : vector<1x144xf32>, vector<1x144xf32> -> vector<2x144xf32>
    %cst_61 = arith.constant dense<0.000000e+00> : vector<2x144xf32>
    %227 = tpu.matmul %191, %24, %cst_61 {dimension_numbers = #tpu.dot_dimension_numbers<[1], [0], [0], [1], [0, 0, 1, 1], [], []>} : vector<2x48xf32>, vector<48x144xf32>, vector<2x144xf32> -> vector<2x144xf32>
    %228 = vector.extract_strided_slice %226 {offsets = [0, 0], sizes = [2, 48], strides = [1, 1]} : vector<2x144xf32> to vector<2x48xf32>
    %229 = vector.extract_strided_slice %227 {offsets = [0, 0], sizes = [2, 48], strides = [1, 1]} : vector<2x144xf32> to vector<2x48xf32>
    %230 = arith.addf %228, %229 : vector<2x48xf32>
    %231 = arith.negf %230 : vector<2x48xf32>
    %232 = math.exp %231 : vector<2x48xf32>
    %cst_62 = arith.constant 1.000000e+00 : f32
    %233 = vector.broadcast %cst_62 : f32 to vector<2x48xf32>
    %234 = arith.addf %233, %232 : vector<2x48xf32>
    %235 = arith.divf %233, %234 : vector<2x48xf32>
    %236 = vector.extract_strided_slice %226 {offsets = [0, 48], sizes = [2, 48], strides = [1, 1]} : vector<2x144xf32> to vector<2x48xf32>
    %237 = vector.extract_strided_slice %227 {offsets = [0, 48], sizes = [2, 48], strides = [1, 1]} : vector<2x144xf32> to vector<2x48xf32>
    %238 = arith.addf %236, %237 : vector<2x48xf32>
    %239 = arith.negf %238 : vector<2x48xf32>
    %240 = math.exp %239 : vector<2x48xf32>
    %cst_63 = arith.constant 1.000000e+00 : f32
    %241 = vector.broadcast %cst_63 : f32 to vector<2x48xf32>
    %242 = arith.addf %241, %240 : vector<2x48xf32>
    %243 = arith.divf %241, %242 : vector<2x48xf32>
    %244 = vector.extract_strided_slice %226 {offsets = [0, 96], sizes = [2, 48], strides = [1, 1]} : vector<2x144xf32> to vector<2x48xf32>
    %245 = vector.extract_strided_slice %227 {offsets = [0, 96], sizes = [2, 48], strides = [1, 1]} : vector<2x144xf32> to vector<2x48xf32>
    %246 = vector.broadcast %25 : vector<1x48xf32> to vector<2x48xf32>
    %247 = arith.addf %245, %246 : vector<2x48xf32>
    %248 = arith.mulf %235, %247 : vector<2x48xf32>
    %249 = arith.addf %244, %248 : vector<2x48xf32>
    %250 = math.tanh %249 : vector<2x48xf32>
    %cst_64 = arith.constant 1.000000e+00 : f32
    %251 = vector.broadcast %cst_64 : f32 to vector<2x48xf32>
    %252 = arith.subf %251, %243 : vector<2x48xf32>
    %253 = arith.mulf %252, %250 : vector<2x48xf32>
    %254 = arith.mulf %243, %191 : vector<2x48xf32>
    %255 = arith.addf %253, %254 : vector<2x48xf32>
    %cst_65 = arith.constant dense<0.000000e+00> : vector<2x144xf32>
    %256 = tpu.matmul %255, %26, %cst_65 {dimension_numbers = #tpu.dot_dimension_numbers<[1], [0], [0], [1], [0, 0, 1, 1], [], []>} : vector<2x48xf32>, vector<48x144xf32>, vector<2x144xf32> -> vector<2x144xf32>
    %257 = vector.broadcast %27 : vector<1x144xf32> to vector<2x144xf32>
    %258 = arith.addf %256, %257 : vector<2x144xf32>
    %cst_66 = arith.constant dense<0.000000e+00> : vector<2x144xf32>
    %259 = tpu.matmul %223, %28, %cst_66 {dimension_numbers = #tpu.dot_dimension_numbers<[1], [0], [0], [1], [0, 0, 1, 1], [], []>} : vector<2x48xf32>, vector<48x144xf32>, vector<2x144xf32> -> vector<2x144xf32>
    %260 = vector.extract_strided_slice %258 {offsets = [0, 0], sizes = [2, 48], strides = [1, 1]} : vector<2x144xf32> to vector<2x48xf32>
    %261 = vector.extract_strided_slice %259 {offsets = [0, 0], sizes = [2, 48], strides = [1, 1]} : vector<2x144xf32> to vector<2x48xf32>
    %262 = arith.addf %260, %261 : vector<2x48xf32>
    %263 = arith.negf %262 : vector<2x48xf32>
    %264 = math.exp %263 : vector<2x48xf32>
    %cst_67 = arith.constant 1.000000e+00 : f32
    %265 = vector.broadcast %cst_67 : f32 to vector<2x48xf32>
    %266 = arith.addf %265, %264 : vector<2x48xf32>
    %267 = arith.divf %265, %266 : vector<2x48xf32>
    %268 = vector.extract_strided_slice %258 {offsets = [0, 48], sizes = [2, 48], strides = [1, 1]} : vector<2x144xf32> to vector<2x48xf32>
    %269 = vector.extract_strided_slice %259 {offsets = [0, 48], sizes = [2, 48], strides = [1, 1]} : vector<2x144xf32> to vector<2x48xf32>
    %270 = arith.addf %268, %269 : vector<2x48xf32>
    %271 = arith.negf %270 : vector<2x48xf32>
    %272 = math.exp %271 : vector<2x48xf32>
    %cst_68 = arith.constant 1.000000e+00 : f32
    %273 = vector.broadcast %cst_68 : f32 to vector<2x48xf32>
    %274 = arith.addf %273, %272 : vector<2x48xf32>
    %275 = arith.divf %273, %274 : vector<2x48xf32>
    %276 = vector.extract_strided_slice %258 {offsets = [0, 96], sizes = [2, 48], strides = [1, 1]} : vector<2x144xf32> to vector<2x48xf32>
    %277 = vector.extract_strided_slice %259 {offsets = [0, 96], sizes = [2, 48], strides = [1, 1]} : vector<2x144xf32> to vector<2x48xf32>
    %278 = vector.broadcast %29 : vector<1x48xf32> to vector<2x48xf32>
    %279 = arith.addf %277, %278 : vector<2x48xf32>
    %280 = arith.mulf %267, %279 : vector<2x48xf32>
    %281 = arith.addf %276, %280 : vector<2x48xf32>
    %282 = math.tanh %281 : vector<2x48xf32>
    %cst_69 = arith.constant 1.000000e+00 : f32
    %283 = vector.broadcast %cst_69 : f32 to vector<2x48xf32>
    %284 = arith.subf %283, %275 : vector<2x48xf32>
    %285 = arith.mulf %284, %282 : vector<2x48xf32>
    %286 = arith.mulf %275, %223 : vector<2x48xf32>
    %287 = arith.addf %285, %286 : vector<2x48xf32>
    %288 = vector.extract_strided_slice %19 {offsets = [4, 0], sizes = [1, 144], strides = [1, 1]} : vector<16x144xf32> to vector<1x144xf32>
    %289 = vector.extract_strided_slice %23 {offsets = [4, 0], sizes = [1, 144], strides = [1, 1]} : vector<16x144xf32> to vector<1x144xf32>
    %290 = tpu.concatenate %288, %289 in 0 : vector<1x144xf32>, vector<1x144xf32> -> vector<2x144xf32>
    %cst_70 = arith.constant dense<0.000000e+00> : vector<2x144xf32>
    %291 = tpu.matmul %255, %24, %cst_70 {dimension_numbers = #tpu.dot_dimension_numbers<[1], [0], [0], [1], [0, 0, 1, 1], [], []>} : vector<2x48xf32>, vector<48x144xf32>, vector<2x144xf32> -> vector<2x144xf32>
    %292 = vector.extract_strided_slice %290 {offsets = [0, 0], sizes = [2, 48], strides = [1, 1]} : vector<2x144xf32> to vector<2x48xf32>
    %293 = vector.extract_strided_slice %291 {offsets = [0, 0], sizes = [2, 48], strides = [1, 1]} : vector<2x144xf32> to vector<2x48xf32>
    %294 = arith.addf %292, %293 : vector<2x48xf32>
    %295 = arith.negf %294 : vector<2x48xf32>
    %296 = math.exp %295 : vector<2x48xf32>
    %cst_71 = arith.constant 1.000000e+00 : f32
    %297 = vector.broadcast %cst_71 : f32 to vector<2x48xf32>
    %298 = arith.addf %297, %296 : vector<2x48xf32>
    %299 = arith.divf %297, %298 : vector<2x48xf32>
    %300 = vector.extract_strided_slice %290 {offsets = [0, 48], sizes = [2, 48], strides = [1, 1]} : vector<2x144xf32> to vector<2x48xf32>
    %301 = vector.extract_strided_slice %291 {offsets = [0, 48], sizes = [2, 48], strides = [1, 1]} : vector<2x144xf32> to vector<2x48xf32>
    %302 = arith.addf %300, %301 : vector<2x48xf32>
    %303 = arith.negf %302 : vector<2x48xf32>
    %304 = math.exp %303 : vector<2x48xf32>
    %cst_72 = arith.constant 1.000000e+00 : f32
    %305 = vector.broadcast %cst_72 : f32 to vector<2x48xf32>
    %306 = arith.addf %305, %304 : vector<2x48xf32>
    %307 = arith.divf %305, %306 : vector<2x48xf32>
    %308 = vector.extract_strided_slice %290 {offsets = [0, 96], sizes = [2, 48], strides = [1, 1]} : vector<2x144xf32> to vector<2x48xf32>
    %309 = vector.extract_strided_slice %291 {offsets = [0, 96], sizes = [2, 48], strides = [1, 1]} : vector<2x144xf32> to vector<2x48xf32>
    %310 = vector.broadcast %25 : vector<1x48xf32> to vector<2x48xf32>
    %311 = arith.addf %309, %310 : vector<2x48xf32>
    %312 = arith.mulf %299, %311 : vector<2x48xf32>
    %313 = arith.addf %308, %312 : vector<2x48xf32>
    %314 = math.tanh %313 : vector<2x48xf32>
    %cst_73 = arith.constant 1.000000e+00 : f32
    %315 = vector.broadcast %cst_73 : f32 to vector<2x48xf32>
    %316 = arith.subf %315, %307 : vector<2x48xf32>
    %317 = arith.mulf %316, %314 : vector<2x48xf32>
    %318 = arith.mulf %307, %255 : vector<2x48xf32>
    %319 = arith.addf %317, %318 : vector<2x48xf32>
    %cst_74 = arith.constant dense<0.000000e+00> : vector<2x144xf32>
    %320 = tpu.matmul %319, %26, %cst_74 {dimension_numbers = #tpu.dot_dimension_numbers<[1], [0], [0], [1], [0, 0, 1, 1], [], []>} : vector<2x48xf32>, vector<48x144xf32>, vector<2x144xf32> -> vector<2x144xf32>
    %321 = vector.broadcast %27 : vector<1x144xf32> to vector<2x144xf32>
    %322 = arith.addf %320, %321 : vector<2x144xf32>
    %cst_75 = arith.constant dense<0.000000e+00> : vector<2x144xf32>
    %323 = tpu.matmul %287, %28, %cst_75 {dimension_numbers = #tpu.dot_dimension_numbers<[1], [0], [0], [1], [0, 0, 1, 1], [], []>} : vector<2x48xf32>, vector<48x144xf32>, vector<2x144xf32> -> vector<2x144xf32>
    %324 = vector.extract_strided_slice %322 {offsets = [0, 0], sizes = [2, 48], strides = [1, 1]} : vector<2x144xf32> to vector<2x48xf32>
    %325 = vector.extract_strided_slice %323 {offsets = [0, 0], sizes = [2, 48], strides = [1, 1]} : vector<2x144xf32> to vector<2x48xf32>
    %326 = arith.addf %324, %325 : vector<2x48xf32>
    %327 = arith.negf %326 : vector<2x48xf32>
    %328 = math.exp %327 : vector<2x48xf32>
    %cst_76 = arith.constant 1.000000e+00 : f32
    %329 = vector.broadcast %cst_76 : f32 to vector<2x48xf32>
    %330 = arith.addf %329, %328 : vector<2x48xf32>
    %331 = arith.divf %329, %330 : vector<2x48xf32>
    %332 = vector.extract_strided_slice %322 {offsets = [0, 48], sizes = [2, 48], strides = [1, 1]} : vector<2x144xf32> to vector<2x48xf32>
    %333 = vector.extract_strided_slice %323 {offsets = [0, 48], sizes = [2, 48], strides = [1, 1]} : vector<2x144xf32> to vector<2x48xf32>
    %334 = arith.addf %332, %333 : vector<2x48xf32>
    %335 = arith.negf %334 : vector<2x48xf32>
    %336 = math.exp %335 : vector<2x48xf32>
    %cst_77 = arith.constant 1.000000e+00 : f32
    %337 = vector.broadcast %cst_77 : f32 to vector<2x48xf32>
    %338 = arith.addf %337, %336 : vector<2x48xf32>
    %339 = arith.divf %337, %338 : vector<2x48xf32>
    %340 = vector.extract_strided_slice %322 {offsets = [0, 96], sizes = [2, 48], strides = [1, 1]} : vector<2x144xf32> to vector<2x48xf32>
    %341 = vector.extract_strided_slice %323 {offsets = [0, 96], sizes = [2, 48], strides = [1, 1]} : vector<2x144xf32> to vector<2x48xf32>
    %342 = vector.broadcast %29 : vector<1x48xf32> to vector<2x48xf32>
    %343 = arith.addf %341, %342 : vector<2x48xf32>
    %344 = arith.mulf %331, %343 : vector<2x48xf32>
    %345 = arith.addf %340, %344 : vector<2x48xf32>
    %346 = math.tanh %345 : vector<2x48xf32>
    %cst_78 = arith.constant 1.000000e+00 : f32
    %347 = vector.broadcast %cst_78 : f32 to vector<2x48xf32>
    %348 = arith.subf %347, %339 : vector<2x48xf32>
    %349 = arith.mulf %348, %346 : vector<2x48xf32>
    %350 = arith.mulf %339, %287 : vector<2x48xf32>
    %351 = arith.addf %349, %350 : vector<2x48xf32>
    %352 = vector.extract_strided_slice %19 {offsets = [5, 0], sizes = [1, 144], strides = [1, 1]} : vector<16x144xf32> to vector<1x144xf32>
    %353 = vector.extract_strided_slice %23 {offsets = [5, 0], sizes = [1, 144], strides = [1, 1]} : vector<16x144xf32> to vector<1x144xf32>
    %354 = tpu.concatenate %352, %353 in 0 : vector<1x144xf32>, vector<1x144xf32> -> vector<2x144xf32>
    %cst_79 = arith.constant dense<0.000000e+00> : vector<2x144xf32>
    %355 = tpu.matmul %319, %24, %cst_79 {dimension_numbers = #tpu.dot_dimension_numbers<[1], [0], [0], [1], [0, 0, 1, 1], [], []>} : vector<2x48xf32>, vector<48x144xf32>, vector<2x144xf32> -> vector<2x144xf32>
    %356 = vector.extract_strided_slice %354 {offsets = [0, 0], sizes = [2, 48], strides = [1, 1]} : vector<2x144xf32> to vector<2x48xf32>
    %357 = vector.extract_strided_slice %355 {offsets = [0, 0], sizes = [2, 48], strides = [1, 1]} : vector<2x144xf32> to vector<2x48xf32>
    %358 = arith.addf %356, %357 : vector<2x48xf32>
    %359 = arith.negf %358 : vector<2x48xf32>
    %360 = math.exp %359 : vector<2x48xf32>
    %cst_80 = arith.constant 1.000000e+00 : f32
    %361 = vector.broadcast %cst_80 : f32 to vector<2x48xf32>
    %362 = arith.addf %361, %360 : vector<2x48xf32>
    %363 = arith.divf %361, %362 : vector<2x48xf32>
    %364 = vector.extract_strided_slice %354 {offsets = [0, 48], sizes = [2, 48], strides = [1, 1]} : vector<2x144xf32> to vector<2x48xf32>
    %365 = vector.extract_strided_slice %355 {offsets = [0, 48], sizes = [2, 48], strides = [1, 1]} : vector<2x144xf32> to vector<2x48xf32>
    %366 = arith.addf %364, %365 : vector<2x48xf32>
    %367 = arith.negf %366 : vector<2x48xf32>
    %368 = math.exp %367 : vector<2x48xf32>
    %cst_81 = arith.constant 1.000000e+00 : f32
    %369 = vector.broadcast %cst_81 : f32 to vector<2x48xf32>
    %370 = arith.addf %369, %368 : vector<2x48xf32>
    %371 = arith.divf %369, %370 : vector<2x48xf32>
    %372 = vector.extract_strided_slice %354 {offsets = [0, 96], sizes = [2, 48], strides = [1, 1]} : vector<2x144xf32> to vector<2x48xf32>
    %373 = vector.extract_strided_slice %355 {offsets = [0, 96], sizes = [2, 48], strides = [1, 1]} : vector<2x144xf32> to vector<2x48xf32>
    %374 = vector.broadcast %25 : vector<1x48xf32> to vector<2x48xf32>
    %375 = arith.addf %373, %374 : vector<2x48xf32>
    %376 = arith.mulf %363, %375 : vector<2x48xf32>
    %377 = arith.addf %372, %376 : vector<2x48xf32>
    %378 = math.tanh %377 : vector<2x48xf32>
    %cst_82 = arith.constant 1.000000e+00 : f32
    %379 = vector.broadcast %cst_82 : f32 to vector<2x48xf32>
    %380 = arith.subf %379, %371 : vector<2x48xf32>
    %381 = arith.mulf %380, %378 : vector<2x48xf32>
    %382 = arith.mulf %371, %319 : vector<2x48xf32>
    %383 = arith.addf %381, %382 : vector<2x48xf32>
    %cst_83 = arith.constant dense<0.000000e+00> : vector<2x144xf32>
    %384 = tpu.matmul %383, %26, %cst_83 {dimension_numbers = #tpu.dot_dimension_numbers<[1], [0], [0], [1], [0, 0, 1, 1], [], []>} : vector<2x48xf32>, vector<48x144xf32>, vector<2x144xf32> -> vector<2x144xf32>
    %385 = vector.broadcast %27 : vector<1x144xf32> to vector<2x144xf32>
    %386 = arith.addf %384, %385 : vector<2x144xf32>
    %cst_84 = arith.constant dense<0.000000e+00> : vector<2x144xf32>
    %387 = tpu.matmul %351, %28, %cst_84 {dimension_numbers = #tpu.dot_dimension_numbers<[1], [0], [0], [1], [0, 0, 1, 1], [], []>} : vector<2x48xf32>, vector<48x144xf32>, vector<2x144xf32> -> vector<2x144xf32>
    %388 = vector.extract_strided_slice %386 {offsets = [0, 0], sizes = [2, 48], strides = [1, 1]} : vector<2x144xf32> to vector<2x48xf32>
    %389 = vector.extract_strided_slice %387 {offsets = [0, 0], sizes = [2, 48], strides = [1, 1]} : vector<2x144xf32> to vector<2x48xf32>
    %390 = arith.addf %388, %389 : vector<2x48xf32>
    %391 = arith.negf %390 : vector<2x48xf32>
    %392 = math.exp %391 : vector<2x48xf32>
    %cst_85 = arith.constant 1.000000e+00 : f32
    %393 = vector.broadcast %cst_85 : f32 to vector<2x48xf32>
    %394 = arith.addf %393, %392 : vector<2x48xf32>
    %395 = arith.divf %393, %394 : vector<2x48xf32>
    %396 = vector.extract_strided_slice %386 {offsets = [0, 48], sizes = [2, 48], strides = [1, 1]} : vector<2x144xf32> to vector<2x48xf32>
    %397 = vector.extract_strided_slice %387 {offsets = [0, 48], sizes = [2, 48], strides = [1, 1]} : vector<2x144xf32> to vector<2x48xf32>
    %398 = arith.addf %396, %397 : vector<2x48xf32>
    %399 = arith.negf %398 : vector<2x48xf32>
    %400 = math.exp %399 : vector<2x48xf32>
    %cst_86 = arith.constant 1.000000e+00 : f32
    %401 = vector.broadcast %cst_86 : f32 to vector<2x48xf32>
    %402 = arith.addf %401, %400 : vector<2x48xf32>
    %403 = arith.divf %401, %402 : vector<2x48xf32>
    %404 = vector.extract_strided_slice %386 {offsets = [0, 96], sizes = [2, 48], strides = [1, 1]} : vector<2x144xf32> to vector<2x48xf32>
    %405 = vector.extract_strided_slice %387 {offsets = [0, 96], sizes = [2, 48], strides = [1, 1]} : vector<2x144xf32> to vector<2x48xf32>
    %406 = vector.broadcast %29 : vector<1x48xf32> to vector<2x48xf32>
    %407 = arith.addf %405, %406 : vector<2x48xf32>
    %408 = arith.mulf %395, %407 : vector<2x48xf32>
    %409 = arith.addf %404, %408 : vector<2x48xf32>
    %410 = math.tanh %409 : vector<2x48xf32>
    %cst_87 = arith.constant 1.000000e+00 : f32
    %411 = vector.broadcast %cst_87 : f32 to vector<2x48xf32>
    %412 = arith.subf %411, %403 : vector<2x48xf32>
    %413 = arith.mulf %412, %410 : vector<2x48xf32>
    %414 = arith.mulf %403, %351 : vector<2x48xf32>
    %415 = arith.addf %413, %414 : vector<2x48xf32>
    %416 = vector.extract_strided_slice %19 {offsets = [6, 0], sizes = [1, 144], strides = [1, 1]} : vector<16x144xf32> to vector<1x144xf32>
    %417 = vector.extract_strided_slice %23 {offsets = [6, 0], sizes = [1, 144], strides = [1, 1]} : vector<16x144xf32> to vector<1x144xf32>
    %418 = tpu.concatenate %416, %417 in 0 : vector<1x144xf32>, vector<1x144xf32> -> vector<2x144xf32>
    %cst_88 = arith.constant dense<0.000000e+00> : vector<2x144xf32>
    %419 = tpu.matmul %383, %24, %cst_88 {dimension_numbers = #tpu.dot_dimension_numbers<[1], [0], [0], [1], [0, 0, 1, 1], [], []>} : vector<2x48xf32>, vector<48x144xf32>, vector<2x144xf32> -> vector<2x144xf32>
    %420 = vector.extract_strided_slice %418 {offsets = [0, 0], sizes = [2, 48], strides = [1, 1]} : vector<2x144xf32> to vector<2x48xf32>
    %421 = vector.extract_strided_slice %419 {offsets = [0, 0], sizes = [2, 48], strides = [1, 1]} : vector<2x144xf32> to vector<2x48xf32>
    %422 = arith.addf %420, %421 : vector<2x48xf32>
    %423 = arith.negf %422 : vector<2x48xf32>
    %424 = math.exp %423 : vector<2x48xf32>
    %cst_89 = arith.constant 1.000000e+00 : f32
    %425 = vector.broadcast %cst_89 : f32 to vector<2x48xf32>
    %426 = arith.addf %425, %424 : vector<2x48xf32>
    %427 = arith.divf %425, %426 : vector<2x48xf32>
    %428 = vector.extract_strided_slice %418 {offsets = [0, 48], sizes = [2, 48], strides = [1, 1]} : vector<2x144xf32> to vector<2x48xf32>
    %429 = vector.extract_strided_slice %419 {offsets = [0, 48], sizes = [2, 48], strides = [1, 1]} : vector<2x144xf32> to vector<2x48xf32>
    %430 = arith.addf %428, %429 : vector<2x48xf32>
    %431 = arith.negf %430 : vector<2x48xf32>
    %432 = math.exp %431 : vector<2x48xf32>
    %cst_90 = arith.constant 1.000000e+00 : f32
    %433 = vector.broadcast %cst_90 : f32 to vector<2x48xf32>
    %434 = arith.addf %433, %432 : vector<2x48xf32>
    %435 = arith.divf %433, %434 : vector<2x48xf32>
    %436 = vector.extract_strided_slice %418 {offsets = [0, 96], sizes = [2, 48], strides = [1, 1]} : vector<2x144xf32> to vector<2x48xf32>
    %437 = vector.extract_strided_slice %419 {offsets = [0, 96], sizes = [2, 48], strides = [1, 1]} : vector<2x144xf32> to vector<2x48xf32>
    %438 = vector.broadcast %25 : vector<1x48xf32> to vector<2x48xf32>
    %439 = arith.addf %437, %438 : vector<2x48xf32>
    %440 = arith.mulf %427, %439 : vector<2x48xf32>
    %441 = arith.addf %436, %440 : vector<2x48xf32>
    %442 = math.tanh %441 : vector<2x48xf32>
    %cst_91 = arith.constant 1.000000e+00 : f32
    %443 = vector.broadcast %cst_91 : f32 to vector<2x48xf32>
    %444 = arith.subf %443, %435 : vector<2x48xf32>
    %445 = arith.mulf %444, %442 : vector<2x48xf32>
    %446 = arith.mulf %435, %383 : vector<2x48xf32>
    %447 = arith.addf %445, %446 : vector<2x48xf32>
    %cst_92 = arith.constant dense<0.000000e+00> : vector<2x144xf32>
    %448 = tpu.matmul %447, %26, %cst_92 {dimension_numbers = #tpu.dot_dimension_numbers<[1], [0], [0], [1], [0, 0, 1, 1], [], []>} : vector<2x48xf32>, vector<48x144xf32>, vector<2x144xf32> -> vector<2x144xf32>
    %449 = vector.broadcast %27 : vector<1x144xf32> to vector<2x144xf32>
    %450 = arith.addf %448, %449 : vector<2x144xf32>
    %cst_93 = arith.constant dense<0.000000e+00> : vector<2x144xf32>
    %451 = tpu.matmul %415, %28, %cst_93 {dimension_numbers = #tpu.dot_dimension_numbers<[1], [0], [0], [1], [0, 0, 1, 1], [], []>} : vector<2x48xf32>, vector<48x144xf32>, vector<2x144xf32> -> vector<2x144xf32>
    %452 = vector.extract_strided_slice %450 {offsets = [0, 0], sizes = [2, 48], strides = [1, 1]} : vector<2x144xf32> to vector<2x48xf32>
    %453 = vector.extract_strided_slice %451 {offsets = [0, 0], sizes = [2, 48], strides = [1, 1]} : vector<2x144xf32> to vector<2x48xf32>
    %454 = arith.addf %452, %453 : vector<2x48xf32>
    %455 = arith.negf %454 : vector<2x48xf32>
    %456 = math.exp %455 : vector<2x48xf32>
    %cst_94 = arith.constant 1.000000e+00 : f32
    %457 = vector.broadcast %cst_94 : f32 to vector<2x48xf32>
    %458 = arith.addf %457, %456 : vector<2x48xf32>
    %459 = arith.divf %457, %458 : vector<2x48xf32>
    %460 = vector.extract_strided_slice %450 {offsets = [0, 48], sizes = [2, 48], strides = [1, 1]} : vector<2x144xf32> to vector<2x48xf32>
    %461 = vector.extract_strided_slice %451 {offsets = [0, 48], sizes = [2, 48], strides = [1, 1]} : vector<2x144xf32> to vector<2x48xf32>
    %462 = arith.addf %460, %461 : vector<2x48xf32>
    %463 = arith.negf %462 : vector<2x48xf32>
    %464 = math.exp %463 : vector<2x48xf32>
    %cst_95 = arith.constant 1.000000e+00 : f32
    %465 = vector.broadcast %cst_95 : f32 to vector<2x48xf32>
    %466 = arith.addf %465, %464 : vector<2x48xf32>
    %467 = arith.divf %465, %466 : vector<2x48xf32>
    %468 = vector.extract_strided_slice %450 {offsets = [0, 96], sizes = [2, 48], strides = [1, 1]} : vector<2x144xf32> to vector<2x48xf32>
    %469 = vector.extract_strided_slice %451 {offsets = [0, 96], sizes = [2, 48], strides = [1, 1]} : vector<2x144xf32> to vector<2x48xf32>
    %470 = vector.broadcast %29 : vector<1x48xf32> to vector<2x48xf32>
    %471 = arith.addf %469, %470 : vector<2x48xf32>
    %472 = arith.mulf %459, %471 : vector<2x48xf32>
    %473 = arith.addf %468, %472 : vector<2x48xf32>
    %474 = math.tanh %473 : vector<2x48xf32>
    %cst_96 = arith.constant 1.000000e+00 : f32
    %475 = vector.broadcast %cst_96 : f32 to vector<2x48xf32>
    %476 = arith.subf %475, %467 : vector<2x48xf32>
    %477 = arith.mulf %476, %474 : vector<2x48xf32>
    %478 = arith.mulf %467, %415 : vector<2x48xf32>
    %479 = arith.addf %477, %478 : vector<2x48xf32>
    %480 = vector.extract_strided_slice %19 {offsets = [7, 0], sizes = [1, 144], strides = [1, 1]} : vector<16x144xf32> to vector<1x144xf32>
    %481 = vector.extract_strided_slice %23 {offsets = [7, 0], sizes = [1, 144], strides = [1, 1]} : vector<16x144xf32> to vector<1x144xf32>
    %482 = tpu.concatenate %480, %481 in 0 : vector<1x144xf32>, vector<1x144xf32> -> vector<2x144xf32>
    %cst_97 = arith.constant dense<0.000000e+00> : vector<2x144xf32>
    %483 = tpu.matmul %447, %24, %cst_97 {dimension_numbers = #tpu.dot_dimension_numbers<[1], [0], [0], [1], [0, 0, 1, 1], [], []>} : vector<2x48xf32>, vector<48x144xf32>, vector<2x144xf32> -> vector<2x144xf32>
    %484 = vector.extract_strided_slice %482 {offsets = [0, 0], sizes = [2, 48], strides = [1, 1]} : vector<2x144xf32> to vector<2x48xf32>
    %485 = vector.extract_strided_slice %483 {offsets = [0, 0], sizes = [2, 48], strides = [1, 1]} : vector<2x144xf32> to vector<2x48xf32>
    %486 = arith.addf %484, %485 : vector<2x48xf32>
    %487 = arith.negf %486 : vector<2x48xf32>
    %488 = math.exp %487 : vector<2x48xf32>
    %cst_98 = arith.constant 1.000000e+00 : f32
    %489 = vector.broadcast %cst_98 : f32 to vector<2x48xf32>
    %490 = arith.addf %489, %488 : vector<2x48xf32>
    %491 = arith.divf %489, %490 : vector<2x48xf32>
    %492 = vector.extract_strided_slice %482 {offsets = [0, 48], sizes = [2, 48], strides = [1, 1]} : vector<2x144xf32> to vector<2x48xf32>
    %493 = vector.extract_strided_slice %483 {offsets = [0, 48], sizes = [2, 48], strides = [1, 1]} : vector<2x144xf32> to vector<2x48xf32>
    %494 = arith.addf %492, %493 : vector<2x48xf32>
    %495 = arith.negf %494 : vector<2x48xf32>
    %496 = math.exp %495 : vector<2x48xf32>
    %cst_99 = arith.constant 1.000000e+00 : f32
    %497 = vector.broadcast %cst_99 : f32 to vector<2x48xf32>
    %498 = arith.addf %497, %496 : vector<2x48xf32>
    %499 = arith.divf %497, %498 : vector<2x48xf32>
    %500 = vector.extract_strided_slice %482 {offsets = [0, 96], sizes = [2, 48], strides = [1, 1]} : vector<2x144xf32> to vector<2x48xf32>
    %501 = vector.extract_strided_slice %483 {offsets = [0, 96], sizes = [2, 48], strides = [1, 1]} : vector<2x144xf32> to vector<2x48xf32>
    %502 = vector.broadcast %25 : vector<1x48xf32> to vector<2x48xf32>
    %503 = arith.addf %501, %502 : vector<2x48xf32>
    %504 = arith.mulf %491, %503 : vector<2x48xf32>
    %505 = arith.addf %500, %504 : vector<2x48xf32>
    %506 = math.tanh %505 : vector<2x48xf32>
    %cst_100 = arith.constant 1.000000e+00 : f32
    %507 = vector.broadcast %cst_100 : f32 to vector<2x48xf32>
    %508 = arith.subf %507, %499 : vector<2x48xf32>
    %509 = arith.mulf %508, %506 : vector<2x48xf32>
    %510 = arith.mulf %499, %447 : vector<2x48xf32>
    %511 = arith.addf %509, %510 : vector<2x48xf32>
    %cst_101 = arith.constant dense<0.000000e+00> : vector<2x144xf32>
    %512 = tpu.matmul %511, %26, %cst_101 {dimension_numbers = #tpu.dot_dimension_numbers<[1], [0], [0], [1], [0, 0, 1, 1], [], []>} : vector<2x48xf32>, vector<48x144xf32>, vector<2x144xf32> -> vector<2x144xf32>
    %513 = vector.broadcast %27 : vector<1x144xf32> to vector<2x144xf32>
    %514 = arith.addf %512, %513 : vector<2x144xf32>
    %cst_102 = arith.constant dense<0.000000e+00> : vector<2x144xf32>
    %515 = tpu.matmul %479, %28, %cst_102 {dimension_numbers = #tpu.dot_dimension_numbers<[1], [0], [0], [1], [0, 0, 1, 1], [], []>} : vector<2x48xf32>, vector<48x144xf32>, vector<2x144xf32> -> vector<2x144xf32>
    %516 = vector.extract_strided_slice %514 {offsets = [0, 0], sizes = [2, 48], strides = [1, 1]} : vector<2x144xf32> to vector<2x48xf32>
    %517 = vector.extract_strided_slice %515 {offsets = [0, 0], sizes = [2, 48], strides = [1, 1]} : vector<2x144xf32> to vector<2x48xf32>
    %518 = arith.addf %516, %517 : vector<2x48xf32>
    %519 = arith.negf %518 : vector<2x48xf32>
    %520 = math.exp %519 : vector<2x48xf32>
    %cst_103 = arith.constant 1.000000e+00 : f32
    %521 = vector.broadcast %cst_103 : f32 to vector<2x48xf32>
    %522 = arith.addf %521, %520 : vector<2x48xf32>
    %523 = arith.divf %521, %522 : vector<2x48xf32>
    %524 = vector.extract_strided_slice %514 {offsets = [0, 48], sizes = [2, 48], strides = [1, 1]} : vector<2x144xf32> to vector<2x48xf32>
    %525 = vector.extract_strided_slice %515 {offsets = [0, 48], sizes = [2, 48], strides = [1, 1]} : vector<2x144xf32> to vector<2x48xf32>
    %526 = arith.addf %524, %525 : vector<2x48xf32>
    %527 = arith.negf %526 : vector<2x48xf32>
    %528 = math.exp %527 : vector<2x48xf32>
    %cst_104 = arith.constant 1.000000e+00 : f32
    %529 = vector.broadcast %cst_104 : f32 to vector<2x48xf32>
    %530 = arith.addf %529, %528 : vector<2x48xf32>
    %531 = arith.divf %529, %530 : vector<2x48xf32>
    %532 = vector.extract_strided_slice %514 {offsets = [0, 96], sizes = [2, 48], strides = [1, 1]} : vector<2x144xf32> to vector<2x48xf32>
    %533 = vector.extract_strided_slice %515 {offsets = [0, 96], sizes = [2, 48], strides = [1, 1]} : vector<2x144xf32> to vector<2x48xf32>
    %534 = vector.broadcast %29 : vector<1x48xf32> to vector<2x48xf32>
    %535 = arith.addf %533, %534 : vector<2x48xf32>
    %536 = arith.mulf %523, %535 : vector<2x48xf32>
    %537 = arith.addf %532, %536 : vector<2x48xf32>
    %538 = math.tanh %537 : vector<2x48xf32>
    %cst_105 = arith.constant 1.000000e+00 : f32
    %539 = vector.broadcast %cst_105 : f32 to vector<2x48xf32>
    %540 = arith.subf %539, %531 : vector<2x48xf32>
    %541 = arith.mulf %540, %538 : vector<2x48xf32>
    %542 = arith.mulf %531, %479 : vector<2x48xf32>
    %543 = arith.addf %541, %542 : vector<2x48xf32>
    %544 = vector.extract_strided_slice %19 {offsets = [8, 0], sizes = [1, 144], strides = [1, 1]} : vector<16x144xf32> to vector<1x144xf32>
    %545 = vector.extract_strided_slice %23 {offsets = [8, 0], sizes = [1, 144], strides = [1, 1]} : vector<16x144xf32> to vector<1x144xf32>
    %546 = tpu.concatenate %544, %545 in 0 : vector<1x144xf32>, vector<1x144xf32> -> vector<2x144xf32>
    %cst_106 = arith.constant dense<0.000000e+00> : vector<2x144xf32>
    %547 = tpu.matmul %511, %24, %cst_106 {dimension_numbers = #tpu.dot_dimension_numbers<[1], [0], [0], [1], [0, 0, 1, 1], [], []>} : vector<2x48xf32>, vector<48x144xf32>, vector<2x144xf32> -> vector<2x144xf32>
    %548 = vector.extract_strided_slice %546 {offsets = [0, 0], sizes = [2, 48], strides = [1, 1]} : vector<2x144xf32> to vector<2x48xf32>
    %549 = vector.extract_strided_slice %547 {offsets = [0, 0], sizes = [2, 48], strides = [1, 1]} : vector<2x144xf32> to vector<2x48xf32>
    %550 = arith.addf %548, %549 : vector<2x48xf32>
    %551 = arith.negf %550 : vector<2x48xf32>
    %552 = math.exp %551 : vector<2x48xf32>
    %cst_107 = arith.constant 1.000000e+00 : f32
    %553 = vector.broadcast %cst_107 : f32 to vector<2x48xf32>
    %554 = arith.addf %553, %552 : vector<2x48xf32>
    %555 = arith.divf %553, %554 : vector<2x48xf32>
    %556 = vector.extract_strided_slice %546 {offsets = [0, 48], sizes = [2, 48], strides = [1, 1]} : vector<2x144xf32> to vector<2x48xf32>
    %557 = vector.extract_strided_slice %547 {offsets = [0, 48], sizes = [2, 48], strides = [1, 1]} : vector<2x144xf32> to vector<2x48xf32>
    %558 = arith.addf %556, %557 : vector<2x48xf32>
    %559 = arith.negf %558 : vector<2x48xf32>
    %560 = math.exp %559 : vector<2x48xf32>
    %cst_108 = arith.constant 1.000000e+00 : f32
    %561 = vector.broadcast %cst_108 : f32 to vector<2x48xf32>
    %562 = arith.addf %561, %560 : vector<2x48xf32>
    %563 = arith.divf %561, %562 : vector<2x48xf32>
    %564 = vector.extract_strided_slice %546 {offsets = [0, 96], sizes = [2, 48], strides = [1, 1]} : vector<2x144xf32> to vector<2x48xf32>
    %565 = vector.extract_strided_slice %547 {offsets = [0, 96], sizes = [2, 48], strides = [1, 1]} : vector<2x144xf32> to vector<2x48xf32>
    %566 = vector.broadcast %25 : vector<1x48xf32> to vector<2x48xf32>
    %567 = arith.addf %565, %566 : vector<2x48xf32>
    %568 = arith.mulf %555, %567 : vector<2x48xf32>
    %569 = arith.addf %564, %568 : vector<2x48xf32>
    %570 = math.tanh %569 : vector<2x48xf32>
    %cst_109 = arith.constant 1.000000e+00 : f32
    %571 = vector.broadcast %cst_109 : f32 to vector<2x48xf32>
    %572 = arith.subf %571, %563 : vector<2x48xf32>
    %573 = arith.mulf %572, %570 : vector<2x48xf32>
    %574 = arith.mulf %563, %511 : vector<2x48xf32>
    %575 = arith.addf %573, %574 : vector<2x48xf32>
    %cst_110 = arith.constant dense<0.000000e+00> : vector<2x144xf32>
    %576 = tpu.matmul %575, %26, %cst_110 {dimension_numbers = #tpu.dot_dimension_numbers<[1], [0], [0], [1], [0, 0, 1, 1], [], []>} : vector<2x48xf32>, vector<48x144xf32>, vector<2x144xf32> -> vector<2x144xf32>
    %577 = vector.broadcast %27 : vector<1x144xf32> to vector<2x144xf32>
    %578 = arith.addf %576, %577 : vector<2x144xf32>
    %cst_111 = arith.constant dense<0.000000e+00> : vector<2x144xf32>
    %579 = tpu.matmul %543, %28, %cst_111 {dimension_numbers = #tpu.dot_dimension_numbers<[1], [0], [0], [1], [0, 0, 1, 1], [], []>} : vector<2x48xf32>, vector<48x144xf32>, vector<2x144xf32> -> vector<2x144xf32>
    %580 = vector.extract_strided_slice %578 {offsets = [0, 0], sizes = [2, 48], strides = [1, 1]} : vector<2x144xf32> to vector<2x48xf32>
    %581 = vector.extract_strided_slice %579 {offsets = [0, 0], sizes = [2, 48], strides = [1, 1]} : vector<2x144xf32> to vector<2x48xf32>
    %582 = arith.addf %580, %581 : vector<2x48xf32>
    %583 = arith.negf %582 : vector<2x48xf32>
    %584 = math.exp %583 : vector<2x48xf32>
    %cst_112 = arith.constant 1.000000e+00 : f32
    %585 = vector.broadcast %cst_112 : f32 to vector<2x48xf32>
    %586 = arith.addf %585, %584 : vector<2x48xf32>
    %587 = arith.divf %585, %586 : vector<2x48xf32>
    %588 = vector.extract_strided_slice %578 {offsets = [0, 48], sizes = [2, 48], strides = [1, 1]} : vector<2x144xf32> to vector<2x48xf32>
    %589 = vector.extract_strided_slice %579 {offsets = [0, 48], sizes = [2, 48], strides = [1, 1]} : vector<2x144xf32> to vector<2x48xf32>
    %590 = arith.addf %588, %589 : vector<2x48xf32>
    %591 = arith.negf %590 : vector<2x48xf32>
    %592 = math.exp %591 : vector<2x48xf32>
    %cst_113 = arith.constant 1.000000e+00 : f32
    %593 = vector.broadcast %cst_113 : f32 to vector<2x48xf32>
    %594 = arith.addf %593, %592 : vector<2x48xf32>
    %595 = arith.divf %593, %594 : vector<2x48xf32>
    %596 = vector.extract_strided_slice %578 {offsets = [0, 96], sizes = [2, 48], strides = [1, 1]} : vector<2x144xf32> to vector<2x48xf32>
    %597 = vector.extract_strided_slice %579 {offsets = [0, 96], sizes = [2, 48], strides = [1, 1]} : vector<2x144xf32> to vector<2x48xf32>
    %598 = vector.broadcast %29 : vector<1x48xf32> to vector<2x48xf32>
    %599 = arith.addf %597, %598 : vector<2x48xf32>
    %600 = arith.mulf %587, %599 : vector<2x48xf32>
    %601 = arith.addf %596, %600 : vector<2x48xf32>
    %602 = math.tanh %601 : vector<2x48xf32>
    %cst_114 = arith.constant 1.000000e+00 : f32
    %603 = vector.broadcast %cst_114 : f32 to vector<2x48xf32>
    %604 = arith.subf %603, %595 : vector<2x48xf32>
    %605 = arith.mulf %604, %602 : vector<2x48xf32>
    %606 = arith.mulf %595, %543 : vector<2x48xf32>
    %607 = arith.addf %605, %606 : vector<2x48xf32>
    %608 = vector.extract_strided_slice %19 {offsets = [9, 0], sizes = [1, 144], strides = [1, 1]} : vector<16x144xf32> to vector<1x144xf32>
    %609 = vector.extract_strided_slice %23 {offsets = [9, 0], sizes = [1, 144], strides = [1, 1]} : vector<16x144xf32> to vector<1x144xf32>
    %610 = tpu.concatenate %608, %609 in 0 : vector<1x144xf32>, vector<1x144xf32> -> vector<2x144xf32>
    %cst_115 = arith.constant dense<0.000000e+00> : vector<2x144xf32>
    %611 = tpu.matmul %575, %24, %cst_115 {dimension_numbers = #tpu.dot_dimension_numbers<[1], [0], [0], [1], [0, 0, 1, 1], [], []>} : vector<2x48xf32>, vector<48x144xf32>, vector<2x144xf32> -> vector<2x144xf32>
    %612 = vector.extract_strided_slice %610 {offsets = [0, 0], sizes = [2, 48], strides = [1, 1]} : vector<2x144xf32> to vector<2x48xf32>
    %613 = vector.extract_strided_slice %611 {offsets = [0, 0], sizes = [2, 48], strides = [1, 1]} : vector<2x144xf32> to vector<2x48xf32>
    %614 = arith.addf %612, %613 : vector<2x48xf32>
    %615 = arith.negf %614 : vector<2x48xf32>
    %616 = math.exp %615 : vector<2x48xf32>
    %cst_116 = arith.constant 1.000000e+00 : f32
    %617 = vector.broadcast %cst_116 : f32 to vector<2x48xf32>
    %618 = arith.addf %617, %616 : vector<2x48xf32>
    %619 = arith.divf %617, %618 : vector<2x48xf32>
    %620 = vector.extract_strided_slice %610 {offsets = [0, 48], sizes = [2, 48], strides = [1, 1]} : vector<2x144xf32> to vector<2x48xf32>
    %621 = vector.extract_strided_slice %611 {offsets = [0, 48], sizes = [2, 48], strides = [1, 1]} : vector<2x144xf32> to vector<2x48xf32>
    %622 = arith.addf %620, %621 : vector<2x48xf32>
    %623 = arith.negf %622 : vector<2x48xf32>
    %624 = math.exp %623 : vector<2x48xf32>
    %cst_117 = arith.constant 1.000000e+00 : f32
    %625 = vector.broadcast %cst_117 : f32 to vector<2x48xf32>
    %626 = arith.addf %625, %624 : vector<2x48xf32>
    %627 = arith.divf %625, %626 : vector<2x48xf32>
    %628 = vector.extract_strided_slice %610 {offsets = [0, 96], sizes = [2, 48], strides = [1, 1]} : vector<2x144xf32> to vector<2x48xf32>
    %629 = vector.extract_strided_slice %611 {offsets = [0, 96], sizes = [2, 48], strides = [1, 1]} : vector<2x144xf32> to vector<2x48xf32>
    %630 = vector.broadcast %25 : vector<1x48xf32> to vector<2x48xf32>
    %631 = arith.addf %629, %630 : vector<2x48xf32>
    %632 = arith.mulf %619, %631 : vector<2x48xf32>
    %633 = arith.addf %628, %632 : vector<2x48xf32>
    %634 = math.tanh %633 : vector<2x48xf32>
    %cst_118 = arith.constant 1.000000e+00 : f32
    %635 = vector.broadcast %cst_118 : f32 to vector<2x48xf32>
    %636 = arith.subf %635, %627 : vector<2x48xf32>
    %637 = arith.mulf %636, %634 : vector<2x48xf32>
    %638 = arith.mulf %627, %575 : vector<2x48xf32>
    %639 = arith.addf %637, %638 : vector<2x48xf32>
    %cst_119 = arith.constant dense<0.000000e+00> : vector<2x144xf32>
    %640 = tpu.matmul %639, %26, %cst_119 {dimension_numbers = #tpu.dot_dimension_numbers<[1], [0], [0], [1], [0, 0, 1, 1], [], []>} : vector<2x48xf32>, vector<48x144xf32>, vector<2x144xf32> -> vector<2x144xf32>
    %641 = vector.broadcast %27 : vector<1x144xf32> to vector<2x144xf32>
    %642 = arith.addf %640, %641 : vector<2x144xf32>
    %cst_120 = arith.constant dense<0.000000e+00> : vector<2x144xf32>
    %643 = tpu.matmul %607, %28, %cst_120 {dimension_numbers = #tpu.dot_dimension_numbers<[1], [0], [0], [1], [0, 0, 1, 1], [], []>} : vector<2x48xf32>, vector<48x144xf32>, vector<2x144xf32> -> vector<2x144xf32>
    %644 = vector.extract_strided_slice %642 {offsets = [0, 0], sizes = [2, 48], strides = [1, 1]} : vector<2x144xf32> to vector<2x48xf32>
    %645 = vector.extract_strided_slice %643 {offsets = [0, 0], sizes = [2, 48], strides = [1, 1]} : vector<2x144xf32> to vector<2x48xf32>
    %646 = arith.addf %644, %645 : vector<2x48xf32>
    %647 = arith.negf %646 : vector<2x48xf32>
    %648 = math.exp %647 : vector<2x48xf32>
    %cst_121 = arith.constant 1.000000e+00 : f32
    %649 = vector.broadcast %cst_121 : f32 to vector<2x48xf32>
    %650 = arith.addf %649, %648 : vector<2x48xf32>
    %651 = arith.divf %649, %650 : vector<2x48xf32>
    %652 = vector.extract_strided_slice %642 {offsets = [0, 48], sizes = [2, 48], strides = [1, 1]} : vector<2x144xf32> to vector<2x48xf32>
    %653 = vector.extract_strided_slice %643 {offsets = [0, 48], sizes = [2, 48], strides = [1, 1]} : vector<2x144xf32> to vector<2x48xf32>
    %654 = arith.addf %652, %653 : vector<2x48xf32>
    %655 = arith.negf %654 : vector<2x48xf32>
    %656 = math.exp %655 : vector<2x48xf32>
    %cst_122 = arith.constant 1.000000e+00 : f32
    %657 = vector.broadcast %cst_122 : f32 to vector<2x48xf32>
    %658 = arith.addf %657, %656 : vector<2x48xf32>
    %659 = arith.divf %657, %658 : vector<2x48xf32>
    %660 = vector.extract_strided_slice %642 {offsets = [0, 96], sizes = [2, 48], strides = [1, 1]} : vector<2x144xf32> to vector<2x48xf32>
    %661 = vector.extract_strided_slice %643 {offsets = [0, 96], sizes = [2, 48], strides = [1, 1]} : vector<2x144xf32> to vector<2x48xf32>
    %662 = vector.broadcast %29 : vector<1x48xf32> to vector<2x48xf32>
    %663 = arith.addf %661, %662 : vector<2x48xf32>
    %664 = arith.mulf %651, %663 : vector<2x48xf32>
    %665 = arith.addf %660, %664 : vector<2x48xf32>
    %666 = math.tanh %665 : vector<2x48xf32>
    %cst_123 = arith.constant 1.000000e+00 : f32
    %667 = vector.broadcast %cst_123 : f32 to vector<2x48xf32>
    %668 = arith.subf %667, %659 : vector<2x48xf32>
    %669 = arith.mulf %668, %666 : vector<2x48xf32>
    %670 = arith.mulf %659, %607 : vector<2x48xf32>
    %671 = arith.addf %669, %670 : vector<2x48xf32>
    %672 = vector.extract_strided_slice %19 {offsets = [10, 0], sizes = [1, 144], strides = [1, 1]} : vector<16x144xf32> to vector<1x144xf32>
    %673 = vector.extract_strided_slice %23 {offsets = [10, 0], sizes = [1, 144], strides = [1, 1]} : vector<16x144xf32> to vector<1x144xf32>
    %674 = tpu.concatenate %672, %673 in 0 : vector<1x144xf32>, vector<1x144xf32> -> vector<2x144xf32>
    %cst_124 = arith.constant dense<0.000000e+00> : vector<2x144xf32>
    %675 = tpu.matmul %639, %24, %cst_124 {dimension_numbers = #tpu.dot_dimension_numbers<[1], [0], [0], [1], [0, 0, 1, 1], [], []>} : vector<2x48xf32>, vector<48x144xf32>, vector<2x144xf32> -> vector<2x144xf32>
    %676 = vector.extract_strided_slice %674 {offsets = [0, 0], sizes = [2, 48], strides = [1, 1]} : vector<2x144xf32> to vector<2x48xf32>
    %677 = vector.extract_strided_slice %675 {offsets = [0, 0], sizes = [2, 48], strides = [1, 1]} : vector<2x144xf32> to vector<2x48xf32>
    %678 = arith.addf %676, %677 : vector<2x48xf32>
    %679 = arith.negf %678 : vector<2x48xf32>
    %680 = math.exp %679 : vector<2x48xf32>
    %cst_125 = arith.constant 1.000000e+00 : f32
    %681 = vector.broadcast %cst_125 : f32 to vector<2x48xf32>
    %682 = arith.addf %681, %680 : vector<2x48xf32>
    %683 = arith.divf %681, %682 : vector<2x48xf32>
    %684 = vector.extract_strided_slice %674 {offsets = [0, 48], sizes = [2, 48], strides = [1, 1]} : vector<2x144xf32> to vector<2x48xf32>
    %685 = vector.extract_strided_slice %675 {offsets = [0, 48], sizes = [2, 48], strides = [1, 1]} : vector<2x144xf32> to vector<2x48xf32>
    %686 = arith.addf %684, %685 : vector<2x48xf32>
    %687 = arith.negf %686 : vector<2x48xf32>
    %688 = math.exp %687 : vector<2x48xf32>
    %cst_126 = arith.constant 1.000000e+00 : f32
    %689 = vector.broadcast %cst_126 : f32 to vector<2x48xf32>
    %690 = arith.addf %689, %688 : vector<2x48xf32>
    %691 = arith.divf %689, %690 : vector<2x48xf32>
    %692 = vector.extract_strided_slice %674 {offsets = [0, 96], sizes = [2, 48], strides = [1, 1]} : vector<2x144xf32> to vector<2x48xf32>
    %693 = vector.extract_strided_slice %675 {offsets = [0, 96], sizes = [2, 48], strides = [1, 1]} : vector<2x144xf32> to vector<2x48xf32>
    %694 = vector.broadcast %25 : vector<1x48xf32> to vector<2x48xf32>
    %695 = arith.addf %693, %694 : vector<2x48xf32>
    %696 = arith.mulf %683, %695 : vector<2x48xf32>
    %697 = arith.addf %692, %696 : vector<2x48xf32>
    %698 = math.tanh %697 : vector<2x48xf32>
    %cst_127 = arith.constant 1.000000e+00 : f32
    %699 = vector.broadcast %cst_127 : f32 to vector<2x48xf32>
    %700 = arith.subf %699, %691 : vector<2x48xf32>
    %701 = arith.mulf %700, %698 : vector<2x48xf32>
    %702 = arith.mulf %691, %639 : vector<2x48xf32>
    %703 = arith.addf %701, %702 : vector<2x48xf32>
    %cst_128 = arith.constant dense<0.000000e+00> : vector<2x144xf32>
    %704 = tpu.matmul %703, %26, %cst_128 {dimension_numbers = #tpu.dot_dimension_numbers<[1], [0], [0], [1], [0, 0, 1, 1], [], []>} : vector<2x48xf32>, vector<48x144xf32>, vector<2x144xf32> -> vector<2x144xf32>
    %705 = vector.broadcast %27 : vector<1x144xf32> to vector<2x144xf32>
    %706 = arith.addf %704, %705 : vector<2x144xf32>
    %cst_129 = arith.constant dense<0.000000e+00> : vector<2x144xf32>
    %707 = tpu.matmul %671, %28, %cst_129 {dimension_numbers = #tpu.dot_dimension_numbers<[1], [0], [0], [1], [0, 0, 1, 1], [], []>} : vector<2x48xf32>, vector<48x144xf32>, vector<2x144xf32> -> vector<2x144xf32>
    %708 = vector.extract_strided_slice %706 {offsets = [0, 0], sizes = [2, 48], strides = [1, 1]} : vector<2x144xf32> to vector<2x48xf32>
    %709 = vector.extract_strided_slice %707 {offsets = [0, 0], sizes = [2, 48], strides = [1, 1]} : vector<2x144xf32> to vector<2x48xf32>
    %710 = arith.addf %708, %709 : vector<2x48xf32>
    %711 = arith.negf %710 : vector<2x48xf32>
    %712 = math.exp %711 : vector<2x48xf32>
    %cst_130 = arith.constant 1.000000e+00 : f32
    %713 = vector.broadcast %cst_130 : f32 to vector<2x48xf32>
    %714 = arith.addf %713, %712 : vector<2x48xf32>
    %715 = arith.divf %713, %714 : vector<2x48xf32>
    %716 = vector.extract_strided_slice %706 {offsets = [0, 48], sizes = [2, 48], strides = [1, 1]} : vector<2x144xf32> to vector<2x48xf32>
    %717 = vector.extract_strided_slice %707 {offsets = [0, 48], sizes = [2, 48], strides = [1, 1]} : vector<2x144xf32> to vector<2x48xf32>
    %718 = arith.addf %716, %717 : vector<2x48xf32>
    %719 = arith.negf %718 : vector<2x48xf32>
    %720 = math.exp %719 : vector<2x48xf32>
    %cst_131 = arith.constant 1.000000e+00 : f32
    %721 = vector.broadcast %cst_131 : f32 to vector<2x48xf32>
    %722 = arith.addf %721, %720 : vector<2x48xf32>
    %723 = arith.divf %721, %722 : vector<2x48xf32>
    %724 = vector.extract_strided_slice %706 {offsets = [0, 96], sizes = [2, 48], strides = [1, 1]} : vector<2x144xf32> to vector<2x48xf32>
    %725 = vector.extract_strided_slice %707 {offsets = [0, 96], sizes = [2, 48], strides = [1, 1]} : vector<2x144xf32> to vector<2x48xf32>
    %726 = vector.broadcast %29 : vector<1x48xf32> to vector<2x48xf32>
    %727 = arith.addf %725, %726 : vector<2x48xf32>
    %728 = arith.mulf %715, %727 : vector<2x48xf32>
    %729 = arith.addf %724, %728 : vector<2x48xf32>
    %730 = math.tanh %729 : vector<2x48xf32>
    %cst_132 = arith.constant 1.000000e+00 : f32
    %731 = vector.broadcast %cst_132 : f32 to vector<2x48xf32>
    %732 = arith.subf %731, %723 : vector<2x48xf32>
    %733 = arith.mulf %732, %730 : vector<2x48xf32>
    %734 = arith.mulf %723, %671 : vector<2x48xf32>
    %735 = arith.addf %733, %734 : vector<2x48xf32>
    %736 = vector.extract_strided_slice %19 {offsets = [11, 0], sizes = [1, 144], strides = [1, 1]} : vector<16x144xf32> to vector<1x144xf32>
    %737 = vector.extract_strided_slice %23 {offsets = [11, 0], sizes = [1, 144], strides = [1, 1]} : vector<16x144xf32> to vector<1x144xf32>
    %738 = tpu.concatenate %736, %737 in 0 : vector<1x144xf32>, vector<1x144xf32> -> vector<2x144xf32>
    %cst_133 = arith.constant dense<0.000000e+00> : vector<2x144xf32>
    %739 = tpu.matmul %703, %24, %cst_133 {dimension_numbers = #tpu.dot_dimension_numbers<[1], [0], [0], [1], [0, 0, 1, 1], [], []>} : vector<2x48xf32>, vector<48x144xf32>, vector<2x144xf32> -> vector<2x144xf32>
    %740 = vector.extract_strided_slice %738 {offsets = [0, 0], sizes = [2, 48], strides = [1, 1]} : vector<2x144xf32> to vector<2x48xf32>
    %741 = vector.extract_strided_slice %739 {offsets = [0, 0], sizes = [2, 48], strides = [1, 1]} : vector<2x144xf32> to vector<2x48xf32>
    %742 = arith.addf %740, %741 : vector<2x48xf32>
    %743 = arith.negf %742 : vector<2x48xf32>
    %744 = math.exp %743 : vector<2x48xf32>
    %cst_134 = arith.constant 1.000000e+00 : f32
    %745 = vector.broadcast %cst_134 : f32 to vector<2x48xf32>
    %746 = arith.addf %745, %744 : vector<2x48xf32>
    %747 = arith.divf %745, %746 : vector<2x48xf32>
    %748 = vector.extract_strided_slice %738 {offsets = [0, 48], sizes = [2, 48], strides = [1, 1]} : vector<2x144xf32> to vector<2x48xf32>
    %749 = vector.extract_strided_slice %739 {offsets = [0, 48], sizes = [2, 48], strides = [1, 1]} : vector<2x144xf32> to vector<2x48xf32>
    %750 = arith.addf %748, %749 : vector<2x48xf32>
    %751 = arith.negf %750 : vector<2x48xf32>
    %752 = math.exp %751 : vector<2x48xf32>
    %cst_135 = arith.constant 1.000000e+00 : f32
    %753 = vector.broadcast %cst_135 : f32 to vector<2x48xf32>
    %754 = arith.addf %753, %752 : vector<2x48xf32>
    %755 = arith.divf %753, %754 : vector<2x48xf32>
    %756 = vector.extract_strided_slice %738 {offsets = [0, 96], sizes = [2, 48], strides = [1, 1]} : vector<2x144xf32> to vector<2x48xf32>
    %757 = vector.extract_strided_slice %739 {offsets = [0, 96], sizes = [2, 48], strides = [1, 1]} : vector<2x144xf32> to vector<2x48xf32>
    %758 = vector.broadcast %25 : vector<1x48xf32> to vector<2x48xf32>
    %759 = arith.addf %757, %758 : vector<2x48xf32>
    %760 = arith.mulf %747, %759 : vector<2x48xf32>
    %761 = arith.addf %756, %760 : vector<2x48xf32>
    %762 = math.tanh %761 : vector<2x48xf32>
    %cst_136 = arith.constant 1.000000e+00 : f32
    %763 = vector.broadcast %cst_136 : f32 to vector<2x48xf32>
    %764 = arith.subf %763, %755 : vector<2x48xf32>
    %765 = arith.mulf %764, %762 : vector<2x48xf32>
    %766 = arith.mulf %755, %703 : vector<2x48xf32>
    %767 = arith.addf %765, %766 : vector<2x48xf32>
    %cst_137 = arith.constant dense<0.000000e+00> : vector<2x144xf32>
    %768 = tpu.matmul %767, %26, %cst_137 {dimension_numbers = #tpu.dot_dimension_numbers<[1], [0], [0], [1], [0, 0, 1, 1], [], []>} : vector<2x48xf32>, vector<48x144xf32>, vector<2x144xf32> -> vector<2x144xf32>
    %769 = vector.broadcast %27 : vector<1x144xf32> to vector<2x144xf32>
    %770 = arith.addf %768, %769 : vector<2x144xf32>
    %cst_138 = arith.constant dense<0.000000e+00> : vector<2x144xf32>
    %771 = tpu.matmul %735, %28, %cst_138 {dimension_numbers = #tpu.dot_dimension_numbers<[1], [0], [0], [1], [0, 0, 1, 1], [], []>} : vector<2x48xf32>, vector<48x144xf32>, vector<2x144xf32> -> vector<2x144xf32>
    %772 = vector.extract_strided_slice %770 {offsets = [0, 0], sizes = [2, 48], strides = [1, 1]} : vector<2x144xf32> to vector<2x48xf32>
    %773 = vector.extract_strided_slice %771 {offsets = [0, 0], sizes = [2, 48], strides = [1, 1]} : vector<2x144xf32> to vector<2x48xf32>
    %774 = arith.addf %772, %773 : vector<2x48xf32>
    %775 = arith.negf %774 : vector<2x48xf32>
    %776 = math.exp %775 : vector<2x48xf32>
    %cst_139 = arith.constant 1.000000e+00 : f32
    %777 = vector.broadcast %cst_139 : f32 to vector<2x48xf32>
    %778 = arith.addf %777, %776 : vector<2x48xf32>
    %779 = arith.divf %777, %778 : vector<2x48xf32>
    %780 = vector.extract_strided_slice %770 {offsets = [0, 48], sizes = [2, 48], strides = [1, 1]} : vector<2x144xf32> to vector<2x48xf32>
    %781 = vector.extract_strided_slice %771 {offsets = [0, 48], sizes = [2, 48], strides = [1, 1]} : vector<2x144xf32> to vector<2x48xf32>
    %782 = arith.addf %780, %781 : vector<2x48xf32>
    %783 = arith.negf %782 : vector<2x48xf32>
    %784 = math.exp %783 : vector<2x48xf32>
    %cst_140 = arith.constant 1.000000e+00 : f32
    %785 = vector.broadcast %cst_140 : f32 to vector<2x48xf32>
    %786 = arith.addf %785, %784 : vector<2x48xf32>
    %787 = arith.divf %785, %786 : vector<2x48xf32>
    %788 = vector.extract_strided_slice %770 {offsets = [0, 96], sizes = [2, 48], strides = [1, 1]} : vector<2x144xf32> to vector<2x48xf32>
    %789 = vector.extract_strided_slice %771 {offsets = [0, 96], sizes = [2, 48], strides = [1, 1]} : vector<2x144xf32> to vector<2x48xf32>
    %790 = vector.broadcast %29 : vector<1x48xf32> to vector<2x48xf32>
    %791 = arith.addf %789, %790 : vector<2x48xf32>
    %792 = arith.mulf %779, %791 : vector<2x48xf32>
    %793 = arith.addf %788, %792 : vector<2x48xf32>
    %794 = math.tanh %793 : vector<2x48xf32>
    %cst_141 = arith.constant 1.000000e+00 : f32
    %795 = vector.broadcast %cst_141 : f32 to vector<2x48xf32>
    %796 = arith.subf %795, %787 : vector<2x48xf32>
    %797 = arith.mulf %796, %794 : vector<2x48xf32>
    %798 = arith.mulf %787, %735 : vector<2x48xf32>
    %799 = arith.addf %797, %798 : vector<2x48xf32>
    %800 = vector.extract_strided_slice %19 {offsets = [12, 0], sizes = [1, 144], strides = [1, 1]} : vector<16x144xf32> to vector<1x144xf32>
    %801 = vector.extract_strided_slice %23 {offsets = [12, 0], sizes = [1, 144], strides = [1, 1]} : vector<16x144xf32> to vector<1x144xf32>
    %802 = tpu.concatenate %800, %801 in 0 : vector<1x144xf32>, vector<1x144xf32> -> vector<2x144xf32>
    %cst_142 = arith.constant dense<0.000000e+00> : vector<2x144xf32>
    %803 = tpu.matmul %767, %24, %cst_142 {dimension_numbers = #tpu.dot_dimension_numbers<[1], [0], [0], [1], [0, 0, 1, 1], [], []>} : vector<2x48xf32>, vector<48x144xf32>, vector<2x144xf32> -> vector<2x144xf32>
    %804 = vector.extract_strided_slice %802 {offsets = [0, 0], sizes = [2, 48], strides = [1, 1]} : vector<2x144xf32> to vector<2x48xf32>
    %805 = vector.extract_strided_slice %803 {offsets = [0, 0], sizes = [2, 48], strides = [1, 1]} : vector<2x144xf32> to vector<2x48xf32>
    %806 = arith.addf %804, %805 : vector<2x48xf32>
    %807 = arith.negf %806 : vector<2x48xf32>
    %808 = math.exp %807 : vector<2x48xf32>
    %cst_143 = arith.constant 1.000000e+00 : f32
    %809 = vector.broadcast %cst_143 : f32 to vector<2x48xf32>
    %810 = arith.addf %809, %808 : vector<2x48xf32>
    %811 = arith.divf %809, %810 : vector<2x48xf32>
    %812 = vector.extract_strided_slice %802 {offsets = [0, 48], sizes = [2, 48], strides = [1, 1]} : vector<2x144xf32> to vector<2x48xf32>
    %813 = vector.extract_strided_slice %803 {offsets = [0, 48], sizes = [2, 48], strides = [1, 1]} : vector<2x144xf32> to vector<2x48xf32>
    %814 = arith.addf %812, %813 : vector<2x48xf32>
    %815 = arith.negf %814 : vector<2x48xf32>
    %816 = math.exp %815 : vector<2x48xf32>
    %cst_144 = arith.constant 1.000000e+00 : f32
    %817 = vector.broadcast %cst_144 : f32 to vector<2x48xf32>
    %818 = arith.addf %817, %816 : vector<2x48xf32>
    %819 = arith.divf %817, %818 : vector<2x48xf32>
    %820 = vector.extract_strided_slice %802 {offsets = [0, 96], sizes = [2, 48], strides = [1, 1]} : vector<2x144xf32> to vector<2x48xf32>
    %821 = vector.extract_strided_slice %803 {offsets = [0, 96], sizes = [2, 48], strides = [1, 1]} : vector<2x144xf32> to vector<2x48xf32>
    %822 = vector.broadcast %25 : vector<1x48xf32> to vector<2x48xf32>
    %823 = arith.addf %821, %822 : vector<2x48xf32>
    %824 = arith.mulf %811, %823 : vector<2x48xf32>
    %825 = arith.addf %820, %824 : vector<2x48xf32>
    %826 = math.tanh %825 : vector<2x48xf32>
    %cst_145 = arith.constant 1.000000e+00 : f32
    %827 = vector.broadcast %cst_145 : f32 to vector<2x48xf32>
    %828 = arith.subf %827, %819 : vector<2x48xf32>
    %829 = arith.mulf %828, %826 : vector<2x48xf32>
    %830 = arith.mulf %819, %767 : vector<2x48xf32>
    %831 = arith.addf %829, %830 : vector<2x48xf32>
    %cst_146 = arith.constant dense<0.000000e+00> : vector<2x144xf32>
    %832 = tpu.matmul %831, %26, %cst_146 {dimension_numbers = #tpu.dot_dimension_numbers<[1], [0], [0], [1], [0, 0, 1, 1], [], []>} : vector<2x48xf32>, vector<48x144xf32>, vector<2x144xf32> -> vector<2x144xf32>
    %833 = vector.broadcast %27 : vector<1x144xf32> to vector<2x144xf32>
    %834 = arith.addf %832, %833 : vector<2x144xf32>
    %cst_147 = arith.constant dense<0.000000e+00> : vector<2x144xf32>
    %835 = tpu.matmul %799, %28, %cst_147 {dimension_numbers = #tpu.dot_dimension_numbers<[1], [0], [0], [1], [0, 0, 1, 1], [], []>} : vector<2x48xf32>, vector<48x144xf32>, vector<2x144xf32> -> vector<2x144xf32>
    %836 = vector.extract_strided_slice %834 {offsets = [0, 0], sizes = [2, 48], strides = [1, 1]} : vector<2x144xf32> to vector<2x48xf32>
    %837 = vector.extract_strided_slice %835 {offsets = [0, 0], sizes = [2, 48], strides = [1, 1]} : vector<2x144xf32> to vector<2x48xf32>
    %838 = arith.addf %836, %837 : vector<2x48xf32>
    %839 = arith.negf %838 : vector<2x48xf32>
    %840 = math.exp %839 : vector<2x48xf32>
    %cst_148 = arith.constant 1.000000e+00 : f32
    %841 = vector.broadcast %cst_148 : f32 to vector<2x48xf32>
    %842 = arith.addf %841, %840 : vector<2x48xf32>
    %843 = arith.divf %841, %842 : vector<2x48xf32>
    %844 = vector.extract_strided_slice %834 {offsets = [0, 48], sizes = [2, 48], strides = [1, 1]} : vector<2x144xf32> to vector<2x48xf32>
    %845 = vector.extract_strided_slice %835 {offsets = [0, 48], sizes = [2, 48], strides = [1, 1]} : vector<2x144xf32> to vector<2x48xf32>
    %846 = arith.addf %844, %845 : vector<2x48xf32>
    %847 = arith.negf %846 : vector<2x48xf32>
    %848 = math.exp %847 : vector<2x48xf32>
    %cst_149 = arith.constant 1.000000e+00 : f32
    %849 = vector.broadcast %cst_149 : f32 to vector<2x48xf32>
    %850 = arith.addf %849, %848 : vector<2x48xf32>
    %851 = arith.divf %849, %850 : vector<2x48xf32>
    %852 = vector.extract_strided_slice %834 {offsets = [0, 96], sizes = [2, 48], strides = [1, 1]} : vector<2x144xf32> to vector<2x48xf32>
    %853 = vector.extract_strided_slice %835 {offsets = [0, 96], sizes = [2, 48], strides = [1, 1]} : vector<2x144xf32> to vector<2x48xf32>
    %854 = vector.broadcast %29 : vector<1x48xf32> to vector<2x48xf32>
    %855 = arith.addf %853, %854 : vector<2x48xf32>
    %856 = arith.mulf %843, %855 : vector<2x48xf32>
    %857 = arith.addf %852, %856 : vector<2x48xf32>
    %858 = math.tanh %857 : vector<2x48xf32>
    %cst_150 = arith.constant 1.000000e+00 : f32
    %859 = vector.broadcast %cst_150 : f32 to vector<2x48xf32>
    %860 = arith.subf %859, %851 : vector<2x48xf32>
    %861 = arith.mulf %860, %858 : vector<2x48xf32>
    %862 = arith.mulf %851, %799 : vector<2x48xf32>
    %863 = arith.addf %861, %862 : vector<2x48xf32>
    %864 = vector.extract_strided_slice %19 {offsets = [13, 0], sizes = [1, 144], strides = [1, 1]} : vector<16x144xf32> to vector<1x144xf32>
    %865 = vector.extract_strided_slice %23 {offsets = [13, 0], sizes = [1, 144], strides = [1, 1]} : vector<16x144xf32> to vector<1x144xf32>
    %866 = tpu.concatenate %864, %865 in 0 : vector<1x144xf32>, vector<1x144xf32> -> vector<2x144xf32>
    %cst_151 = arith.constant dense<0.000000e+00> : vector<2x144xf32>
    %867 = tpu.matmul %831, %24, %cst_151 {dimension_numbers = #tpu.dot_dimension_numbers<[1], [0], [0], [1], [0, 0, 1, 1], [], []>} : vector<2x48xf32>, vector<48x144xf32>, vector<2x144xf32> -> vector<2x144xf32>
    %868 = vector.extract_strided_slice %866 {offsets = [0, 0], sizes = [2, 48], strides = [1, 1]} : vector<2x144xf32> to vector<2x48xf32>
    %869 = vector.extract_strided_slice %867 {offsets = [0, 0], sizes = [2, 48], strides = [1, 1]} : vector<2x144xf32> to vector<2x48xf32>
    %870 = arith.addf %868, %869 : vector<2x48xf32>
    %871 = arith.negf %870 : vector<2x48xf32>
    %872 = math.exp %871 : vector<2x48xf32>
    %cst_152 = arith.constant 1.000000e+00 : f32
    %873 = vector.broadcast %cst_152 : f32 to vector<2x48xf32>
    %874 = arith.addf %873, %872 : vector<2x48xf32>
    %875 = arith.divf %873, %874 : vector<2x48xf32>
    %876 = vector.extract_strided_slice %866 {offsets = [0, 48], sizes = [2, 48], strides = [1, 1]} : vector<2x144xf32> to vector<2x48xf32>
    %877 = vector.extract_strided_slice %867 {offsets = [0, 48], sizes = [2, 48], strides = [1, 1]} : vector<2x144xf32> to vector<2x48xf32>
    %878 = arith.addf %876, %877 : vector<2x48xf32>
    %879 = arith.negf %878 : vector<2x48xf32>
    %880 = math.exp %879 : vector<2x48xf32>
    %cst_153 = arith.constant 1.000000e+00 : f32
    %881 = vector.broadcast %cst_153 : f32 to vector<2x48xf32>
    %882 = arith.addf %881, %880 : vector<2x48xf32>
    %883 = arith.divf %881, %882 : vector<2x48xf32>
    %884 = vector.extract_strided_slice %866 {offsets = [0, 96], sizes = [2, 48], strides = [1, 1]} : vector<2x144xf32> to vector<2x48xf32>
    %885 = vector.extract_strided_slice %867 {offsets = [0, 96], sizes = [2, 48], strides = [1, 1]} : vector<2x144xf32> to vector<2x48xf32>
    %886 = vector.broadcast %25 : vector<1x48xf32> to vector<2x48xf32>
    %887 = arith.addf %885, %886 : vector<2x48xf32>
    %888 = arith.mulf %875, %887 : vector<2x48xf32>
    %889 = arith.addf %884, %888 : vector<2x48xf32>
    %890 = math.tanh %889 : vector<2x48xf32>
    %cst_154 = arith.constant 1.000000e+00 : f32
    %891 = vector.broadcast %cst_154 : f32 to vector<2x48xf32>
    %892 = arith.subf %891, %883 : vector<2x48xf32>
    %893 = arith.mulf %892, %890 : vector<2x48xf32>
    %894 = arith.mulf %883, %831 : vector<2x48xf32>
    %895 = arith.addf %893, %894 : vector<2x48xf32>
    %cst_155 = arith.constant dense<0.000000e+00> : vector<2x144xf32>
    %896 = tpu.matmul %895, %26, %cst_155 {dimension_numbers = #tpu.dot_dimension_numbers<[1], [0], [0], [1], [0, 0, 1, 1], [], []>} : vector<2x48xf32>, vector<48x144xf32>, vector<2x144xf32> -> vector<2x144xf32>
    %897 = vector.broadcast %27 : vector<1x144xf32> to vector<2x144xf32>
    %898 = arith.addf %896, %897 : vector<2x144xf32>
    %cst_156 = arith.constant dense<0.000000e+00> : vector<2x144xf32>
    %899 = tpu.matmul %863, %28, %cst_156 {dimension_numbers = #tpu.dot_dimension_numbers<[1], [0], [0], [1], [0, 0, 1, 1], [], []>} : vector<2x48xf32>, vector<48x144xf32>, vector<2x144xf32> -> vector<2x144xf32>
    %900 = vector.extract_strided_slice %898 {offsets = [0, 0], sizes = [2, 48], strides = [1, 1]} : vector<2x144xf32> to vector<2x48xf32>
    %901 = vector.extract_strided_slice %899 {offsets = [0, 0], sizes = [2, 48], strides = [1, 1]} : vector<2x144xf32> to vector<2x48xf32>
    %902 = arith.addf %900, %901 : vector<2x48xf32>
    %903 = arith.negf %902 : vector<2x48xf32>
    %904 = math.exp %903 : vector<2x48xf32>
    %cst_157 = arith.constant 1.000000e+00 : f32
    %905 = vector.broadcast %cst_157 : f32 to vector<2x48xf32>
    %906 = arith.addf %905, %904 : vector<2x48xf32>
    %907 = arith.divf %905, %906 : vector<2x48xf32>
    %908 = vector.extract_strided_slice %898 {offsets = [0, 48], sizes = [2, 48], strides = [1, 1]} : vector<2x144xf32> to vector<2x48xf32>
    %909 = vector.extract_strided_slice %899 {offsets = [0, 48], sizes = [2, 48], strides = [1, 1]} : vector<2x144xf32> to vector<2x48xf32>
    %910 = arith.addf %908, %909 : vector<2x48xf32>
    %911 = arith.negf %910 : vector<2x48xf32>
    %912 = math.exp %911 : vector<2x48xf32>
    %cst_158 = arith.constant 1.000000e+00 : f32
    %913 = vector.broadcast %cst_158 : f32 to vector<2x48xf32>
    %914 = arith.addf %913, %912 : vector<2x48xf32>
    %915 = arith.divf %913, %914 : vector<2x48xf32>
    %916 = vector.extract_strided_slice %898 {offsets = [0, 96], sizes = [2, 48], strides = [1, 1]} : vector<2x144xf32> to vector<2x48xf32>
    %917 = vector.extract_strided_slice %899 {offsets = [0, 96], sizes = [2, 48], strides = [1, 1]} : vector<2x144xf32> to vector<2x48xf32>
    %918 = vector.broadcast %29 : vector<1x48xf32> to vector<2x48xf32>
    %919 = arith.addf %917, %918 : vector<2x48xf32>
    %920 = arith.mulf %907, %919 : vector<2x48xf32>
    %921 = arith.addf %916, %920 : vector<2x48xf32>
    %922 = math.tanh %921 : vector<2x48xf32>
    %cst_159 = arith.constant 1.000000e+00 : f32
    %923 = vector.broadcast %cst_159 : f32 to vector<2x48xf32>
    %924 = arith.subf %923, %915 : vector<2x48xf32>
    %925 = arith.mulf %924, %922 : vector<2x48xf32>
    %926 = arith.mulf %915, %863 : vector<2x48xf32>
    %927 = arith.addf %925, %926 : vector<2x48xf32>
    %928 = vector.extract_strided_slice %19 {offsets = [14, 0], sizes = [1, 144], strides = [1, 1]} : vector<16x144xf32> to vector<1x144xf32>
    %929 = vector.extract_strided_slice %23 {offsets = [14, 0], sizes = [1, 144], strides = [1, 1]} : vector<16x144xf32> to vector<1x144xf32>
    %930 = tpu.concatenate %928, %929 in 0 : vector<1x144xf32>, vector<1x144xf32> -> vector<2x144xf32>
    %cst_160 = arith.constant dense<0.000000e+00> : vector<2x144xf32>
    %931 = tpu.matmul %895, %24, %cst_160 {dimension_numbers = #tpu.dot_dimension_numbers<[1], [0], [0], [1], [0, 0, 1, 1], [], []>} : vector<2x48xf32>, vector<48x144xf32>, vector<2x144xf32> -> vector<2x144xf32>
    %932 = vector.extract_strided_slice %930 {offsets = [0, 0], sizes = [2, 48], strides = [1, 1]} : vector<2x144xf32> to vector<2x48xf32>
    %933 = vector.extract_strided_slice %931 {offsets = [0, 0], sizes = [2, 48], strides = [1, 1]} : vector<2x144xf32> to vector<2x48xf32>
    %934 = arith.addf %932, %933 : vector<2x48xf32>
    %935 = arith.negf %934 : vector<2x48xf32>
    %936 = math.exp %935 : vector<2x48xf32>
    %cst_161 = arith.constant 1.000000e+00 : f32
    %937 = vector.broadcast %cst_161 : f32 to vector<2x48xf32>
    %938 = arith.addf %937, %936 : vector<2x48xf32>
    %939 = arith.divf %937, %938 : vector<2x48xf32>
    %940 = vector.extract_strided_slice %930 {offsets = [0, 48], sizes = [2, 48], strides = [1, 1]} : vector<2x144xf32> to vector<2x48xf32>
    %941 = vector.extract_strided_slice %931 {offsets = [0, 48], sizes = [2, 48], strides = [1, 1]} : vector<2x144xf32> to vector<2x48xf32>
    %942 = arith.addf %940, %941 : vector<2x48xf32>
    %943 = arith.negf %942 : vector<2x48xf32>
    %944 = math.exp %943 : vector<2x48xf32>
    %cst_162 = arith.constant 1.000000e+00 : f32
    %945 = vector.broadcast %cst_162 : f32 to vector<2x48xf32>
    %946 = arith.addf %945, %944 : vector<2x48xf32>
    %947 = arith.divf %945, %946 : vector<2x48xf32>
    %948 = vector.extract_strided_slice %930 {offsets = [0, 96], sizes = [2, 48], strides = [1, 1]} : vector<2x144xf32> to vector<2x48xf32>
    %949 = vector.extract_strided_slice %931 {offsets = [0, 96], sizes = [2, 48], strides = [1, 1]} : vector<2x144xf32> to vector<2x48xf32>
    %950 = vector.broadcast %25 : vector<1x48xf32> to vector<2x48xf32>
    %951 = arith.addf %949, %950 : vector<2x48xf32>
    %952 = arith.mulf %939, %951 : vector<2x48xf32>
    %953 = arith.addf %948, %952 : vector<2x48xf32>
    %954 = math.tanh %953 : vector<2x48xf32>
    %cst_163 = arith.constant 1.000000e+00 : f32
    %955 = vector.broadcast %cst_163 : f32 to vector<2x48xf32>
    %956 = arith.subf %955, %947 : vector<2x48xf32>
    %957 = arith.mulf %956, %954 : vector<2x48xf32>
    %958 = arith.mulf %947, %895 : vector<2x48xf32>
    %959 = arith.addf %957, %958 : vector<2x48xf32>
    %cst_164 = arith.constant dense<0.000000e+00> : vector<2x144xf32>
    %960 = tpu.matmul %959, %26, %cst_164 {dimension_numbers = #tpu.dot_dimension_numbers<[1], [0], [0], [1], [0, 0, 1, 1], [], []>} : vector<2x48xf32>, vector<48x144xf32>, vector<2x144xf32> -> vector<2x144xf32>
    %961 = vector.broadcast %27 : vector<1x144xf32> to vector<2x144xf32>
    %962 = arith.addf %960, %961 : vector<2x144xf32>
    %cst_165 = arith.constant dense<0.000000e+00> : vector<2x144xf32>
    %963 = tpu.matmul %927, %28, %cst_165 {dimension_numbers = #tpu.dot_dimension_numbers<[1], [0], [0], [1], [0, 0, 1, 1], [], []>} : vector<2x48xf32>, vector<48x144xf32>, vector<2x144xf32> -> vector<2x144xf32>
    %964 = vector.extract_strided_slice %962 {offsets = [0, 0], sizes = [2, 48], strides = [1, 1]} : vector<2x144xf32> to vector<2x48xf32>
    %965 = vector.extract_strided_slice %963 {offsets = [0, 0], sizes = [2, 48], strides = [1, 1]} : vector<2x144xf32> to vector<2x48xf32>
    %966 = arith.addf %964, %965 : vector<2x48xf32>
    %967 = arith.negf %966 : vector<2x48xf32>
    %968 = math.exp %967 : vector<2x48xf32>
    %cst_166 = arith.constant 1.000000e+00 : f32
    %969 = vector.broadcast %cst_166 : f32 to vector<2x48xf32>
    %970 = arith.addf %969, %968 : vector<2x48xf32>
    %971 = arith.divf %969, %970 : vector<2x48xf32>
    %972 = vector.extract_strided_slice %962 {offsets = [0, 48], sizes = [2, 48], strides = [1, 1]} : vector<2x144xf32> to vector<2x48xf32>
    %973 = vector.extract_strided_slice %963 {offsets = [0, 48], sizes = [2, 48], strides = [1, 1]} : vector<2x144xf32> to vector<2x48xf32>
    %974 = arith.addf %972, %973 : vector<2x48xf32>
    %975 = arith.negf %974 : vector<2x48xf32>
    %976 = math.exp %975 : vector<2x48xf32>
    %cst_167 = arith.constant 1.000000e+00 : f32
    %977 = vector.broadcast %cst_167 : f32 to vector<2x48xf32>
    %978 = arith.addf %977, %976 : vector<2x48xf32>
    %979 = arith.divf %977, %978 : vector<2x48xf32>
    %980 = vector.extract_strided_slice %962 {offsets = [0, 96], sizes = [2, 48], strides = [1, 1]} : vector<2x144xf32> to vector<2x48xf32>
    %981 = vector.extract_strided_slice %963 {offsets = [0, 96], sizes = [2, 48], strides = [1, 1]} : vector<2x144xf32> to vector<2x48xf32>
    %982 = vector.broadcast %29 : vector<1x48xf32> to vector<2x48xf32>
    %983 = arith.addf %981, %982 : vector<2x48xf32>
    %984 = arith.mulf %971, %983 : vector<2x48xf32>
    %985 = arith.addf %980, %984 : vector<2x48xf32>
    %986 = math.tanh %985 : vector<2x48xf32>
    %cst_168 = arith.constant 1.000000e+00 : f32
    %987 = vector.broadcast %cst_168 : f32 to vector<2x48xf32>
    %988 = arith.subf %987, %979 : vector<2x48xf32>
    %989 = arith.mulf %988, %986 : vector<2x48xf32>
    %990 = arith.mulf %979, %927 : vector<2x48xf32>
    %991 = arith.addf %989, %990 : vector<2x48xf32>
    %992 = vector.extract_strided_slice %19 {offsets = [15, 0], sizes = [1, 144], strides = [1, 1]} : vector<16x144xf32> to vector<1x144xf32>
    %993 = vector.extract_strided_slice %23 {offsets = [15, 0], sizes = [1, 144], strides = [1, 1]} : vector<16x144xf32> to vector<1x144xf32>
    %994 = tpu.concatenate %992, %993 in 0 : vector<1x144xf32>, vector<1x144xf32> -> vector<2x144xf32>
    %cst_169 = arith.constant dense<0.000000e+00> : vector<2x144xf32>
    %995 = tpu.matmul %959, %24, %cst_169 {dimension_numbers = #tpu.dot_dimension_numbers<[1], [0], [0], [1], [0, 0, 1, 1], [], []>} : vector<2x48xf32>, vector<48x144xf32>, vector<2x144xf32> -> vector<2x144xf32>
    %996 = vector.extract_strided_slice %994 {offsets = [0, 0], sizes = [2, 48], strides = [1, 1]} : vector<2x144xf32> to vector<2x48xf32>
    %997 = vector.extract_strided_slice %995 {offsets = [0, 0], sizes = [2, 48], strides = [1, 1]} : vector<2x144xf32> to vector<2x48xf32>
    %998 = arith.addf %996, %997 : vector<2x48xf32>
    %999 = arith.negf %998 : vector<2x48xf32>
    %1000 = math.exp %999 : vector<2x48xf32>
    %cst_170 = arith.constant 1.000000e+00 : f32
    %1001 = vector.broadcast %cst_170 : f32 to vector<2x48xf32>
    %1002 = arith.addf %1001, %1000 : vector<2x48xf32>
    %1003 = arith.divf %1001, %1002 : vector<2x48xf32>
    %1004 = vector.extract_strided_slice %994 {offsets = [0, 48], sizes = [2, 48], strides = [1, 1]} : vector<2x144xf32> to vector<2x48xf32>
    %1005 = vector.extract_strided_slice %995 {offsets = [0, 48], sizes = [2, 48], strides = [1, 1]} : vector<2x144xf32> to vector<2x48xf32>
    %1006 = arith.addf %1004, %1005 : vector<2x48xf32>
    %1007 = arith.negf %1006 : vector<2x48xf32>
    %1008 = math.exp %1007 : vector<2x48xf32>
    %cst_171 = arith.constant 1.000000e+00 : f32
    %1009 = vector.broadcast %cst_171 : f32 to vector<2x48xf32>
    %1010 = arith.addf %1009, %1008 : vector<2x48xf32>
    %1011 = arith.divf %1009, %1010 : vector<2x48xf32>
    %1012 = vector.extract_strided_slice %994 {offsets = [0, 96], sizes = [2, 48], strides = [1, 1]} : vector<2x144xf32> to vector<2x48xf32>
    %1013 = vector.extract_strided_slice %995 {offsets = [0, 96], sizes = [2, 48], strides = [1, 1]} : vector<2x144xf32> to vector<2x48xf32>
    %1014 = vector.broadcast %25 : vector<1x48xf32> to vector<2x48xf32>
    %1015 = arith.addf %1013, %1014 : vector<2x48xf32>
    %1016 = arith.mulf %1003, %1015 : vector<2x48xf32>
    %1017 = arith.addf %1012, %1016 : vector<2x48xf32>
    %1018 = math.tanh %1017 : vector<2x48xf32>
    %cst_172 = arith.constant 1.000000e+00 : f32
    %1019 = vector.broadcast %cst_172 : f32 to vector<2x48xf32>
    %1020 = arith.subf %1019, %1011 : vector<2x48xf32>
    %1021 = arith.mulf %1020, %1018 : vector<2x48xf32>
    %1022 = arith.mulf %1011, %959 : vector<2x48xf32>
    %1023 = arith.addf %1021, %1022 : vector<2x48xf32>
    %cst_173 = arith.constant dense<0.000000e+00> : vector<2x144xf32>
    %1024 = tpu.matmul %1023, %26, %cst_173 {dimension_numbers = #tpu.dot_dimension_numbers<[1], [0], [0], [1], [0, 0, 1, 1], [], []>} : vector<2x48xf32>, vector<48x144xf32>, vector<2x144xf32> -> vector<2x144xf32>
    %1025 = vector.broadcast %27 : vector<1x144xf32> to vector<2x144xf32>
    %1026 = arith.addf %1024, %1025 : vector<2x144xf32>
    %cst_174 = arith.constant dense<0.000000e+00> : vector<2x144xf32>
    %1027 = tpu.matmul %991, %28, %cst_174 {dimension_numbers = #tpu.dot_dimension_numbers<[1], [0], [0], [1], [0, 0, 1, 1], [], []>} : vector<2x48xf32>, vector<48x144xf32>, vector<2x144xf32> -> vector<2x144xf32>
    %1028 = vector.extract_strided_slice %1026 {offsets = [0, 0], sizes = [2, 48], strides = [1, 1]} : vector<2x144xf32> to vector<2x48xf32>
    %1029 = vector.extract_strided_slice %1027 {offsets = [0, 0], sizes = [2, 48], strides = [1, 1]} : vector<2x144xf32> to vector<2x48xf32>
    %1030 = arith.addf %1028, %1029 : vector<2x48xf32>
    %1031 = arith.negf %1030 : vector<2x48xf32>
    %1032 = math.exp %1031 : vector<2x48xf32>
    %cst_175 = arith.constant 1.000000e+00 : f32
    %1033 = vector.broadcast %cst_175 : f32 to vector<2x48xf32>
    %1034 = arith.addf %1033, %1032 : vector<2x48xf32>
    %1035 = arith.divf %1033, %1034 : vector<2x48xf32>
    %1036 = vector.extract_strided_slice %1026 {offsets = [0, 48], sizes = [2, 48], strides = [1, 1]} : vector<2x144xf32> to vector<2x48xf32>
    %1037 = vector.extract_strided_slice %1027 {offsets = [0, 48], sizes = [2, 48], strides = [1, 1]} : vector<2x144xf32> to vector<2x48xf32>
    %1038 = arith.addf %1036, %1037 : vector<2x48xf32>
    %1039 = arith.negf %1038 : vector<2x48xf32>
    %1040 = math.exp %1039 : vector<2x48xf32>
    %cst_176 = arith.constant 1.000000e+00 : f32
    %1041 = vector.broadcast %cst_176 : f32 to vector<2x48xf32>
    %1042 = arith.addf %1041, %1040 : vector<2x48xf32>
    %1043 = arith.divf %1041, %1042 : vector<2x48xf32>
    %1044 = vector.extract_strided_slice %1026 {offsets = [0, 96], sizes = [2, 48], strides = [1, 1]} : vector<2x144xf32> to vector<2x48xf32>
    %1045 = vector.extract_strided_slice %1027 {offsets = [0, 96], sizes = [2, 48], strides = [1, 1]} : vector<2x144xf32> to vector<2x48xf32>
    %1046 = vector.broadcast %29 : vector<1x48xf32> to vector<2x48xf32>
    %1047 = arith.addf %1045, %1046 : vector<2x48xf32>
    %1048 = arith.mulf %1035, %1047 : vector<2x48xf32>
    %1049 = arith.addf %1044, %1048 : vector<2x48xf32>
    %1050 = math.tanh %1049 : vector<2x48xf32>
    %cst_177 = arith.constant 1.000000e+00 : f32
    %1051 = vector.broadcast %cst_177 : f32 to vector<2x48xf32>
    %1052 = arith.subf %1051, %1043 : vector<2x48xf32>
    %1053 = arith.mulf %1052, %1050 : vector<2x48xf32>
    %1054 = arith.mulf %1043, %991 : vector<2x48xf32>
    %1055 = arith.addf %1053, %1054 : vector<2x48xf32>
    %c0_178 = arith.constant 0 : index
    %c0_179 = arith.constant 0 : index
    %1056 = vector.load %arg15[%c0_178, %c0_179] : memref<48x16xf32, #tpu.memory_space<vmem>>, vector<48x16xf32>
    %cst_180 = arith.constant dense<0.000000e+00> : vector<2x16xf32>
    %1057 = tpu.matmul %1055, %1056, %cst_180 {dimension_numbers = #tpu.dot_dimension_numbers<[1], [0], [0], [1], [0, 0, 1, 1], [], []>, precision = #tpu.contract_precision<fp32>} : vector<2x48xf32>, vector<48x16xf32>, vector<2x16xf32> -> vector<2x16xf32>
    %c0_181 = arith.constant 0 : index
    %c0_182 = arith.constant 0 : index
    %1058 = vector.load %arg16[%c0_181, %c0_182] : memref<1x16xf32, #tpu.memory_space<vmem>>, vector<1x16xf32>
    %1059 = vector.broadcast %1058 : vector<1x16xf32> to vector<2x16xf32>
    %1060 = arith.addf %1057, %1059 : vector<2x16xf32>
    %cst_183 = arith.constant 0.000000e+00 : f32
    %1061 = vector.broadcast %cst_183 : f32 to vector<2x16xf32>
    %1062 = arith.maximumf %1060, %1061 : vector<2x16xf32>
    %c0_184 = arith.constant 0 : index
    %c0_185 = arith.constant 0 : index
    %1063 = vector.load %arg17[%c0_184, %c0_185] : memref<16x4xf32, #tpu.memory_space<vmem>>, vector<16x4xf32>
    %cst_186 = arith.constant dense<0.000000e+00> : vector<2x4xf32>
    %1064 = tpu.matmul %1062, %1063, %cst_186 {dimension_numbers = #tpu.dot_dimension_numbers<[1], [0], [0], [1], [0, 0, 1, 1], [], []>, precision = #tpu.contract_precision<fp32>} : vector<2x16xf32>, vector<16x4xf32>, vector<2x4xf32> -> vector<2x4xf32>
    %c0_187 = arith.constant 0 : index
    %c0_188 = arith.constant 0 : index
    %1065 = vector.load %arg18[%c0_187, %c0_188] : memref<1x4xf32, #tpu.memory_space<vmem>>, vector<1x4xf32>
    %1066 = vector.broadcast %1065 : vector<1x4xf32> to vector<2x4xf32>
    %1067 = arith.addf %1064, %1066 : vector<2x4xf32>
    %cst_189 = arith.constant dense<0xFF800000> : vector<2xf32>
    %1068 = vector.multi_reduction <maximumf>, %1067, %cst_189 [1] : vector<2x4xf32> to vector<2xf32>
    %1069 = vector.shape_cast %1068 : vector<2xf32> to vector<2x1xf32>
    %1070 = vector.broadcast %1069 : vector<2x1xf32> to vector<2x4xf32>
    %1071 = arith.subf %1067, %1070 : vector<2x4xf32>
    %1072 = math.exp %1071 : vector<2x4xf32>
    %cst_190 = arith.constant dense<0.000000e+00> : vector<2xf32>
    %1073 = vector.multi_reduction <add>, %1072, %cst_190 [1] : vector<2x4xf32> to vector<2xf32>
    %1074 = vector.shape_cast %1073 : vector<2xf32> to vector<2x1xf32>
    %1075 = vector.broadcast %1074 : vector<2x1xf32> to vector<2x4xf32>
    %1076 = arith.divf %1072, %1075 : vector<2x4xf32>
    %c0_191 = arith.constant 0 : index
    %c0_192 = arith.constant 0 : index
    %1077 = vector.load %arg19[%c0_191, %c0_192] : memref<2x4xf32, #tpu.memory_space<vmem>>, vector<2x4xf32>
    tpu.vector_store %arg19[%c0_191, %c0_192], %1076 {strides = array<i32>} : memref<2x4xf32, #tpu.memory_space<vmem>>, vector<2x4xf32>,
    return
  }
  func.func @transform_0(%arg0: i32) -> (i32, i32) {
    %c0_i32 = arith.constant 0 : i32
    %c0_i32_0 = arith.constant 0 : i32
    %c0_i32_1 = arith.constant 0 : i32
    return %c0_i32, %c0_i32_0 : i32, i32
  }
  func.func @transform_1(%arg0: i32) -> (i32, i32) {
    %c0_i32 = arith.constant 0 : i32
    %c0_i32_0 = arith.constant 0 : i32
    %c0_i32_1 = arith.constant 0 : i32
    return %c0_i32, %c0_i32_0 : i32, i32
  }
  func.func @transform_2(%arg0: i32) -> (i32, i32) {
    %c0_i32 = arith.constant 0 : i32
    %c0_i32_0 = arith.constant 0 : i32
    %c0_i32_1 = arith.constant 0 : i32
    return %c0_i32, %c0_i32_0 : i32, i32
  }
  func.func @transform_3(%arg0: i32) -> (i32, i32) {
    %c0_i32 = arith.constant 0 : i32
    %c0_i32_0 = arith.constant 0 : i32
    %c0_i32_1 = arith.constant 0 : i32
    return %c0_i32, %c0_i32_0 : i32, i32
  }
  func.func @transform_4(%arg0: i32) -> (i32, i32) {
    %c0_i32 = arith.constant 0 : i32
    %c0_i32_0 = arith.constant 0 : i32
    %c0_i32_1 = arith.constant 0 : i32
    return %c0_i32, %c0_i32_0 : i32, i32
  }
  func.func @transform_5(%arg0: i32) -> (i32, i32) {
    %c0_i32 = arith.constant 0 : i32
    %c0_i32_0 = arith.constant 0 : i32
    %c0_i32_1 = arith.constant 0 : i32
    return %c0_i32, %c0_i32_0 : i32, i32
  }
  func.func @transform_6(%arg0: i32) -> (i32, i32) {
    %c0_i32 = arith.constant 0 : i32
    %c0_i32_0 = arith.constant 0 : i32
    %c0_i32_1 = arith.constant 0 : i32
    return %c0_i32, %c0_i32_0 : i32, i32
  }
  func.func @transform_7(%arg0: i32) -> (i32, i32) {
    %c0_i32 = arith.constant 0 : i32
    %c0_i32_0 = arith.constant 0 : i32
    %c0_i32_1 = arith.constant 0 : i32
    return %c0_i32, %c0_i32_0 : i32, i32
  }
  func.func @transform_8(%arg0: i32) -> (i32, i32) {
    %c0_i32 = arith.constant 0 : i32
    %c0_i32_0 = arith.constant 0 : i32
    %c0_i32_1 = arith.constant 0 : i32
    return %c0_i32, %c0_i32_0 : i32, i32
  }
  func.func @transform_9(%arg0: i32) -> (i32, i32) {
    %c0_i32 = arith.constant 0 : i32
    %c0_i32_0 = arith.constant 0 : i32
    %c0_i32_1 = arith.constant 0 : i32
    return %c0_i32, %c0_i32_0 : i32, i32
  }
  func.func @transform_10(%arg0: i32) -> (i32, i32) {
    %c0_i32 = arith.constant 0 : i32
    %c0_i32_0 = arith.constant 0 : i32
    %c0_i32_1 = arith.constant 0 : i32
    return %c0_i32, %c0_i32_0 : i32, i32
  }
  func.func @transform_11(%arg0: i32) -> (i32, i32) {
    %c0_i32 = arith.constant 0 : i32
    %c0_i32_0 = arith.constant 0 : i32
    %c0_i32_1 = arith.constant 0 : i32
    return %c0_i32, %c0_i32_0 : i32, i32
  }
  func.func @transform_12(%arg0: i32) -> (i32, i32) {
    %c0_i32 = arith.constant 0 : i32
    %c0_i32_0 = arith.constant 0 : i32
    %c0_i32_1 = arith.constant 0 : i32
    return %c0_i32, %c0_i32_0 : i32, i32
  }
  func.func @transform_13(%arg0: i32) -> (i32, i32) {
    %c0_i32 = arith.constant 0 : i32
    %c0_i32_0 = arith.constant 0 : i32
    %c0_i32_1 = arith.constant 0 : i32
    return %c0_i32, %c0_i32_0 : i32, i32
  }
  func.func @transform_14(%arg0: i32) -> (i32, i32) {
    %c0_i32 = arith.constant 0 : i32
    %c0_i32_0 = arith.constant 0 : i32
    %c0_i32_1 = arith.constant 0 : i32
    return %c0_i32, %c0_i32_0 : i32, i32
  }
  func.func @transform_15(%arg0: i32) -> (i32, i32) {
    %c0_i32 = arith.constant 0 : i32
    %c0_i32_0 = arith.constant 0 : i32
    %c0_i32_1 = arith.constant 0 : i32
    return %c0_i32, %c0_i32_0 : i32, i32
  }
  func.func @transform_16(%arg0: i32) -> (i32, i32) {
    %c0_i32 = arith.constant 0 : i32
    %c0_i32_0 = arith.constant 0 : i32
    %c0_i32_1 = arith.constant 0 : i32
    return %c0_i32, %c0_i32_0 : i32, i32
  }
  func.func @transform_17(%arg0: i32) -> (i32, i32) {
    %c0_i32 = arith.constant 0 : i32
    %c0_i32_0 = arith.constant 0 : i32
    %c0_i32_1 = arith.constant 0 : i32
    return %c0_i32, %c0_i32_0 : i32, i32
  }
  func.func @transform_18(%arg0: i32) -> (i32, i32) {
    %c0_i32 = arith.constant 0 : i32
    %c0_i32_0 = arith.constant 0 : i32
    %c0_i32_1 = arith.constant 0 : i32
    return %c0_i32, %c0_i32_0 : i32, i32
  }
}

</mosaic_0001>

<bundles_post_ra>
// kernel: gcngru_forward.1
= control target key start
LH: loop header
LB: loop body
LE: loop exit
PB: predicated region body
PF: predicated region fallthrough
CT: control target
= control target key end

     0   :  { %s17969_s0 = inlined_call_operand.vmem [shape: f32[192,192], index: 0, kind: input, shape index: {}]   ;;  %s17970_s1 = inlined_call_operand.vmem [shape: f32[8,192], index: 1, kind: input, shape index: {}]   ;;  %s17971_s2 = inlined_call_operand.vmem [shape: f32[32,8], index: 2, kind: input, shape index: {}]   ;;  %s17972_s3 = inlined_call_operand.vmem [shape: f32[32,1], index: 3, kind: input, shape index: {}]   ;;  %s17973_s4 = inlined_call_operand.vmem [shape: f32[16,32], index: 4, kind: input, shape index: {}]   ;;  %s17974_s5 = inlined_call_operand.vmem [shape: f32[16,1], index: 5, kind: input, shape index: {}]   ;;  %s17975_s6 = inlined_call_operand.vmem [shape: f32[96,144], index: 6, kind: input, shape index: {}]   ;;  %s17976_s7 = inlined_call_operand.vmem [shape: f32[1,144], index: 7, kind: input, shape index: {}]   ;;  %s17977_s8 = inlined_call_operand.hbm [shape: f32[48,144], index: 8, kind: input, shape index: {}]   ;;  %s17978_s9 = inlined_call_operand.hbm [shape: f32[1,48], index: 9, kind: input, shape index: {}]   ;;  %s17979_s10 = inlined_call_operand.hbm [shape: f32[48,144], index: 10, kind: input, shape index: {}]   ;;  %s17980_s11 = inlined_call_operand.hbm [shape: f32[1,144], index: 11, kind: input, shape index: {}]   ;;  %s17981_s12 = inlined_call_operand.hbm [shape: f32[48,144], index: 12, kind: input, shape index: {}]   ;;  %s17982_s13 = inlined_call_operand.hbm [shape: f32[1,48], index: 13, kind: input, shape index: {}]   ;;  %s17983_s14 = inlined_call_operand.vmem [shape: f32[48,16], index: 14, kind: input, shape index: {}]   ;;  %s17984_s15 = inlined_call_operand.hbm [shape: f32[1,16], index: 15, kind: input, shape index: {}]   ;;  %s17985_s16 = inlined_call_operand.vmem [shape: f32[16,4], index: 16, kind: input, shape index: {}]   ;;  %s17986_s17 = inlined_call_operand.hbm [shape: f32[1,4], index: 17, kind: input, shape index: {}]   ;;  %s17987_s18 = inlined_call_operand.hbm [shape: f32[2,4], index: 18, kind: output, shape index: {}]  }
   0x1   :  { %18233 = sst [smem:[#allocation111_spill]] %s17969_s0 }
   0x2   :  { %18234 = sst [smem:[#allocation112_spill]] %s17970_s1 }
   0x3   :  { %18235 = sst [smem:[#allocation113_spill]] %s17971_s2 }
   0x4   :  { %23 = vsyncpa [#allocation3], 0 }
   0x5   :  { %24 = vsyncpa [#allocation6], 0 }
   0x6   :  { %25 = vsyncpa [#allocation9], 0 }
   0x7   :  { %26 = vsyncpa [#allocation12], 0 }
   0x8   :  { %27 = vsyncpa [#allocation15], 0 }
   0x9   :  { %28 = vsyncpa [#allocation4], 0  ;;  %s14040_s27 = smov [#allocation5]   ;;  %s14041_s29 = smov [#allocation8]  }
   0xa   :  { %s63_s28 = sshll.u32 %s14040_s27, 4  ;;  %s85_s30 = sshll.u32 %s14041_s29, 4  ;;  %s64_s28 = int_to_ptr.vmem [resolvable:$true] %s63_s28  ;;  %s86_s30 = int_to_ptr.vmem [resolvable:$true] %s85_s30 }
   0xb   :  { %s13830_s1 = scalar_lea.hbm %s17978_s9, 16 }
   0xc   :  { %p13831_p0 = scmp.ne.s32.totalorder %s17978_s9, %s13830_s1  ;;  %p13834_p1 = scmp.lt.u32.totalorder %s13830_s1, %s17978_s9 }
   0xe   :  { %p13836_p2 = pnand %p13834_p1, %p13831_p0 }
  0x10   :  { %13839 = shalt.err (!%p13836_p2)
}
  0x11   :  { %s13840_s23 = scalar_lea.vmem %s64_s28, 16  ;;  %s13844_s24 = scalar_lea.vmem %s64_s28, 32 }
  0x12   :  { %p13841_p3 = scmp.ne.s32.totalorder %s64_s28, %s13840_s23  ;;  %p13845_p4 = scmp.lt.s32.totalorder %s64_s28, %s64_s28 }
  0x13   :  { %p13846_p5 = scmp.lt.s32.totalorder %s13844_s24, %s13840_s23 }
  0x15   :  { %p13847_p6 = por %p13846_p5, %p13845_p4 }
  0x17   :  { %p13848_p7 = pnand %p13847_p6, %p13841_p3 }
  0x19   :  { %13851 = shalt.err (!%p13848_p7)
}
  0x1a   :  { %66 = dma.hbm_to_vmem [thread:$0]  %s17978_s9, 16, %s64_s28, [#allocation6]  }
  0x1b   :  { %s13852_s0 = scalar_lea.hbm %s17980_s11, 32 }
  0x1c   :  { %p13853_p8 = scmp.ne.s32.totalorder %s17980_s11, %s13852_s0  ;;  %p13856_p9 = scmp.lt.u32.totalorder %s13852_s0, %s17980_s11 }
  0x1e   :  { %p13858_p10 = pnand %p13856_p9, %p13853_p8 }
  0x20   :  { %13861 = shalt.err (!%p13858_p10)
}
  0x21   :  { %s13862_s22 = scalar_lea.vmem %s86_s30, 32  ;;  %p13867_p12 = scmp.lt.s32.totalorder %s86_s30, %s86_s30 }
  0x22   :  { %p13863_p11 = scmp.ne.s32.totalorder %s86_s30, %s13862_s22  ;;  %p13868_p13 = scmp.lt.s32.totalorder %s13862_s22, %s13862_s22 }
  0x24   :  { %p13869_p0 = por %p13868_p13, %p13867_p12 }
  0x26   :  { %p13870_p1 = pnand %p13869_p0, %p13863_p11 }
  0x28   :  { %13873 = shalt.err (!%p13870_p1)
}
  0x29   :  { %88 = dma.hbm_to_vmem [thread:$0]  %s17980_s11, 32, %s86_s30, [#allocation9]  }
  0x2a   :  { %s14042_s2 = smov [#allocation11]   ;;  %s14043_s24 = smov [#allocation2]  }
  0x2b   :  { %s107_s23 = sshll.u32 %s14042_s2, 4  ;;  %s50_s25 = sshll.u32 %s14043_s24, 4  ;;  %s108_s23 = int_to_ptr.vmem [resolvable:$true] %s107_s23  ;;  %s14177_s25 = int_to_ptr.vmem [resolvable:$true] %s50_s25 }
  0x2c   :  { %s13874_s29 = scalar_lea.hbm %s17982_s13, 16 }
  0x2d   :  { %p13875_p2 = scmp.ne.s32.totalorder %s17982_s13, %s13874_s29  ;;  %p13878_p3 = scmp.lt.u32.totalorder %s13874_s29, %s17982_s13 }
  0x2f   :  { %p13880_p4 = pnand %p13878_p3, %p13875_p2 }
  0x31   :  { %13883 = shalt.err (!%p13880_p4)
}
  0x32   :  { %s13884_s11 = scalar_lea.vmem %s108_s23, 16  ;;  %s13888_s30 = scalar_lea.vmem %s108_s23, 32 }
  0x33   :  { %p13885_p5 = scmp.ne.s32.totalorder %s108_s23, %s13884_s11  ;;  %p13889_p6 = scmp.lt.s32.totalorder %s108_s23, %s108_s23 }
  0x34   :  { %p13890_p7 = scmp.lt.s32.totalorder %s13888_s30, %s13884_s11 }
  0x36   :  { %p13891_p8 = por %p13890_p7, %p13889_p6 }
  0x38   :  { %p13892_p9 = pnand %p13891_p8, %p13885_p5 }
  0x3a   :  { %13895 = shalt.err (!%p13892_p9)
}
  0x3b   :  { %110 = dma.hbm_to_vmem [thread:$0]  %s17982_s13, 16, %s108_s23, [#allocation12]  }
  0x3c   :  { %s13896_s2 = scalar_lea.hbm %s17977_s8, 1536 }
  0x3d   :  { %p13897_p10 = scmp.ne.s32.totalorder %s17977_s8, %s13896_s2  ;;  %p13900_p11 = scmp.lt.u32.totalorder %s13896_s2, %s17977_s8 }
  0x3f   :  { %p13902_p12 = pnand %p13900_p11, %p13897_p10 }
  0x41   :  { %13905 = shalt.err (!%p13902_p12)
}
  0x42   :  { %s13906_s0 = scalar_lea.vmem %s14177_s25, 1536  ;;  %p13911_p0 = scmp.lt.s32.totalorder %s14177_s25, %s14177_s25 }
  0x43   :  { %p13907_p13 = scmp.ne.s32.totalorder %s14177_s25, %s13906_s0  ;;  %p13912_p1 = scmp.lt.s32.totalorder %s13906_s0, %s13906_s0 }
  0x45   :  { %p13913_p2 = por %p13912_p1, %p13911_p0 }
  0x47   :  { %p13914_p3 = pnand %p13913_p2, %p13907_p13 }
  0x49   :  { %13917 = shalt.err (!%p13914_p3)
}
  0x4a   :  { %s14044_s13 = smov 256   ;;  %s14045_s23 = smov 16  }
  0x4b   :  { %56 = dma.hbm_to_vmem [thread:$0]  %s17977_s8, 1536, %s14177_s25, [#allocation3], %s14044_s13, %s14044_s13, %s14045_s23  }
  0x4c   :  { %s14046_s20 = smov [#allocation7]   ;;  %s14047_s30 = smov [#allocation10]  }
  0x4d   :  { %s72_s11 = sshll.u32 %s14046_s20, 4  ;;  %s94_s21 = sshll.u32 %s14047_s30, 4  ;;  %s73_s11 = int_to_ptr.vmem [resolvable:$true] %s72_s11  ;;  %s14211_s21 = int_to_ptr.vmem [resolvable:$true] %s94_s21 }
  0x4e   :  { %s13918_s28 = scalar_lea.hbm %s17979_s10, 1536 }
  0x4f   :  { %p13919_p4 = scmp.ne.s32.totalorder %s17979_s10, %s13918_s28  ;;  %p13922_p5 = scmp.lt.u32.totalorder %s13918_s28, %s17979_s10 }
  0x51   :  { %p13924_p6 = pnand %p13922_p5, %p13919_p4 }
  0x53   :  { %13927 = shalt.err (!%p13924_p6)
}
  0x54   :  { %s13928_s8 = scalar_lea.vmem %s73_s11, 1536  ;;  %p13933_p8 = scmp.lt.s32.totalorder %s73_s11, %s73_s11 }
  0x55   :  { %p13929_p7 = scmp.ne.s32.totalorder %s73_s11, %s13928_s8  ;;  %p13934_p9 = scmp.lt.s32.totalorder %s13928_s8, %s13928_s8 }
  0x57   :  { %p13935_p10 = por %p13934_p9, %p13933_p8 }
  0x59   :  { %p13936_p11 = pnand %p13935_p10, %p13929_p7 }
  0x5b   :  { %13939 = shalt.err (!%p13936_p11)
}
  0x5c   :  { %78 = dma.hbm_to_vmem [thread:$0]  %s17979_s10, 1536, %s73_s11, [#allocation6], %s14044_s13, %s14044_s13, %s14045_s23  }
  0x5d   :  { %s13940_s1 = scalar_lea.hbm %s17981_s12, 1536 }
  0x5e   :  { %p13941_p12 = scmp.ne.s32.totalorder %s17981_s12, %s13940_s1  ;;  %p13944_p13 = scmp.lt.u32.totalorder %s13940_s1, %s17981_s12 }
  0x60   :  { %p13946_p0 = pnand %p13944_p13, %p13941_p12 }
  0x62   :  { %13949 = shalt.err (!%p13946_p0)
}
  0x63   :  { %s13950_s28 = scalar_lea.vmem %s14211_s21, 1536  ;;  %p13955_p2 = scmp.lt.s32.totalorder %s14211_s21, %s14211_s21 }
  0x64   :  { %p13951_p1 = scmp.ne.s32.totalorder %s14211_s21, %s13950_s28  ;;  %p13956_p3 = scmp.lt.s32.totalorder %s13950_s28, %s13950_s28 }
  0x66   :  { %p13957_p4 = por %p13956_p3, %p13955_p2 }
  0x68   :  { %p13958_p5 = pnand %p13957_p4, %p13951_p1 }
  0x6a   :  { %13961 = shalt.err (!%p13958_p5)
}
  0x6b   :  { %100 = dma.hbm_to_vmem [thread:$0]  %s17981_s12, 1536, %s14211_s21, [#allocation9], %s14044_s13, %s14044_s13, %s14045_s23  }
  0x6c   :  { %s14048_s2 = smov [#allocation13]   ;;  %s14049_s26 = smov [#allocation14]  }
  0x6d   :  { %s119_s24 = sshll.u32 %s14048_s2, 4  ;;  %s131_s27 = sshll.u32 %s14049_s26, 4  ;;  %s120_s24 = int_to_ptr.vmem [resolvable:$true] %s119_s24  ;;  %s132_s27 = int_to_ptr.vmem [resolvable:$true] %s131_s27 }
  0x6e   :  { %s13962_s29 = scalar_lea.hbm %s17984_s15, 16 }
  0x6f   :  { %p13963_p6 = scmp.ne.s32.totalorder %s17984_s15, %s13962_s29  ;;  %p13966_p7 = scmp.lt.u32.totalorder %s13962_s29, %s17984_s15 }
  0x71   :  { %p13968_p8 = pnand %p13966_p7, %p13963_p6 }
  0x73   :  { %13971 = shalt.err (!%p13968_p8)
}
  0x74   :  { %s13972_s12 = scalar_lea.vmem %s120_s24, 16  ;;  %s13976_s13 = scalar_lea.vmem %s120_s24, 32 }
  0x75   :  { %p13973_p9 = scmp.ne.s32.totalorder %s120_s24, %s13972_s12  ;;  %p13977_p10 = scmp.lt.s32.totalorder %s120_s24, %s120_s24 }
  0x76   :  { %p13978_p11 = scmp.lt.s32.totalorder %s13976_s13, %s13972_s12 }
  0x78   :  { %p13979_p12 = por %p13978_p11, %p13977_p10 }
  0x7a   :  { %p13980_p13 = pnand %p13979_p12, %p13973_p9 }
  0x7c   :  { %13983 = shalt.err (!%p13980_p13)
}
  0x7d   :  { %122 = dma.hbm_to_vmem [thread:$0]  %s17984_s15, 16, %s120_s24, [#allocation12]  }
  0x7e   :  { %s13984_s9 = scalar_lea.hbm %s17986_s17, 16 }
  0x7f   :  { %p13985_p0 = scmp.ne.s32.totalorder %s17986_s17, %s13984_s9  ;;  %p13988_p1 = scmp.lt.u32.totalorder %s13984_s9, %s17986_s17 }
  0x81   :  { %p13990_p2 = pnand %p13988_p1, %p13985_p0 }
  0x83   :  { %13993 = shalt.err (!%p13990_p2)
}
  0x84   :  { %s13994_s26 = scalar_lea.vmem %s132_s27, 16  ;;  %s13998_s8 = scalar_lea.vmem %s132_s27, 32 }
  0x85   :  { %p13995_p3 = scmp.ne.s32.totalorder %s132_s27, %s13994_s26  ;;  %p13999_p4 = scmp.lt.s32.totalorder %s132_s27, %s132_s27 }
  0x86   :  { %p14000_p5 = scmp.lt.s32.totalorder %s13998_s8, %s13994_s26 }
  0x88   :  { %p14001_p6 = por %p14000_p5, %p13999_p4 }
  0x8a   :  { %p14002_p7 = pnand %p14001_p6, %p13995_p3 }
  0x8c   :  { %14005 = shalt.err (!%p14002_p7)
}
  0x8d   :  { %134 = dma.hbm_to_vmem [thread:$0]  %s17986_s17, 16, %s132_s27, [#allocation15]  }
  0x8e   :  { %14028 = dma.done.wait [#allocation3], 1536  }
  0x8f   :  { %14029 = vsyncadd [#allocation3], 4294965760 }
  0x90   :  { %14030 = dma.done.wait [#allocation6], 1552  }
  0x91   :  { %14031 = vsyncadd [#allocation6], 4294965744 }
  0x92   :  { %14032 = dma.done.wait [#allocation9], 1568  }
  0x93   :  { %14033 = vsyncadd [#allocation9], 4294965728 }
  0x94   :  { %14034 = dma.done.wait [#allocation12], 32  }
  0x95   :  { %14035 = vsyncadd [#allocation12], 4294967264 }
  0x96   :  { %14036 = dma.done.wait [#allocation15], 16  }
  0x97   :  { %14037 = vsyncadd [#allocation15], 4294967280  ;;  %s18236_s0 = sld [smem:[#allocation111_spill]]  ;;  %vm209_vm0 = vcmask 523264   ;;  %s18246_s26 = sld [smem:[#allocation112_spill]]  ;;  %vm1317_vm1 = vcmask 64512  }
  0x98   :  { %s18561_s17 = sld [smem:[#allocation113_spill]]  ;;  %vm3230_vm2 = vcmask 261120   ;;  %vm3865_vm3 = vcmask 785408   ;;  %vm5533_vm4 = vcmask 1040384   ;;  %s14054_s22 = smov 80   ;;  %vm5652_vm5 = vcmask 654336  }
  0x99   :  { %vm5536_vm6 = vcmask 392192   ;;  %vm14056_vm7 = vmmov 0   ;;  %vm11030_vm8 = vcmask 130048   ;;  %vm11493_vm9 = vcmask 25600  }
  0x9d   :  { %v14275_v0 = vld [vmem:[%s18236_s0 + $0x8] sm:$0xff]  ;;  %v14280_v1 = vld [vmem:[%s18236_s0 + $0x18] sm:$0xff]  ;;  %v14285_v2 = vld [vmem:[%s18236_s0] sm:$0xff] }
  0x9e   :  { %v213_v3 = vand.u32 4294901760, %v14275_v0  ;;  %v18015_v4 = vand.u32 4294901760, %v14280_v1  ;;  %v14292_v5 = vld [vmem:[%s18236_s0 + $0x10] sm:$0xff]  ;;  %v18014_v6 = vand.u32 4294901760, %v14285_v2  ;;  %v14298_v7 = vld [vmem:[%s18236_s0 + $0x28] sm:$0xff]  ;;  %v14303_v8 = vld [vmem:[%s18236_s0 + $0x38] sm:$0xff] }
  0x9f   :  { %v18009_v9 = vand.u32 4294901760, %v14292_v5  ;;  %v18008_v10 = vand.u32 4294901760, %v14298_v7  ;;  %v18007_v11 = vand.u32 4294901760, %v14303_v8  ;;  %v14311_v12 = vld [vmem:[%s18236_s0 + $0x20] sm:$0xff]  ;;  %v14316_v13 = vld [vmem:[%s18236_s0 + $0x30] sm:$0xff]  ;;  %v14321_v14 = vld [vmem:[%s18236_s0 + $0x48] sm:$0xff] }
  0xa0   :  { %v14327_v15 = vpack.c.bf16 %v18015_v4, %v213_v3  ;;  %v18006_v16 = vand.u32 4294901760, %v14311_v12  ;;  %v18005_v17 = vand.u32 4294901760, %v14316_v13  ;;  %v14334_v18 = vld [vmem:[%s18236_s0 + $0x58] sm:$0xff]  ;;  %v18002_v19 = vand.u32 4294901760, %v14321_v14  ;;  %v14340_v20 = vld [vmem:[%s18236_s0 + $0x40] sm:$0xff]  ;;  %v14345_v21 = vld [vmem:[%s18236_s0 + $0x50] sm:$0xff] }
  0xa1   :  { %v14351_v22 = vpack.c.bf16 %v18009_v9, %v18014_v6  ;;  %v14357_v23 = vpack.c.bf16 %v18007_v11, %v18008_v10  ;;  %v18001_v24 = vand.u32 4294901760, %v14334_v18  ;;  %v14363_v25 = vld [vmem:[%s18236_s0 + $0x68] sm:$0xff]  ;;  %v14368_v26 = vld [vmem:[%s18236_s0 + $0x78] sm:$0xff]  ;;  %v17998_v28 = vand.u32 4294901760, %v14340_v20  ;;  %v14392_v33 = vld [vmem:[%s18236_s0 + $0x60] sm:$0xff] }
  0xa2   :  { %18237 = vst [vmem:[#allocation23_spill] sm:$0xff] %v14327_v15  ;;  %11800 = vmatprep.subr.bf16.mxu0 %v14327_v15  ;;  %v14376_v27 = vpack.c.bf16 %v18005_v17, %v18006_v16  ;;  %v17997_v29 = vand.u32 4294901760, %v14345_v21  ;;  %v17996_v31 = vand.u32 4294901760, %v14363_v25  ;;  %v17995_v32 = vand.u32 4294901760, %v14368_v26  ;;  %v14397_v34 = vld [vmem:[%s18236_s0 + $0x70] sm:$0xff]  ;;  %v14402_v35 = vld [vmem:[%s18236_s0 + $0x88] sm:$0xff] }
  0xa3   :  { %18238 = vst [vmem:[#allocation24_spill] sm:$0xff] %v14351_v22  ;;  %18239 = vst [vmem:[#allocation25_spill] sm:$0xff] %v14357_v23  ;;  %11802 = vmatpush1.bf16.msra.mxu0 %v14351_v22  ;;  %v14385_v30 = vpack.c.bf16 %v18001_v24, %v18002_v19  ;;  %v14407_v36 = vld [vmem:[%s18236_s0 + $0x98] sm:$0xff]  ;;  %v17994_v38 = vand.u32 4294901760, %v14392_v33  ;;  %v17993_v39 = vand.u32 4294901760, %v14397_v34  ;;  %v17992_v41 = vand.u32 4294901760, %v14402_v35 }
  0xa4   :  { %18240 = vst [vmem:[#allocation26_spill] sm:$0xff] %v14376_v27  ;;  %11804 = vmatprep.subr.bf16.mxu0 %v14357_v23  ;;  %v14414_v37 = vpack.c.bf16 %v17997_v29, %v17998_v28  ;;  %v14423_v40 = vpack.c.bf16 %v17995_v32, %v17996_v31  ;;  %v17991_v42 = vand.u32 4294901760, %v14407_v36  ;;  %v14430_v43 = vld [vmem:[%s18236_s0 + $0x80] sm:$0xff]  ;;  %v14435_v44 = vld [vmem:[%s18236_s0 + $0x90] sm:$0xff]  ;;  %v14440_v45 = vld [vmem:[%s18236_s0 + $0xa8] sm:$0xff] }
  0xa5   :  { %18241 = vst [vmem:[#allocation27_spill] sm:$0xff] %v14385_v30  ;;  %v14445_v46 = vld [vmem:[%s18236_s0 + $0xb8] sm:$0xff]  ;;  %v14450_v47 = vld [vmem:[%s18236_s0 + $0xa0] sm:$0xff]  ;;  %v14457_v48 = vpack.c.bf16 %v17993_v39, %v17994_v38  ;;  %v18000_v49 = vand.u32 4294901760, %v14430_v43  ;;  %v17999_v50 = vand.u32 4294901760, %v14435_v44  ;;  %v14464_v51 = vld [vmem:[%s18236_s0 + $0xb0] sm:$0xff] }
  0xa6   :  { %18242 = vst [vmem:[#allocation28_spill] sm:$0xff] %v14414_v37  ;;  %18243 = vst [vmem:[#allocation29_spill] sm:$0xff] %v14423_v40  ;;  %v14469_v52 = vld [vmem:[%s18236_s0 + $0xc8] sm:$0xff]  ;;  %v14474_v53 = vld [vmem:[%s18236_s0 + $0xd8] sm:$0xff]  ;;  %v14481_v54 = vpack.c.bf16 %v17991_v42, %v17992_v41  ;;  %v18004_v55 = vand.u32 4294901760, %v14440_v45  ;;  %v18003_v56 = vand.u32 4294901760, %v14445_v46 }
  0xa7   :  { %11806 = vmatpush1.bf16.msra.mxu0 %v14376_v27  ;;  %18244 = vst [vmem:[#allocation30_spill] sm:$0xff] %v14457_v48  ;;  %v14488_v57 = vld [vmem:[%s18236_s0 + $0xc0] sm:$0xff]  ;;  %v14493_v58 = vld [vmem:[%s18236_s0 + $0xd0] sm:$0xff]  ;;  %v14498_v59 = vld [vmem:[%s18236_s0 + $0xe8] sm:$0xff]  ;;  %v18013_v62 = vand.u32 4294901760, %v14450_v47  ;;  %v18010_v63 = vand.u32 4294901760, %v14464_v51  ;;  %v14517_v39 = vpack.c.bf16 %v17999_v50, %v18000_v49 }
  0xa8   :  { %11808 = vmatprep.subr.bf16.mxu0 %v14385_v30  ;;  %18245 = vst [vmem:[#allocation31_spill] sm:$0xff] %v14481_v54  ;;  %v14503_v60 = vld [vmem:[%s18236_s0 + $0xf8] sm:$0xff]  ;;  %v208_v61 = vld [vmem:[%s18246_s26 + $0x8] sm:$0xff]  ;;  %v18012_v42 = vand.u32 4294901760, %v14469_v52  ;;  %v18011_v41 = vand.u32 4294901760, %v14474_v53  ;;  %v18017_v38 = vand.u32 4294901760, %v14488_v57  ;;  %v14532_v28 = vpack.c.bf16 %v18003_v56, %v18004_v55 }
  0xa9   :  { %18247 = vst [vmem:[#allocation32_spill] sm:$0xff] %v14517_v39  ;;  %v18016_v32 = vand.u32 4294901760, %v14493_v58  ;;  %v14524_v31 = vld [vmem:[%s18236_s0 + $0xe0] sm:$0xff]  ;;  %v211_v29 = vsel %vm209_vm0, %v208_v61, 0  ;;  %v18027_v50 = vand.u32 4294901760, %v14498_v59  ;;  %v18026_v49 = vand.u32 4294901760, %v14503_v60 }
  0xaa   :  { %18248 = vst [vmem:[#allocation33_spill] sm:$0xff] %v14532_v28  ;;  %v14539_v24 = vld [vmem:[%s18236_s0 + $0xf0] sm:$0xff]  ;;  %v14544_v61 = vld [vmem:[%s18236_s0 + $0x108] sm:$0xff]  ;;  %v14546_v19 = vand.u32 4294901760, %v211_v29  ;;  %v14551_v56 = vld [vmem:[%s18236_s0 + $0x118] sm:$0xff]  ;;  %v14560_v17 = vpack.c.bf16 %v18010_v63, %v18013_v62  ;;  %v14566_v16 = vpack.c.bf16 %v18011_v41, %v18012_v42  ;;  %v18258_v62 = vand.u32 4294901760, %v14280_v1 }
  0xab   :  { %11810 = vmatpush1.bf16.msra.mxu0 %v14414_v37  ;;  %v207_v55 = vld [vmem:[%s18246_s26] sm:$0xff]  ;;  %v14577_v9 = vld [vmem:[%s18236_s0 + $0x110] sm:$0xff]  ;;  %v14582_v63 = vld [vmem:[%s18236_s0 + $0x128] sm:$0xff]  ;;  %v14592_v42 = vpack.c.bf16 %v18016_v32, %v18017_v38  ;;  %v14614_v32 = vsub.f32 %v14275_v0, %v213_v3  ;;  %v14621_v38 = vpack.c.bf16 %v18026_v49, %v18027_v50  ;;  %v18262_v49 = vand.u32 4294901760, %v14285_v2 }
  0xac   :  { %11812 = vmatprep.subr.bf16.mxu0 %v14423_v40  ;;  %18249 = vst [vmem:[#allocation34_spill] sm:$0xff] %v14546_v19  ;;  %18250 = vst [vmem:[#allocation35_spill] sm:$0xff] %v14560_v17  ;;  %v14572_v10 = vld [vmem:[%s18236_s0 + $0x100] sm:$0xff]  ;;  %v14585_v41 = vsub.f32 %v211_v29, %v14546_v19  ;;  %v14599_v6 = vld [vmem:[%s18236_s0 + $0x138] sm:$0xff]  ;;  %v18278_v50 = vand.u32 4294901760, %v14577_v9 }
  0xad   :  { %18251 = vst [vmem:[#allocation36_spill] sm:$0xff] %v14566_v16  ;;  %18253 = vst [vmem:[#allocation38_spill] sm:$0xff] %v14592_v42  ;;  %v14604_v29 = vld [vmem:[%s18236_s0 + $0x120] sm:$0xff]  ;;  %v14609_v4 = vld [vmem:[%s18236_s0 + $0x130] sm:$0xff]  ;;  %v18281_v23 = vand.u32 4294901760, %v14599_v6 }
  0xae   :  { %18252 = vst [vmem:[#allocation37_spill] sm:$0xff] %v14585_v41  ;;  %18254 = vst [vmem:[#allocation39_spill] sm:$0xff] %v14604_v29  ;;  %v14655_v11 = vld [vmem:[%s18236_s0 + $0x140] sm:$0xff]  ;;  %v18284_v22 = vand.u32 4294901760, %v14609_v4 }
  0xaf   :  { %11814 = vmatpush1.bf16.msra.mxu0 %v14457_v48  ;;  %18255 = vst [vmem:[#allocation40_spill] sm:$0xff] %v14609_v4  ;;  %18256 = vst [vmem:[#allocation41_spill] sm:$0xff] %v14614_v32  ;;  %v14650_v48 = vld [vmem:[%s18236_s0 + $0x158] sm:$0xff] }
  0xb0   :  { %11816 = vmatprep.subr.bf16.mxu0 %v14481_v54  ;;  %18257 = vst [vmem:[#allocation42_spill] sm:$0xff] %v14621_v38  ;;  %v14629_v54 = vand.u32 4294901760, %v207_v55 }
  0xb2   :  { %18260 = vst [vmem:[#allocation44_spill] sm:$0xff] %v14629_v54  ;;  %v14676_v30 = vsub.f32 %v207_v55, %v14629_v54  ;;  %v18277_v55 = vand.u32 4294901760, %v14572_v10  ;;  %v18292_v54 = vand.u32 4294901760, %v14321_v14 }
  0xb3   :  { %11818 = vmatpush1.bf16.msra.mxu0 %v14517_v39  ;;  %v14627_v39 = vsub.f32 %v14280_v1, %v18258_v62  ;;  %v14641_v1 = vld [vmem:[%s18236_s0 + $0x148] sm:$0xff]  ;;  %v18261_v62 = vand.u32 4294901760, %v14585_v41 }
  0xb4   :  { %11820 = vmatprep.subr.bf16.mxu0 %v14532_v28  ;;  %v14661_v28 = vsub.f32 %v14285_v2, %v18262_v49  ;;  %18268 = vst [vmem:[#allocation48_spill] sm:$0xff] %v14676_v30  ;;  %v18269_v2 = vand.u32 4294901760, %v14303_v8 }
  0xb5   :  { %18259 = vst [vmem:[#allocation43_spill] sm:$0xff] %v14627_v39  ;;  %v328_v0 = vsub.f32 %v14585_v41, %v18261_v62  ;;  %v18264_v62 = vand.u32 4294901760, %v14292_v5  ;;  %v18289_v15 = vand.u32 4294901760, %v14627_v39 }
  0xb6   :  { %18263 = vst [vmem:[#allocation45_spill] sm:$0xff] %v14661_v28  ;;  %v14681_v49 = vsub.f32 %v14303_v8, %v18269_v2  ;;  %v18280_v2 = vand.u32 4294901760, %v14582_v63 }
  0xb7   :  { %11822 = vmatpush1.bf16.msra.mxu0 %v14560_v17  ;;  %v14666_v3 = vsub.f32 %v14292_v5, %v18264_v62  ;;  %v18266_v17 = vand.u32 4294901760, %v14298_v7  ;;  %v329_v37 = vand.u32 4294901760, %v328_v0  ;;  %v18271_v5 = vand.u32 4294901760, %v14524_v31 }
  0xb8   :  { %11824 = vmatprep.subr.bf16.mxu0 %v14566_v16  ;;  %18270 = vst [vmem:[#allocation49_spill] sm:$0xff] %v14681_v49  ;;  %v18272_v62 = vand.u32 4294901760, %v14539_v24  ;;  %v14699_v16 = vpack.c.bf16 %v18278_v50, %v18277_v55  ;;  %v14718_v50 = vld [vmem:[%s18236_s0 + $0x150] sm:$0xff]  ;;  %v18288_v55 = vand.u32 4294901760, %v14614_v32  ;;  %v357_v41 = vsub.f32 %v14627_v39, %v18289_v15 }
  0xb9   :  { %18265 = vst [vmem:[#allocation46_spill] sm:$0xff] %v14666_v3  ;;  %v14671_v40 = vsub.f32 %v14298_v7, %v18266_v17  ;;  %v18274_v7 = vand.u32 4294901760, %v14544_v61  ;;  %v18275_v17 = vand.u32 4294901760, %v14551_v56  ;;  %330 = vmatprep.mubr.f32.mxu0 %v329_v37  ;;  %v18295_v15 = vand.u32 4294901760, %v14666_v3 }
  0xba   :  { %v14687_v27 = vpack.c.bf16 %v18272_v62, %v18271_v5  ;;  %18279 = vst [vmem:[#allocation52_spill] sm:$0xff] %v14699_v16  ;;  %v14706_v5 = vpack.c.bf16 %v18281_v23, %v18280_v2  ;;  %v18283_v62 = vand.u32 4294901760, %v14604_v29  ;;  %v14724_v23 = vld [vmem:[%s18236_s0 + $0x168] sm:$0xff]  ;;  %v14729_v2 = vld [vmem:[%s18236_s0 + $0x178] sm:$0xff]  ;;  %v18290_v29 = vand.u32 4294901760, %v14311_v12 }
  0xbb   :  { %18267 = vst [vmem:[#allocation47_spill] sm:$0xff] %v14671_v40  ;;  %v14693_v0 = vpack.c.bf16 %v18275_v17, %v18274_v7  ;;  %18286 = vst [vmem:[#allocation55_spill] sm:$0xff] %v14729_v2  ;;  %11826 = vmatpush1.bf16.msra.mxu0 %v14592_v42  ;;  %v345_v17 = vsub.f32 %v14614_v32, %v18288_v55  ;;  %v363_v4 = vsub.f32 %v14666_v3, %v18295_v15 }
  0xbc   :  { %18273 = vst [vmem:[#allocation50_spill] sm:$0xff] %v14687_v27  ;;  %18282 = vst [vmem:[#allocation53_spill] sm:$0xff] %v14706_v5  ;;  %v14712_v7 = vpack.c.bf16 %v18284_v22, %v18283_v62  ;;  %v14735_v22 = vld [vmem:[%s18236_s0 + $0x160] sm:$0xff]  ;;  %v14740_v62 = vld [vmem:[%s18236_s0 + $0x170] sm:$0xff]  ;;  %11828 = vmatprep.subr.bf16.mxu0 %v14621_v38  ;;  %v14757_v55 = vsub.f32 %v14311_v12, %v18290_v29  ;;  %v18291_v38 = vand.u32 4294901760, %v14316_v13  ;;  %v18293_v29 = vand.u32 4294901760, %v14334_v18 }
  0xbd   :  { %18276 = vst [vmem:[#allocation51_spill] sm:$0xff] %v14693_v0  ;;  %18287 = vst [vmem:[#allocation56_spill] sm:$0xff] %v14740_v62  ;;  %v14772_v12 = vsub.f32 %v14321_v14, %v18292_v54  ;;  %v346_v42 = vand.u32 4294901760, %v345_v17  ;;  %v18296_v8 = vand.u32 4294901760, %v14671_v40  ;;  %v358_v54 = vand.u32 4294901760, %v357_v41 }
  0xbe   :  { %18285 = vst [vmem:[#allocation54_spill] sm:$0xff] %v14712_v7  ;;  %v14765_v32 = vsub.f32 %v14316_v13, %v18291_v38  ;;  %v14777_v37 = vsub.f32 %v14334_v18, %v18293_v29  ;;  %v18294_v13 = vand.u32 4294901760, %v14661_v28  ;;  %v18297_v18 = vand.u32 4294901760, %v14676_v30 }
  0xbf   :  { %11830 = vmatpush1.bf16.msra.mxu0 %v14687_v27  ;;  %v369_v14 = vsub.f32 %v14671_v40, %v18296_v8  ;;  %v18298_v17 = vand.u32 4294901760, %v14681_v49  ;;  %v18299_v15 = vand.u32 4294901760, %v14641_v1  ;;  %v18300_v3 = vand.u32 4294901760, %v14650_v48 }
  0xc0   :  { %v351_v38 = vsub.f32 %v14661_v28, %v18294_v13  ;;  %11832 = vmatprep.subr.bf16.mxu0 %v14693_v0  ;;  %v14793_v29 = vsub.f32 %v14676_v30, %v18297_v18  ;;  %v18302_v41 = vand.u32 4294901760, %v14340_v20  ;;  %v18303_v18 = vand.u32 4294901760, %v14345_v21 }
  0xc1   :  { %v381_v13 = vsub.f32 %v14681_v49, %v18298_v17  ;;  %v14803_v28 = vpack.c.bf16 %v18300_v3, %v18299_v15  ;;  %v18304_v17 = vand.u32 4294901760, %v14655_v11  ;;  %v18305_v27 = vand.u32 4294901760, %v14718_v50 }
  0xc2   :  { %v14809_v0 = vsub.f32 %v14340_v20, %v18302_v41  ;;  %v14814_v30 = vsub.f32 %v14345_v21, %v18303_v18  ;;  %v18307_v3 = vand.u32 4294901760, %v14724_v23  ;;  %v18308_v15 = vand.u32 4294901760, %v14729_v2 }
  0xc3   :  { %18301 = vst [vmem:[#allocation57_spill] sm:$0xff] %v14803_v28  ;;  %v14820_v49 = vpack.c.bf16 %v18305_v27, %v18304_v17  ;;  %11834 = vmatpush1.bf16.msra.mxu0 %v14699_v16  ;;  %v18310_v21 = vand.u32 4294901760, %v14735_v22  ;;  %v18311_v18 = vand.u32 4294901760, %v14740_v62  ;;  %v352_v27 = vand.u32 4294901760, %v351_v38 }
  0xc4   :  { %v14826_v8 = vpack.c.bf16 %v18308_v15, %v18307_v3  ;;  %v364_v17 = vand.u32 4294901760, %v363_v4  ;;  %v370_v39 = vand.u32 4294901760, %v369_v14  ;;  %11836 = vmatprep.subr.bf16.mxu0 %v14706_v5  ;;  %v14838_v2 = vpack.c.bf16 %v358_v54, %v346_v42 }
  0xc5   :  { %18306 = vst [vmem:[#allocation58_spill] sm:$0xff] %v14820_v49  ;;  %v14835_v40 = vpack.c.bf16 %v18311_v18, %v18310_v21  ;;  %v335_v3 = vand.u32 4294901760, %v14793_v29  ;;  %v382_v15 = vand.u32 4294901760, %v381_v13  ;;  %v18314_v41 = vand.u32 4294901760, %v14757_v55 }
  0xc6   :  { %18309 = vst [vmem:[#allocation59_spill] sm:$0xff] %v14826_v8  ;;  %18313 = vst [vmem:[#allocation61_spill] sm:$0xff] %v14838_v2  ;;  %v18315_v16 = vand.u32 4294901760, %v14765_v32  ;;  %v18316_v38 = vand.u32 4294901760, %v14363_v25  ;;  %v18318_v14 = vand.u32 4294901760, %v14772_v12  ;;  %v18319_v29 = vand.u32 4294901760, %v14777_v37 }
  0xc7   :  { %18312 = vst [vmem:[#allocation60_spill] sm:$0xff] %v14835_v40  ;;  %v375_v20 = vsub.f32 %v14757_v55, %v18314_v41  ;;  %v18320_v41 = vand.u32 4294901760, %v14368_v26  ;;  %v18321_v18 = vand.u32 4294901760, %v14392_v33  ;;  %11838 = vmatpush1.bf16.msra.mxu0 %v14712_v7 }
  0xc8   :  { %v387_v62 = vsub.f32 %v14765_v32, %v18315_v16  ;;  %v14852_v42 = vsub.f32 %v14363_v25, %v18316_v38  ;;  %v393_v54 = vsub.f32 %v14772_v12, %v18318_v14  ;;  %v405_v13 = vsub.f32 %v14777_v37, %v18319_v29  ;;  %11840 = vmatprep.subr.bf16.mxu0 %v14803_v28 }
  0xc9   :  { %v14863_v16 = vsub.f32 %v14368_v26, %v18320_v41  ;;  %v14868_v4 = vsub.f32 %v14392_v33, %v18321_v18  ;;  %v14871_v25 = vpack.c.bf16 %v364_v17, %v352_v27  ;;  %v18323_v38 = vand.u32 4294901760, %v14397_v34 }
  0xca   :  { %18317 = vst [vmem:[#allocation62_spill] sm:$0xff] %v14852_v42  ;;  %v18324_v29 = vand.u32 4294901760, %v14402_v35  ;;  %v18325_v26 = vand.u32 4294901760, %v14407_v36  ;;  %v14889_v33 = vpack.c.bf16 %v382_v15, %v370_v39  ;;  %v376_v27 = vand.u32 4294901760, %v375_v20 }
  0xcb   :  { %18322 = vst [vmem:[#allocation63_spill] sm:$0xff] %v14871_v25  ;;  %v14876_v14 = vsub.f32 %v14397_v34, %v18323_v38  ;;  %v18327_v17 = vand.u32 4294901760, %v14430_v43  ;;  %v18328_v18 = vand.u32 4294901760, %v14435_v44  ;;  %v388_v38 = vand.u32 4294901760, %v387_v62  ;;  %11842 = vmatpush1.bf16.msra.mxu0 %v14820_v49 }
  0xcc   :  { %v14881_v21 = vsub.f32 %v14402_v35, %v18324_v29  ;;  %v14886_v41 = vsub.f32 %v14407_v36, %v18325_v26  ;;  %18326 = vst [vmem:[#allocation64_spill] sm:$0xff] %v14889_v33  ;;  %v18330_v29 = vand.u32 4294901760, %v14809_v0  ;;  %v18331_v39 = vand.u32 4294901760, %v14814_v30  ;;  %11844 = vmatprep.subr.bf16.mxu0 %v14826_v8 }
  0xcd   :  { %v14894_v34 = vsub.f32 %v14430_v43, %v18327_v17  ;;  %v14899_v35 = vsub.f32 %v14435_v44, %v18328_v18  ;;  %v18084_v15 = vand.u32 4294901760, %v14852_v42  ;;  %v394_v43 = vand.u32 4294901760, %v393_v54 }
  0xce   :  { %v14904_v36 = vsub.f32 %v14809_v0, %v18330_v29  ;;  %v14909_v20 = vsub.f32 %v14814_v30, %v18331_v39  ;;  %v406_v26 = vand.u32 4294901760, %v405_v13  ;;  %v18332_v28 = vand.u32 4294901760, %v14440_v45 }
  0xcf   :  { %18329 = vst [vmem:[#allocation65_spill] sm:$0xff] %v14899_v35  ;;  %v18333_v44 = vand.u32 4294901760, %v14445_v46  ;;  %v18334_v18 = vand.u32 4294901760, %v14450_v47  ;;  %v14936_v62 = vpack.c.bf16 %v388_v38, %v376_v27  ;;  %v18336_v13 = vand.u32 4294901760, %v14464_v51  ;;  %11846 = vmatpush1.bf16.msra.mxu0 %v14835_v40 }
  0xd0   :  { %v14921_v39 = vsub.f32 %v14440_v45, %v18332_v28  ;;  %v400_v28 = vand.u32 4294901760, %v14904_v36  ;;  %v417_v45 = vsub.f32 %v14852_v42, %v18084_v15  ;;  %v18339_v38 = vand.u32 4294901760, %v14868_v4  ;;  %11848 = vmatprep.subr.bf16.mxu0 %v14838_v2 }
  0xd1   :  { %v14929_v17 = vsub.f32 %v14445_v46, %v18333_v44  ;;  %v14934_v29 = vsub.f32 %v14450_v47, %v18334_v18  ;;  %18335 = vst [vmem:[#allocation66_spill] sm:$0xff] %v14936_v62  ;;  %v14945_v54 = vsub.f32 %v14464_v51, %v18336_v13  ;;  %v14947_v46 = vpack.c.bf16 %v406_v26, %v394_v43 }
  0xd2   :  { %v412_v44 = vand.u32 4294901760, %v14909_v20  ;;  %v18338_v47 = vand.u32 4294901760, %v14863_v16  ;;  %v423_v36 = vsub.f32 %v14868_v4, %v18339_v38  ;;  %v18340_v18 = vand.u32 4294901760, %v14876_v14  ;;  %336 = vmatmul.mubr.f32.vlgmr.msra.gmra.mrb[0].mxu0 %v335_v3 }
  0xd3   :  { %18337 = vst [vmem:[#allocation67_spill] sm:$0xff] %v14947_v46  ;;  %v18341_v51 = vand.u32 4294901760, %v14881_v21  ;;  %v18342_v20 = vand.u32 4294901760, %v14886_v41  ;;  %v18344_v40 = vand.u32 4294901760, %v14899_v35  ;;  %v418_v49 = vand.u32 4294901760, %v417_v45  ;;  %11850 = vmatpush1.bf16.msra.mxu0 %v14871_v25  ;;  %647 = vmatprep.mubr.f32.mxu0 %v14546_v19 }
  0xd4   :  { %v429_v27 = vsub.f32 %v14863_v16, %v18338_v47  ;;  %v435_v15 = vsub.f32 %v14876_v14, %v18340_v18  ;;  %v18343_v47 = vand.u32 4294901760, %v14894_v34  ;;  %v18346_v2 = vand.u32 4294901760, %v14474_v53  ;;  %11852 = vmatprep.subr.bf16.mxu0 %v14889_v33 }
  0xd5   :  { %v441_v43 = vsub.f32 %v14881_v21, %v18341_v51  ;;  %v453_v26 = vsub.f32 %v14886_v41, %v18342_v20  ;;  %v459_v18 = vsub.f32 %v14899_v35, %v18344_v40  ;;  %v18345_v20 = vand.u32 4294901760, %v14469_v52 }
  0xd6   :  { %v447_v38 = vsub.f32 %v14894_v34, %v18343_v47  ;;  %v14985_v47 = vsub.f32 %v14474_v53, %v18346_v2  ;;  %v430_v5 = vand.u32 4294901760, %v429_v27  ;;  %v424_v40 = vand.u32 4294901760, %v423_v36 }
  0xd7   :  { %v14980_v13 = vsub.f32 %v14469_v52, %v18345_v20  ;;  %v18347_v8 = vand.u32 4294901760, %v14488_v57  ;;  %v18348_v45 = vand.u32 4294901760, %v14493_v58  ;;  %v436_v52 = vand.u32 4294901760, %v435_v15  ;;  %11854 = vmatpush1.bf16.msra.mxu0 %v14936_v62 }
  0xd8   :  { %v442_v20 = vand.u32 4294901760, %v441_v43  ;;  %v454_v35 = vand.u32 4294901760, %v453_v26  ;;  %v18349_v53 = vand.u32 4294901760, %v14921_v39  ;;  %v18350_v3 = vand.u32 4294901760, %v14929_v17  ;;  %11856 = vmatprep.subr.bf16.mxu0 %v14947_v46 }
  0xd9   :  { %v14990_v51 = vsub.f32 %v14488_v57, %v18347_v8  ;;  %v14995_v7 = vsub.f32 %v14493_v58, %v18348_v45  ;;  %v448_v57 = vand.u32 4294901760, %v447_v38  ;;  %v460_v8 = vand.u32 4294901760, %v459_v18 }
  0xda   :  { %v465_v2 = vsub.f32 %v14921_v39, %v18349_v53  ;;  %v477_v58 = vsub.f32 %v14929_v17, %v18350_v3  ;;  %v18351_v27 = vand.u32 4294901760, %v14934_v29  ;;  %v18352_v36 = vand.u32 4294901760, %v14945_v54 }
  0xdb   :  { %v18353_v53 = vand.u32 4294901760, %v14498_v59  ;;  %v18354_v33 = vand.u32 4294901760, %v14503_v60  ;;  %v15032_v45 = vpack.c.bf16 %v412_v44, %v400_v28  ;;  %v15038_v18 = vpack.c.bf16 %v454_v35, %v442_v20 }
  0xdc   :  { %v471_v15 = vsub.f32 %v14934_v29, %v18351_v27  ;;  %v483_v43 = vsub.f32 %v14945_v54, %v18352_v36  ;;  %v18355_v36 = vand.u32 4294901760, %v14524_v31  ;;  %v15041_v3 = vpack.c.bf16 %v460_v8, %v448_v57 }
  0xdd   :  { %v15017_v38 = vsub.f32 %v14498_v59, %v18353_v53  ;;  %v15024_v27 = vsub.f32 %v14503_v60, %v18354_v33  ;;  %18356 = vst [vmem:[#allocation68_spill] sm:$0xff] %v15032_v45  ;;  %v15034_v59 = vpack.c.bf16 %v430_v5, %v418_v49  ;;  %v15036_v53 = vpack.c.bf16 %v436_v52, %v424_v40 }
  0xde   :  { %v15029_v26 = vsub.f32 %v14524_v31, %v18355_v36  ;;  %18359 = vst [vmem:[#allocation71_spill] sm:$0xff] %v15038_v18  ;;  %18360 = vst [vmem:[#allocation72_spill] sm:$0xff] %v15041_v3  ;;  %v466_v60 = vand.u32 4294901760, %v465_v2  ;;  %v478_v33 = vand.u32 4294901760, %v477_v58  ;;  %v472_v25 = vand.u32 4294901760, %v471_v15  ;;  %11858 = vmatpush1.bf16.msra.mxu0 %v15032_v45 }
  0xdf   :  { %18357 = vst [vmem:[#allocation69_spill] sm:$0xff] %v15034_v59  ;;  %18358 = vst [vmem:[#allocation70_spill] sm:$0xff] %v15036_v53  ;;  %v484_v19 = vand.u32 4294901760, %v483_v43  ;;  %v18361_v31 = vand.u32 4294901760, %v14980_v13  ;;  %v18362_v28 = vand.u32 4294901760, %v14985_v47  ;;  %v18104_v5 = vand.u32 4294901760, %v15017_v38  ;;  %11860 = vmatprep.subr.bf16.mxu0 %v15034_v59 }
  0xe0   :  { %v18363_v35 = vand.u32 4294901760, %v14990_v51  ;;  %v18364_v40 = vand.u32 4294901760, %v14995_v7  ;;  %v18103_v20 = vand.u32 4294901760, %v15024_v27  ;;  %v18102_v2 = vand.u32 4294901760, %v15029_v26 }
  0xe1   :  { %v489_v36 = vsub.f32 %v14980_v13, %v18361_v31  ;;  %v501_v49 = vsub.f32 %v14985_v47, %v18362_v28  ;;  %v18365_v57 = vand.u32 4294901760, %v14539_v24  ;;  %v18366_v58 = vand.u32 4294901760, %v14544_v61 }
  0xe2   :  { %v495_v44 = vsub.f32 %v14990_v51, %v18363_v35  ;;  %v507_v52 = vsub.f32 %v14995_v7, %v18364_v40  ;;  %v18367_v43 = vand.u32 4294901760, %v14551_v56  ;;  %v18368_v28 = vand.u32 4294901760, %v14572_v10  ;;  %11862 = vmatpush1.bf16.msra.mxu0 %v15036_v53 }
  0xe3   :  { %v15062_v8 = vsub.f32 %v14539_v24, %v18365_v57  ;;  %v15067_v15 = vsub.f32 %v14544_v61, %v18366_v58  ;;  %v15080_v40 = vpack.c.bf16 %v478_v33, %v466_v60  ;;  %v18370_v24 = vand.u32 4294901760, %v14577_v9  ;;  %11864 = vmatprep.subr.bf16.mxu0 %v15038_v18 }
  0xe4   :  { %v15072_v31 = vsub.f32 %v14551_v56, %v18367_v43  ;;  %v15077_v35 = vsub.f32 %v14572_v10, %v18368_v28  ;;  %v18371_v61 = vand.u32 4294901760, %v14582_v63  ;;  %v18372_v56 = vand.u32 4294901760, %v14599_v6 }
  0xe5   :  { %18369 = vst [vmem:[#allocation73_spill] sm:$0xff] %v15080_v40  ;;  %v15085_v57 = vsub.f32 %v14577_v9, %v18370_v24  ;;  %v15097_v10 = vpack.c.bf16 %v484_v19, %v472_v25  ;;  %v490_v28 = vand.u32 4294901760, %v489_v36  ;;  %v502_v60 = vand.u32 4294901760, %v501_v49 }
  0xe6   :  { %v15090_v58 = vsub.f32 %v14582_v63, %v18371_v61  ;;  %v15095_v43 = vsub.f32 %v14599_v6, %v18372_v56  ;;  %v513_v33 = vsub.f32 %v15017_v38, %v18104_v5  ;;  %v496_v9 = vand.u32 4294901760, %v495_v44  ;;  %v18374_v56 = vld [vmem:[#allocation39_spill] sm:$0xff]  ;;  %v18377_v6 = vld [vmem:[#allocation40_spill] sm:$0xff]  ;;  %11866 = vmatpush1.bf16.msra.mxu0 %v15041_v3 }
  0xe7   :  { %18373 = vst [vmem:[#allocation74_spill] sm:$0xff] %v15097_v10  ;;  %v508_v24 = vand.u32 4294901760, %v507_v52  ;;  %v525_v63 = vsub.f32 %v15024_v27, %v18103_v20  ;;  %v519_v61 = vsub.f32 %v15029_v26, %v18102_v2  ;;  %v18375_v2 = vand.u32 4294901760, %v18374_v56  ;;  %11868 = vmatprep.subr.bf16.mxu0 %v15080_v40 }
  0xe8   :  { %v15122_v5 = vpack.c.bf16 %v502_v60, %v490_v28  ;;  %v514_v19 = vand.u32 4294901760, %v513_v33  ;;  %v18378_v25 = vand.u32 4294901760, %v18377_v6  ;;  %v18379_v18 = vand.u32 4294901760, %v14641_v1 }
  0xe9   :  { %v15120_v20 = vsub.f32 %v18374_v56, %v18375_v2  ;;  %v15134_v44 = vpack.c.bf16 %v508_v24, %v496_v9  ;;  %v526_v52 = vand.u32 4294901760, %v525_v63  ;;  %v520_v53 = vand.u32 4294901760, %v519_v61 }
  0xea   :  { %18376 = vst [vmem:[#allocation39_spill] sm:$0xff] %v15122_v5  ;;  %v15127_v36 = vsub.f32 %v18377_v6, %v18378_v25  ;;  %v15132_v49 = vsub.f32 %v14641_v1, %v18379_v18  ;;  %v18381_v2 = vand.u32 4294901760, %v14650_v48  ;;  %v18383_v60 = vand.u32 4294901760, %v15062_v8  ;;  %11870 = vmatpush1.bf16.msra.mxu0 %v15097_v10 }
  0xeb   :  { %18380 = vst [vmem:[#allocation40_spill] sm:$0xff] %v15134_v44  ;;  %v18384_v6 = vand.u32 4294901760, %v15067_v15  ;;  %v18385_v18 = vand.u32 4294901760, %v15072_v31  ;;  %v18386_v24 = vand.u32 4294901760, %v15077_v35  ;;  %v18388_v25 = vand.u32 4294901760, %v15090_v58  ;;  %11872 = vmatprep.subr.bf16.mxu0 %v15122_v5 }
  0xec   :  { %v15139_v28 = vsub.f32 %v14650_v48, %v18381_v2  ;;  %v531_v33 = vsub.f32 %v15062_v8, %v18383_v60  ;;  %v18387_v48 = vand.u32 4294901760, %v15085_v57  ;;  %v18389_v2 = vand.u32 4294901760, %v15095_v43 }
  0xed   :  { %v537_v1 = vsub.f32 %v15067_v15, %v18384_v6  ;;  %v549_v9 = vsub.f32 %v15072_v31, %v18385_v18  ;;  %v543_v63 = vsub.f32 %v15077_v35, %v18386_v24  ;;  %v561_v56 = vsub.f32 %v15090_v58, %v18388_v25  ;;  %v18397_v24 = vld [vmem:[#allocation55_spill] sm:$0xff] }
  0xee   :  { %18382 = vst [vmem:[#allocation75_spill] sm:$0xff] %v15139_v28  ;;  %v555_v61 = vsub.f32 %v15085_v57, %v18387_v48  ;;  %v573_v60 = vsub.f32 %v15095_v43, %v18389_v2  ;;  %v18390_v40 = vand.u32 4294901760, %v14655_v11  ;;  %v18392_v48 = vand.u32 4294901760, %v14718_v50  ;;  %11874 = vmatpush1.bf16.msra.mxu0 %v15134_v44 }
  0xef   :  { %v15177_v25 = vpack.c.bf16 %v526_v52, %v514_v19  ;;  %v18395_v6 = vand.u32 4294901760, %v14724_v23  ;;  %v18398_v45 = vand.u32 4294901760, %v18397_v24  ;;  %v562_v52 = vand.u32 4294901760, %v561_v56 }
  0xf0   :  { %v15170_v3 = vsub.f32 %v14655_v11, %v18390_v40  ;;  %v15175_v59 = vsub.f32 %v14718_v50, %v18392_v48  ;;  %v532_v11 = vand.u32 4294901760, %v531_v33  ;;  %v538_v40 = vand.u32 4294901760, %v537_v1  ;;  %v18406_v1 = vld [vmem:[#allocation56_spill] sm:$0xff] }
  0xf1   :  { %18394 = vst [vmem:[#allocation78_spill] sm:$0xff] %v15177_v25  ;;  %v15183_v18 = vsub.f32 %v14724_v23, %v18395_v6  ;;  %v15188_v46 = vsub.f32 %v18397_v24, %v18398_v45  ;;  %v550_v50 = vand.u32 4294901760, %v549_v9  ;;  %v544_v48 = vand.u32 4294901760, %v543_v63  ;;  %11876 = vmatprep.subr.bf16.mxu0 %v15177_v25 }
  0xf2   :  { %18391 = vst [vmem:[#allocation76_spill] sm:$0xff] %v15170_v3  ;;  %18393 = vst [vmem:[#allocation77_spill] sm:$0xff] %v15175_v59  ;;  %v556_v19 = vand.u32 4294901760, %v555_v61  ;;  %v574_v2 = vand.u32 4294901760, %v573_v60  ;;  %v18400_v62 = vand.u32 4294901760, %v15120_v20  ;;  %v18401_v6 = vand.u32 4294901760, %v15127_v36 }
  0xf3   :  { %18396 = vst [vmem:[#allocation79_spill] sm:$0xff] %v15183_v18  ;;  %18399 = vst [vmem:[#allocation55_spill] sm:$0xff] %v15188_v46  ;;  %v18402_v24 = vand.u32 4294901760, %v15132_v49  ;;  %v18403_v63 = vand.u32 4294901760, %v15139_v28  ;;  %v18404_v60 = vand.u32 4294901760, %v14735_v22  ;;  %v18407_v5 = vand.u32 4294901760, %v18406_v1 }
  0xf4   :  { %v567_v23 = vsub.f32 %v15120_v20, %v18400_v62  ;;  %v579_v45 = vsub.f32 %v15127_v36, %v18401_v6  ;;  %v15224_v56 = vpack.c.bf16 %v556_v19, %v544_v48  ;;  %v15226_v62 = vpack.c.bf16 %v574_v2, %v562_v52 }
  0xf5   :  { %v585_v33 = vsub.f32 %v15132_v49, %v18402_v24  ;;  %v597_v61 = vsub.f32 %v15139_v28, %v18403_v63  ;;  %v15211_v6 = vsub.f32 %v14735_v22, %v18404_v60  ;;  %v15214_v24 = vpack.c.bf16 %v532_v11, %v520_v53 }
  0xf6   :  { %v15219_v9 = vsub.f32 %v18406_v1, %v18407_v5  ;;  %v15222_v63 = vpack.c.bf16 %v550_v50, %v538_v40  ;;  %18409 = vst [vmem:[#allocation81_spill] sm:$0xff] %v15224_v56  ;;  %v568_v10 = vand.u32 4294901760, %v567_v23  ;;  %v580_v22 = vand.u32 4294901760, %v579_v45  ;;  %v18416_v23 = vld [vmem:[#allocation43_spill] sm:$0xff] }
  0xf7   :  { %18405 = vst [vmem:[#allocation80_spill] sm:$0xff] %v15214_v24  ;;  %v586_v60 = vand.u32 4294901760, %v585_v33  ;;  %v18410_v44 = vand.u32 4294901760, %v15170_v3  ;;  %v18411_v11 = vand.u32 4294901760, %v15175_v59  ;;  %v598_v1 = vand.u32 4294901760, %v597_v61  ;;  %11878 = vmatpush1.bf16.msra.mxu0 %v15214_v24  ;;  %v18419_v61 = vld [vmem:[#allocation45_spill] sm:$0xff] }
  0xf8   :  { %18408 = vst [vmem:[#allocation56_spill] sm:$0xff] %v15222_v63  ;;  %v18412_v25 = vand.u32 4294901760, %v15183_v18  ;;  %v18413_v50 = vand.u32 4294901760, %v15188_v46  ;;  %v18417_v45 = vand.u32 4294901760, %v18416_v23  ;;  %11880 = vmatprep.subr.bf16.mxu0 %v15222_v63  ;;  %v18429_v19 = vand.u32 4294901760, %v14757_v55 }
  0xf9   :  { %v591_v53 = vsub.f32 %v15170_v3, %v18410_v44  ;;  %v603_v5 = vsub.f32 %v15175_v59, %v18411_v11  ;;  %v18414_v44 = vld [vmem:[#allocation41_spill] sm:$0xff]  ;;  %v18420_v11 = vand.u32 4294901760, %v18419_v61  ;;  %v18421_v59 = vld [vmem:[#allocation46_spill] sm:$0xff]  ;;  %v18424_v3 = vld [vmem:[#allocation47_spill] sm:$0xff]  ;;  %v18430_v24 = vand.u32 4294901760, %v14765_v32 }
  0xfa   :  { %v609_v40 = vsub.f32 %v15183_v18, %v18412_v25  ;;  %v621_v2 = vsub.f32 %v15188_v46, %v18413_v50  ;;  %v18415_v52 = vand.u32 4294901760, %v18414_v44  ;;  %v18422_v25 = vand.u32 4294901760, %v18421_v59  ;;  %v18426_v46 = vld [vmem:[#allocation49_spill] sm:$0xff] }
  0xfb   :  { %v18425_v50 = vand.u32 4294901760, %v18424_v3  ;;  %v18427_v48 = vand.u32 4294901760, %v18426_v46  ;;  %v18439_v63 = vand.u32 4294901760, %v14863_v16  ;;  %11882 = vmatpush1.bf16.msra.mxu0 %v15224_v56 }
  0xfc   :  { %v15247_v33 = vpack.c.bf16 %v18417_v45, %v18415_v52  ;;  %v15253_v18 = vpack.c.bf16 %v18422_v25, %v18420_v11  ;;  %v15266_v52 = vpack.c.bf16 %v18430_v24, %v18429_v19  ;;  %v18432_v45 = vand.u32 4294901760, %v14772_v12  ;;  %11884 = vmatprep.subr.bf16.mxu0 %v15226_v62 }
  0xfd   :  { %v15259_v28 = vpack.c.bf16 %v18427_v48, %v18425_v50  ;;  %v18435_v25 = vand.u32 4294901760, %v14809_v0  ;;  %v18438_v50 = vand.u32 4294901760, %v14852_v42  ;;  %v18441_v24 = vand.u32 4294901760, %v14868_v4 }
  0xfe   :  { %18418 = vst [vmem:[#allocation41_spill] sm:$0xff] %v15247_v33  ;;  %18423 = vst [vmem:[#allocation43_spill] sm:$0xff] %v15253_v18  ;;  %v18433_v33 = vand.u32 4294901760, %v14777_v37  ;;  %v18436_v18 = vand.u32 4294901760, %v14814_v30  ;;  %v18442_v19 = vand.u32 4294901760, %v14876_v14 }
  0xff   :  { %18428 = vst [vmem:[#allocation45_spill] sm:$0xff] %v15259_v28  ;;  %18431 = vst [vmem:[#allocation46_spill] sm:$0xff] %v15266_v52  ;;  %v15284_v28 = vpack.c.bf16 %v18439_v63, %v18438_v50  ;;  %v15304_v63 = vpack.c.bf16 %v580_v22, %v568_v10  ;;  %v592_v50 = vand.u32 4294901760, %v591_v53  ;;  %v15320_v10 = vpack.c.bf16 %v598_v1, %v586_v60 }
 0x100   :  { %v15272_v11 = vpack.c.bf16 %v18433_v33, %v18432_v45  ;;  %v15278_v48 = vpack.c.bf16 %v18436_v18, %v18435_v25  ;;  %v15290_v52 = vpack.c.bf16 %v18442_v19, %v18441_v24  ;;  %v18444_v33 = vand.u32 4294901760, %v14881_v21  ;;  %v18448_v25 = vld [vmem:[#allocation65_spill] sm:$0xff] }
 0x101   :  { %18440 = vst [vmem:[#allocation82_spill] sm:$0xff] %v15284_v28  ;;  %v18445_v45 = vand.u32 4294901760, %v14886_v41  ;;  %v18447_v18 = vand.u32 4294901760, %v14894_v34  ;;  %v604_v28 = vand.u32 4294901760, %v603_v5  ;;  %v18451_v24 = vand.u32 4294901760, %v15211_v6  ;;  %11886 = vmatpush1.bf16.msra.mxu0 %v15304_v63 }
 0x102   :  { %18434 = vst [vmem:[#allocation47_spill] sm:$0xff] %v15272_v11  ;;  %18437 = vst [vmem:[#allocation49_spill] sm:$0xff] %v15278_v48  ;;  %v18449_v48 = vand.u32 4294901760, %v18448_v25  ;;  %v610_v22 = vand.u32 4294901760, %v609_v40  ;;  %v622_v53 = vand.u32 4294901760, %v621_v2  ;;  %v18456_v5 = vand.u32 4294901760, %v14934_v29  ;;  %11888 = vmatprep.subr.bf16.mxu0 %v15320_v10 }
 0x103   :  { %18443 = vst [vmem:[#allocation83_spill] sm:$0xff] %v15290_v52  ;;  %v15296_v11 = vpack.c.bf16 %v18445_v45, %v18444_v33  ;;  %v615_v19 = vsub.f32 %v15211_v6, %v18451_v24  ;;  %v18452_v52 = vand.u32 4294901760, %v15219_v9  ;;  %v18453_v45 = vand.u32 4294901760, %v14921_v39 }
 0x104   :  { %v15302_v42 = vpack.c.bf16 %v18449_v48, %v18447_v18  ;;  %v18457_v18 = vand.u32 4294901760, %v14945_v54  ;;  %v15338_v1 = vpack.c.bf16 %v622_v53, %v610_v22  ;;  %v18462_v40 = vand.u32 4294901760, %v14990_v51 }
 0x105   :  { %18446 = vst [vmem:[#allocation84_spill] sm:$0xff] %v15296_v11  ;;  %v627_v33 = vsub.f32 %v15219_v9, %v18452_v52  ;;  %v18454_v11 = vand.u32 4294901760, %v14929_v17  ;;  %v15329_v52 = vpack.c.bf16 %v604_v28, %v592_v50  ;;  %v616_v56 = vand.u32 4294901760, %v615_v19 }
 0x106   :  { %18450 = vst [vmem:[#allocation65_spill] sm:$0xff] %v15302_v42  ;;  %v15326_v24 = vpack.c.bf16 %v18457_v18, %v18456_v5  ;;  %v18463_v2 = vand.u32 4294901760, %v14995_v7  ;;  %v18465_v50 = vand.u32 4294901760, %v15017_v38  ;;  %v18466_v19 = vand.u32 4294901760, %v15024_v27 }
 0x107   :  { %v15317_v48 = vpack.c.bf16 %v18454_v11, %v18453_v45  ;;  %v628_v42 = vand.u32 4294901760, %v627_v33  ;;  %v18459_v11 = vand.u32 4294901760, %v14980_v13  ;;  %v18460_v45 = vand.u32 4294901760, %v14985_v47  ;;  %11890 = vmatpush1.bf16.msra.mxu0 %v15329_v52 }
 0x108   :  { %18458 = vst [vmem:[#allocation86_spill] sm:$0xff] %v15326_v24  ;;  %v15344_v5 = vpack.c.bf16 %v18463_v2, %v18462_v40  ;;  %v15353_v33 = vpack.c.bf16 %v18466_v19, %v18465_v50  ;;  %11892 = vmatprep.subr.bf16.mxu0 %v15338_v1  ;;  %v15358_v22 = vpack.c.bf16 %v18416_v23, %v18414_v44  ;;  %v18469_v53 = vand.u32 4294901760, %v15029_v26  ;;  %v18482_v19 = vld [vmem:[#allocation37_spill] sm:$0xff] }
 0x109   :  { %18455 = vst [vmem:[#allocation85_spill] sm:$0xff] %v15317_v48  ;;  %v15335_v60 = vpack.c.bf16 %v18460_v45, %v18459_v11  ;;  %v15347_v28 = vpack.c.bf16 %v628_v42, %v616_v56  ;;  %v18470_v18 = vand.u32 4294901760, %v15062_v8  ;;  %v15369_v42 = vpack.c.bf16 %v18421_v59, %v18419_v61  ;;  %v18480_v59 = vld [vmem:[#allocation44_spill] sm:$0xff] }
 0x10a   :  { %18464 = vst [vmem:[#allocation88_spill] sm:$0xff] %v15344_v5  ;;  %18467 = vst [vmem:[#allocation89_spill] sm:$0xff] %v15353_v33  ;;  %v18473_v56 = vand.u32 4294901760, %v15067_v15  ;;  %v18474_v45 = vand.u32 4294901760, %v15072_v31  ;;  %v15380_v44 = vpack.c.bf16 %v18426_v46, %v18424_v3  ;;  %v18477_v23 = vand.u32 4294901760, %v15077_v35 }
 0x10b   :  { %18461 = vst [vmem:[#allocation87_spill] sm:$0xff] %v15335_v60  ;;  %18468 = vst [vmem:[#allocation90_spill] sm:$0xff] %v15358_v22  ;;  %v15364_v11 = vpack.c.bf16 %v18470_v18, %v18469_v53  ;;  %11894 = vmatpush1.bf16.msra.mxu0 %v15347_v28  ;;  %v18478_v2 = vand.u32 4294901760, %v15085_v57  ;;  %v15392_v61 = vpack.c.bf16 %v14765_v32, %v14757_v55  ;;  %v18483_v53 = vand.u32 4294901760, %v15090_v58 }
 0x10c   :  { %18472 = vst [vmem:[#allocation92_spill] sm:$0xff] %v15369_v42  ;;  %v15375_v40 = vpack.c.bf16 %v18474_v45, %v18473_v56  ;;  %11896 = vmatprep.subr.bf16.mxu0 %v15358_v22  ;;  %18476 = vst [vmem:[#allocation94_spill] sm:$0xff] %v15380_v44  ;;  %v18484_v46 = vand.u32 4294901760, %v15095_v43  ;;  %v15404_v18 = vpack.c.bf16 %v14777_v37, %v14772_v12  ;;  %v18487_v56 = vand.u32 4294901760, %v15120_v20  ;;  %v18494_v37 = vld [vmem:[#allocation62_spill] sm:$0xff] }
 0x10d   :  { %18471 = vst [vmem:[#allocation91_spill] sm:$0xff] %v15364_v11  ;;  %v15386_v50 = vpack.c.bf16 %v18478_v2, %v18477_v23  ;;  %18481 = vst [vmem:[#allocation44_spill] sm:$0xff] %v15392_v61  ;;  %v18488_v45 = vand.u32 4294901760, %v15127_v36  ;;  %v15415_v55 = vpack.c.bf16 %v14814_v30, %v14809_v0  ;;  %v18490_v23 = vand.u32 4294901760, %v15132_v49  ;;  %v18491_v2 = vld [vmem:[#allocation75_spill] sm:$0xff] }
 0x10e   :  { %18475 = vst [vmem:[#allocation93_spill] sm:$0xff] %v15375_v40  ;;  %649 = vmatmul.mubr.f32.vlgmr.msra.gmra.mrb[0].mxu0 %v18480_v59  ;;  %v15399_v3 = vpack.c.bf16 %v18484_v46, %v18483_v53  ;;  %18486 = vst [vmem:[#allocation96_spill] sm:$0xff] %v15404_v18  ;;  %v18492_v53 = vand.u32 4294901760, %v18491_v2  ;;  %v15426_v12 = vpack.c.bf16 %v14863_v16, %v18494_v37  ;;  %v18500_v0 = vld [vmem:[#allocation79_spill] sm:$0xff]  ;;  %v18506_v37 = vand.u32 4294901760, %v15219_v9 }
 0x10f   :  { %18479 = vst [vmem:[#allocation95_spill] sm:$0xff] %v15386_v50  ;;  %11898 = vmatpush1.bf16.msra.mxu0 %v15369_v42  ;;  %817 = vmatprep.mubr.f32.mxu0 %v18482_v19  ;;  %v15410_v32 = vpack.c.bf16 %v18488_v45, %v18487_v56  ;;  %v18495_v56 = vld [vmem:[#allocation76_spill] sm:$0xff]  ;;  %v15437_v30 = vpack.c.bf16 %v14876_v14, %v14868_v4 }
 0x110   :  { %18485 = vst [vmem:[#allocation37_spill] sm:$0xff] %v15399_v3  ;;  %11900 = vmatprep.subr.bf16.mxu0 %v15380_v44  ;;  %v15421_v46 = vpack.c.bf16 %v18492_v53, %v18490_v23  ;;  %v18496_v45 = vand.u32 4294901760, %v18495_v56  ;;  %v18497_v44 = vld [vmem:[#allocation77_spill] sm:$0xff]  ;;  %v18501_v23 = vand.u32 4294901760, %v18500_v0  ;;  %v18502_v53 = vld [vmem:[#allocation55_spill] sm:$0xff]  ;;  %v15448_v16 = vpack.c.bf16 %v14886_v41, %v14881_v21 }
 0x111   :  { %18489 = vst [vmem:[#allocation97_spill] sm:$0xff] %v15410_v32  ;;  %v15459_v4 = vpack.c.bf16 %v18448_v25, %v14894_v34  ;;  %v15464_v14 = vpack.c.bf16 %v14929_v17, %v14921_v39  ;;  %v15469_v21 = vpack.c.bf16 %v14945_v54, %v14934_v29  ;;  %v15474_v41 = vpack.c.bf16 %v14985_v47, %v14980_v13  ;;  %v18536_v25 = vld [vmem:[#allocation35_spill] sm:$0xff] }
 0x112   :  { %18493 = vst [vmem:[#allocation75_spill] sm:$0xff] %v15421_v46  ;;  %v15479_v34 = vpack.c.bf16 %v14995_v7, %v14990_v51  ;;  %v15484_v17 = vpack.c.bf16 %v15024_v27, %v15017_v38  ;;  %v15489_v29 = vpack.c.bf16 %v15062_v8, %v15029_v26  ;;  %v15494_v39 = vpack.c.bf16 %v15072_v31, %v15067_v15  ;;  %v18523_v27 = vld [vmem:[#allocation23_spill] sm:$0xff]  ;;  %v18525_v8 = vld [vmem:[#allocation24_spill] sm:$0xff]  ;;  %v18527_v31 = vld [vmem:[#allocation25_spill] sm:$0xff] }
 0x113   :  { %11902 = vmatpush1.bf16.msra.mxu0 %v15392_v61  ;;  %v18498_v61 = vand.u32 4294901760, %v18497_v44  ;;  %18508 = vst [vmem:[#allocation79_spill] sm:$0xff] %v15459_v4  ;;  %18509 = vst [vmem:[#allocation55_spill] sm:$0xff] %v15464_v14  ;;  %v15499_v7 = vpack.c.bf16 %v15085_v57, %v15077_v35  ;;  %v15504_v54 = vpack.c.bf16 %v15095_v43, %v15090_v58  ;;  %v18526_v15 = vand.u32 4294901760, %v18482_v19  ;;  %v18528_v35 = vld [vmem:[#allocation26_spill] sm:$0xff]  ;;  %v18529_v57 = vld [vmem:[#allocation27_spill] sm:$0xff] }
 0x114   :  { %11904 = vmatprep.subr.bf16.mxu0 %v15404_v18  ;;  %v18503_v18 = vand.u32 4294901760, %v18502_v53  ;;  %18510 = vst [vmem:[#allocation98_spill] sm:$0xff] %v15469_v21  ;;  %18511 = vst [vmem:[#allocation99_spill] sm:$0xff] %v15474_v41  ;;  %v15509_v13 = vpack.c.bf16 %v15127_v36, %v15120_v20  ;;  %v15514_v51 = vpack.c.bf16 %v18491_v2, %v15132_v49  ;;  %v18524_v20 = vld [vmem:[#allocation48_spill] sm:$0xff]  ;;  %v18531_v43 = vld [vmem:[#allocation29_spill] sm:$0xff] }
 0x115   :  { %v15432_v42 = vpack.c.bf16 %v18498_v61, %v18496_v45  ;;  %v18505_v61 = vand.u32 4294901760, %v15211_v6  ;;  %18512 = vst [vmem:[#allocation100_spill] sm:$0xff] %v15479_v34  ;;  %18513 = vst [vmem:[#allocation101_spill] sm:$0xff] %v15484_v17  ;;  %v15519_v47 = vpack.c.bf16 %v18497_v44, %v18495_v56  ;;  %v15524_v26 = vpack.c.bf16 %v18502_v53, %v18500_v0  ;;  %v18530_v58 = vld [vmem:[#allocation28_spill] sm:$0xff]  ;;  %v18532_v36 = vld [vmem:[#allocation30_spill] sm:$0xff] }
 0x116   :  { %v15443_v22 = vpack.c.bf16 %v18503_v18, %v18501_v23  ;;  %18514 = vst [vmem:[#allocation102_spill] sm:$0xff] %v15489_v29  ;;  %18515 = vst [vmem:[#allocation103_spill] sm:$0xff] %v15494_v39  ;;  %v15529_v38 = vpack.c.bf16 %v15219_v9, %v15211_v6  ;;  %v18533_v49 = vld [vmem:[#allocation31_spill] sm:$0xff]  ;;  %v18534_v9 = vld [vmem:[#allocation32_spill] sm:$0xff] }
 0x117   :  { %18499 = vst [vmem:[#allocation62_spill] sm:$0xff] %v15432_v42  ;;  %11906 = vmatpush1.bf16.msra.mxu0 %v15415_v55  ;;  %v15454_v45 = vpack.c.bf16 %v18506_v37, %v18505_v61  ;;  %18516 = vst [vmem:[#allocation104_spill] sm:$0xff] %v15499_v7  ;;  %v18535_v6 = vld [vmem:[#allocation33_spill] sm:$0xff]  ;;  %v18537_v44 = vld [vmem:[#allocation36_spill] sm:$0xff] }
 0x118   :  { %18504 = vst [vmem:[#allocation76_spill] sm:$0xff] %v15443_v22  ;;  %11908 = vmatprep.subr.bf16.mxu0 %v15426_v12  ;;  %18517 = vst [vmem:[#allocation105_spill] sm:$0xff] %v15504_v54  ;;  %v18538_v19 = vld [vmem:[#allocation38_spill] sm:$0xff]  ;;  %v18541_v56 = vld [vmem:[#allocation51_spill] sm:$0xff] }
 0x119   :  { %18507 = vst [vmem:[#allocation77_spill] sm:$0xff] %v15454_v45  ;;  %18518 = vst [vmem:[#allocation106_spill] sm:$0xff] %v15509_v13  ;;  %v18539_v18 = vld [vmem:[#allocation42_spill] sm:$0xff]  ;;  %v18542_v0 = vld [vmem:[#allocation52_spill] sm:$0xff] }
 0x11a   :  { %18519 = vst [vmem:[#allocation107_spill] sm:$0xff] %v15514_v51  ;;  %18520 = vst [vmem:[#allocation108_spill] sm:$0xff] %v15519_v47  ;;  %v18540_v2 = vld [vmem:[#allocation50_spill] sm:$0xff]  ;;  %v18543_v23 = vld [vmem:[#allocation53_spill] sm:$0xff] }
 0x11b   :  { %11910 = vmatpush1.bf16.msra.mxu0 %v15437_v30  ;;  %18521 = vst [vmem:[#allocation109_spill] sm:$0xff] %v15524_v26  ;;  %18522 = vst [vmem:[#allocation110_spill] sm:$0xff] %v15529_v38  ;;  %v18544_v53 = vld [vmem:[#allocation54_spill] sm:$0xff]  ;;  %v18545_v61 = vld [vmem:[#allocation57_spill] sm:$0xff] }
 0x11c   :  { %11912 = vmatprep.subr.bf16.mxu0 %v15448_v16  ;;  %v18546_v37 = vld [vmem:[#allocation58_spill] sm:$0xff] }
 0x11f   :  { %11914 = vmatpush1.bf16.msra.mxu0 %v15459_v4 }
 0x120   :  { %11916 = vmatprep.subr.bf16.mxu0 %v15464_v14 }
 0x123   :  { %11918 = vmatpush1.bf16.msra.mxu0 %v15469_v21 }
 0x124   :  { %11920 = vmatprep.subr.bf16.mxu0 %v15474_v41  ;;  %v18562_v41 = vmov 0.0  }
 0x127   :  { %11922 = vmatpush1.bf16.msra.mxu0 %v15479_v34  ;;  %v18558_v34 = vld [vmem:[#allocation83_spill] sm:$0xff] }
 0x128   :  { %11924 = vmatprep.subr.bf16.mxu0 %v15484_v17  ;;  %v18557_v17 = vld [vmem:[#allocation82_spill] sm:$0xff] }
 0x12b   :  { %11926 = vmatpush1.bf16.msra.mxu0 %v15489_v29  ;;  %v18556_v29 = vld [vmem:[#allocation49_spill] sm:$0xff] }
 0x12c   :  { %11928 = vmatprep.subr.bf16.mxu0 %v15494_v39  ;;  %v18555_v39 = vld [vmem:[#allocation47_spill] sm:$0xff] }
 0x12f   :  { %11930 = vmatpush1.bf16.msra.mxu0 %v15499_v7  ;;  %v18554_v7 = vld [vmem:[#allocation46_spill] sm:$0xff] }
 0x130   :  { %11932 = vmatprep.subr.bf16.mxu0 %v15504_v54  ;;  %v18553_v54 = vld [vmem:[#allocation45_spill] sm:$0xff] }
 0x133   :  { %11934 = vmatpush1.bf16.msra.mxu0 %v15509_v13  ;;  %v18552_v13 = vld [vmem:[#allocation34_spill] sm:$0xff] }
 0x134   :  { %11936 = vmatprep.subr.bf16.mxu0 %v15514_v51  ;;  %v18551_v51 = vld [vmem:[#allocation43_spill] sm:$0xff] }
 0x137   :  { %11938 = vmatpush1.bf16.msra.mxu0 %v15519_v47  ;;  %v18550_v47 = vand.u32 4294901760, %v18524_v20 }
 0x138   :  { %11940 = vmatprep.subr.bf16.mxu0 %v15524_v26  ;;  %v18549_v26 = vld [vmem:[#allocation41_spill] sm:$0xff] }
 0x13b   :  { %11942 = vmatpush1.bf16.msra.mxu0 %v15529_v38  ;;  %v18548_v38 = vld [vmem:[#allocation60_spill] sm:$0xff] }
 0x13c   :  { %11944 = vmatprep.subr.bf16.mxu0 %v18523_v27 }
 0x13e   :  { %820 = vmatmul.mubr.f32.vlgmr.msra.gmra.mrb[0].mxu0 %v18524_v20  ;;  %v18560_v20 = vld [vmem:[#allocation65_spill] sm:$0xff] }
 0x13f   :  { %11946 = vmatpush1.bf16.msra.mxu0 %v18525_v8  ;;  %941 = vmatprep.mubr.f32.mxu0 %v18526_v15  ;;  %v18547_v15 = vld [vmem:[#allocation59_spill] sm:$0xff] }
 0x140   :  { %11948 = vmatprep.subr.bf16.mxu0 %v18527_v31 }
 0x143   :  { %11950 = vmatpush1.bf16.msra.mxu0 %v18528_v35 }
 0x144   :  { %11952 = vmatprep.subr.bf16.mxu0 %v18529_v57 }
 0x147   :  { %11954 = vmatpush1.bf16.msra.mxu0 %v18530_v58 }
 0x148   :  { %11956 = vmatprep.subr.bf16.mxu0 %v18531_v43 }
 0x14b   :  { %11958 = vmatpush1.bf16.msra.mxu0 %v18532_v36 }
 0x14c   :  { %11960 = vmatprep.subr.bf16.mxu0 %v18533_v49 }
 0x14f   :  { %11962 = vmatpush1.bf16.msra.mxu0 %v18534_v9 }
 0x150   :  { %11964 = vmatprep.subr.bf16.mxu0 %v18535_v6 }
 0x153   :  { %11966 = vmatpush1.bf16.msra.mxu0 %v18536_v25 }
 0x154   :  { %11968 = vmatprep.subr.bf16.mxu0 %v18537_v44 }
 0x157   :  { %11970 = vmatpush1.bf16.msra.mxu0 %v18538_v19 }
 0x158   :  { %11972 = vmatprep.subr.bf16.mxu0 %v18539_v18 }
 0x15b   :  { %11974 = vmatpush1.bf16.msra.mxu0 %v18540_v2 }
 0x15c   :  { %11976 = vmatprep.subr.bf16.mxu0 %v18541_v56 }
 0x15f   :  { %11978 = vmatpush1.bf16.msra.mxu0 %v18542_v0 }
 0x160   :  { %11980 = vmatprep.subr.bf16.mxu0 %v18543_v23 }
 0x163   :  { %11982 = vmatpush1.bf16.msra.mxu0 %v18544_v53 }
 0x164   :  { %11984 = vmatprep.subr.bf16.mxu0 %v18545_v61 }
 0x167   :  { %11986 = vmatpush1.bf16.msra.mxu0 %v18546_v37 }
 0x168   :  { %11988 = vmatprep.subr.bf16.mxu0 %v18547_v15 }
 0x16b   :  { %11990 = vmatpush1.bf16.msra.mxu0 %v18548_v38 }
 0x16c   :  { %11992 = vmatprep.subr.bf16.mxu0 %v18549_v26  ;;  %v18559_v26 = vld [vmem:[#allocation84_spill] sm:$0xff] }
 0x16e   :  { %945 = vmatmul.mubr.f32.vlgmr.msra.gmra.mrb[0].mxu0 %v18550_v47  ;;  %v1293_v47 = vld [vmem:[%s17972_s3] sm:$0xff] }
 0x16f   :  { %11994 = vmatpush1.bf16.msra.mxu0 %v18551_v51  ;;  %1160 = vmatprep.mubr.f32.mxu0 %v18552_v13 }
 0x170   :  { %11996 = vmatprep.subr.bf16.mxu0 %v18553_v54 }
 0x173   :  { %11998 = vmatpush1.bf16.msra.mxu0 %v18554_v7 }
 0x174   :  { %12000 = vmatprep.subr.bf16.mxu0 %v18555_v39 }
 0x177   :  { %12002 = vmatpush1.bf16.msra.mxu0 %v18556_v29 }
 0x178   :  { %12004 = vmatprep.subr.bf16.mxu0 %v18557_v17 }
 0x17b   :  { %12006 = vmatpush1.bf16.msra.mxu0 %v18558_v34 }
 0x17c   :  { %12008 = vmatprep.subr.bf16.mxu0 %v18559_v26 }
 0x17f   :  { %12010 = vmatpush1.bf16.msra.mxu0 %v18560_v20 }
 0x180   :  { %12012 = vmatprep.subr.bf16.mxu0 %v15317_v48 }
 0x183   :  { %12014 = vmatpush1.bf16.msra.mxu0 %v15326_v24 }
 0x184   :  { %12016 = vmatprep.subr.bf16.mxu0 %v15335_v60 }
 0x187   :  { %12018 = vmatpush1.bf16.msra.mxu0 %v15344_v5 }
 0x188   :  { %12020 = vmatprep.subr.bf16.mxu0 %v15353_v33 }
 0x18b   :  { %12022 = vmatpush1.bf16.msra.mxu0 %v15364_v11 }
 0x18c   :  { %12024 = vmatprep.subr.bf16.mxu0 %v15375_v40 }
 0x18f   :  { %12026 = vmatpush1.bf16.msra.mxu0 %v15386_v50 }
 0x190   :  { %12028 = vmatprep.subr.bf16.mxu0 %v15399_v3 }
 0x193   :  { %12030 = vmatpush1.bf16.msra.mxu0 %v15410_v32  ;;  %v1291_v32 = vld [vmem:[%s18561_s17 + $0x10] sm:$0xff] }
 0x194   :  { %12032 = vmatprep.subr.bf16.mxu0 %v15421_v46  ;;  %v1325_v40 = vsel %vm1317_vm1, %v1291_v32, 0 }
 0x197   :  { %12034 = vmatpush1.bf16.msra.mxu0 %v15432_v42  ;;  %v3219_v42 = vld [vmem:[%s17974_s5 + $0x8] sm:$0xff] }
 0x198   :  { %12036 = vmatprep.subr.bf16.mxu0 %v15443_v22  ;;  %v1295_v22 = vld [vmem:[%s17972_s3 + $0x10] sm:$0xff] }
 0x19b   :  { %12038 = vmatpush1.bf16.msra.mxu0 %v15454_v45  ;;  %v14051_v45 = vmov 0  }
 0x19c   :  { %12040 = vmatprep.subr.bf16.mxu0 %v18523_v27  ;;  %13568 = vset.pattern.permute.xlu0 %v14051_v45 }
 0x19d   :  { %13569 = vset.pattern.permute.xlu1 %v14051_v45  ;;  %1299 = vperm.xlu0 %13568, %v1293_v47   ;;  %v3218_v45 = vld [vmem:[%s17974_s5] sm:$0xff] }
 0x19e   :  { %1162 = vmatmul.mubr.f32.vlgmr.msra.gmra.mrb[0].mxu0 %v18480_v59  ;;  %1309 = vperm.xlu1 %13569, %v1295_v22   ;;  %v1289_v22 = vld [vmem:[%s18561_s17] sm:$0xff] }
 0x19f   :  { %12042 = vmatpush1.bf16.msra.mxu0 %v18525_v8  ;;  %1281 = vmatprep.mubr.f32.mxu0 %v18552_v13  ;;  %v18159_v13 = vmov 0.0   ;;  %v1319_v47 = vsel %vm1317_vm1, %v1289_v22, 0 }
 0x1a0   :  { %12044 = vmatprep.subr.bf16.mxu0 %v18527_v31  ;;  %1396 = vmatprep.mubr.f32.mxu1 %v18159_v13 }
 0x1a3   :  { %12046 = vmatpush1.bf16.msra.mxu0 %v18528_v35 }
 0x1a4   :  { %12048 = vmatprep.subr.bf16.mxu0 %v18529_v57 }
 0x1a7   :  { %12050 = vmatpush1.bf16.msra.mxu0 %v18530_v58 }
 0x1a8   :  { %12052 = vmatprep.subr.bf16.mxu0 %v18531_v43 }
 0x1ab   :  { %12054 = vmatpush1.bf16.msra.mxu0 %v18532_v36 }
 0x1ac   :  { %12056 = vmatprep.subr.bf16.mxu0 %v18533_v49 }
 0x1af   :  { %12058 = vmatpush1.bf16.msra.mxu0 %v18534_v9 }
 0x1b0   :  { %12060 = vmatprep.subr.bf16.mxu0 %v18535_v6 }
 0x1b3   :  { %12062 = vmatpush1.bf16.msra.mxu0 %v18536_v25 }
 0x1b4   :  { %12064 = vmatprep.subr.bf16.mxu0 %v18537_v44 }
 0x1b7   :  { %12066 = vmatpush1.bf16.msra.mxu0 %v18538_v19 }
 0x1b8   :  { %12068 = vmatprep.subr.bf16.mxu0 %v18539_v18 }
 0x1bb   :  { %12070 = vmatpush1.bf16.msra.mxu0 %v18540_v2 }
 0x1bc   :  { %12072 = vmatprep.subr.bf16.mxu0 %v18541_v56 }
 0x1bf   :  { %12074 = vmatpush1.bf16.msra.mxu0 %v18542_v0 }
 0x1c0   :  { %12076 = vmatprep.subr.bf16.mxu0 %v18543_v23 }
 0x1c3   :  { %12078 = vmatpush1.bf16.msra.mxu0 %v18544_v53 }
 0x1c4   :  { %12080 = vmatprep.subr.bf16.mxu0 %v18545_v61 }
 0x1c7   :  { %12082 = vmatpush1.bf16.msra.mxu0 %v18546_v37 }
 0x1c8   :  { %12084 = vmatprep.subr.bf16.mxu0 %v18547_v15 }
 0x1cb   :  { %12086 = vmatpush1.bf16.msra.mxu0 %v18548_v38 }
 0x1ce   :  { %1283 = vmatmul.mubr.f32.vlgmr.msra.gmra.mrb[0].mxu0 %v18480_v59  ;;  %v1294_v59 = vld [vmem:[%s17972_s3 + $0x8] sm:$0xff] }
 0x1cf   :  { %3309 = vmatprep.mubr.f32.mxu0 %v18159_v13  ;;  %v1296_v13 = vld [vmem:[%s17972_s3 + $0x18] sm:$0xff]  ;;  %1304 = vperm.xlu0 %13568, %v1294_v59   ;;  %v15640_v59 = vand.u32 4294901760, %v1319_v47 }
 0x1d0   :  { %1314 = vperm.xlu1 %13569, %v1296_v13   ;;  %v1290_v13 = vld [vmem:[%s18561_s17 + $0x8] sm:$0xff] }
 0x1d1   :  { %v1322_v46 = vsel %vm1317_vm1, %v1290_v13, 0  ;;  %v15646_v3 = vsub.f32 %v1319_v47, %v15640_v59  ;;  %v15657_v13 = vand.u32 4294901760, %v1325_v40 }
 0x1d2   :  { %v15648_v50 = vand.u32 4294901760, %v1322_v46 }
 0x1d3   :  { %3222 = vperm.xlu0 %13568, %v3218_v45   ;;  %v1399_v45 = vand.u32 4294901760, %v15646_v3  ;;  %v15662_v5 = vsub.f32 %v1325_v40, %v15657_v13 }
 0x1d4   :  { %3227 = vperm.xlu1 %13569, %v3219_v42   ;;  %v1292_v42 = vld [vmem:[%s18561_s17 + $0x18] sm:$0xff]  ;;  %v15655_v22 = vsub.f32 %v1322_v46, %v15648_v50 }
 0x1d5   :  { %v1328_v11 = vsel %vm1317_vm1, %v1292_v42, 0  ;;  %v1400_v33 = vsub.f32 %v15646_v3, %v1399_v45  ;;  %v1421_v34 = vand.u32 4294901760, %v15662_v5 }
 0x1d6   :  { %v1410_v47 = vand.u32 4294901760, %v15655_v22  ;;  %v15664_v32 = vand.u32 4294901760, %v1328_v11 }
 0x1d7   :  { %v1401_v20 = vand.u32 4294901760, %v1400_v33  ;;  %v1422_v54 = vsub.f32 %v15662_v5, %v1421_v34 }
 0x1d8   :  { %v1411_v46 = vsub.f32 %v15655_v22, %v1410_v47  ;;  %v1431_v42 = vsub.f32 %v1328_v11, %v15664_v32 }
 0x1d9   :  { %v1423_v11 = vand.u32 4294901760, %v1422_v54 }
 0x1da   :  { %v1412_v7 = vand.u32 4294901760, %v1411_v46  ;;  %v1432_v33 = vand.u32 4294901760, %v1431_v42 }
 0x1dc   :  { %v1433_v4 = vsub.f32 %v1431_v42, %v1432_v33 }
 0x2a1   :  { %v1284_v60 = vpop.f32.mrb[0].mxu0 }
 0x2a2   :  { %v15666_v24 = vand.u32 4294901760, %v1284_v60  ;;  %v1286_v48 = vpop.f32.mrb[1].mxu0 }
 0x2a3   :  { %v1330_v26 = vand.u32 4294901760, %v1286_v48 }
 0x2a4   :  { %v1448_v17 = vsub.f32 %v1284_v60, %v15666_v24 }
 0x2a5   :  { %v1442_v29 = vsub.f32 %v1286_v48, %v1330_v26  ;;  %1331 = vmatprep.subr.mxu1 %v1330_v26  ;;  %v1434_v48 = vand.u32 4294901760, %v1433_v4 }
 0x2a6   :  { %v1449_v40 = vand.u32 4294901760, %v1448_v17  ;;  %1333 = vmatpush1.msra.mxu1 %v15666_v24 }
 0x2a7   :  { %v1443_v39 = vand.u32 4294901760, %v1442_v29  ;;  %1402 = vmatmul.mubr.f32.vlgmr.msra.gmra.mrb[0].mxu1 %v1401_v20 }
 0x2a8   :  { %v1450_v51 = vsub.f32 %v1448_v17, %v1449_v40  ;;  %1407 = vmatprep.mubr.f32.mxu1 %v18562_v41 }
 0x2a9   :  { %v1444_v21 = vsub.f32 %v1442_v29, %v1443_v39 }
 0x2aa   :  { %v1451_v60 = vand.u32 4294901760, %v1450_v51 }
 0x2ab   :  { %1413 = vmatmul.mubr.f32.gmra.mrb[2].mxu1 %v1412_v7  ;;  %v1445_v14 = vand.u32 4294901760, %v1444_v21 }
 0x2ac   :  { %1418 = vmatprep.mubr.f32.mxu1 %v18562_v41 }
 0x2ad   :  { %1446 = vmatprep.subr.mxu1 %v1445_v14 }
 0x2ae   :  { %1452 = vmatpush1.msra.mxu1 %v1451_v60 }
 0x2af   :  { %1424 = vmatmul.mubr.f32.gmra.mrb[4].mxu1 %v1423_v11  ;;  %1546 = vmatprep.subr.mxu1 %v1442_v29 }
 0x2b0   :  { %1429 = vmatprep.mubr.f32.mxu1 %v18562_v41 }
 0x2b3   :  { %1435 = vmatmul.mubr.f32.gmra.mrb[6].mxu1 %v1434_v48 }
 0x2b4   :  { %1515 = vmatprep.mubr.f32.mxu1 %v18562_v41 }
 0x2b7   :  { %1517 = vmatmul.mubr.f32.vlgmr.msra.gmra.mrb[0].mxu1 %v15640_v59 }
 0x2b8   :  { %1549 = vmatpush1.msra.mxu1 %v1448_v17  ;;  %1522 = vmatprep.mubr.f32.mxu1 %v18562_v41 }
 0x2b9   :  { %1646 = vmatprep.subr.mxu1 %v1330_v26 }
 0x2bb   :  { %1524 = vmatmul.mubr.f32.gmra.mrb[2].mxu1 %v15648_v50 }
 0x2bc   :  { %1529 = vmatprep.mubr.f32.mxu1 %v18562_v41 }
 0x2bf   :  { %1531 = vmatmul.mubr.f32.gmra.mrb[4].mxu1 %v15657_v13 }
 0x2c0   :  { %1536 = vmatprep.mubr.f32.mxu1 %v18562_v41 }
 0x2c3   :  { %1538 = vmatmul.mubr.f32.gmra.mrb[6].mxu1 %v15664_v32 }
 0x2c4   :  { %1612 = vmatprep.mubr.f32.mxu1 %v18562_v41 }
 0x2c7   :  { %1615 = vmatmul.mubr.f32.vlgmr.msra.gmra.mrb[0].mxu1 %v15646_v3 }
 0x2c8   :  { %1648 = vmatpush1.msra.mxu1 %v15666_v24  ;;  %1620 = vmatprep.mubr.f32.mxu1 %v18562_v41 }
 0x2c9   :  { %1751 = vmatprep.subr.mxu1 %v1443_v39  ;;  %v1310_v39 = vpop.permute.xlu1 %1309 }
 0x2cb   :  { %1623 = vmatmul.mubr.f32.gmra.mrb[2].mxu1 %v15655_v22 }
 0x2cc   :  { %1628 = vmatprep.mubr.f32.mxu1 %v18562_v41 }
 0x2cd   :  { %v1315_v60 = vpop.permute.xlu1 %1314 }
 0x2cf   :  { %1631 = vmatmul.mubr.f32.gmra.mrb[4].mxu1 %v15662_v5  ;;  %v1300_v5 = vpop.permute.xlu0 %1299 }
 0x2d0   :  { %1636 = vmatprep.mubr.f32.mxu1 %v18562_v41 }
 0x2d3   :  { %1639 = vmatmul.mubr.f32.gmra.mrb[6].mxu1 %v1431_v42 }
 0x2d4   :  { %1711 = vmatprep.mubr.f32.mxu1 %v18562_v41 }
 0x2d7   :  { %1715 = vmatmul.mubr.f32.vlgmr.msra.gmra.mrb[0].mxu1 %v1399_v45 }
 0x2d8   :  { %1755 = vmatpush1.msra.mxu1 %v1449_v40  ;;  %1720 = vmatprep.mubr.f32.mxu1 %v18562_v41 }
 0x2d9   :  { %1848 = vmatprep.subr.mxu1 %v1330_v26 }
 0x2db   :  { %1724 = vmatmul.mubr.f32.gmra.mrb[2].mxu1 %v1410_v47 }
 0x2dc   :  { %1729 = vmatprep.mubr.f32.mxu1 %v18562_v41 }
 0x2df   :  { %1733 = vmatmul.mubr.f32.gmra.mrb[4].mxu1 %v1421_v34  ;;  %v1305_v34 = vpop.permute.xlu0 %1304 }
 0x2e0   :  { %1738 = vmatprep.mubr.f32.mxu1 %v18562_v41 }
 0x2e3   :  { %1742 = vmatmul.mubr.f32.gmra.mrb[6].mxu1 %v1432_v33 }
 0x2e4   :  { %1818 = vmatprep.mubr.f32.mxu1 %v18562_v41 }
 0x2e7   :  { %1820 = vmatmul.mubr.f32.vlgmr.msra.gmra.mrb[0].mxu1 %v15640_v59 }
 0x2e8   :  { %1850 = vmatpush1.msra.mxu1 %v15666_v24  ;;  %1825 = vmatprep.mubr.f32.mxu1 %v18562_v41  ;;  %v18563_v24 = vld [vmem:[#allocation61_spill] sm:$0xff] }
 0x2e9   :  { %12088 = vmatprep.subr.bf16.mxu1 %v18523_v27 }
 0x2eb   :  { %1827 = vmatmul.mubr.f32.gmra.mrb[2].mxu1 %v15648_v50 }
 0x2ec   :  { %1832 = vmatprep.mubr.f32.mxu1 %v18562_v41 }
 0x2ef   :  { %1834 = vmatmul.mubr.f32.gmra.mrb[4].mxu1 %v15657_v13 }
 0x2f0   :  { %1839 = vmatprep.mubr.f32.mxu1 %v18562_v41 }
 0x2f3   :  { %1841 = vmatmul.mubr.f32.gmra.mrb[6].mxu1 %v15664_v32 }
 0x2f4   :  { %1913 = vmatprep.mubr.f32.mxu1 %v18562_v41 }
 0x2f7   :  { %1915 = vmatmul.mubr.f32.vlgmr.msra.gmra.mrb[0].mxu1 %v15640_v59 }
 0x2f8   :  { %1920 = vmatprep.mubr.f32.mxu1 %v18562_v41  ;;  %12090 = vmatpush1.bf16.msra.mxu1 %v18525_v8 }
 0x2f9   :  { %12092 = vmatprep.subr.bf16.mxu1 %v18527_v31 }
 0x2fb   :  { %1922 = vmatmul.mubr.f32.gmra.mrb[2].mxu1 %v15648_v50 }
 0x2fc   :  { %1927 = vmatprep.mubr.f32.mxu1 %v18562_v41  ;;  %12094 = vmatpush1.bf16.msra.mxu1 %v18528_v35 }
 0x2fd   :  { %12096 = vmatprep.subr.bf16.mxu1 %v18529_v57 }
 0x2ff   :  { %1929 = vmatmul.mubr.f32.gmra.mrb[4].mxu1 %v15657_v13 }
 0x300   :  { %1934 = vmatprep.mubr.f32.mxu1 %v18562_v41  ;;  %12098 = vmatpush1.bf16.msra.mxu1 %v18530_v58 }
 0x301   :  { %12100 = vmatprep.subr.bf16.mxu1 %v18531_v43 }
 0x303   :  { %1936 = vmatmul.mubr.f32.gmra.mrb[6].mxu1 %v15664_v32 }
 0x304   :  { %12102 = vmatpush1.bf16.msra.mxu1 %v18532_v36 }
 0x305   :  { %12104 = vmatprep.subr.bf16.mxu1 %v18533_v49 }
 0x308   :  { %12106 = vmatpush1.bf16.msra.mxu1 %v18534_v9 }
 0x309   :  { %12108 = vmatprep.subr.bf16.mxu1 %v18535_v6 }
 0x30c   :  { %12110 = vmatpush1.bf16.msra.mxu1 %v18536_v25 }
 0x30d   :  { %12112 = vmatprep.subr.bf16.mxu1 %v18537_v44 }
 0x310   :  { %12114 = vmatpush1.bf16.msra.mxu1 %v18538_v19 }
 0x311   :  { %12116 = vmatprep.subr.bf16.mxu1 %v18539_v18 }
 0x314   :  { %12118 = vmatpush1.bf16.msra.mxu1 %v18540_v2 }
 0x315   :  { %12120 = vmatprep.subr.bf16.mxu1 %v18541_v56 }
 0x318   :  { %12122 = vmatpush1.bf16.msra.mxu1 %v18542_v0 }
 0x319   :  { %12124 = vmatprep.subr.bf16.mxu1 %v18543_v23 }
 0x31c   :  { %12126 = vmatpush1.bf16.msra.mxu1 %v18544_v53 }
 0x31d   :  { %12128 = vmatprep.subr.bf16.mxu1 %v18545_v61 }
 0x320   :  { %12130 = vmatpush1.bf16.msra.mxu1 %v18546_v37 }
 0x321   :  { %12132 = vmatprep.subr.bf16.mxu1 %v18547_v15 }
 0x324   :  { %12134 = vmatpush1.bf16.msra.mxu1 %v18548_v38 }
 0x325   :  { %12136 = vmatprep.subr.bf16.mxu1 %v18563_v24 }
 0x3ca   :  { %v1916_v50 = vpop.f32.mrb[0].mxu1 }
 0x3cb   :  { %v13359_v3 = vadd.f32 %v1916_v50, %v1300_v5  ;;  %v1918_v4 = vpop.f32.mrb[1].mxu1 }
 0x3cc   :  { %v13360_v14 = vadd.f32 %v1918_v4, %v1300_v5 }
 0x3cd   :  { %v15739_v21 = vand.u32 4294901760, %v13359_v3 }
 0x3ce   :  { %v1943_v17 = vsel %vm209_vm0, %v13360_v14, 0  ;;  %v1923_v29 = vpop.f32.mrb[2].mxu1 }
 0x3cf   :  { %v15743_v7 = vsub.f32 %v13359_v3, %v15739_v21  ;;  %v15745_v54 = vand.u32 4294901760, %v1943_v17  ;;  %v13361_v51 = vadd.f32 %v1923_v29, %v1305_v34  ;;  %v1925_v26 = vpop.f32.mrb[3].mxu1 }
 0x3d0   :  { %v13362_v20 = vadd.f32 %v1925_v26, %v1305_v34 }
 0x3d1   :  { %v18177_v59 = vand.u32 4294901760, %v15743_v7  ;;  %v15749_v45 = vsub.f32 %v1943_v17, %v15745_v54  ;;  %v15751_v22 = vand.u32 4294901760, %v13361_v51 }
 0x3d2   :  { %v1946_v13 = vsel %vm209_vm0, %v13362_v20, 0  ;;  %v1930_v47 = vpop.f32.mrb[4].mxu1 }
 0x3d3   :  { %v15755_v32 = vsub.f32 %v13361_v51, %v15751_v22  ;;  %v15757_v46 = vand.u32 4294901760, %v1946_v13  ;;  %v13363_v42 = vadd.f32 %v1930_v47, %v1310_v39  ;;  %v1932_v40 = vpop.f32.mrb[5].mxu1  ;;  %v2075_v33 = vsub.f32 %v15743_v7, %v18177_v59 }
 0x3d4   :  { %v13364_v11 = vadd.f32 %v1932_v40, %v1310_v39  ;;  %v18179_v48 = vand.u32 4294901760, %v15749_v45 }
 0x3d5   :  { %v15764_v24 = vsub.f32 %v1946_v13, %v15757_v46  ;;  %v15766_v5 = vand.u32 4294901760, %v13363_v42  ;;  %v18178_v50 = vand.u32 4294901760, %v15755_v32  ;;  %v2076_v26 = vand.u32 4294901760, %v2075_v33 }
 0x3d6   :  { %v1949_v3 = vsel %vm209_vm0, %v13364_v11, 0  ;;  %v1937_v4 = vpop.f32.mrb[6].mxu1  ;;  %v2069_v14 = vsub.f32 %v15749_v45, %v18179_v48 }
 0x3d7   :  { %v15774_v34 = vsub.f32 %v13363_v42, %v15766_v5  ;;  %v15776_v17 = vand.u32 4294901760, %v1949_v3  ;;  %v13365_v29 = vadd.f32 %v1937_v4, %v1315_v60  ;;  %v1939_v39 = vpop.f32.mrb[7].mxu1  ;;  %v18180_v51 = vand.u32 4294901760, %v15764_v24 }
 0x3d8   :  { %v13366_v20 = vadd.f32 %v1939_v39, %v1315_v60  ;;  %v2070_v13 = vand.u32 4294901760, %v2069_v14  ;;  %v2091_v47 = vsub.f32 %v15755_v32, %v18178_v50  ;;  %v18564_v39 = vld [vmem:[#allocation63_spill] sm:$0xff] }
 0x3d9   :  { %v15783_v40 = vsub.f32 %v1949_v3, %v15776_v17  ;;  %v15785_v11 = vand.u32 4294901760, %v13365_v29  ;;  %v2085_v42 = vsub.f32 %v15764_v24, %v18180_v51  ;;  %v18181_v4 = vand.u32 4294901760, %v15774_v34  ;;  %v18565_v51 = vld [vmem:[#allocation64_spill] sm:$0xff] }
 0x3da   :  { %v1952_v59 = vsel %vm209_vm0, %v13366_v20, 0  ;;  %2071 = vmatprep.mubr.f32.mxu1 %v2070_v13  ;;  %v2092_v50 = vand.u32 4294901760, %v2091_v47 }
 0x3db   :  { %v15793_v33 = vsub.f32 %v13365_v29, %v15785_v11  ;;  %v15795_v60 = vand.u32 4294901760, %v1952_v59  ;;  %2077 = vmatmul.mubr.f32.vlgmr.msra.gmra.mrb[8].mxu1 %v2076_v26  ;;  %v2086_v14 = vand.u32 4294901760, %v2085_v42  ;;  %v2100_v3 = vand.u32 4294901760, %v15783_v40  ;;  %v18566_v42 = vld [vmem:[#allocation66_spill] sm:$0xff] }
 0x3dc   :  { %12138 = vmatpush1.bf16.msra.mxu1 %v18564_v39  ;;  %v2107_v26 = vsub.f32 %v15774_v34, %v18181_v4 }
 0x3dd   :  { %v15800_v48 = vsub.f32 %v1952_v59, %v15795_v60  ;;  %2087 = vmatprep.mubr.f32.mxu1 %v2086_v14  ;;  %12140 = vmatprep.subr.bf16.mxu1 %v18565_v51  ;;  %v2101_v29 = vsub.f32 %v15783_v40, %v2100_v3  ;;  %v18183_v20 = vand.u32 4294901760, %v15793_v33  ;;  %v18567_v59 = vld [vmem:[#allocation67_spill] sm:$0xff] }
 0x3de   :  { %v2108_v51 = vand.u32 4294901760, %v2107_v26  ;;  %v18571_v26 = vld [vmem:[#allocation71_spill] sm:$0xff] }
 0x3df   :  { %2093 = vmatmul.mubr.f32.gmra.mrb[10].mxu1 %v2092_v50  ;;  %v2102_v13 = vand.u32 4294901760, %v2101_v29  ;;  %v18182_v47 = vand.u32 4294901760, %v15800_v48  ;;  %v2123_v39 = vsub.f32 %v15793_v33, %v18183_v20  ;;  %v18568_v50 = vld [vmem:[#allocation68_spill] sm:$0xff]  ;;  %v18569_v29 = vld [vmem:[#allocation69_spill] sm:$0xff]  ;;  %v18574_v20 = vld [vmem:[#allocation74_spill] sm:$0xff] }
 0x3e0   :  { %12142 = vmatpush1.bf16.msra.mxu1 %v18566_v42 }
 0x3e1   :  { %2103 = vmatprep.mubr.f32.mxu1 %v2102_v13  ;;  %12144 = vmatprep.subr.bf16.mxu1 %v18567_v59  ;;  %v2117_v14 = vsub.f32 %v15800_v48, %v18182_v47  ;;  %v2124_v42 = vand.u32 4294901760, %v2123_v39  ;;  %v18570_v13 = vld [vmem:[#allocation70_spill] sm:$0xff]  ;;  %v18572_v59 = vld [vmem:[#allocation72_spill] sm:$0xff]  ;;  %v18573_v47 = vld [vmem:[#allocation73_spill] sm:$0xff] }
 0x3e2   :  { %v18578_v39 = vld [vmem:[#allocation80_spill] sm:$0xff] }
 0x3e3   :  { %2109 = vmatmul.mubr.f32.gmra.mrb[12].mxu1 %v2108_v51  ;;  %v2118_v4 = vand.u32 4294901760, %v2117_v14  ;;  %v18575_v51 = vld [vmem:[#allocation39_spill] sm:$0xff]  ;;  %v18576_v14 = vld [vmem:[#allocation40_spill] sm:$0xff] }
 0x3e4   :  { %12146 = vmatpush1.bf16.msra.mxu1 %v18568_v50  ;;  %v18579_v50 = vld [vmem:[#allocation56_spill] sm:$0xff] }
 0x3e5   :  { %2119 = vmatprep.mubr.f32.mxu1 %v2118_v4  ;;  %12148 = vmatprep.subr.bf16.mxu1 %v18569_v29  ;;  %v18577_v4 = vld [vmem:[#allocation78_spill] sm:$0xff]  ;;  %v18580_v29 = vld [vmem:[#allocation81_spill] sm:$0xff] }
 0x3e7   :  { %2125 = vmatmul.mubr.f32.gmra.mrb[14].mxu1 %v2124_v42  ;;  %v18583_v42 = vld [vmem:[#allocation94_spill] sm:$0xff] }
 0x3e8   :  { %12150 = vmatpush1.bf16.msra.mxu1 %v18570_v13  ;;  %2436 = vmatprep.mubr.f32.mxu1 %v15745_v54  ;;  %v18590_v13 = vld [vmem:[#allocation100_spill] sm:$0xff] }
 0x3e9   :  { %12152 = vmatprep.subr.bf16.mxu1 %v18571_v26  ;;  %v18593_v26 = vld [vmem:[#allocation103_spill] sm:$0xff] }
 0x3ec   :  { %12154 = vmatpush1.bf16.msra.mxu1 %v18572_v59  ;;  %v18595_v59 = vld [vmem:[#allocation105_spill] sm:$0xff] }
 0x3ed   :  { %12156 = vmatprep.subr.bf16.mxu1 %v18573_v47  ;;  %v18582_v47 = vld [vmem:[#allocation92_spill] sm:$0xff] }
 0x3f0   :  { %12158 = vmatpush1.bf16.msra.mxu1 %v18574_v20  ;;  %v18581_v20 = vld [vmem:[#allocation90_spill] sm:$0xff] }
 0x3f1   :  { %12160 = vmatprep.subr.bf16.mxu1 %v18575_v51  ;;  %v18597_v51 = vld [vmem:[#allocation107_spill] sm:$0xff] }
 0x3f4   :  { %12162 = vmatpush1.bf16.msra.mxu1 %v18576_v14  ;;  %v18598_v14 = vld [vmem:[#allocation108_spill] sm:$0xff] }
 0x3f5   :  { %12164 = vmatprep.subr.bf16.mxu1 %v18577_v4  ;;  %v18599_v4 = vld [vmem:[#allocation109_spill] sm:$0xff] }
 0x3f8   :  { %12166 = vmatpush1.bf16.msra.mxu1 %v18578_v39  ;;  %v18600_v39 = vld [vmem:[#allocation110_spill] sm:$0xff] }
 0x3f9   :  { %12168 = vmatprep.subr.bf16.mxu1 %v18579_v50  ;;  %v18601_v50 = vand.u32 4294901760, %v15749_v45 }
 0x3fc   :  { %12170 = vmatpush1.bf16.msra.mxu1 %v18580_v29  ;;  %v18603_v29 = vand.u32 4294901760, %v15743_v7 }
 0x3fd   :  { %12172 = vmatprep.subr.bf16.mxu1 %v15226_v62  ;;  %v18584_v62 = vld [vmem:[#allocation44_spill] sm:$0xff] }
 0x400   :  { %12174 = vmatpush1.bf16.msra.mxu1 %v15304_v63  ;;  %v18585_v63 = vld [vmem:[#allocation96_spill] sm:$0xff] }
 0x401   :  { %12176 = vmatprep.subr.bf16.mxu1 %v15320_v10  ;;  %v18586_v10 = vld [vmem:[#allocation79_spill] sm:$0xff] }
 0x404   :  { %12178 = vmatpush1.bf16.msra.mxu1 %v15329_v52  ;;  %v18587_v52 = vld [vmem:[#allocation55_spill] sm:$0xff] }
 0x405   :  { %12180 = vmatprep.subr.bf16.mxu1 %v15338_v1  ;;  %v18588_v1 = vld [vmem:[#allocation98_spill] sm:$0xff] }
 0x408   :  { %12182 = vmatpush1.bf16.msra.mxu1 %v15347_v28  ;;  %v18589_v28 = vld [vmem:[#allocation99_spill] sm:$0xff] }
 0x409   :  { %12184 = vmatprep.subr.bf16.mxu1 %v18581_v20  ;;  %v18604_v20 = vand.u32 4294901760, %v15764_v24 }
 0x40b   :  { %2438 = vmatmul.mubr.f32.vlgmr.msra.gmra.mrb[8].mxu1 %v15739_v21 }
 0x40c   :  { %2444 = vmatprep.mubr.f32.mxu1 %v15757_v46  ;;  %12186 = vmatpush1.bf16.msra.mxu1 %v18582_v47  ;;  %v18605_v47 = vld [vmem:[#allocation43_spill] sm:$0xff] }
 0x40d   :  { %12188 = vmatprep.subr.bf16.mxu1 %v18583_v42  ;;  %v18606_v42 = vld [vmem:[#allocation45_spill] sm:$0xff] }
 0x40f   :  { %2446 = vmatmul.mubr.f32.gmra.mrb[10].mxu1 %v15751_v22 }
 0x410   :  { %2452 = vmatprep.mubr.f32.mxu1 %v15776_v17  ;;  %12190 = vmatpush1.bf16.msra.mxu1 %v18584_v62  ;;  %v18607_v62 = vand.u32 4294901760, %v15755_v32 }
 0x411   :  { %12192 = vmatprep.subr.bf16.mxu1 %v18585_v63  ;;  %v18608_v63 = vld [vmem:[#allocation46_spill] sm:$0xff] }
 0x413   :  { %2454 = vmatmul.mubr.f32.gmra.mrb[12].mxu1 %v15766_v5 }
 0x414   :  { %2460 = vmatprep.mubr.f32.mxu1 %v15795_v60  ;;  %12194 = vmatpush1.bf16.msra.mxu1 %v15415_v55  ;;  %v18591_v55 = vld [vmem:[#allocation101_spill] sm:$0xff] }
 0x415   :  { %12196 = vmatprep.subr.bf16.mxu1 %v15426_v12  ;;  %v18592_v12 = vld [vmem:[#allocation102_spill] sm:$0xff] }
 0x417   :  { %2462 = vmatmul.mubr.f32.gmra.mrb[14].mxu1 %v15785_v11 }
 0x418   :  { %12198 = vmatpush1.bf16.msra.mxu1 %v15437_v30  ;;  %2630 = vmatprep.mubr.f32.mxu1 %v15749_v45  ;;  %v18594_v30 = vld [vmem:[#allocation104_spill] sm:$0xff]  ;;  %v18602_v45 = vld [vmem:[#allocation41_spill] sm:$0xff] }
 0x419   :  { %12200 = vmatprep.subr.bf16.mxu1 %v15448_v16  ;;  %v18596_v16 = vld [vmem:[#allocation106_spill] sm:$0xff] }
 0x41c   :  { %12202 = vmatpush1.bf16.msra.mxu1 %v18586_v10  ;;  %v18609_v10 = vld [vmem:[#allocation47_spill] sm:$0xff] }
 0x41d   :  { %12204 = vmatprep.subr.bf16.mxu1 %v18587_v52  ;;  %v18612_v52 = vld [vmem:[#allocation49_spill] sm:$0xff] }
 0x420   :  { %12206 = vmatpush1.bf16.msra.mxu1 %v18588_v1  ;;  %v18613_v1 = vld [vmem:[#allocation82_spill] sm:$0xff] }
 0x421   :  { %12208 = vmatprep.subr.bf16.mxu1 %v18589_v28  ;;  %v18615_v28 = vld [vmem:[#allocation83_spill] sm:$0xff] }
 0x424   :  { %12210 = vmatpush1.bf16.msra.mxu1 %v18590_v13  ;;  %v18619_v13 = vld [vmem:[#allocation86_spill] sm:$0xff] }
 0x425   :  { %12212 = vmatprep.subr.bf16.mxu1 %v18591_v55  ;;  %v18621_v55 = vld [vmem:[#allocation88_spill] sm:$0xff] }
 0x428   :  { %12214 = vmatpush1.bf16.msra.mxu1 %v18592_v12  ;;  %v18622_v12 = vld [vmem:[#allocation89_spill] sm:$0xff] }
 0x429   :  { %12216 = vmatprep.subr.bf16.mxu1 %v18593_v26  ;;  %v18624_v26 = vld [vmem:[#allocation93_spill] sm:$0xff] }
 0x42c   :  { %12218 = vmatpush1.bf16.msra.mxu1 %v18594_v30  ;;  %v18625_v30 = vld [vmem:[#allocation95_spill] sm:$0xff] }
 0x42d   :  { %12220 = vmatprep.subr.bf16.mxu1 %v18595_v59  ;;  %v18626_v59 = vld [vmem:[#allocation37_spill] sm:$0xff] }
 0x430   :  { %12222 = vmatpush1.bf16.msra.mxu1 %v18596_v16  ;;  %v18627_v16 = vld [vmem:[#allocation97_spill] sm:$0xff] }
 0x431   :  { %12224 = vmatprep.subr.bf16.mxu1 %v18597_v51  ;;  %v18628_v51 = vld [vmem:[#allocation75_spill] sm:$0xff] }
 0x434   :  { %12226 = vmatpush1.bf16.msra.mxu1 %v18598_v14  ;;  %v18629_v14 = vld [vmem:[#allocation62_spill] sm:$0xff] }
 0x435   :  { %12228 = vmatprep.subr.bf16.mxu1 %v18599_v4  ;;  %v18630_v4 = vld [vmem:[#allocation76_spill] sm:$0xff] }
 0x438   :  { %12230 = vmatpush1.bf16.msra.mxu1 %v18600_v39  ;;  %v18631_v39 = vld [vmem:[#allocation77_spill] sm:$0xff] }
 0x439   :  { %12232 = vmatprep.subr.bf16.mxu1 %v18523_v27 }
 0x43b   :  { %2633 = vmatmul.mubr.f32.vlgmr.msra.gmra.mrb[8].mxu1 %v15743_v7  ;;  %v18610_v7 = vand.u32 4294901760, %v15774_v34 }
 0x43c   :  { %2640 = vmatprep.mubr.f32.mxu1 %v15764_v24  ;;  %12234 = vmatpush1.bf16.msra.mxu1 %v18525_v8  ;;  %v18611_v24 = vand.u32 4294901760, %v15800_v48 }
 0x43d   :  { %12236 = vmatprep.subr.bf16.mxu1 %v18527_v31 }
 0x43f   :  { %2643 = vmatmul.mubr.f32.gmra.mrb[10].mxu1 %v15755_v32  ;;  %v18614_v32 = vand.u32 4294901760, %v15793_v33 }
 0x440   :  { %2650 = vmatprep.mubr.f32.mxu1 %v15783_v40  ;;  %12238 = vmatpush1.bf16.msra.mxu1 %v18528_v35  ;;  %v18616_v40 = vld [vmem:[#allocation84_spill] sm:$0xff] }
 0x441   :  { %12240 = vmatprep.subr.bf16.mxu1 %v18529_v57 }
 0x443   :  { %2653 = vmatmul.mubr.f32.gmra.mrb[12].mxu1 %v15774_v34  ;;  %v18618_v34 = vld [vmem:[#allocation85_spill] sm:$0xff] }
 0x444   :  { %2660 = vmatprep.mubr.f32.mxu1 %v15800_v48  ;;  %12242 = vmatpush1.bf16.msra.mxu1 %v18530_v58  ;;  %v18620_v48 = vld [vmem:[#allocation87_spill] sm:$0xff] }
 0x445   :  { %12244 = vmatprep.subr.bf16.mxu1 %v18531_v43 }
 0x447   :  { %2663 = vmatmul.mubr.f32.gmra.mrb[14].mxu1 %v15793_v33  ;;  %v18623_v33 = vld [vmem:[#allocation91_spill] sm:$0xff] }
 0x448   :  { %12246 = vmatpush1.bf16.msra.mxu1 %v18532_v36  ;;  %2784 = vmatprep.mubr.f32.mxu1 %v18601_v50  ;;  %v3842_v50 = vld [vmem:[%s17975_s6 + $0x68] sm:$0xff] }
 0x449   :  { %12248 = vmatprep.subr.bf16.mxu1 %v18533_v49 }
 0x44c   :  { %12250 = vmatpush1.bf16.msra.mxu1 %v18534_v9 }
 0x44d   :  { %12252 = vmatprep.subr.bf16.mxu1 %v18535_v6 }
 0x450   :  { %12254 = vmatpush1.bf16.msra.mxu1 %v18536_v25 }
 0x451   :  { %12256 = vmatprep.subr.bf16.mxu1 %v18537_v44 }
 0x454   :  { %12258 = vmatpush1.bf16.msra.mxu1 %v18538_v19 }
 0x455   :  { %12260 = vmatprep.subr.bf16.mxu1 %v18539_v18 }
 0x458   :  { %12262 = vmatpush1.bf16.msra.mxu1 %v18540_v2 }
 0x459   :  { %12264 = vmatprep.subr.bf16.mxu1 %v18541_v56 }
 0x45c   :  { %12266 = vmatpush1.bf16.msra.mxu1 %v18542_v0 }
 0x45d   :  { %12268 = vmatprep.subr.bf16.mxu1 %v18543_v23 }
 0x460   :  { %12270 = vmatpush1.bf16.msra.mxu1 %v18544_v53 }
 0x461   :  { %12272 = vmatprep.subr.bf16.mxu1 %v18545_v61 }
 0x464   :  { %12274 = vmatpush1.bf16.msra.mxu1 %v18546_v37 }
 0x465   :  { %12276 = vmatprep.subr.bf16.mxu1 %v18547_v15 }
 0x468   :  { %12278 = vmatpush1.bf16.msra.mxu1 %v18548_v38 }
 0x469   :  { %12280 = vmatprep.subr.bf16.mxu1 %v18602_v45  ;;  %v3844_v45 = vld [vmem:[%s17975_s6 + $0x78] sm:$0xff] }
 0x46b   :  { %2788 = vmatmul.mubr.f32.vlgmr.msra.gmra.mrb[8].mxu1 %v18603_v29 }
 0x46c   :  { %2796 = vmatprep.mubr.f32.mxu1 %v18604_v20  ;;  %12282 = vmatpush1.bf16.msra.mxu1 %v18605_v47 }
 0x46d   :  { %12284 = vmatprep.subr.bf16.mxu1 %v18606_v42 }
 0x46f   :  { %2800 = vmatmul.mubr.f32.gmra.mrb[10].mxu1 %v18607_v62 }
 0x470   :  { %2808 = vmatprep.mubr.f32.mxu1 %v2100_v3  ;;  %12286 = vmatpush1.bf16.msra.mxu1 %v18608_v63  ;;  %v18617_v3 = vld [vmem:[#allocation65_spill] sm:$0xff] }
 0x471   :  { %12288 = vmatprep.subr.bf16.mxu1 %v18609_v10  ;;  %v3896_v10 = vand.u32 4294901760, %v3842_v50 }
 0x473   :  { %2812 = vmatmul.mubr.f32.gmra.mrb[12].mxu1 %v18610_v7  ;;  %v3900_v7 = vand.u32 4294901760, %v3844_v45 }
 0x474   :  { %2820 = vmatprep.mubr.f32.mxu1 %v18611_v24  ;;  %12290 = vmatpush1.bf16.msra.mxu1 %v18612_v52  ;;  %v16057_v52 = vsub.f32 %v3842_v50, %v3896_v10 }
 0x475   :  { %12292 = vmatprep.subr.bf16.mxu1 %v18613_v1  ;;  %v16060_v1 = vsub.f32 %v3844_v45, %v3900_v7 }
 0x477   :  { %2824 = vmatmul.mubr.f32.gmra.mrb[14].mxu1 %v18614_v32 }
 0x478   :  { %12294 = vmatpush1.bf16.msra.mxu1 %v18615_v28  ;;  %3039 = vmatprep.mubr.f32.mxu1 %v15745_v54  ;;  %v16067_v28 = vld [vmem:[%s17975_s6 + $0x88] sm:$0xff] }
 0x479   :  { %12296 = vmatprep.subr.bf16.mxu1 %v18616_v40  ;;  %v16072_v40 = vld [vmem:[%s17975_s6 + $0x98] sm:$0xff] }
 0x47c   :  { %12298 = vmatpush1.bf16.msra.mxu1 %v18617_v3 }
 0x47d   :  { %12300 = vmatprep.subr.bf16.mxu1 %v18618_v34  ;;  %v18185_v34 = vand.u32 4294901760, %v16067_v28 }
 0x480   :  { %12302 = vmatpush1.bf16.msra.mxu1 %v18619_v13  ;;  %v18184_v13 = vand.u32 4294901760, %v16072_v40 }
 0x481   :  { %12304 = vmatprep.subr.bf16.mxu1 %v18620_v48 }
 0x482   :  { %v16084_v48 = vpack.c.bf16 %v18184_v13, %v18185_v34 }
 0x484   :  { %12306 = vmatpush1.bf16.msra.mxu1 %v18621_v55  ;;  %v16086_v55 = vpack.c.bf16 %v3900_v7, %v3896_v10 }
 0x485   :  { %12308 = vmatprep.subr.bf16.mxu1 %v18622_v12 }
 0x486   :  { %18632 = vst [vmem:[#allocation23_spill] sm:$0xff] %v16086_v55 }
 0x488   :  { %12310 = vmatpush1.bf16.msra.mxu1 %v18623_v33  ;;  %v3216_v33 = vld [vmem:[%s17973_s4] sm:$0xff] }
 0x489   :  { %12312 = vmatprep.subr.bf16.mxu1 %v18624_v26  ;;  %v3232_v26 = vsel %vm3230_vm2, %v3216_v33, 0 }
 0x48c   :  { %12314 = vmatpush1.bf16.msra.mxu1 %v18625_v30  ;;  %v3217_v30 = vld [vmem:[%s17973_s4 + $0x8] sm:$0xff] }
 0x48d   :  { %12316 = vmatprep.subr.bf16.mxu1 %v18626_v59  ;;  %v16099_v59 = vand.u32 4294901760, %v3232_v26 }
 0x490   :  { %12318 = vmatpush1.bf16.msra.mxu1 %v18627_v16 }
 0x491   :  { %12320 = vmatprep.subr.bf16.mxu1 %v18628_v51 }
 0x494   :  { %12322 = vmatpush1.bf16.msra.mxu1 %v18629_v14 }
 0x495   :  { %12324 = vmatprep.subr.bf16.mxu1 %v18630_v4  ;;  %v3235_v4 = vsel %vm3230_vm2, %v3217_v30, 0 }
 0x498   :  { %12326 = vmatpush1.bf16.msra.mxu1 %v18631_v39 }
 0x499   :  { %12328 = vmatprep.subr.bf16.mxu1 %v18523_v27  ;;  %v3832_v27 = vld [vmem:[%s17975_s6 + $0x18] sm:$0xff] }
 0x49b   :  { %3041 = vmatmul.mubr.f32.vlgmr.msra.gmra.mrb[8].mxu1 %v15739_v21 }
 0x49c   :  { %3047 = vmatprep.mubr.f32.mxu1 %v15757_v46  ;;  %12330 = vmatpush1.bf16.msra.mxu1 %v18525_v8  ;;  %v3829_v8 = vld [vmem:[%s17975_s6] sm:$0xff] }
 0x49d   :  { %12332 = vmatprep.subr.bf16.mxu1 %v18527_v31 }
 0x49f   :  { %3049 = vmatmul.mubr.f32.gmra.mrb[10].mxu1 %v15751_v22 }
 0x4a0   :  { %3055 = vmatprep.mubr.f32.mxu1 %v15776_v17  ;;  %12334 = vmatpush1.bf16.msra.mxu1 %v18528_v35  ;;  %v3876_v35 = vand.u32 4294901760, %v3832_v27 }
 0x4a1   :  { %12336 = vmatprep.subr.bf16.mxu1 %v18529_v57  ;;  %v3831_v57 = vld [vmem:[%s17975_s6 + $0x10] sm:$0xff] }
 0x4a3   :  { %3057 = vmatmul.mubr.f32.gmra.mrb[12].mxu1 %v15766_v5 }
 0x4a4   :  { %3063 = vmatprep.mubr.f32.mxu1 %v15795_v60  ;;  %12338 = vmatpush1.bf16.msra.mxu1 %v18530_v58  ;;  %v3874_v58 = vand.u32 4294901760, %v3829_v8 }
 0x4a5   :  { %12340 = vmatprep.subr.bf16.mxu1 %v18531_v43  ;;  %v3834_v43 = vld [vmem:[%s17975_s6 + $0x28] sm:$0xff] }
 0x4a7   :  { %3065 = vmatmul.mubr.f32.gmra.mrb[14].mxu1 %v15785_v11 }
 0x4a8   :  { %12342 = vmatpush1.bf16.msra.mxu1 %v18532_v36  ;;  %3184 = vmatprep.mubr.f32.mxu1 %v15745_v54  ;;  %v3836_v36 = vld [vmem:[%s17975_s6 + $0x38] sm:$0xff]  ;;  %v3838_v54 = vld [vmem:[%s17975_s6 + $0x48] sm:$0xff] }
 0x4a9   :  { %12344 = vmatprep.subr.bf16.mxu1 %v18533_v49  ;;  %v3878_v49 = vand.u32 4294901760, %v3831_v57 }
 0x4ab   :  { %v16052_v63 = vpack.c.bf16 %v3878_v49, %v3874_v58 }
 0x4ac   :  { %12346 = vmatpush1.bf16.msra.mxu1 %v18534_v9  ;;  %v3880_v9 = vand.u32 4294901760, %v3834_v43 }
 0x4ad   :  { %12348 = vmatprep.subr.bf16.mxu1 %v18535_v6  ;;  %v3884_v6 = vand.u32 4294901760, %v3836_v36 }
 0x4af   :  { %v16044_v29 = vpack.c.bf16 %v3884_v6, %v3880_v9 }
 0x4b0   :  { %12350 = vmatpush1.bf16.msra.mxu1 %v18536_v25  ;;  %v3833_v25 = vld [vmem:[%s17975_s6 + $0x20] sm:$0xff] }
 0x4b1   :  { %12352 = vmatprep.subr.bf16.mxu1 %v18537_v44 }
 0x4b4   :  { %12354 = vmatpush1.bf16.msra.mxu1 %v18538_v19 }
 0x4b5   :  { %12356 = vmatprep.subr.bf16.mxu1 %v18539_v18  ;;  %v16008_v18 = vsub.f32 %v3832_v27, %v3876_v35  ;;  %v16105_v27 = vsub.f32 %v3232_v26, %v16099_v59 }
 0x4b8   :  { %12358 = vmatpush1.bf16.msra.mxu1 %v18540_v2  ;;  %v16010_v2 = vsub.f32 %v3829_v8, %v3874_v58 }
 0x4b9   :  { %12360 = vmatprep.subr.bf16.mxu1 %v18541_v56  ;;  %v3835_v56 = vld [vmem:[%s17975_s6 + $0x30] sm:$0xff] }
 0x4bc   :  { %12362 = vmatpush1.bf16.msra.mxu1 %v18542_v0  ;;  %v16015_v0 = vsub.f32 %v3831_v57, %v3878_v49 }
 0x4bd   :  { %12364 = vmatprep.subr.bf16.mxu1 %v18543_v23  ;;  %v16017_v23 = vsub.f32 %v3834_v43, %v3880_v9 }
 0x4c0   :  { %12366 = vmatpush1.bf16.msra.mxu1 %v18544_v53  ;;  %v16019_v53 = vsub.f32 %v3836_v36, %v3884_v6 }
 0x4c1   :  { %12368 = vmatprep.subr.bf16.mxu1 %v18545_v61  ;;  %v3882_v61 = vand.u32 4294901760, %v3833_v25 }
 0x4c4   :  { %12370 = vmatpush1.bf16.msra.mxu1 %v18546_v37  ;;  %v3886_v37 = vand.u32 4294901760, %v3835_v56 }
 0x4c5   :  { %12372 = vmatprep.subr.bf16.mxu1 %v18547_v15  ;;  %v16022_v15 = vsub.f32 %v3833_v25, %v3882_v61  ;;  %v18186_v25 = vand.u32 4294901760, %v16105_v27 }
 0x4c6   :  { %v16074_v3 = vpack.c.bf16 %v3886_v37, %v3882_v61 }
 0x4c7   :  { %v3313_v33 = vsub.f32 %v16105_v27, %v18186_v25 }
 0x4c8   :  { %12374 = vmatpush1.bf16.msra.mxu1 %v18548_v38  ;;  %v3830_v38 = vld [vmem:[%s17975_s6 + $0x8] sm:$0xff] }
 0x4c9   :  { %v3872_v31 = vand.u32 4294901760, %v3830_v38 }
 0x4cb   :  { %3186 = vmatmul.mubr.f32.vlgmr.msra.gmra.mrb[8].mxu1 %v15739_v21  ;;  %v16004_v44 = vpack.c.bf16 %v3876_v35, %v3872_v31  ;;  %v16006_v19 = vsub.f32 %v3830_v38, %v3872_v31  ;;  %v16024_v21 = vsub.f32 %v3835_v56, %v3886_v37  ;;  %v16109_v35 = vand.u32 4294901760, %v3235_v4 }
 0x4cc   :  { %3192 = vmatprep.mubr.f32.mxu1 %v15757_v46  ;;  %v3837_v46 = vld [vmem:[%s17975_s6 + $0x40] sm:$0xff] }
 0x4cd   :  { %12424 = vmatprep.subr.bf16.mxu1 %v16004_v44 }
 0x4ce   :  { %12426 = vmatpush1.bf16.msra.mxu1 %v16052_v63 }
 0x4cf   :  { %3194 = vmatmul.mubr.f32.gmra.mrb[10].mxu1 %v15751_v22  ;;  %v3840_v22 = vld [vmem:[%s17975_s6 + $0x58] sm:$0xff]  ;;  %12428 = vmatprep.subr.bf16.mxu1 %v16044_v29 }
 0x4d0   :  { %3200 = vmatprep.mubr.f32.mxu1 %v15776_v17  ;;  %v3892_v17 = vand.u32 4294901760, %v3840_v22 }
 0x4d2   :  { %v16048_v47 = vsub.f32 %v3840_v22, %v3892_v17  ;;  %12430 = vmatpush1.bf16.msra.mxu1 %v16074_v3 }
 0x4d3   :  { %3202 = vmatmul.mubr.f32.gmra.mrb[12].mxu1 %v15766_v5  ;;  %v3888_v5 = vand.u32 4294901760, %v3838_v54 }
 0x4d4   :  { %3208 = vmatprep.mubr.f32.mxu1 %v15795_v60  ;;  %v3890_v60 = vand.u32 4294901760, %v3837_v46 }
 0x4d5   :  { %v16046_v20 = vsub.f32 %v3838_v54, %v3888_v5  ;;  %v16062_v32 = vpack.c.bf16 %v3892_v17, %v3888_v5  ;;  %v16123_v54 = vsub.f32 %v3235_v4, %v16109_v35 }
 0x4d6   :  { %v16050_v62 = vsub.f32 %v3837_v46, %v3890_v60 }
 0x4d7   :  { %3210 = vmatmul.mubr.f32.gmra.mrb[14].mxu1 %v15785_v11  ;;  %v3839_v11 = vld [vmem:[%s17975_s6 + $0x50] sm:$0xff]  ;;  %12432 = vmatprep.subr.bf16.mxu1 %v16062_v32 }
 0x4d8   :  { %3960 = vmatprep.mubr.f32.mxu1 %v18562_v41  ;;  %v3894_v42 = vand.u32 4294901760, %v3839_v11 }
 0x4da   :  { %v16054_v24 = vsub.f32 %v3839_v11, %v3894_v42  ;;  %v16088_v12 = vpack.c.bf16 %v3894_v42, %v3890_v60 }
 0x4dc   :  { %18633 = vst [vmem:[#allocation48_spill] sm:$0xff] %v16088_v12  ;;  %12434 = vmatpush1.bf16.msra.mxu1 %v16088_v12  ;;  %v18634_v12 = vand.u32 4294901760, %v16123_v54 }
 0x4dd   :  { %12436 = vmatprep.subr.bf16.mxu1 %v16086_v55 }
 0x59e   :  { %v3187_v16 = vpop.f32.mrb[8].mxu1 }
 0x59f   :  { %v3239_v51 = vand.u32 4294901760, %v3187_v16  ;;  %v3189_v14 = vpop.f32.mrb[9].mxu1 }
 0x5a0   :  { %v3237_v39 = vand.u32 4294901760, %v3189_v14 }
 0x5a1   :  { %v16102_v38 = vsub.f32 %v3187_v16, %v3239_v51 }
 0x5a2   :  { %v16107_v8 = vsub.f32 %v3189_v14, %v3237_v39  ;;  %v3195_v31 = vpop.f32.mrb[10].mxu1 }
 0x5a3   :  { %v3340_v57 = vand.u32 4294901760, %v16102_v38  ;;  %v3243_v58 = vand.u32 4294901760, %v3195_v31  ;;  %v3197_v43 = vpop.f32.mrb[11].mxu1 }
 0x5a4   :  { %v3334_v36 = vand.u32 4294901760, %v16107_v8  ;;  %v3241_v49 = vand.u32 4294901760, %v3197_v43 }
 0x5a5   :  { %v16113_v9 = vpack.c.bf16 %v3243_v58, %v3239_v51  ;;  %v16115_v6 = vsub.f32 %v3195_v31, %v3243_v58  ;;  %v3341_v22 = vsub.f32 %v16102_v38, %v3340_v57 }
 0x5a6   :  { %v16118_v56 = vpack.c.bf16 %v3241_v49, %v3237_v39  ;;  %v16120_v61 = vsub.f32 %v3197_v43, %v3241_v49  ;;  %v3203_v37 = vpop.f32.mrb[12].mxu1  ;;  %v3335_v60 = vsub.f32 %v16107_v8, %v3334_v36 }
 0x5a7   :  { %v3352_v46 = vand.u32 4294901760, %v16115_v6  ;;  %v3247_v17 = vand.u32 4294901760, %v3203_v37  ;;  %v3205_v11 = vpop.f32.mrb[13].mxu1  ;;  %v3342_v39 = vand.u32 4294901760, %v3341_v22  ;;  %v3314_v22 = vand.u32 4294901760, %v3313_v33 }
 0x5a8   :  { %v3346_v50 = vand.u32 4294901760, %v16120_v61  ;;  %v3245_v45 = vand.u32 4294901760, %v3205_v11  ;;  %12376 = vmatprep.subr.bf16.mxu0 %v16118_v56  ;;  %v12391_v42 = vpack.c.bf16 %v16120_v61, %v16107_v8  ;;  %v3336_v13 = vand.u32 4294901760, %v3335_v60 }
 0x5a9   :  { %v3353_v10 = vsub.f32 %v16115_v6, %v3352_v46  ;;  %v3363_v7 = vsub.f32 %v3203_v37, %v3247_v17  ;;  %12378 = vmatpush1.bf16.msra.mxu0 %v16113_v9  ;;  %v16139_v26 = vpack.c.bf16 %v3352_v46, %v3340_v57  ;;  %v3324_v60 = vsub.f32 %v16123_v54, %v18634_v12 }
 0x5aa   :  { %v3347_v30 = vsub.f32 %v16120_v61, %v3346_v50  ;;  %v3357_v16 = vsub.f32 %v3205_v11, %v3245_v45  ;;  %v3211_v51 = vpop.f32.mrb[14].mxu1  ;;  %v12407_v4 = vpack.c.bf16 %v3346_v50, %v3334_v36  ;;  %v18210_v12 = vand.u32 4294901760, %v16006_v19 }
 0x5ab   :  { %v3354_v8 = vand.u32 4294901760, %v3353_v10  ;;  %v3364_v31 = vand.u32 4294901760, %v3363_v7  ;;  %v3251_v58 = vand.u32 4294901760, %v3211_v51  ;;  %v3213_v43 = vpop.f32.mrb[15].mxu1 }
 0x5ac   :  { %v3358_v49 = vand.u32 4294901760, %v3357_v16  ;;  %v3249_v37 = vand.u32 4294901760, %v3213_v43  ;;  %v3348_v34 = vand.u32 4294901760, %v3347_v30 }
 0x5ad   :  { %v16143_v5 = vpack.c.bf16 %v3251_v58, %v3247_v17  ;;  %v3375_v57 = vsub.f32 %v3211_v51, %v3251_v58  ;;  %v12385_v46 = vpack.c.bf16 %v3354_v8, %v3342_v39  ;;  %v3365_v55 = vsub.f32 %v3363_v7, %v3364_v31 }
 0x5ae   :  { %v16145_v25 = vpack.c.bf16 %v3249_v37, %v3245_v45  ;;  %v3369_v61 = vsub.f32 %v3213_v43, %v3249_v37  ;;  %v12383_v11 = vpack.c.bf16 %v3348_v34, %v3336_v13  ;;  %v3359_v50 = vsub.f32 %v3357_v16, %v3358_v49 }
 0x5af   :  { %v3376_v14 = vand.u32 4294901760, %v3375_v57  ;;  %v12397_v36 = vpack.c.bf16 %v3375_v57, %v3363_v7  ;;  %v3366_v13 = vand.u32 4294901760, %v3365_v55  ;;  %v3325_v7 = vand.u32 4294901760, %v3324_v60 }
 0x5b0   :  { %v3370_v10 = vand.u32 4294901760, %v3369_v61  ;;  %12380 = vmatprep.subr.bf16.mxu0 %v16145_v25  ;;  %v12395_v17 = vpack.c.bf16 %v3369_v61, %v3357_v16  ;;  %v3360_v33 = vand.u32 4294901760, %v3359_v50  ;;  %v18635_v55 = vpack.c.bf16 %v16115_v6, %v16102_v38 }
 0x5b1   :  { %v3377_v30 = vsub.f32 %v3375_v57, %v3376_v14  ;;  %12382 = vmatpush1.bf16.msra.mxu0 %v16143_v5  ;;  %v12413_v45 = vpack.c.bf16 %v3376_v14, %v3364_v31  ;;  %v18209_v38 = vand.u32 4294901760, %v16008_v18  ;;  %v18208_v6 = vand.u32 4294901760, %v16010_v2 }
 0x5b2   :  { %v3371_v51 = vsub.f32 %v3369_v61, %v3370_v10  ;;  %12384 = vmatprep.subr.bf16.mxu0 %v12383_v11  ;;  %v12411_v34 = vpack.c.bf16 %v3370_v10, %v3358_v49  ;;  %v18206_v16 = vand.u32 4294901760, %v16017_v23  ;;  %v18195_v14 = vand.u32 4294901760, %v16019_v53  ;;  %v16205_v61 = vld [vmem:[%s17975_s6 + $0x70] sm:$0xff] }
 0x5b3   :  { %v3378_v39 = vand.u32 4294901760, %v3377_v30  ;;  %v3986_v31 = vsub.f32 %v16006_v19, %v18210_v12  ;;  %v3998_v49 = vsub.f32 %v16008_v18, %v18209_v38  ;;  %v18636_v37 = vand.u32 4294901760, %v16105_v27 }
 0x5b4   :  { %3315 = vmatmul.mubr.f32.vlgmr.msra.gmra.mrb[2].mxu0 %v3314_v22  ;;  %v3372_v8 = vand.u32 4294901760, %v3371_v51  ;;  %v18194_v22 = vand.u32 4294901760, %v16022_v15  ;;  %v18193_v50 = vand.u32 4294901760, %v16024_v21  ;;  %v18637_v10 = vand.u32 4294901760, %v16123_v54 }
 0x5b5   :  { %12386 = vmatpush1.bf16.msra.mxu0 %v12385_v46  ;;  %3320 = vmatprep.mubr.f32.mxu0 %v18562_v41  ;;  %v12389_v58 = vpack.c.bf16 %v3378_v39, %v3366_v13  ;;  %v4010_v46 = vsub.f32 %v16017_v23, %v18206_v16  ;;  %v3987_v11 = vand.u32 4294901760, %v3986_v31  ;;  %v18192_v60 = vand.u32 4294901760, %v16046_v20 }
 0x5b6   :  { %v12387_v43 = vpack.c.bf16 %v3372_v8, %v3360_v33  ;;  %v18213_v51 = vand.u32 4294901760, %v16205_v61  ;;  %v4028_v8 = vsub.f32 %v16024_v21, %v18193_v50  ;;  %v18196_v31 = vand.u32 4294901760, %v16054_v24 }
 0x5b7   :  { %v4011_v39 = vand.u32 4294901760, %v4010_v46  ;;  %v18197_v46 = vand.u32 4294901760, %v16060_v1 }
 0x5b8   :  { %3326 = vmatmul.mubr.f32.gmra.mrb[4].mxu0 %v3325_v7  ;;  %12388 = vmatprep.subr.bf16.mxu0 %v12387_v43 }
 0x5b9   :  { %12390 = vmatpush1.bf16.msra.mxu0 %v12389_v58  ;;  %3436 = vmatprep.mubr.f32.mxu0 %v18562_v41  ;;  %v4034_v58 = vsub.f32 %v16046_v20, %v18192_v60 }
 0x5ba   :  { %12392 = vmatprep.subr.bf16.mxu0 %v12391_v42  ;;  %v18207_v42 = vand.u32 4294901760, %v16015_v0 }
 0x5bc   :  { %3438 = vmatmul.mubr.f32.vlgmr.msra.gmra.mrb[2].mxu0 %v16099_v59  ;;  %v4004_v57 = vsub.f32 %v16015_v0, %v18207_v42 }
 0x5bd   :  { %12394 = vmatpush1.bf16.msra.mxu0 %v18635_v55  ;;  %3443 = vmatprep.mubr.f32.mxu0 %v18562_v41  ;;  %v18205_v55 = vand.u32 4294901760, %v16050_v62 }
 0x5be   :  { %12396 = vmatprep.subr.bf16.mxu0 %v12395_v17  ;;  %v18191_v17 = vand.u32 4294901760, %v16048_v47  ;;  %v4005_v13 = vand.u32 4294901760, %v4004_v57 }
 0x5c0   :  { %3445 = vmatmul.mubr.f32.gmra.mrb[4].mxu0 %v16109_v35  ;;  %v4046_v43 = vsub.f32 %v16048_v47, %v18191_v17 }
 0x5c1   :  { %12398 = vmatpush1.bf16.msra.mxu0 %v12397_v36  ;;  %3531 = vmatprep.mubr.f32.mxu0 %v18562_v41  ;;  %v3999_v36 = vand.u32 4294901760, %v3998_v49 }
 0x5c2   :  { %12400 = vmatprep.subr.bf16.mxu0 %v16118_v56 }
 0x5c3   :  { %v16227_v7 = vpack.c.bf16 %v3999_v36, %v3987_v11  ;;  %v18639_v36 = vand.u32 4294901760, %v16072_v40 }
 0x5c4   :  { %3534 = vmatmul.mubr.f32.vlgmr.msra.gmra.mrb[2].mxu0 %v16105_v27  ;;  %v4022_v27 = vsub.f32 %v16019_v53, %v18195_v14  ;;  %v4047_v14 = vand.u32 4294901760, %v4046_v43 }
 0x5c5   :  { %12402 = vmatpush1.bf16.msra.mxu0 %v16113_v9  ;;  %3539 = vmatprep.mubr.f32.mxu0 %v18562_v41 }
 0x5c6   :  { %12404 = vmatprep.subr.bf16.mxu0 %v16145_v25  ;;  %v4023_v33 = vand.u32 4294901760, %v4022_v27  ;;  %v18638_v27 = vand.u32 4294901760, %v16067_v28 }
 0x5c8   :  { %3542 = vmatmul.mubr.f32.gmra.mrb[4].mxu0 %v16123_v54  ;;  %v16220_v54 = vld [vmem:[%s17975_s6 + $0x80] sm:$0xff]  ;;  %v16264_v11 = vsub.f32 %v16067_v28, %v18638_v27  ;;  %v16273_v60 = vpack.c.bf16 %v4023_v33, %v4011_v39  ;;  %v4040_v28 = vsub.f32 %v16050_v62, %v18205_v55  ;;  %v4052_v27 = vsub.f32 %v16054_v24, %v18196_v31 }
 0x5c9   :  { %12406 = vmatpush1.bf16.msra.mxu0 %v16143_v5  ;;  %3620 = vmatprep.mubr.f32.mxu0 %v18562_v41  ;;  %v4070_v33 = vsub.f32 %v16060_v1, %v18197_v46 }
 0x5ca   :  { %12408 = vmatprep.subr.bf16.mxu0 %v12407_v4  ;;  %v3992_v4 = vsub.f32 %v16010_v2, %v18208_v6  ;;  %v4053_v31 = vand.u32 4294901760, %v4052_v27 }
 0x5cc   :  { %3624 = vmatmul.mubr.f32.vlgmr.msra.gmra.mrb[2].mxu0 %v18636_v37  ;;  %v16254_v37 = vsub.f32 %v16205_v61, %v18213_v51 }
 0x5cd   :  { %12410 = vmatpush1.bf16.msra.mxu0 %v16139_v26  ;;  %3629 = vmatprep.mubr.f32.mxu0 %v18562_v41  ;;  %v16200_v26 = vld [vmem:[%s17975_s6 + $0x60] sm:$0xff] }
 0x5ce   :  { %12412 = vmatprep.subr.bf16.mxu0 %v12411_v34  ;;  %v3898_v30 = vand.u32 4294901760, %v16200_v26  ;;  %v3993_v34 = vand.u32 4294901760, %v3992_v4  ;;  %v18212_v4 = vand.u32 4294901760, %v16220_v54 }
 0x5d0   :  { %3633 = vmatmul.mubr.f32.gmra.mrb[4].mxu0 %v18637_v10  ;;  %v16249_v49 = vsub.f32 %v16200_v26, %v3898_v30  ;;  %v16269_v10 = vsub.f32 %v16072_v40, %v18639_v36  ;;  %v16271_v17 = vpack.c.bf16 %v4005_v13, %v3993_v34  ;;  %v18199_v34 = vand.u32 4294901760, %v16254_v37 }
 0x5d1   :  { %12414 = vmatpush1.bf16.msra.mxu0 %v12413_v45  ;;  %3727 = vmatprep.mubr.f32.mxu0 %v18562_v41  ;;  %v16225_v45 = vld [vmem:[%s17975_s6 + $0x90] sm:$0xff]  ;;  %v16289_v13 = vsub.f32 %v16220_v54, %v18212_v4  ;;  %v4041_v36 = vand.u32 4294901760, %v4040_v28 }
 0x5d2   :  { %12416 = vmatprep.subr.bf16.mxu0 %v16118_v56  ;;  %v4016_v56 = vsub.f32 %v16022_v15, %v18194_v22  ;;  %v18211_v57 = vand.u32 4294901760, %v16225_v45  ;;  %v4035_v22 = vand.u32 4294901760, %v4034_v58  ;;  %v18200_v40 = vand.u32 4294901760, %v16249_v49 }
 0x5d3   :  { %v16328_v27 = vpack.c.bf16 %v4053_v31, %v4041_v36 }
 0x5d4   :  { %3729 = vmatmul.mubr.f32.vlgmr.msra.gmra.mrb[2].mxu0 %v16099_v59  ;;  %v4017_v50 = vand.u32 4294901760, %v4016_v56  ;;  %v16294_v39 = vsub.f32 %v16225_v45, %v18211_v57  ;;  %v18204_v56 = vand.u32 4294901760, %v16264_v11  ;;  %v16308_v43 = vpack.c.bf16 %v4047_v14, %v4035_v22 }
 0x5d5   :  { %12418 = vmatpush1.bf16.msra.mxu0 %v16113_v9  ;;  %3734 = vmatprep.mubr.f32.mxu0 %v18562_v41  ;;  %v18198_v9 = vand.u32 4294901760, %v16057_v52  ;;  %v4064_v46 = vsub.f32 %v16249_v49, %v18200_v40  ;;  %v4071_v22 = vand.u32 4294901760, %v4070_v33 }
 0x5d6   :  { %12420 = vmatprep.subr.bf16.mxu0 %v16145_v25  ;;  %v4029_v25 = vand.u32 4294901760, %v4028_v8  ;;  %v18201_v8 = vand.u32 4294901760, %v16269_v10 }
 0x5d8   :  { %3736 = vmatmul.mubr.f32.gmra.mrb[4].mxu0 %v16109_v35  ;;  %v16306_v58 = vpack.c.bf16 %v4029_v25, %v4017_v50  ;;  %v18203_v50 = vand.u32 4294901760, %v16294_v39  ;;  %v4082_v25 = vsub.f32 %v16264_v11, %v18204_v56  ;;  %v4094_v28 = vsub.f32 %v16269_v10, %v18201_v8 }
 0x5d9   :  { %12422 = vmatpush1.bf16.msra.mxu0 %v16143_v5  ;;  %3814 = vmatprep.mubr.f32.mxu0 %v18562_v41  ;;  %v4058_v5 = vsub.f32 %v16057_v52, %v18198_v9  ;;  %v4076_v9 = vsub.f32 %v16254_v37, %v18199_v34  ;;  %v4065_v34 = vand.u32 4294901760, %v4064_v46 }
 0x5da   :  { %12448 = vmatprep.subr.bf16.mxu0 %v16227_v7  ;;  %v4100_v33 = vsub.f32 %v16294_v39, %v18203_v50  ;;  %v4095_v31 = vand.u32 4294901760, %v4094_v28  ;;  %v3851_v28 = vld [vmem:[%s17975_s6 + $0xb0] sm:$0xff] }
 0x5db   :  { %v4059_v14 = vand.u32 4294901760, %v4058_v5  ;;  %v4077_v40 = vand.u32 4294901760, %v4076_v9 }
 0x5dc   :  { %3816 = vmatmul.mubr.f32.vlgmr.msra.gmra.mrb[2].mxu0 %v16099_v59  ;;  %v18202_v59 = vand.u32 4294901760, %v16289_v13  ;;  %v4101_v36 = vand.u32 4294901760, %v4100_v33  ;;  %v3918_v33 = vand.u32 4294901760, %v3851_v28 }
 0x5dd   :  { %3821 = vmatprep.mubr.f32.mxu0 %v18562_v41  ;;  %12450 = vmatpush1.bf16.msra.mxu0 %v16271_v17  ;;  %v16339_v8 = vpack.c.bf16 %v4071_v22, %v4059_v14  ;;  %v16342_v46 = vpack.c.bf16 %v4077_v40, %v4065_v34  ;;  %v3850_v14 = vld [vmem:[%s17975_s6 + $0xa8] sm:$0xff]  ;;  %v3852_v40 = vld [vmem:[%s17975_s6 + $0xb8] sm:$0xff] }
 0x5de   :  { %12452 = vmatprep.subr.bf16.mxu0 %v16273_v60  ;;  %v4088_v5 = vsub.f32 %v16289_v13, %v18202_v59  ;;  %v3912_v34 = vand.u32 4294901760, %v3850_v14  ;;  %v3916_v22 = vand.u32 4294901760, %v3852_v40 }
 0x5e0   :  { %3823 = vmatmul.mubr.f32.gmra.mrb[4].mxu0 %v16109_v35  ;;  %v4083_v35 = vand.u32 4294901760, %v4082_v25  ;;  %v4089_v9 = vand.u32 4294901760, %v4088_v5  ;;  %v3849_v25 = vld [vmem:[%s17975_s6 + $0xa0] sm:$0xff]  ;;  %s14052_s6 = smov 32  }
 0x5e1   :  { %12454 = vmatpush1.bf16.msra.mxu0 %v16306_v58  ;;  %4167 = vmatprep.mubr.f32.mxu0 %v18562_v41  ;;  %v3914_v5 = vand.u32 4294901760, %v3849_v25 }
 0x5e2   :  { %12456 = vmatprep.subr.bf16.mxu0 %v16308_v43  ;;  %v16345_v59 = vpack.c.bf16 %v4095_v31, %v4083_v35  ;;  %v16348_v50 = vpack.c.bf16 %v4101_v36, %v4089_v9  ;;  %v16364_v35 = vsub.f32 %v3850_v14, %v3912_v34  ;;  %v16366_v31 = vsub.f32 %v3852_v40, %v3916_v22 }
 0x5e3   :  { %v16368_v9 = vsub.f32 %v3849_v25, %v3914_v5  ;;  %v16370_v36 = vsub.f32 %v3851_v28, %v3918_v33 }
 0x5e4   :  { %v18215_v56 = vand.u32 4294901760, %v16364_v35  ;;  %v18214_v55 = vand.u32 4294901760, %v16366_v31 }
 0x5e5   :  { %12458 = vmatpush1.bf16.msra.mxu0 %v16328_v27  ;;  %v18217_v16 = vand.u32 4294901760, %v16368_v9  ;;  %v18216_v42 = vand.u32 4294901760, %v16370_v36 }
 0x5e6   :  { %12460 = vmatprep.subr.bf16.mxu0 %v16339_v8  ;;  %v4106_v6 = vsub.f32 %v16364_v35, %v18215_v56  ;;  %v4118_v14 = vsub.f32 %v16366_v31, %v18214_v55  ;;  %v18640_v55 = vand.u32 4294901760, %v16205_v61  ;;  %v16413_v61 = vpack.c.bf16 %v3916_v22, %v3912_v34 }
 0x5e7   :  { %v4112_v40 = vsub.f32 %v16368_v9, %v18217_v16  ;;  %v4124_v25 = vsub.f32 %v16370_v36, %v18216_v42  ;;  %v16479_v16 = vpack.c.bf16 %v16060_v1, %v16057_v52 }
 0x5e8   :  { %v4107_v28 = vand.u32 4294901760, %v4106_v6  ;;  %v4119_v38 = vand.u32 4294901760, %v4118_v14  ;;  %v16397_v56 = vpack.c.bf16 %v18640_v55, %v3898_v30  ;;  %v16403_v6 = vpack.c.bf16 %v16008_v18, %v16006_v19 }
 0x5e9   :  { %12462 = vmatpush1.bf16.msra.mxu0 %v16342_v46  ;;  %v4113_v12 = vand.u32 4294901760, %v4112_v40  ;;  %v4125_v57 = vand.u32 4294901760, %v4124_v25  ;;  %v16417_v30 = vpack.c.bf16 %v3918_v33, %v3914_v5  ;;  %v16423_v55 = vpack.c.bf16 %v16366_v31, %v16364_v35  ;;  %v3228_v40 = vpop.permute.xlu1 %3227  ;;  %18648 = vst [vmem:[#allocation29_spill] sm:$0xff] %v16479_v16 }
 0x5ea   :  { %12464 = vmatprep.subr.bf16.mxu0 %v16345_v59  ;;  %v16388_v4 = vpack.c.bf16 %v4119_v38, %v4107_v28  ;;  %12438 = vmatpush1.bf16.msra.mxu1 %v16397_v56  ;;  %v18642_v38 = vand.u32 4294901760, %v16225_v45  ;;  %v3223_v45 = vpop.permute.xlu0 %3222  ;;  %v16433_v33 = vpack.c.bf16 %v16015_v0, %v16010_v2 }
 0x5eb   :  { %v16390_v51 = vpack.c.bf16 %v4125_v57, %v4113_v12  ;;  %12440 = vmatprep.subr.bf16.mxu1 %v16084_v48  ;;  %v18641_v12 = vand.u32 4294901760, %v16220_v54  ;;  %18643 = vst [vmem:[#allocation24_spill] sm:$0xff] %v16423_v55  ;;  %v16427_v54 = vpack.c.bf16 %v16370_v36, %v16368_v9 }
 0x5ed   :  { %12466 = vmatpush1.bf16.msra.mxu0 %v16348_v50  ;;  %v16411_v26 = vpack.c.bf16 %v18642_v38, %v18641_v12  ;;  %18644 = vst [vmem:[#allocation25_spill] sm:$0xff] %v16427_v54 }
 0x5ee   :  { %12468 = vmatprep.subr.bf16.mxu0 %v16388_v4 }
 0x5ef   :  { %12442 = vmatpush1.bf16.msra.mxu1 %v16411_v26 }
 0x5f0   :  { %12444 = vmatprep.subr.bf16.mxu1 %v16413_v61 }
 0x5f1   :  { %12470 = vmatpush1.bf16.msra.mxu0 %v16390_v51 }
 0x5f2   :  { %12472 = vmatprep.subr.bf16.mxu0 %v16403_v6 }
 0x5f3   :  { %12446 = vmatpush1.bf16.msra.mxu1 %v16417_v30 }
 0x5f4   :  { %12568 = vmatprep.subr.bf16.mxu1 %v16004_v44 }
 0x6af   :  { %v3817_v57 = vpop.f32.mrb[2].mxu0 }
 0x6b0   :  { %v13367_v34 = vadd.f32 %v3817_v57, %v3223_v45  ;;  %v3819_v22 = vpop.f32.mrb[3].mxu0 }
 0x6b1   :  { %v13368_v14 = vadd.f32 %v3819_v22, %v3223_v45  ;;  %v16440_v45 = vpack.c.bf16 %v16019_v53, %v16017_v23 }
 0x6b2   :  { %v3867_v5 = vsel %vm3865_vm3, %v13367_v34, 0  ;;  %4674 = vrot.lane.b32.xlu0 %v13367_v34, %s14052_s6 }
 0x6b3   :  { %v16435_v25 = vand.u32 4294901760, %v3867_v5  ;;  %v3824_v28 = vpop.f32.mrb[4].mxu0  ;;  %4676 = vrot.lane.b32.xlu1 %v13368_v14, %s14052_s6  ;;  %v16451_v14 = vpack.c.bf16 %v16024_v21, %v16022_v15 }
 0x6b4   :  { %v13369_v12 = vadd.f32 %v3824_v28, %v3228_v40  ;;  %v3826_v38 = vpop.f32.mrb[5].mxu0 }
 0x6b5   :  { %v16443_v57 = vsub.f32 %v3867_v5, %v16435_v25  ;;  %v13370_v34 = vadd.f32 %v3826_v38, %v3228_v40  ;;  %4169 = vmatmul.mubr.f32.vlgmr.msra.gmra.mrb[6].mxu0 %v16435_v25  ;;  %18645 = vst [vmem:[#allocation26_spill] sm:$0xff] %v16451_v14  ;;  %v16460_v5 = vpack.c.bf16 %v16048_v47, %v16046_v20 }
 0x6b6   :  { %v3870_v22 = vsel %vm3865_vm3, %v13369_v12, 0  ;;  %12474 = vmatpush1.bf16.msra.mxu0 %v16433_v33  ;;  %4678 = vrot.lane.b32.xlu0 %v13369_v12, %s14052_s6  ;;  %v16473_v38 = vpack.c.bf16 %v16054_v24, %v16050_v62 }
 0x6b7   :  { %v18218_v28 = vand.u32 4294901760, %v16443_v57  ;;  %v16454_v42 = vand.u32 4294901760, %v3870_v22  ;;  %4680 = vrot.lane.b32.xlu1 %v13370_v34, %s14052_s6  ;;  %4174 = vmatprep.mubr.f32.mxu0 %v18562_v41  ;;  %18646 = vst [vmem:[#allocation27_spill] sm:$0xff] %v16460_v5 }
 0x6b8   :  { %12476 = vmatprep.subr.bf16.mxu0 %v16440_v45  ;;  %18647 = vst [vmem:[#allocation28_spill] sm:$0xff] %v16473_v38 }
 0x6b9   :  { %v3964_v40 = vsub.f32 %v16443_v57, %v18218_v28  ;;  %v16467_v12 = vsub.f32 %v3870_v22, %v16454_v42  ;;  %4176 = vmatmul.mubr.f32.gmra.mrb[8].mxu0 %v16454_v42 }
 0x6ba   :  { %12478 = vmatpush1.bf16.msra.mxu0 %v16451_v14  ;;  %4294 = vmatprep.mubr.f32.mxu0 %v18562_v41  ;;  %v16487_v14 = vpack.c.bf16 %v16254_v37, %v16249_v49 }
 0x6bb   :  { %v3965_v34 = vand.u32 4294901760, %v3964_v40  ;;  %12480 = vmatprep.subr.bf16.mxu0 %v16460_v5  ;;  %v3974_v22 = vand.u32 4294901760, %v16467_v12  ;;  %v16492_v5 = vpack.c.bf16 %v16269_v10, %v16264_v11 }
 0x6bc   :  { %18649 = vst [vmem:[#allocation30_spill] sm:$0xff] %v16487_v14 }
 0x6bd   :  { %3966 = vmatmul.mubr.f32.vlgmr.msra.gmra.mrb[16].mxu1 %v3965_v34  ;;  %v3975_v28 = vsub.f32 %v16467_v12, %v3974_v22  ;;  %18650 = vst [vmem:[#allocation31_spill] sm:$0xff] %v16492_v5  ;;  %v16499_v34 = vpack.c.bf16 %v16294_v39, %v16289_v13 }
 0x6be   :  { %12482 = vmatpush1.bf16.msra.mxu0 %v16473_v38  ;;  %3971 = vmatprep.mubr.f32.mxu1 %v18562_v41 }
 0x6bf   :  { %12484 = vmatprep.subr.bf16.mxu0 %v16479_v16  ;;  %v3976_v40 = vand.u32 4294901760, %v3975_v28  ;;  %12570 = vmatpush1.bf16.msra.mxu1 %v16052_v63  ;;  %18651 = vst [vmem:[#allocation32_spill] sm:$0xff] %v16499_v34  ;;  %v18652_v28 = vld [vmem:[#allocation48_spill] sm:$0xff]  ;;  %v18659_v16 = vand.u32 4294901760, %v16019_v53  ;;  %v18664_v53 = vand.u32 4294901760, %v16048_v47 }
 0x6c0   :  { %12572 = vmatprep.subr.bf16.mxu1 %v16044_v29 }
 0x6c1   :  { %3977 = vmatmul.mubr.f32.gmra.mrb[18].mxu1 %v3976_v40  ;;  %v18653_v40 = vld [vmem:[#allocation23_spill] sm:$0xff] }
 0x6c2   :  { %12486 = vmatpush1.bf16.msra.mxu0 %v16487_v14  ;;  %4776 = vmatprep.mubr.f32.mxu1 %v18562_v41  ;;  %v18658_v14 = vand.u32 4294901760, %v16017_v23  ;;  %v18663_v23 = vand.u32 4294901760, %v16046_v20  ;;  %v18668_v20 = vand.u32 4294901760, %v16060_v1  ;;  %v18674_v1 = vand.u32 4294901760, %v16294_v39  ;;  %v5489_v39 = vld [vmem:[#allocation2 + $0x8] sm:$0xff] }
 0x6c3   :  { %12488 = vmatprep.subr.bf16.mxu0 %v16492_v5  ;;  %12574 = vmatpush1.bf16.msra.mxu1 %v16074_v3 }
 0x6c4   :  { %12576 = vmatprep.subr.bf16.mxu1 %v16062_v32  ;;  %v16549_v38 = vpack.c.bf16 %v18659_v16, %v18658_v14  ;;  %v16566_v16 = vpack.c.bf16 %v18664_v53, %v18663_v23  ;;  %v18669_v14 = vand.u32 4294901760, %v16249_v49  ;;  %v18675_v49 = vand.u32 4294901760, %v16364_v35  ;;  %v5491_v35 = vld [vmem:[#allocation2 + $0x18] sm:$0xff]  ;;  %v16642_v23 = vld [vmem:[%s17976_s7] sm:$0x3]  ;;  %s14053_s7 = smov 96  }
 0x6c6   :  { %12490 = vmatpush1.bf16.msra.mxu0 %v16499_v34  ;;  %v18657_v34 = vand.u32 4294901760, %v16015_v0 }
 0x6c7   :  { %12492 = vmatprep.subr.bf16.mxu0 %v16423_v55  ;;  %12578 = vmatpush1.bf16.msra.mxu1 %v18652_v28 }
 0x6c8   :  { %12580 = vmatprep.subr.bf16.mxu1 %v18653_v40 }
 0x6ca   :  { %12494 = vmatpush1.bf16.msra.mxu0 %v16427_v54  ;;  %v18655_v54 = vand.u32 4294901760, %v16008_v18  ;;  %v18661_v18 = vand.u32 4294901760, %v16022_v15 }
 0x6cb   :  { %12496 = vmatprep.subr.bf16.mxu0 %v16004_v44  ;;  %12582 = vmatpush1.bf16.msra.mxu1 %v16397_v56 }
 0x6cc   :  { %12584 = vmatprep.subr.bf16.mxu1 %v16084_v48 }
 0x6cd   :  { %4297 = vmatmul.mubr.f32.vlgmr.msra.gmra.mrb[6].mxu0 %v16443_v57 }
 0x6ce   :  { %12498 = vmatpush1.bf16.msra.mxu0 %v16052_v63  ;;  %4302 = vmatprep.mubr.f32.mxu0 %v18562_v41 }
 0x6cf   :  { %12500 = vmatprep.subr.bf16.mxu0 %v16044_v29  ;;  %12586 = vmatpush1.bf16.msra.mxu1 %v16411_v26 }
 0x6d0   :  { %12588 = vmatprep.subr.bf16.mxu1 %v16413_v61 }
 0x6d1   :  { %4305 = vmatmul.mubr.f32.gmra.mrb[8].mxu0 %v16467_v12  ;;  %v18654_v12 = vand.u32 4294901760, %v16006_v19  ;;  %v18660_v19 = vand.u32 4294901760, %v16443_v57  ;;  %v18666_v57 = vand.u32 4294901760, %v16054_v24  ;;  %v18671_v24 = vand.u32 4294901760, %v16264_v11 }
 0x6d2   :  { %12502 = vmatpush1.bf16.msra.mxu0 %v16074_v3  ;;  %4399 = vmatprep.mubr.f32.mxu0 %v18562_v41  ;;  %v18677_v11 = vand.u32 4294901760, %v16368_v9  ;;  %v16637_v9 = vpack.c.bf16 %v5491_v35, %v5489_v39 }
 0x6d3   :  { %12504 = vmatprep.subr.bf16.mxu0 %v16062_v32  ;;  %12590 = vmatpush1.bf16.msra.mxu1 %v16417_v30  ;;  %v16535_v55 = vpack.c.bf16 %v18655_v54, %v18654_v12  ;;  %v18665_v54 = vand.u32 4294901760, %v16050_v62  ;;  %v18670_v62 = vand.u32 4294901760, %v16254_v37  ;;  %v18676_v37 = vand.u32 4294901760, %v16366_v31 }
 0x6d4   :  { %12592 = vmatprep.subr.bf16.mxu1 %v16227_v7  ;;  %v18656_v7 = vand.u32 4294901760, %v16010_v2  ;;  %v18662_v2 = vand.u32 4294901760, %v16024_v21  ;;  %v18667_v21 = vand.u32 4294901760, %v16057_v52  ;;  %v18673_v52 = vand.u32 4294901760, %v16289_v13 }
 0x6d5   :  { %v16573_v15 = vpack.c.bf16 %v18666_v57, %v18665_v54  ;;  %v3855_v13 = vlaneseq  ;;  %v5493_v54 = vld [vmem:[#allocation2 + $0x28] sm:$0xff]  ;;  %v5495_v57 = vld [vmem:[#allocation2 + $0x38] sm:$0xff] }
 0x6d6   :  { %12506 = vmatpush1.bf16.msra.mxu0 %v18652_v28  ;;  %v16542_v5 = vpack.c.bf16 %v18657_v34, %v18656_v7  ;;  %v16559_v0 = vpack.c.bf16 %v18662_v2, %v18661_v18  ;;  %v16581_v47 = vpack.c.bf16 %v18668_v20, %v18667_v21  ;;  %v18672_v34 = vand.u32 4294901760, %v16269_v10  ;;  %v5490_v2 = vld [vmem:[#allocation2 + $0x10] sm:$0xff]  ;;  %v16645_v21 = vld [vmem:[#allocation8] sm:$0x3] }
 0x6d7   :  { %12508 = vmatprep.subr.bf16.mxu0 %v18653_v40  ;;  %v16602_v7 = vpack.c.bf16 %v18674_v1, %v18673_v52  ;;  %v18678_v10 = vand.u32 4294901760, %v16370_v36  ;;  %v16633_v31 = vshrl.u32 %v3855_v13, 7  ;;  %v5488_v36 = vld [vmem:[#allocation2] sm:$0xff]  ;;  %v5494_v52 = vld [vmem:[#allocation2 + $0x30] sm:$0xff]  ;;  %v5497_v1 = vld [vmem:[#allocation2 + $0x48] sm:$0xff] }
 0x6d8   :  { %v16595_v12 = vpack.c.bf16 %v18672_v34, %v18671_v24  ;;  %v16657_v24 = vpack.c.bf16 %v5495_v57, %v5493_v54  ;;  %v5492_v34 = vld [vmem:[#allocation2 + $0x20] sm:$0xff]  ;;  %v5498_v13 = vld [vmem:[#allocation2 + $0x50] sm:$0xff] }
 0x6d9   :  { %v16616_v18 = vpack.c.bf16 %v18678_v10, %v18677_v11  ;;  %v3861_v53 = vsub.s32 1, %v16633_v31  ;;  %v5496_v10 = vld [vmem:[#allocation2 + $0x40] sm:$0xff] }
 0x6da   :  { %12510 = vmatpush1.bf16.msra.mxu0 %v16397_v56  ;;  %v16669_v39 = vpack.c.bf16 %v5498_v13, %v5496_v10 }
 0x6db   :  { %12512 = vmatprep.subr.bf16.mxu0 %v16084_v48  ;;  %v16648_v20 = vrot.slane %v16642_v23, %v3861_v53 }
 0x6de   :  { %12514 = vmatpush1.bf16.msra.mxu0 %v16411_v26 }
 0x6df   :  { %12516 = vmatprep.subr.bf16.mxu0 %v16413_v61 }
 0x6e2   :  { %12518 = vmatpush1.bf16.msra.mxu0 %v16417_v30 }
 0x6e3   :  { %12520 = vmatprep.subr.bf16.mxu0 %v16535_v55 }
 0x6e5   :  { %4403 = vmatmul.mubr.f32.vlgmr.msra.gmra.mrb[6].mxu0 %v18660_v19  ;;  %v16609_v19 = vpack.c.bf16 %v18676_v37, %v18675_v49  ;;  %v5499_v49 = vld [vmem:[#allocation2 + $0x58] sm:$0xff]  ;;  %v16662_v37 = vpack.c.bf16 %v5494_v52, %v5492_v34 }
 0x6e6   :  { %12522 = vmatpush1.bf16.msra.mxu0 %v16542_v5  ;;  %4408 = vmatprep.mubr.f32.mxu0 %v18562_v41  ;;  %v16665_v11 = vpack.c.bf16 %v5499_v49, %v5497_v1 }
 0x6e7   :  { %12524 = vmatprep.subr.bf16.mxu0 %v16549_v38 }
 0x6e9   :  { %4412 = vmatmul.mubr.f32.gmra.mrb[8].mxu0 %v3974_v22  ;;  %v16588_v22 = vpack.c.bf16 %v18670_v62, %v18669_v14  ;;  %v16651_v14 = vpack.c.bf16 %v5490_v2, %v5488_v36  ;;  %v16654_v62 = vrot.slane %v16645_v21, %v3861_v53 }
 0x6ea   :  { %12526 = vmatpush1.bf16.msra.mxu0 %v16559_v0  ;;  %4554 = vmatprep.mubr.f32.mxu0 %v18562_v41 }
 0x6eb   :  { %12528 = vmatprep.subr.bf16.mxu0 %v16566_v16  ;;  %18679 = vst [vmem:[#allocation33_spill] sm:$0xff] %v16654_v62  ;;  %v11526_v62 = vld [vmem:[#allocation5] ss:$0 sm:$0xff] }
 0x6ec   :  { %5623 = vrot.lane.b32.xlu0 %v11526_v62, %s14053_s7 }
 0x6ee   :  { %12530 = vmatpush1.bf16.msra.mxu0 %v16573_v15 }
 0x6ef   :  { %12532 = vmatprep.subr.bf16.mxu0 %v16581_v47 }
 0x6f2   :  { %12534 = vmatpush1.bf16.msra.mxu0 %v16588_v22 }
 0x6f3   :  { %12536 = vmatprep.subr.bf16.mxu0 %v16595_v12 }
 0x6f6   :  { %12538 = vmatpush1.bf16.msra.mxu0 %v16602_v7 }
 0x6f7   :  { %12540 = vmatprep.subr.bf16.mxu0 %v16609_v19 }
 0x6fa   :  { %12542 = vmatpush1.bf16.msra.mxu0 %v16616_v18 }
 0x6fb   :  { %12544 = vmatprep.subr.bf16.mxu0 %v16004_v44 }
 0x6fd   :  { %4556 = vmatmul.mubr.f32.vlgmr.msra.gmra.mrb[6].mxu0 %v16435_v25 }
 0x6fe   :  { %12546 = vmatpush1.bf16.msra.mxu0 %v16052_v63  ;;  %4561 = vmatprep.mubr.f32.mxu0 %v18562_v41 }
 0x6ff   :  { %12548 = vmatprep.subr.bf16.mxu0 %v16044_v29 }
 0x701   :  { %4563 = vmatmul.mubr.f32.gmra.mrb[8].mxu0 %v16454_v42 }
 0x702   :  { %12550 = vmatpush1.bf16.msra.mxu0 %v16074_v3  ;;  %4657 = vmatprep.mubr.f32.mxu0 %v18562_v41 }
 0x703   :  { %12552 = vmatprep.subr.bf16.mxu0 %v16062_v32 }
 0x706   :  { %12554 = vmatpush1.bf16.msra.mxu0 %v18652_v28 }
 0x707   :  { %12556 = vmatprep.subr.bf16.mxu0 %v18653_v40 }
 0x70a   :  { %12558 = vmatpush1.bf16.msra.mxu0 %v16397_v56 }
 0x70b   :  { %12560 = vmatprep.subr.bf16.mxu0 %v16084_v48 }
 0x70e   :  { %12562 = vmatpush1.bf16.msra.mxu0 %v16411_v26 }
 0x70f   :  { %12564 = vmatprep.subr.bf16.mxu0 %v16413_v61 }
 0x712   :  { %12566 = vmatpush1.bf16.msra.mxu0 %v16417_v30 }
 0x713   :  { %12712 = vmatprep.subr.bf16.mxu0 %v16637_v9 }
 0x715   :  { %4659 = vmatmul.mubr.f32.vlgmr.msra.gmra.mrb[6].mxu0 %v16435_v25 }
 0x716   :  { %4664 = vmatprep.mubr.f32.mxu0 %v18562_v41  ;;  %12714 = vmatpush1.bf16.msra.mxu0 %v16651_v14 }
 0x717   :  { %12716 = vmatprep.subr.bf16.mxu0 %v16657_v24 }
 0x719   :  { %4666 = vmatmul.mubr.f32.gmra.mrb[8].mxu0 %v16454_v42 }
 0x71a   :  { %12718 = vmatpush1.bf16.msra.mxu0 %v16662_v37  ;;  %5604 = vmatprep.mubr.f32.mxu0 %v18562_v41 }
 0x71b   :  { %12720 = vmatprep.subr.bf16.mxu0 %v16665_v11 }
 0x71e   :  { %12722 = vmatpush1.bf16.msra.mxu0 %v16669_v39 }
 0x721   :  { %5605 = vmatmul.mubr.f32.vlgmr.msra.gmra.mrb[10].mxu0 %v18562_v41 }
 0x722   :  { %5738 = vmatprep.mubr.f32.mxu0 %v18562_v41 }
 0x724   :  { %v4675_v25 = vpop.permute.xlu0 %4674 }
 0x725   :  { %v4677_v35 = vpop.permute.xlu1 %4676 }
 0x726   :  { %v4682_v36 = vsel %vm3230_vm2, %v4675_v25, %v4677_v35 }
 0x727   :  { %v4684_v42 = vsel %vm3865_vm3, %v4682_v36, 0 }
 0x728   :  { %v16678_v2 = vand.u32 4294901760, %v4684_v42  ;;  %v4679_v53 = vpop.permute.xlu0 %4678 }
 0x729   :  { %v4681_v54 = vpop.permute.xlu1 %4680 }
 0x72a   :  { %v4778_v57 = vsub.f32 %v4684_v42, %v16678_v2  ;;  %v4683_v34 = vsel %vm3230_vm2, %v4679_v53, %v4681_v54 }
 0x72b   :  { %v4686_v52 = vsel %vm3865_vm3, %v4683_v34, 0 }
 0x72c   :  { %v4779_v1 = vand.u32 4294901760, %v4778_v57  ;;  %v16683_v49 = vand.u32 4294901760, %v4686_v52 }
 0x72e   :  { %v4780_v10 = vsub.f32 %v4778_v57, %v4779_v1  ;;  %v4789_v13 = vsub.f32 %v4686_v52, %v16683_v49 }
 0x730   :  { %v4781_v25 = vand.u32 4294901760, %v4780_v10  ;;  %v4790_v35 = vand.u32 4294901760, %v4789_v13 }
 0x732   :  { %4782 = vmatmul.mubr.f32.vlgmr.msra.gmra.mrb[20].mxu1 %v4781_v25  ;;  %v4791_v36 = vsub.f32 %v4789_v13, %v4790_v35 }
 0x733   :  { %12594 = vmatpush1.bf16.msra.mxu1 %v16271_v17  ;;  %4787 = vmatprep.mubr.f32.mxu1 %v18562_v41  ;;  %v18681_v17 = vld [vmem:[#allocation27_spill] sm:$0xff] }
 0x734   :  { %12596 = vmatprep.subr.bf16.mxu1 %v16273_v60  ;;  %v4792_v42 = vand.u32 4294901760, %v4791_v36  ;;  %v18680_v60 = vld [vmem:[#allocation26_spill] sm:$0xff] }
 0x736   :  { %4793 = vmatmul.mubr.f32.gmra.mrb[22].mxu1 %v4792_v42 }
 0x737   :  { %12598 = vmatpush1.bf16.msra.mxu1 %v16306_v58  ;;  %4983 = vmatprep.mubr.f32.mxu1 %v18562_v41  ;;  %v18685_v58 = vld [vmem:[#allocation31_spill] sm:$0xff] }
 0x738   :  { %12600 = vmatprep.subr.bf16.mxu1 %v16308_v43  ;;  %v18686_v43 = vld [vmem:[#allocation32_spill] sm:$0xff] }
 0x73b   :  { %12602 = vmatpush1.bf16.msra.mxu1 %v16328_v27 }
 0x73c   :  { %12604 = vmatprep.subr.bf16.mxu1 %v16339_v8  ;;  %v18684_v8 = vld [vmem:[#allocation30_spill] sm:$0xff] }
 0x73f   :  { %12606 = vmatpush1.bf16.msra.mxu1 %v16342_v46 }
 0x740   :  { %12608 = vmatprep.subr.bf16.mxu1 %v16345_v59  ;;  %v18687_v59 = vld [vmem:[#allocation24_spill] sm:$0xff] }
 0x743   :  { %12610 = vmatpush1.bf16.msra.mxu1 %v16348_v50  ;;  %v18688_v50 = vld [vmem:[#allocation25_spill] sm:$0xff] }
 0x744   :  { %12612 = vmatprep.subr.bf16.mxu1 %v16388_v4  ;;  %v18682_v4 = vld [vmem:[#allocation28_spill] sm:$0xff] }
 0x747   :  { %12614 = vmatpush1.bf16.msra.mxu1 %v16390_v51  ;;  %v18683_v51 = vld [vmem:[#allocation29_spill] sm:$0xff] }
 0x748   :  { %12616 = vmatprep.subr.bf16.mxu1 %v16403_v6 }
 0x74a   :  { %4985 = vmatmul.mubr.f32.vlgmr.msra.gmra.mrb[20].mxu1 %v16678_v2 }
 0x74b   :  { %12618 = vmatpush1.bf16.msra.mxu1 %v16433_v33  ;;  %4990 = vmatprep.mubr.f32.mxu1 %v18562_v41 }
 0x74c   :  { %12620 = vmatprep.subr.bf16.mxu1 %v16440_v45 }
 0x74e   :  { %4992 = vmatmul.mubr.f32.gmra.mrb[22].mxu1 %v16683_v49 }
 0x74f   :  { %12622 = vmatpush1.bf16.msra.mxu1 %v18680_v60  ;;  %5110 = vmatprep.mubr.f32.mxu1 %v18562_v41 }
 0x750   :  { %12624 = vmatprep.subr.bf16.mxu1 %v18681_v17 }
 0x753   :  { %12626 = vmatpush1.bf16.msra.mxu1 %v18682_v4 }
 0x754   :  { %12628 = vmatprep.subr.bf16.mxu1 %v18683_v51 }
 0x757   :  { %12630 = vmatpush1.bf16.msra.mxu1 %v18684_v8 }
 0x758   :  { %12632 = vmatprep.subr.bf16.mxu1 %v18685_v58 }
 0x75b   :  { %12634 = vmatpush1.bf16.msra.mxu1 %v18686_v43 }
 0x75c   :  { %12636 = vmatprep.subr.bf16.mxu1 %v18687_v59 }
 0x75f   :  { %12638 = vmatpush1.bf16.msra.mxu1 %v18688_v50 }
 0x760   :  { %12640 = vmatprep.subr.bf16.mxu1 %v16004_v44 }
 0x762   :  { %5113 = vmatmul.mubr.f32.vlgmr.msra.gmra.mrb[20].mxu1 %v4778_v57 }
 0x763   :  { %12642 = vmatpush1.bf16.msra.mxu1 %v16052_v63  ;;  %5118 = vmatprep.mubr.f32.mxu1 %v18562_v41 }
 0x764   :  { %12644 = vmatprep.subr.bf16.mxu1 %v16044_v29 }
 0x766   :  { %5121 = vmatmul.mubr.f32.gmra.mrb[22].mxu1 %v4789_v13 }
 0x767   :  { %12646 = vmatpush1.bf16.msra.mxu1 %v16074_v3  ;;  %5215 = vmatprep.mubr.f32.mxu1 %v18562_v41 }
 0x768   :  { %12648 = vmatprep.subr.bf16.mxu1 %v16062_v32 }
 0x76b   :  { %12650 = vmatpush1.bf16.msra.mxu1 %v18652_v28 }
 0x76c   :  { %12652 = vmatprep.subr.bf16.mxu1 %v18653_v40 }
 0x76f   :  { %12654 = vmatpush1.bf16.msra.mxu1 %v16397_v56 }
 0x770   :  { %12656 = vmatprep.subr.bf16.mxu1 %v16084_v48 }
 0x773   :  { %12658 = vmatpush1.bf16.msra.mxu1 %v16411_v26 }
 0x774   :  { %12660 = vmatprep.subr.bf16.mxu1 %v16413_v61 }
 0x777   :  { %12662 = vmatpush1.bf16.msra.mxu1 %v16417_v30 }
 0x778   :  { %12664 = vmatprep.subr.bf16.mxu1 %v16535_v55 }
 0x77a   :  { %5219 = vmatmul.mubr.f32.vlgmr.msra.gmra.mrb[20].mxu1 %v4779_v1 }
 0x77b   :  { %12666 = vmatpush1.bf16.msra.mxu1 %v16542_v5  ;;  %5224 = vmatprep.mubr.f32.mxu1 %v18562_v41 }
 0x77c   :  { %12668 = vmatprep.subr.bf16.mxu1 %v16549_v38 }
 0x77e   :  { %5228 = vmatmul.mubr.f32.gmra.mrb[22].mxu1 %v4790_v35 }
 0x77f   :  { %12670 = vmatpush1.bf16.msra.mxu1 %v16559_v0  ;;  %5370 = vmatprep.mubr.f32.mxu1 %v18562_v41 }
 0x780   :  { %12672 = vmatprep.subr.bf16.mxu1 %v16566_v16 }
 0x783   :  { %12674 = vmatpush1.bf16.msra.mxu1 %v16573_v15 }
 0x784   :  { %12676 = vmatprep.subr.bf16.mxu1 %v16581_v47 }
 0x787   :  { %12678 = vmatpush1.bf16.msra.mxu1 %v16588_v22 }
 0x788   :  { %12680 = vmatprep.subr.bf16.mxu1 %v16595_v12 }
 0x78b   :  { %12682 = vmatpush1.bf16.msra.mxu1 %v16602_v7 }
 0x78c   :  { %12684 = vmatprep.subr.bf16.mxu1 %v16609_v19 }
 0x78f   :  { %12686 = vmatpush1.bf16.msra.mxu1 %v16616_v18 }
 0x790   :  { %v3967_v27 = vpop.f32.mrb[16].mxu1  ;;  %12688 = vmatprep.subr.bf16.mxu1 %v16004_v44  ;;  %v18229_v44 = vsub.s32 0, %v16633_v31 }
 0x791   :  { %v3969_v46 = vpop.f32.mrb[17].mxu1 }
 0x792   :  { %5372 = vmatmul.mubr.f32.vlgmr.msra.gmra.mrb[20].mxu1 %v16678_v2 }
 0x793   :  { %12690 = vmatpush1.bf16.msra.mxu1 %v16052_v63  ;;  %5377 = vmatprep.mubr.f32.mxu1 %v18562_v41 }
 0x794   :  { %v3978_v6 = vpop.f32.mrb[18].mxu1  ;;  %12692 = vmatprep.subr.bf16.mxu1 %v16044_v29  ;;  %v3858_v29 = vrot.slane %v16642_v23, %v18229_v44 }
 0x795   :  { %v3980_v55 = vpop.f32.mrb[19].mxu1 }
 0x796   :  { %5379 = vmatmul.mubr.f32.gmra.mrb[22].mxu1 %v16683_v49  ;;  %v3968_v63 = vadd.f32 %v3967_v27, %v3858_v29 }
 0x797   :  { %12694 = vmatpush1.bf16.msra.mxu1 %v16074_v3  ;;  %5473 = vmatprep.mubr.f32.mxu1 %v18562_v41 }
 0x798   :  { %12696 = vmatprep.subr.bf16.mxu1 %v16062_v32  ;;  %v3970_v32 = vadd.f32 %v3969_v46, %v16648_v20 }
 0x79b   :  { %12698 = vmatpush1.bf16.msra.mxu1 %v18652_v28  ;;  %v16784_v28 = vpop.permute.xlu0 %5623 }
 0x79c   :  { %12700 = vmatprep.subr.bf16.mxu1 %v18653_v40 }
 0x79f   :  { %12702 = vmatpush1.bf16.msra.mxu1 %v16397_v56 }
 0x7a0   :  { %12704 = vmatprep.subr.bf16.mxu1 %v16084_v48 }
 0x7a3   :  { %12706 = vmatpush1.bf16.msra.mxu1 %v16411_v26 }
 0x7a4   :  { %12708 = vmatprep.subr.bf16.mxu1 %v16413_v61  ;;  %v3979_v61 = vadd.f32 %v3978_v6, %v3858_v29 }
 0x7a7   :  { %12710 = vmatpush1.bf16.msra.mxu1 %v16417_v30  ;;  %v3981_v30 = vadd.f32 %v3980_v55, %v16648_v20 }
 0x7a8   :  { %12748 = vmatprep.subr.bf16.mxu1 %v16637_v9 }
 0x7aa   :  { %5475 = vmatmul.mubr.f32.vlgmr.msra.gmra.mrb[20].mxu1 %v16678_v2 }
 0x7ab   :  { %5480 = vmatprep.mubr.f32.mxu1 %v18562_v41  ;;  %12750 = vmatpush1.bf16.msra.mxu1 %v16651_v14 }
 0x7ac   :  { %12752 = vmatprep.subr.bf16.mxu1 %v16657_v24 }
 0x7ae   :  { %5482 = vmatmul.mubr.f32.gmra.mrb[22].mxu1 %v16683_v49 }
 0x7af   :  { %12754 = vmatpush1.bf16.msra.mxu1 %v16662_v37  ;;  %5934 = vmatprep.mubr.f32.mxu1 %v18562_v41 }
 0x7b0   :  { %12756 = vmatprep.subr.bf16.mxu1 %v16665_v11 }
 0x7b3   :  { %12758 = vmatpush1.bf16.msra.mxu1 %v16669_v39 }
 0x7e8   :  { %v4660_v3 = vpop.f32.mrb[6].mxu0 }
 0x7e9   :  { %v16775_v48 = vadd.f32 %v4660_v3, %v3968_v63  ;;  %v4662_v56 = vpop.f32.mrb[7].mxu0 }
 0x7ea   :  { %v16777_v26 = vadd.f32 %v4662_v56, %v3970_v32 }
 0x7eb   :  { %v5864_v47 = vrot.slane %v16775_v48, 1  ;;  %v6169_v22 = vrot.slane %v16775_v48, 2  ;;  %v6478_v19 = vrot.slane %v16775_v48, 3  ;;  %v6787_v18 = vrot.slane %v16775_v48, 4 }
 0x7ec   :  { %v4667_v33 = vpop.f32.mrb[8].mxu0  ;;  %v5865_v12 = vrot.slane %v16777_v26, 1  ;;  %v6170_v7 = vrot.slane %v16777_v26, 2  ;;  %v6479_v23 = vrot.slane %v16777_v26, 3  ;;  %v6788_v62 = vrot.slane %v16777_v26, 4 }
 0x7ed   :  { %v16780_v45 = vadd.f32 %v4667_v33, %v3979_v61  ;;  %v4669_v5 = vpop.f32.mrb[9].mxu0  ;;  %v7096_v2 = vrot.slane %v16775_v48, 5  ;;  %v7097_v53 = vrot.slane %v16777_v26, 5  ;;  %v7405_v54 = vrot.slane %v16775_v48, 6 }
 0x7ee   :  { %v16782_v38 = vadd.f32 %v4669_v5, %v3981_v30  ;;  %v7406_v57 = vrot.slane %v16777_v26, 6  ;;  %v7714_v34 = vrot.slane %v16775_v48, 7  ;;  %v7715_v52 = vrot.slane %v16777_v26, 7 }
 0x7ef   :  { %v8332_v1 = vrot.slane %v16780_v45, 1  ;;  %v8637_v49 = vrot.slane %v16780_v45, 2  ;;  %v8946_v10 = vrot.slane %v16780_v45, 3  ;;  %v9255_v13 = vrot.slane %v16780_v45, 4 }
 0x7f0   :  { %v8333_v35 = vrot.slane %v16782_v38, 1  ;;  %v8638_v36 = vrot.slane %v16782_v38, 2  ;;  %v8947_v42 = vrot.slane %v16782_v38, 3  ;;  %v9256_v4 = vrot.slane %v16782_v38, 4 }
 0x7f1   :  { %v9564_v51 = vrot.slane %v16780_v45, 5  ;;  %v9565_v8 = vrot.slane %v16782_v38, 5  ;;  %v9873_v43 = vrot.slane %v16780_v45, 6  ;;  %v9874_v59 = vrot.slane %v16782_v38, 6 }
 0x7f2   :  { %v10182_v50 = vrot.slane %v16780_v45, 7 }
 0x7f4   :  { %v5606_v40 = vpop.f32.mrb[10].mxu0 }
 0x7f5   :  { %v5608_v0 = vpop.f32.mrb[11].mxu0  ;;  %v5626_v16 = vadd.f32 %v16784_v28, %v5606_v40 }
 0x7f6   :  { %v5627_v15 = vadd.f32 %v16784_v28, %v5608_v0 }
 0x7f7   :  { %5630 = vrot.lane.b32.xlu1 %v5626_v16, %s14052_s6 }
 0x7f8   :  { %5632 = vrot.lane.b32.xlu0 %v5627_v15, %s14052_s6 }
 0x87d   :  { %v5476_v25 = vpop.f32.mrb[20].mxu1 }
 0x87e   :  { %v13379_v60 = vadd.f32 %v5476_v25, %v3858_v29  ;;  %v5478_v17 = vpop.f32.mrb[21].mxu1 }
 0x87f   :  { %v13380_v58 = vadd.f32 %v5478_v17, %v16648_v20 }
 0x880   :  { %v5529_v27 = vrot.slane %v13379_v60, 7  ;;  %v16819_v46 = vsel %vm5533_vm4, %v5864_v47, %v13379_v60  ;;  %v6173_v6 = vrot.slane %v13379_v60, 1  ;;  %v6482_v55 = vrot.slane %v13379_v60, 2 }
 0x881   :  { %v5483_v63 = vpop.f32.mrb[22].mxu1  ;;  %v5530_v32 = vrot.slane %v13380_v58, 7  ;;  %v16822_v3 = vsel %vm5533_vm4, %v5865_v12, %v13380_v58  ;;  %v6174_v56 = vrot.slane %v13380_v58, 1  ;;  %v6483_v61 = vrot.slane %v13380_v58, 2 }
 0x882   :  { %v13381_v30 = vadd.f32 %v5483_v63, %v3858_v29  ;;  %v5485_v33 = vpop.f32.mrb[23].mxu1  ;;  %v16826_v5 = vsel %vm5533_vm4, %v16775_v48, %v5529_v27  ;;  %v16829_v0 = vsel %vm5533_vm4, %v6169_v22, %v6173_v6  ;;  %v16832_v16 = vsel %vm5533_vm4, %v6478_v19, %v6482_v55 }
 0x883   :  { %v13382_v15 = vadd.f32 %v5485_v33, %v16648_v20  ;;  %v5611_v47 = vadd.f32 %v5606_v40, %v16826_v5  ;;  %v16838_v12 = vsel %vm5533_vm4, %v16777_v26, %v5530_v32  ;;  %v16841_v29 = vsel %vm5533_vm4, %v6170_v7, %v6174_v56 }
 0x884   :  { %v16844_v48 = vsel %vm5533_vm4, %v6479_v23, %v6483_v61  ;;  %v6791_v25 = vrot.slane %v13379_v60, 3  ;;  %v6792_v22 = vrot.slane %v13380_v58, 3  ;;  %v7100_v17 = vrot.slane %v13379_v60, 4 }
 0x885   :  { %v11525_v27 = vmul.f32 -1.442695, %v5611_v47  ;;  %v7101_v19 = vrot.slane %v13380_v58, 4  ;;  %v7409_v6 = vrot.slane %v13379_v60, 5  ;;  %v7410_v55 = vrot.slane %v13380_v58, 5 }
 0x886   :  { %v16847_v20 = vsel %vm5533_vm4, %v6787_v18, %v6791_v25  ;;  %v16850_v40 = vsel %vm5533_vm4, %v6788_v62, %v6792_v22  ;;  %v16853_v26 = vsel %vm5533_vm4, %v7096_v2, %v7100_v17  ;;  %v7718_v7 = vrot.slane %v13379_v60, 6 }
 0x887   :  { %13570 = vpow2.f32 %v11525_v27  ;;  %v16856_v23 = vsel %vm5533_vm4, %v7097_v53, %v7101_v19  ;;  %v16859_v63 = vsel %vm5533_vm4, %v7405_v54, %v7409_v6  ;;  %v16862_v32 = vsel %vm5533_vm4, %v7406_v57, %v7410_v55 }
 0x888   :  { %v16865_v18 = vsel %vm5533_vm4, %v7714_v34, %v7718_v7  ;;  %v7719_v56 = vrot.slane %v13380_v58, 6  ;;  %v8025_v62 = vrot.slane %v13381_v30, 7  ;;  %v8026_v61 = vrot.slane %v13382_v15, 7 }
 0x889   :  { %v16868_v2 = vsel %vm5533_vm4, %v8332_v1, %v13381_v30  ;;  %v16871_v60 = vsel %vm5533_vm4, %v8333_v35, %v13382_v15  ;;  %v8641_v53 = vrot.slane %v13381_v30, 1  ;;  %v8642_v33 = vrot.slane %v13382_v15, 1 }
 0x88a   :  { %v16874_v54 = vsel %vm5533_vm4, %v7715_v52, %v7719_v56  ;;  %v16878_v57 = vsel %vm5533_vm4, %v16780_v45, %v8025_v62  ;;  %v16882_v34 = vsel %vm5533_vm4, %v16782_v38, %v8026_v61  ;;  %v8950_v58 = vrot.slane %v13381_v30, 2 }
 0x88b   :  { %v16887_v1 = vsel %vm5533_vm4, %v8637_v49, %v8641_v53  ;;  %v16890_v35 = vsel %vm5533_vm4, %v8638_v36, %v8642_v33  ;;  %v8951_v47 = vrot.slane %v13382_v15, 2  ;;  %v9259_v52 = vrot.slane %v13381_v30, 3  ;;  %v5633_v53 = vpop.permute.xlu0 %5632 }
 0x88c   :  { %v16895_v25 = vsel %vm5533_vm4, %v8946_v10, %v8950_v58  ;;  %v9260_v22 = vrot.slane %v13382_v15, 3  ;;  %v9568_v17 = vrot.slane %v13381_v30, 4  ;;  %v9569_v27 = vrot.slane %v13382_v15, 4 }
 0x88d   :  { %v16900_v19 = vsel %vm5533_vm4, %v8947_v42, %v8951_v47  ;;  %v16905_v49 = vsel %vm5533_vm4, %v9255_v13, %v9259_v52  ;;  %v9877_v36 = vrot.slane %v13381_v30, 5  ;;  %v9878_v6 = vrot.slane %v13382_v15, 5  ;;  %v5504_v47 = vld [vmem:[#allocation7 + $0x18] sm:$0xff]  ;;  %v5501_v52 = vld [vmem:[#allocation7] sm:$0xff] }
 0x88e   :  { %v16910_v10 = vsel %vm5533_vm4, %v9256_v4, %v9260_v22  ;;  %v16915_v55 = vsel %vm5533_vm4, %v9564_v51, %v9568_v17  ;;  %v16920_v42 = vsel %vm5533_vm4, %v9565_v8, %v9569_v27  ;;  %v10186_v7 = vrot.slane %v13381_v30, 6  ;;  %v5503_v17 = vld [vmem:[#allocation7 + $0x10] sm:$0xff]  ;;  %v5506_v27 = vld [vmem:[#allocation7 + $0x28] sm:$0xff] }
 0x88f   :  { %18689 = vst [vmem:[#allocation35_spill] sm:$0xff] %v16915_v55  ;;  %18690 = vst [vmem:[#allocation36_spill] sm:$0xff] %v16920_v42  ;;  %v16925_v13 = vsel %vm5533_vm4, %v9873_v43, %v9877_v36  ;;  %v16930_v4 = vsel %vm5533_vm4, %v9874_v59, %v9878_v6  ;;  %v10183_v56 = vrot.slane %v16782_v38, 7  ;;  %v10187_v51 = vrot.slane %v13382_v15, 6  ;;  %v5631_v43 = vpop.permute.xlu1 %5630  ;;  %v5502_v15 = vld [vmem:[#allocation7 + $0x8] sm:$0xff]  ;;  %v5508_v36 = vld [vmem:[#allocation7 + $0x38] sm:$0xff] }
 0x890   :  { %18691 = vst [vmem:[#allocation38_spill] sm:$0xff] %v16925_v13  ;;  %18692 = vst [vmem:[#allocation42_spill] sm:$0xff] %v16930_v4  ;;  %v16936_v62 = vsel %vm5533_vm4, %v10182_v50, %v10186_v7  ;;  %v5634_v33 = vsel %vm3230_vm2, %v5631_v43, %v5633_v53  ;;  %v16945_v22 = vpack.c.bf16 %v5504_v47, %v5502_v15  ;;  %v5517_v43 = vld [vmem:[#allocation10 + $0x18] sm:$0xff] }
 0x891   :  { %18693 = vst [vmem:[#allocation50_spill] sm:$0xff] %v16936_v62  ;;  %v13571_v8 = vpop.eup %13570  ;;  %v16939_v30 = vsel %vm5533_vm4, %v10183_v56, %v10187_v51  ;;  %v16947_v6 = vpack.c.bf16 %v5503_v17, %v5501_v52  ;;  %v16949_v7 = vpack.c.bf16 %v5508_v36, %v5506_v27  ;;  %v5505_v56 = vld [vmem:[#allocation7 + $0x20] sm:$0xff]  ;;  %v5507_v51 = vld [vmem:[#allocation7 + $0x30] sm:$0xff] }
 0x892   :  { %18694 = vst [vmem:[#allocation51_spill] sm:$0xff] %v16939_v30  ;;  %v5615_v61 = vadd.f32 1.0, %v13571_v8  ;;  %v5510_v8 = vld [vmem:[#allocation7 + $0x48] sm:$0xff]  ;;  %12724 = vmatprep.subr.bf16.mxu0 %v16945_v22 }
 0x893   :  { %12726 = vmatpush1.bf16.msra.mxu0 %v16947_v6 }
 0x894   :  { %13572 = vrcp.f32 %v5615_v61  ;;  %v5515_v61 = vld [vmem:[#allocation10 + $0x8] sm:$0xff]  ;;  %12728 = vmatprep.subr.bf16.mxu0 %v16949_v7 }
 0x89e   :  { %v13573_v59 = vpop.eup %13572 }
 0x89f   :  { %v5636_v58 = vmul.f32 %v13573_v59, %v5634_v33  ;;  %v5509_v33 = vld [vmem:[#allocation7 + $0x40] sm:$0xff]  ;;  %v5645_v17 = vsub.f32 1.0, %v13573_v59 }
 0x8a1   :  { %5638 = vrot.lane.b32.xlu1 %v5636_v58, %s14053_s7  ;;  %v5511_v58 = vld [vmem:[#allocation7 + $0x50] sm:$0xff] }
 0x8a2   :  { %v16964_v15 = vpack.c.bf16 %v5511_v58, %v5509_v33 }
 0x913   :  { %v5639_v38 = vpop.permute.xlu1 %5638 }
 0x914   :  { %v5641_v45 = vadd.f32 %v5639_v38, %v16826_v5  ;;  %v5642_v50 = vadd.f32 %v5639_v38, %v16838_v12  ;;  %v5512_v5 = vld [vmem:[#allocation7 + $0x58] sm:$0xff]  ;;  %v16953_v12 = vpack.c.bf16 %v5507_v51, %v5505_v56  ;;  %v16958_v38 = vpack.c.bf16 %v5517_v43, %v5515_v61  ;;  %v5519_v61 = vld [vmem:[#allocation10 + $0x28] sm:$0xff] }
 0x915   :  { %v16956_v53 = vpack.c.bf16 %v5512_v5, %v5510_v8  ;;  %v5656_v56 = vmul.f32 0.0, %v13573_v59  ;;  %v5514_v8 = vld [vmem:[#allocation10] sm:$0xff]  ;;  %v5516_v5 = vld [vmem:[#allocation10 + $0x10] sm:$0xff]  ;;  %v5521_v43 = vld [vmem:[#allocation10 + $0x38] sm:$0xff] }
 0x916   :  { %13574 = vtanh.f32 %v5641_v45  ;;  %12772 = vmatprep.subr.bf16.mxu1 %v16958_v38  ;;  %12730 = vmatpush1.bf16.msra.mxu0 %v16953_v12  ;;  %v16974_v33 = vpack.c.bf16 %v5516_v5, %v5514_v8  ;;  %v16976_v58 = vpack.c.bf16 %v5521_v43, %v5519_v61 }
 0x917   :  { %13576 = vtanh.f32 %v5642_v50  ;;  %12732 = vmatprep.subr.bf16.mxu0 %v16956_v53 }
 0x91a   :  { %12734 = vmatpush1.bf16.msra.mxu0 %v16964_v15 }
 0x91b   :  { %12736 = vmatprep.subr.bf16.mxu0 %v16958_v38 }
 0x920   :  { %v13575_v45 = vpop.eup %13574 }
 0x921   :  { %v13577_v50 = vpop.eup %13576  ;;  %5648 = vrot.lane.b32.xlu0 %v13575_v45, %s14054_s22  ;;  %v5518_v45 = vld [vmem:[#allocation10 + $0x20] sm:$0xff] }
 0x922   :  { %5650 = vrot.lane.b32.xlu1 %v13577_v50, %s14054_s22  ;;  %v5520_v50 = vld [vmem:[#allocation10 + $0x30] sm:$0xff] }
 0x923   :  { %v16981_v59 = vpack.c.bf16 %v5520_v50, %v5518_v45  ;;  %v11529_v50 = vld [vmem:[#allocation11] ss:$0 sm:$0xff] }
 0x993   :  { %v5649_v47 = vpop.permute.xlu0 %5648 }
 0x994   :  { %v5651_v52 = vpop.permute.xlu1 %5650 }
 0x995   :  { %v5653_v27 = vsel %vm5652_vm5, %v5649_v47, %v5651_v52  ;;  %v5523_v47 = vld [vmem:[#allocation10 + $0x48] sm:$0xff]  ;;  %v5525_v52 = vld [vmem:[#allocation10 + $0x58] sm:$0xff] }
 0x996   :  { %v5655_v36 = vmul.f32 %v5653_v27, %v5645_v17  ;;  %v16985_v17 = vpack.c.bf16 %v5525_v52, %v5523_v47  ;;  %v5522_v27 = vld [vmem:[#allocation10 + $0x40] sm:$0xff] }
 0x998   :  { %v16970_v51 = vadd.f32 %v5656_v56, %v5655_v36  ;;  %v5524_v36 = vld [vmem:[#allocation10 + $0x50] sm:$0xff] }
 0x99a   :  { %5670 = vrot.lane.b32.xlu0 %v16970_v51, %s14054_s22 }
 0xa0c   :  { %v5671_v44 = vpop.permute.xlu0 %5670 }
 0xa0d   :  { %11527 = vmatmul.mubr.msk.f32.vlgmr.msra.gmra.mrb[12].mxu0 %vm5536_vm6, %v5671_v44  ;;  %11530 = vmatmul.mubr.msk.f32.vlgmr.msra.gmra.mrb[24].mxu1 %vm5536_vm6, %v5671_v44  ;;  %v16991_v44 = vpack.c.bf16 %v5524_v36, %v5522_v27 }
 0xa0e   :  { %12738 = vmatpush1.bf16.msra.mxu0 %v16974_v33  ;;  %5809 = vmatprep.mubr.f32.mxu0 %v18562_v41 }
 0xa0f   :  { %12740 = vmatprep.subr.bf16.mxu0 %v16976_v58  ;;  %12774 = vmatpush1.bf16.msra.mxu1 %v16974_v33 }
 0xa10   :  { %12776 = vmatprep.subr.bf16.mxu1 %v16976_v58  ;;  %6124 = vmatprep.mubr.f32.mxu1 %v18562_v41 }
 0xa12   :  { %12742 = vmatpush1.bf16.msra.mxu0 %v16981_v59 }
 0xa13   :  { %12744 = vmatprep.subr.bf16.mxu0 %v16985_v17  ;;  %12778 = vmatpush1.bf16.msra.mxu1 %v16981_v59 }
 0xa14   :  { %12780 = vmatprep.subr.bf16.mxu1 %v16985_v17 }
 0xa16   :  { %12746 = vmatpush1.bf16.msra.mxu0 %v16991_v44 }
 0xa17   :  { %12760 = vmatprep.subr.bf16.mxu0 %v16945_v22  ;;  %12782 = vmatpush1.bf16.msra.mxu1 %v16991_v44 }
 0xa18   :  { %12796 = vmatprep.subr.bf16.mxu1 %v16945_v22 }
 0xa19   :  { %5810 = vmatmul.mubr.f32.vlgmr.msra.gmra.mrb[14].mxu0 %v18562_v41 }
 0xa1a   :  { %12762 = vmatpush1.bf16.msra.mxu0 %v16947_v6  ;;  %6048 = vmatprep.mubr.f32.mxu0 %v18562_v41 }
 0xa1b   :  { %12764 = vmatprep.subr.bf16.mxu0 %v16949_v7 }
 0xa1e   :  { %12766 = vmatpush1.bf16.msra.mxu0 %v16953_v12 }
 0xa1f   :  { %12768 = vmatprep.subr.bf16.mxu0 %v16956_v53 }
 0xa22   :  { %12770 = vmatpush1.bf16.msra.mxu0 %v16964_v15 }
 0xa23   :  { %12784 = vmatprep.subr.bf16.mxu0 %v16637_v9 }
 0xae0   :  { %v5740_v56 = vpop.f32.mrb[12].mxu0  ;;  %v5936_v8 = vpop.f32.mrb[24].mxu1 }
 0xae1   :  { %v5948_v5 = vadd.f32 %v5936_v8, %v16784_v28  ;;  %v5742_v61 = vpop.f32.mrb[13].mxu0  ;;  %v5938_v43 = vpop.f32.mrb[25].mxu1  ;;  %v5941_v27 = vadd.f32 %v5936_v8, %v16819_v46 }
 0xae2   :  { %v5949_v45 = vadd.f32 %v5938_v43, %v16784_v28 }
 0xae3   :  { %5952 = vrot.lane.b32.xlu1 %v5948_v5, %s14052_s6  ;;  %v11531_v36 = vmul.f32 -1.442695, %v5941_v27 }
 0xae4   :  { %5954 = vrot.lane.b32.xlu0 %v5949_v45, %s14052_s6 }
 0xae5   :  { %13578 = vpow2.f32 %v11531_v36 }
 0xae8   :  { %5828 = vrot.lane.b32.xlu0 %v11529_v50, %s14053_s7 }
 0xaec   :  { %v5811_v47 = vpop.f32.mrb[14].mxu0 }
 0xaed   :  { %v5813_v52 = vpop.f32.mrb[15].mxu0 }
 0xaef   :  { %v13579_v30 = vpop.eup %13578 }
 0xaf0   :  { %v5945_v62 = vadd.f32 1.0, %v13579_v30 }
 0xaf2   :  { %13580 = vrcp.f32 %v5945_v62  ;;  %v18695_v62 = vsub.s32 0, %v16633_v31 }
 0xaf4   :  { %v17025_v30 = vrot.slane %v16645_v21, %v18695_v62 }
 0xafc   :  { %v13581_v42 = vpop.eup %13580 }
 0xb55   :  { %v5953_v4 = vpop.permute.xlu1 %5952 }
 0xb56   :  { %v5955_v13 = vpop.permute.xlu0 %5954 }
 0xb57   :  { %v5956_v43 = vsel %vm3230_vm2, %v5953_v4, %v5955_v13  ;;  %v5741_v13 = vadd.f32 %v5740_v56, %v17025_v30 }
 0xb58   :  { %v5958_v5 = vmul.f32 %v13581_v42, %v5956_v43 }
 0xb59   :  { %v5816_v4 = vadd.f32 %v5811_v47, %v5741_v13 }
 0xb5a   :  { %5960 = vrot.lane.b32.xlu1 %v5958_v5, %s14053_s7  ;;  %v17016_v45 = vpop.permute.xlu0 %5828 }
 0xb5b   :  { %v5832_v50 = vadd.f32 %v17016_v45, %v5813_v52  ;;  %v5831_v55 = vadd.f32 %v17016_v45, %v5811_v47  ;;  %v11528_v8 = vmul.f32 -1.442695, %v5816_v4  ;;  %v5967_v4 = vsub.f32 1.0, %v13581_v42 }
 0xb5d   :  { %5837 = vrot.lane.b32.xlu0 %v5832_v50, %s14052_s6  ;;  %13582 = vpow2.f32 %v11528_v8 }
 0xb5e   :  { %5835 = vrot.lane.b32.xlu1 %v5831_v55, %s14052_s6 }
 0xb67   :  { %v13583_v27 = vpop.eup %13582 }
 0xb68   :  { %v5820_v43 = vadd.f32 1.0, %v13583_v27  ;;  %v18696_v27 = vld [vmem:[#allocation33_spill] sm:$0xff] }
 0xbcc   :  { %v5961_v36 = vpop.permute.xlu1 %5960 }
 0xbcd   :  { %v5963_v52 = vadd.f32 %v5961_v36, %v16819_v46  ;;  %v5964_v5 = vadd.f32 %v5961_v36, %v16822_v3  ;;  %v5743_v36 = vadd.f32 %v5742_v61, %v18696_v27 }
 0xbcf   :  { %13584 = vtanh.f32 %v5963_v52  ;;  %v5838_v31 = vpop.permute.xlu0 %5837  ;;  %v5977_v52 = vmul.f32 %v13581_v42, %v16970_v51 }
 0xbd0   :  { %13586 = vtanh.f32 %v5964_v5  ;;  %v5836_v55 = vpop.permute.xlu1 %5835 }
 0xbd1   :  { %13588 = vrcp.f32 %v5820_v43  ;;  %v5839_v21 = vsel %vm3230_vm2, %v5836_v55, %v5838_v31 }
 0xbd9   :  { %v13585_v50 = vpop.eup %13584 }
 0xbda   :  { %v13587_v62 = vpop.eup %13586  ;;  %5970 = vrot.lane.b32.xlu1 %v13585_v50, %s14054_s22 }
 0xbdb   :  { %v13589_v56 = vpop.eup %13588  ;;  %5972 = vrot.lane.b32.xlu0 %v13587_v62, %s14054_s22 }
 0xbdc   :  { %v5841_v47 = vmul.f32 %v13589_v56, %v5839_v21 }
 0xbde   :  { %5843 = vrot.lane.b32.xlu1 %v5841_v47, %s14053_s7 }
 0xc4c   :  { %v5971_v46 = vpop.permute.xlu1 %5970 }
 0xc4d   :  { %v5973_v3 = vpop.permute.xlu0 %5972 }
 0xc4e   :  { %v5974_v8 = vsel %vm5652_vm5, %v5971_v46, %v5973_v3 }
 0xc4f   :  { %v5976_v43 = vmul.f32 %v5974_v8, %v5967_v4  ;;  %v5860_v4 = vmul.f32 0.0, %v13589_v56 }
 0xc50   :  { %v5844_v5 = vpop.permute.xlu1 %5843 }
 0xc51   :  { %v5846_v55 = vadd.f32 %v5844_v5, %v5741_v13  ;;  %v5847_v31 = vadd.f32 %v5844_v5, %v5743_v36  ;;  %v17037_v50 = vadd.f32 %v5977_v52, %v5976_v43  ;;  %v5850_v13 = vsub.f32 1.0, %v13589_v56 }
 0xc53   :  { %13590 = vtanh.f32 %v5846_v55  ;;  %5980 = vrot.lane.b32.xlu0 %v17037_v50, %s14054_s22 }
 0xc54   :  { %13592 = vtanh.f32 %v5847_v31 }
 0xc5d   :  { %v13591_v21 = vpop.eup %13590 }
 0xc5e   :  { %v13593_v62 = vpop.eup %13592  ;;  %5853 = vrot.lane.b32.xlu1 %v13591_v21, %s14054_s22 }
 0xc5f   :  { %5855 = vrot.lane.b32.xlu0 %v13593_v62, %s14054_s22 }
 0xcc5   :  { %v5981_v61 = vpop.permute.xlu0 %5980 }
 0xcc6   :  { %11532 = vmatmul.mubr.msk.f32.vlgmr.msra.gmra.mrb[16].mxu0 %vm5536_vm6, %v5981_v61 }
 0xcc7   :  { %12786 = vmatpush1.bf16.msra.mxu0 %v16651_v14  ;;  %6243 = vmatprep.mubr.f32.mxu0 %v18562_v41 }
 0xcc8   :  { %12788 = vmatprep.subr.bf16.mxu0 %v16657_v24 }
 0xccb   :  { %12790 = vmatpush1.bf16.msra.mxu0 %v16662_v37 }
 0xccc   :  { %12792 = vmatprep.subr.bf16.mxu0 %v16665_v11 }
 0xccf   :  { %12794 = vmatpush1.bf16.msra.mxu0 %v16669_v39 }
 0xcd0   :  { %v5854_v42 = vpop.permute.xlu1 %5853  ;;  %12808 = vmatprep.subr.bf16.mxu0 %v16958_v38 }
 0xcd1   :  { %v5856_v51 = vpop.permute.xlu0 %5855 }
 0xcd2   :  { %11535 = vmatmul.mubr.msk.f32.vlgmr.msra.gmra.mrb[18].mxu0 %vm5536_vm6, %v5981_v61  ;;  %v5857_v47 = vsel %vm5652_vm5, %v5854_v42, %v5856_v51 }
 0xcd3   :  { %v5859_v46 = vmul.f32 %v5857_v47, %v5850_v13  ;;  %12810 = vmatpush1.bf16.msra.mxu0 %v16974_v33  ;;  %6433 = vmatprep.mubr.f32.mxu0 %v18562_v41 }
 0xcd4   :  { %12812 = vmatprep.subr.bf16.mxu0 %v16976_v58 }
 0xcd5   :  { %v17056_v3 = vadd.f32 %v5860_v4, %v5859_v46 }
 0xcd7   :  { %6056 = vrot.lane.b32.xlu1 %v17056_v3, %s14054_s22  ;;  %12814 = vmatpush1.bf16.msra.mxu0 %v16981_v59 }
 0xcd8   :  { %12816 = vmatprep.subr.bf16.mxu0 %v16985_v17 }
 0xcdb   :  { %12818 = vmatpush1.bf16.msra.mxu0 %v16991_v44 }
 0xcdc   :  { %12832 = vmatprep.subr.bf16.mxu0 %v16945_v22 }
 0xd49   :  { %v6057_v56 = vpop.permute.xlu1 %6056 }
 0xd4a   :  { %11533 = vmatmul.mubr.msk.f32.vlgmr.msra.gmra.mrb[26].mxu1 %vm5536_vm6, %v6057_v56 }
 0xd4b   :  { %12798 = vmatpush1.bf16.msra.mxu1 %v16947_v6  ;;  %6357 = vmatprep.mubr.f32.mxu1 %v18562_v41 }
 0xd4c   :  { %12800 = vmatprep.subr.bf16.mxu1 %v16949_v7 }
 0xd4f   :  { %12802 = vmatpush1.bf16.msra.mxu1 %v16953_v12 }
 0xd50   :  { %12804 = vmatprep.subr.bf16.mxu1 %v16956_v53 }
 0xd53   :  { %12806 = vmatpush1.bf16.msra.mxu1 %v16964_v15 }
 0xd54   :  { %12820 = vmatprep.subr.bf16.mxu1 %v16637_v9 }
 0xd99   :  { %v6050_v8 = vpop.f32.mrb[16].mxu0 }
 0xd9a   :  { %v6052_v36 = vpop.f32.mrb[17].mxu0 }
 0xda5   :  { %v6245_v43 = vpop.f32.mrb[18].mxu0 }
 0xda6   :  { %v6257_v52 = vadd.f32 %v6245_v43, %v16784_v28  ;;  %v6247_v5 = vpop.f32.mrb[19].mxu0  ;;  %v6250_v31 = vadd.f32 %v6245_v43, %v16829_v0  ;;  %v6051_v43 = vadd.f32 %v6050_v8, %v17025_v30 }
 0xda7   :  { %v6258_v55 = vadd.f32 %v6247_v5, %v16784_v28 }
 0xda8   :  { %6261 = vrot.lane.b32.xlu0 %v6257_v52, %s14052_s6  ;;  %v11536_v21 = vmul.f32 -1.442695, %v6250_v31 }
 0xda9   :  { %6263 = vrot.lane.b32.xlu1 %v6258_v55, %s14052_s6 }
 0xdaa   :  { %13594 = vpow2.f32 %v11536_v21 }
 0xdb4   :  { %v13595_v62 = vpop.eup %13594 }
 0xdb5   :  { %v6254_v61 = vadd.f32 1.0, %v13595_v62 }
 0xdb7   :  { %13596 = vrcp.f32 %v6254_v61 }
 0xdc1   :  { %v13597_v13 = vpop.eup %13596 }
 0xe1a   :  { %v6262_v42 = vpop.permute.xlu0 %6261 }
 0xe1b   :  { %v6264_v51 = vpop.permute.xlu1 %6263 }
 0xe1c   :  { %v6265_v47 = vsel %vm3230_vm2, %v6262_v42, %v6264_v51 }
 0xe1d   :  { %v6267_v46 = vmul.f32 %v13597_v13, %v6265_v47  ;;  %v6126_v4 = vpop.f32.mrb[26].mxu1 }
 0xe1e   :  { %v6138_v56 = vadd.f32 %v6126_v4, %v17016_v45  ;;  %v6128_v5 = vpop.f32.mrb[27].mxu1  ;;  %v6131_v55 = vadd.f32 %v6126_v4, %v6051_v43 }
 0xe1f   :  { %v6139_v52 = vadd.f32 %v6128_v5, %v17016_v45  ;;  %6269 = vrot.lane.b32.xlu0 %v6267_v46, %s14053_s7 }
 0xe20   :  { %6142 = vrot.lane.b32.xlu1 %v6138_v56, %s14052_s6  ;;  %v11534_v31 = vmul.f32 -1.442695, %v6131_v55 }
 0xe22   :  { %13598 = vpow2.f32 %v11534_v31 }
 0xe23   :  { %6144 = vrot.lane.b32.xlu0 %v6139_v52, %s14052_s6 }
 0xe2c   :  { %v13599_v21 = vpop.eup %13598 }
 0xe2d   :  { %v6135_v61 = vadd.f32 1.0, %v13599_v21  ;;  %v6053_v21 = vadd.f32 %v6052_v36, %v18696_v27 }
 0xe91   :  { %v6270_v62 = vpop.permute.xlu0 %6269 }
 0xe92   :  { %v6272_v42 = vadd.f32 %v6270_v62, %v16829_v0  ;;  %v6273_v51 = vadd.f32 %v6270_v62, %v16841_v29  ;;  %v6143_v46 = vpop.permute.xlu1 %6142  ;;  %v6276_v29 = vsub.f32 1.0, %v13597_v13 }
 0xe94   :  { %13600 = vtanh.f32 %v6272_v42 }
 0xe95   :  { %13602 = vtanh.f32 %v6273_v51  ;;  %v6145_v47 = vpop.permute.xlu0 %6144 }
 0xe96   :  { %13604 = vrcp.f32 %v6135_v61  ;;  %v6146_v5 = vsel %vm3230_vm2, %v6143_v46, %v6145_v47  ;;  %v6286_v61 = vmul.f32 %v13597_v13, %v17037_v50 }
 0xe9e   :  { %v13601_v56 = vpop.eup %13600 }
 0xe9f   :  { %v13603_v52 = vpop.eup %13602  ;;  %6279 = vrot.lane.b32.xlu1 %v13601_v56, %s14054_s22 }
 0xea0   :  { %v13605_v8 = vpop.eup %13604  ;;  %6281 = vrot.lane.b32.xlu0 %v13603_v52, %s14054_s22 }
 0xea1   :  { %v6148_v4 = vmul.f32 %v13605_v8, %v6146_v5 }
 0xea3   :  { %6150 = vrot.lane.b32.xlu1 %v6148_v4, %s14053_s7 }
 0xf11   :  { %v6280_v0 = vpop.permute.xlu1 %6279 }
 0xf12   :  { %v6282_v55 = vpop.permute.xlu0 %6281 }
 0xf13   :  { %v6283_v31 = vsel %vm5652_vm5, %v6280_v0, %v6282_v55  ;;  %v6167_v0 = vmul.f32 %v13605_v8, %v17056_v3 }
 0xf14   :  { %v6285_v62 = vmul.f32 %v6283_v31, %v6276_v29 }
 0xf15   :  { %v6151_v42 = vpop.permute.xlu1 %6150 }
 0xf16   :  { %v6153_v51 = vadd.f32 %v6151_v42, %v6051_v43  ;;  %v6154_v47 = vadd.f32 %v6151_v42, %v6053_v21  ;;  %v17093_v46 = vadd.f32 %v6286_v61, %v6285_v62  ;;  %v6157_v43 = vsub.f32 1.0, %v13605_v8 }
 0xf18   :  { %13606 = vtanh.f32 %v6153_v51  ;;  %6289 = vrot.lane.b32.xlu0 %v17093_v46, %s14054_s22 }
 0xf19   :  { %13608 = vtanh.f32 %v6154_v47 }
 0xf22   :  { %v13607_v56 = vpop.eup %13606 }
 0xf23   :  { %v13609_v5 = vpop.eup %13608  ;;  %6160 = vrot.lane.b32.xlu1 %v13607_v56, %s14054_s22 }
 0xf24   :  { %6162 = vrot.lane.b32.xlu0 %v13609_v5, %s14054_s22 }
 0xf8a   :  { %v6290_v36 = vpop.permute.xlu0 %6289 }
 0xf8b   :  { %11537 = vmatmul.mubr.msk.f32.vlgmr.msra.gmra.mrb[28].mxu1 %vm5536_vm6, %v6290_v36 }
 0xf8c   :  { %12822 = vmatpush1.bf16.msra.mxu1 %v16651_v14  ;;  %6552 = vmatprep.mubr.f32.mxu1 %v18562_v41 }
 0xf8d   :  { %12824 = vmatprep.subr.bf16.mxu1 %v16657_v24 }
 0xf90   :  { %12826 = vmatpush1.bf16.msra.mxu1 %v16662_v37 }
 0xf91   :  { %12828 = vmatprep.subr.bf16.mxu1 %v16665_v11 }
 0xf94   :  { %12830 = vmatpush1.bf16.msra.mxu1 %v16669_v39 }
 0xf95   :  { %v6161_v50 = vpop.permute.xlu1 %6160  ;;  %12844 = vmatprep.subr.bf16.mxu1 %v16958_v38 }
 0xf96   :  { %v6163_v13 = vpop.permute.xlu0 %6162 }
 0xf97   :  { %11540 = vmatmul.mubr.msk.f32.vlgmr.msra.gmra.mrb[30].mxu1 %vm5536_vm6, %v6290_v36  ;;  %v6164_v52 = vsel %vm5652_vm5, %v6161_v50, %v6163_v13 }
 0xf98   :  { %v6166_v4 = vmul.f32 %v6164_v52, %v6157_v43  ;;  %12846 = vmatpush1.bf16.msra.mxu1 %v16974_v33  ;;  %6742 = vmatprep.mubr.f32.mxu1 %v18562_v41 }
 0xf99   :  { %12848 = vmatprep.subr.bf16.mxu1 %v16976_v58 }
 0xf9a   :  { %v17113_v55 = vadd.f32 %v6167_v0, %v6166_v4 }
 0xf9c   :  { %6365 = vrot.lane.b32.xlu1 %v17113_v55, %s14054_s22  ;;  %12850 = vmatpush1.bf16.msra.mxu1 %v16981_v59 }
 0xf9d   :  { %12852 = vmatprep.subr.bf16.mxu1 %v16985_v17 }
 0xfa0   :  { %12854 = vmatpush1.bf16.msra.mxu1 %v16991_v44 }
 0xfa1   :  { %12868 = vmatprep.subr.bf16.mxu1 %v16945_v22 }
0x100e   :  { %v6366_v3 = vpop.permute.xlu1 %6365 }
0x100f   :  { %11538 = vmatmul.mubr.msk.f32.vlgmr.msra.gmra.mrb[20].mxu0 %vm5536_vm6, %v6366_v3 }
0x1010   :  { %12834 = vmatpush1.bf16.msra.mxu0 %v16947_v6  ;;  %6666 = vmatprep.mubr.f32.mxu0 %v18562_v41 }
0x1011   :  { %12836 = vmatprep.subr.bf16.mxu0 %v16949_v7 }
0x1014   :  { %12838 = vmatpush1.bf16.msra.mxu0 %v16953_v12 }
0x1015   :  { %12840 = vmatprep.subr.bf16.mxu0 %v16956_v53 }
0x1018   :  { %12842 = vmatpush1.bf16.msra.mxu0 %v16964_v15 }
0x1019   :  { %12856 = vmatprep.subr.bf16.mxu0 %v16637_v9 }
0x105e   :  { %v6359_v8 = vpop.f32.mrb[28].mxu1 }
0x105f   :  { %v6361_v29 = vpop.f32.mrb[29].mxu1 }
0x106a   :  { %v6554_v31 = vpop.f32.mrb[30].mxu1 }
0x106b   :  { %v6566_v21 = vadd.f32 %v6554_v31, %v16784_v28  ;;  %v6556_v62 = vpop.f32.mrb[31].mxu1  ;;  %v6559_v42 = vadd.f32 %v6554_v31, %v16832_v16  ;;  %v6360_v31 = vadd.f32 %v6359_v8, %v17025_v30 }
0x106c   :  { %v6567_v61 = vadd.f32 %v6556_v62, %v16784_v28 }
0x106d   :  { %6570 = vrot.lane.b32.xlu0 %v6566_v21, %s14052_s6  ;;  %v11541_v51 = vmul.f32 -1.442695, %v6559_v42 }
0x106e   :  { %6572 = vrot.lane.b32.xlu1 %v6567_v61, %s14052_s6 }
0x106f   :  { %13610 = vpow2.f32 %v11541_v51 }
0x1079   :  { %v13611_v47 = vpop.eup %13610 }
0x107a   :  { %v6563_v56 = vadd.f32 1.0, %v13611_v47 }
0x107c   :  { %13612 = vrcp.f32 %v6563_v56 }
0x1086   :  { %v13613_v50 = vpop.eup %13612 }
0x10df   :  { %v6571_v5 = vpop.permute.xlu0 %6570 }
0x10e0   :  { %v6573_v36 = vpop.permute.xlu1 %6572 }
0x10e1   :  { %v6574_v13 = vsel %vm3230_vm2, %v6571_v5, %v6573_v36 }
0x10e2   :  { %v6576_v43 = vmul.f32 %v13613_v50, %v6574_v13  ;;  %v6435_v52 = vpop.f32.mrb[20].mxu0 }
0x10e3   :  { %v6447_v4 = vadd.f32 %v6435_v52, %v17016_v45  ;;  %v6437_v0 = vpop.f32.mrb[21].mxu0  ;;  %v6440_v21 = vadd.f32 %v6435_v52, %v6360_v31 }
0x10e4   :  { %v6448_v3 = vadd.f32 %v6437_v0, %v17016_v45  ;;  %6578 = vrot.lane.b32.xlu0 %v6576_v43, %s14053_s7 }
0x10e5   :  { %6451 = vrot.lane.b32.xlu1 %v6447_v4, %s14052_s6  ;;  %v11539_v62 = vmul.f32 -1.442695, %v6440_v21  ;;  %v6362_v21 = vadd.f32 %v6361_v29, %v18696_v27 }
0x10e7   :  { %13614 = vpow2.f32 %v11539_v62 }
0x10e8   :  { %6453 = vrot.lane.b32.xlu0 %v6448_v3, %s14052_s6 }
0x10f1   :  { %v13615_v61 = vpop.eup %13614 }
0x10f2   :  { %v6444_v51 = vadd.f32 1.0, %v13615_v61  ;;  %v6595_v61 = vmul.f32 %v13613_v50, %v17093_v46 }
0x1156   :  { %v6579_v42 = vpop.permute.xlu0 %6578 }
0x1157   :  { %v6581_v47 = vadd.f32 %v6579_v42, %v16832_v16  ;;  %v6582_v56 = vadd.f32 %v6579_v42, %v16844_v48  ;;  %v6452_v36 = vpop.permute.xlu1 %6451  ;;  %v6585_v48 = vsub.f32 1.0, %v13613_v50 }
0x1159   :  { %13616 = vtanh.f32 %v6581_v47 }
0x115a   :  { %13618 = vtanh.f32 %v6582_v56  ;;  %v6454_v5 = vpop.permute.xlu0 %6453 }
0x115b   :  { %13620 = vrcp.f32 %v6444_v51  ;;  %v6455_v43 = vsel %vm3230_vm2, %v6452_v36, %v6454_v5 }
0x1163   :  { %v13617_v13 = vpop.eup %13616 }
0x1164   :  { %v13619_v4 = vpop.eup %13618  ;;  %6588 = vrot.lane.b32.xlu1 %v13617_v13, %s14054_s22 }
0x1165   :  { %v13621_v8 = vpop.eup %13620  ;;  %6590 = vrot.lane.b32.xlu0 %v13619_v4, %s14054_s22 }
0x1166   :  { %v6457_v52 = vmul.f32 %v13621_v8, %v6455_v43  ;;  %v6476_v4 = vmul.f32 %v13621_v8, %v17113_v55 }
0x1168   :  { %6459 = vrot.lane.b32.xlu1 %v6457_v52, %s14053_s7 }
0x11d6   :  { %v6589_v16 = vpop.permute.xlu1 %6588 }
0x11d7   :  { %v6591_v0 = vpop.permute.xlu0 %6590 }
0x11d8   :  { %v6592_v3 = vsel %vm5652_vm5, %v6589_v16, %v6591_v0 }
0x11d9   :  { %v6594_v62 = vmul.f32 %v6592_v3, %v6585_v48 }
0x11da   :  { %v6460_v42 = vpop.permute.xlu1 %6459 }
0x11db   :  { %v6462_v51 = vadd.f32 %v6460_v42, %v6360_v31  ;;  %v6463_v47 = vadd.f32 %v6460_v42, %v6362_v21  ;;  %v17150_v56 = vadd.f32 %v6595_v61, %v6594_v62  ;;  %v6466_v31 = vsub.f32 1.0, %v13621_v8 }
0x11dd   :  { %13622 = vtanh.f32 %v6462_v51  ;;  %6598 = vrot.lane.b32.xlu0 %v17150_v56, %s14054_s22 }
0x11de   :  { %13624 = vtanh.f32 %v6463_v47 }
0x11e7   :  { %v13623_v5 = vpop.eup %13622 }
0x11e8   :  { %v13625_v36 = vpop.eup %13624  ;;  %6469 = vrot.lane.b32.xlu1 %v13623_v5, %s14054_s22 }
0x11e9   :  { %6471 = vrot.lane.b32.xlu0 %v13625_v36, %s14054_s22 }
0x124f   :  { %v6599_v29 = vpop.permute.xlu0 %6598 }
0x1250   :  { %11542 = vmatmul.mubr.msk.f32.vlgmr.msra.gmra.mrb[22].mxu0 %vm5536_vm6, %v6599_v29 }
0x1251   :  { %12858 = vmatpush1.bf16.msra.mxu0 %v16651_v14  ;;  %6861 = vmatprep.mubr.f32.mxu0 %v18562_v41 }
0x1252   :  { %12860 = vmatprep.subr.bf16.mxu0 %v16657_v24 }
0x1255   :  { %12862 = vmatpush1.bf16.msra.mxu0 %v16662_v37 }
0x1256   :  { %12864 = vmatprep.subr.bf16.mxu0 %v16665_v11 }
0x1259   :  { %12866 = vmatpush1.bf16.msra.mxu0 %v16669_v39 }
0x125a   :  { %v6470_v46 = vpop.permute.xlu1 %6469  ;;  %12880 = vmatprep.subr.bf16.mxu0 %v16958_v38 }
0x125b   :  { %v6472_v50 = vpop.permute.xlu0 %6471 }
0x125c   :  { %11545 = vmatmul.mubr.msk.f32.vlgmr.msra.gmra.mrb[24].mxu0 %vm5536_vm6, %v6599_v29  ;;  %v6473_v13 = vsel %vm5652_vm5, %v6470_v46, %v6472_v50 }
0x125d   :  { %v6475_v43 = vmul.f32 %v6473_v13, %v6466_v31  ;;  %12882 = vmatpush1.bf16.msra.mxu0 %v16974_v33  ;;  %7051 = vmatprep.mubr.f32.mxu0 %v18562_v41 }
0x125e   :  { %12884 = vmatprep.subr.bf16.mxu0 %v16976_v58 }
0x125f   :  { %v17170_v52 = vadd.f32 %v6476_v4, %v6475_v43 }
0x1261   :  { %6674 = vrot.lane.b32.xlu1 %v17170_v52, %s14054_s22  ;;  %12886 = vmatpush1.bf16.msra.mxu0 %v16981_v59 }
0x1262   :  { %12888 = vmatprep.subr.bf16.mxu0 %v16985_v17 }
0x1265   :  { %12890 = vmatpush1.bf16.msra.mxu0 %v16991_v44 }
0x1266   :  { %12904 = vmatprep.subr.bf16.mxu0 %v16945_v22 }
0x12d3   :  { %v6675_v55 = vpop.permute.xlu1 %6674 }
0x12d4   :  { %11543 = vmatmul.mubr.msk.f32.vlgmr.msra.gmra.mrb[32].mxu1 %vm5536_vm6, %v6675_v55 }
0x12d5   :  { %12870 = vmatpush1.bf16.msra.mxu1 %v16947_v6  ;;  %6975 = vmatprep.mubr.f32.mxu1 %v18562_v41 }
0x12d6   :  { %12872 = vmatprep.subr.bf16.mxu1 %v16949_v7 }
0x12d9   :  { %12874 = vmatpush1.bf16.msra.mxu1 %v16953_v12 }
0x12da   :  { %12876 = vmatprep.subr.bf16.mxu1 %v16956_v53 }
0x12dd   :  { %12878 = vmatpush1.bf16.msra.mxu1 %v16964_v15 }
0x12de   :  { %12892 = vmatprep.subr.bf16.mxu1 %v16637_v9 }
0x1323   :  { %v6668_v8 = vpop.f32.mrb[22].mxu0 }
0x1324   :  { %v6670_v16 = vpop.f32.mrb[23].mxu0  ;;  %v6669_v4 = vadd.f32 %v6668_v8, %v17025_v30 }
0x132f   :  { %v6863_v0 = vpop.f32.mrb[24].mxu0 }
0x1330   :  { %v6875_v48 = vadd.f32 %v6863_v0, %v16784_v28  ;;  %v6865_v3 = vpop.f32.mrb[25].mxu0  ;;  %v6868_v62 = vadd.f32 %v6863_v0, %v16847_v20 }
0x1331   :  { %v6876_v21 = vadd.f32 %v6865_v3, %v16784_v28 }
0x1332   :  { %6879 = vrot.lane.b32.xlu0 %v6875_v48, %s14052_s6  ;;  %v11546_v61 = vmul.f32 -1.442695, %v6868_v62 }
0x1333   :  { %6881 = vrot.lane.b32.xlu1 %v6876_v21, %s14052_s6 }
0x1334   :  { %13626 = vpow2.f32 %v11546_v61 }
0x133e   :  { %v13627_v42 = vpop.eup %13626 }
0x133f   :  { %v6872_v51 = vadd.f32 1.0, %v13627_v42 }
0x1341   :  { %13628 = vrcp.f32 %v6872_v51 }
0x134b   :  { %v13629_v36 = vpop.eup %13628 }
0x13a4   :  { %v6880_v47 = vpop.permute.xlu0 %6879 }
0x13a5   :  { %v6882_v5 = vpop.permute.xlu1 %6881 }
0x13a6   :  { %v6883_v29 = vsel %vm3230_vm2, %v6880_v47, %v6882_v5 }
0x13a7   :  { %v6885_v46 = vmul.f32 %v13629_v36, %v6883_v29  ;;  %v6744_v50 = vpop.f32.mrb[32].mxu1 }
0x13a8   :  { %v6756_v31 = vadd.f32 %v6744_v50, %v17016_v45  ;;  %v6746_v13 = vpop.f32.mrb[33].mxu1  ;;  %v6749_v55 = vadd.f32 %v6744_v50, %v6669_v4 }
0x13a9   :  { %v6757_v43 = vadd.f32 %v6746_v13, %v17016_v45  ;;  %6887 = vrot.lane.b32.xlu0 %v6885_v46, %s14053_s7  ;;  %v6671_v13 = vadd.f32 %v6670_v16, %v18696_v27 }
0x13aa   :  { %6760 = vrot.lane.b32.xlu1 %v6756_v31, %s14052_s6  ;;  %v11544_v0 = vmul.f32 -1.442695, %v6749_v55  ;;  %v6904_v55 = vmul.f32 %v13629_v36, %v17150_v56 }
0x13ac   :  { %13630 = vpow2.f32 %v11544_v0 }
0x13ad   :  { %6762 = vrot.lane.b32.xlu0 %v6757_v43, %s14052_s6 }
0x13b6   :  { %v13631_v48 = vpop.eup %13630 }
0x13b7   :  { %v6753_v21 = vadd.f32 1.0, %v13631_v48 }
0x141b   :  { %v6888_v3 = vpop.permute.xlu0 %6887 }
0x141c   :  { %v6890_v62 = vadd.f32 %v6888_v3, %v16847_v20  ;;  %v6891_v61 = vadd.f32 %v6888_v3, %v16850_v40  ;;  %v6761_v51 = vpop.permute.xlu1 %6760  ;;  %v6894_v40 = vsub.f32 1.0, %v13629_v36 }
0x141e   :  { %13632 = vtanh.f32 %v6890_v62 }
0x141f   :  { %13634 = vtanh.f32 %v6891_v61  ;;  %v6763_v42 = vpop.permute.xlu0 %6762 }
0x1420   :  { %13636 = vrcp.f32 %v6753_v21  ;;  %v6764_v5 = vsel %vm3230_vm2, %v6761_v51, %v6763_v42 }
0x1428   :  { %v13633_v47 = vpop.eup %13632 }
0x1429   :  { %v13635_v29 = vpop.eup %13634  ;;  %6897 = vrot.lane.b32.xlu1 %v13633_v47, %s14054_s22 }
0x142a   :  { %v13637_v8 = vpop.eup %13636  ;;  %6899 = vrot.lane.b32.xlu0 %v13635_v29, %s14054_s22 }
0x142b   :  { %v6766_v46 = vmul.f32 %v13637_v8, %v6764_v5  ;;  %v6785_v47 = vmul.f32 %v13637_v8, %v17170_v52 }
0x142d   :  { %6768 = vrot.lane.b32.xlu1 %v6766_v46, %s14053_s7 }
0x149b   :  { %v6898_v20 = vpop.permute.xlu1 %6897 }
0x149c   :  { %v6900_v50 = vpop.permute.xlu0 %6899 }
0x149d   :  { %v6901_v31 = vsel %vm5652_vm5, %v6898_v20, %v6900_v50 }
0x149e   :  { %v6903_v43 = vmul.f32 %v6901_v31, %v6894_v40 }
0x149f   :  { %v6769_v0 = vpop.permute.xlu1 %6768 }
0x14a0   :  { %v6771_v48 = vadd.f32 %v6769_v0, %v6669_v4  ;;  %v6772_v3 = vadd.f32 %v6769_v0, %v6671_v13  ;;  %v17207_v21 = vadd.f32 %v6904_v55, %v6903_v43  ;;  %v6775_v4 = vsub.f32 1.0, %v13637_v8 }
0x14a2   :  { %13638 = vtanh.f32 %v6771_v48  ;;  %6907 = vrot.lane.b32.xlu0 %v17207_v21, %s14054_s22 }
0x14a3   :  { %13640 = vtanh.f32 %v6772_v3 }
0x14ac   :  { %v13639_v62 = vpop.eup %13638 }
0x14ad   :  { %v13641_v61 = vpop.eup %13640  ;;  %6778 = vrot.lane.b32.xlu1 %v13639_v62, %s14054_s22 }
0x14ae   :  { %6780 = vrot.lane.b32.xlu0 %v13641_v61, %s14054_s22 }
0x1514   :  { %v6908_v16 = vpop.permute.xlu0 %6907 }
0x1515   :  { %11547 = vmatmul.mubr.msk.f32.vlgmr.msra.gmra.mrb[34].mxu1 %vm5536_vm6, %v6908_v16 }
0x1516   :  { %12894 = vmatpush1.bf16.msra.mxu1 %v16651_v14  ;;  %7170 = vmatprep.mubr.f32.mxu1 %v18562_v41 }
0x1517   :  { %12896 = vmatprep.subr.bf16.mxu1 %v16657_v24 }
0x151a   :  { %12898 = vmatpush1.bf16.msra.mxu1 %v16662_v37 }
0x151b   :  { %12900 = vmatprep.subr.bf16.mxu1 %v16665_v11 }
0x151e   :  { %12902 = vmatpush1.bf16.msra.mxu1 %v16669_v39 }
0x151f   :  { %v6779_v56 = vpop.permute.xlu1 %6778  ;;  %12916 = vmatprep.subr.bf16.mxu1 %v16958_v38 }
0x1520   :  { %v6781_v36 = vpop.permute.xlu0 %6780 }
0x1521   :  { %11550 = vmatmul.mubr.msk.f32.vlgmr.msra.gmra.mrb[36].mxu1 %vm5536_vm6, %v6908_v16  ;;  %v6782_v42 = vsel %vm5652_vm5, %v6779_v56, %v6781_v36 }
0x1522   :  { %v6784_v51 = vmul.f32 %v6782_v42, %v6775_v4  ;;  %12918 = vmatpush1.bf16.msra.mxu1 %v16974_v33  ;;  %7360 = vmatprep.mubr.f32.mxu1 %v18562_v41 }
0x1523   :  { %12920 = vmatprep.subr.bf16.mxu1 %v16976_v58 }
0x1524   :  { %v17227_v5 = vadd.f32 %v6785_v47, %v6784_v51 }
0x1526   :  { %6983 = vrot.lane.b32.xlu1 %v17227_v5, %s14054_s22  ;;  %12922 = vmatpush1.bf16.msra.mxu1 %v16981_v59 }
0x1527   :  { %12924 = vmatprep.subr.bf16.mxu1 %v16985_v17 }
0x152a   :  { %12926 = vmatpush1.bf16.msra.mxu1 %v16991_v44 }
0x152b   :  { %12940 = vmatprep.subr.bf16.mxu1 %v16945_v22 }
0x1598   :  { %v6984_v52 = vpop.permute.xlu1 %6983 }
0x1599   :  { %11548 = vmatmul.mubr.msk.f32.vlgmr.msra.gmra.mrb[26].mxu0 %vm5536_vm6, %v6984_v52 }
0x159a   :  { %12906 = vmatpush1.bf16.msra.mxu0 %v16947_v6  ;;  %7284 = vmatprep.mubr.f32.mxu0 %v18562_v41 }
0x159b   :  { %12908 = vmatprep.subr.bf16.mxu0 %v16949_v7 }
0x159e   :  { %12910 = vmatpush1.bf16.msra.mxu0 %v16953_v12 }
0x159f   :  { %12912 = vmatprep.subr.bf16.mxu0 %v16956_v53 }
0x15a2   :  { %12914 = vmatpush1.bf16.msra.mxu0 %v16964_v15 }
0x15a3   :  { %12928 = vmatprep.subr.bf16.mxu0 %v16637_v9 }
0x15e8   :  { %v6977_v29 = vpop.f32.mrb[34].mxu1 }
0x15e9   :  { %v6979_v8 = vpop.f32.mrb[35].mxu1  ;;  %v6978_v42 = vadd.f32 %v6977_v29, %v17025_v30 }
0x15f4   :  { %v7172_v46 = vpop.f32.mrb[36].mxu1 }
0x15f5   :  { %v7184_v20 = vadd.f32 %v7172_v46, %v16784_v28  ;;  %v7174_v50 = vpop.f32.mrb[37].mxu1  ;;  %v7177_v31 = vadd.f32 %v7172_v46, %v16853_v26 }
0x15f6   :  { %v7185_v40 = vadd.f32 %v7174_v50, %v16784_v28 }
0x15f7   :  { %7188 = vrot.lane.b32.xlu0 %v7184_v20, %s14052_s6  ;;  %v11551_v13 = vmul.f32 -1.442695, %v7177_v31 }
0x15f8   :  { %7190 = vrot.lane.b32.xlu1 %v7185_v40, %s14052_s6 }
0x15f9   :  { %13642 = vpow2.f32 %v11551_v13 }
0x1603   :  { %v13643_v43 = vpop.eup %13642 }
0x1604   :  { %v7181_v55 = vadd.f32 1.0, %v13643_v43 }
0x1606   :  { %13644 = vrcp.f32 %v7181_v55 }
0x1610   :  { %v13645_v3 = vpop.eup %13644 }
0x1669   :  { %v7189_v0 = vpop.permute.xlu0 %7188 }
0x166a   :  { %v7191_v48 = vpop.permute.xlu1 %7190 }
0x166b   :  { %v7192_v62 = vsel %vm3230_vm2, %v7189_v0, %v7191_v48 }
0x166c   :  { %v7194_v61 = vmul.f32 %v13645_v3, %v7192_v62  ;;  %v7053_v16 = vpop.f32.mrb[26].mxu0 }
0x166d   :  { %v7065_v56 = vadd.f32 %v7053_v16, %v17016_v45  ;;  %v7055_v36 = vpop.f32.mrb[27].mxu0  ;;  %v7058_v51 = vadd.f32 %v7053_v16, %v6978_v42  ;;  %v6980_v16 = vadd.f32 %v6979_v8, %v18696_v27 }
0x166e   :  { %v7066_v4 = vadd.f32 %v7055_v36, %v17016_v45  ;;  %7196 = vrot.lane.b32.xlu0 %v7194_v61, %s14053_s7  ;;  %v7213_v36 = vmul.f32 %v13645_v3, %v17207_v21 }
0x166f   :  { %7069 = vrot.lane.b32.xlu1 %v7065_v56, %s14052_s6  ;;  %v11549_v47 = vmul.f32 -1.442695, %v7058_v51 }
0x1671   :  { %13646 = vpow2.f32 %v11549_v47 }
0x1672   :  { %7071 = vrot.lane.b32.xlu0 %v7066_v4, %s14052_s6 }
0x167b   :  { %v13647_v52 = vpop.eup %13646 }
0x167c   :  { %v7062_v20 = vadd.f32 1.0, %v13647_v52 }
0x16e0   :  { %v7197_v46 = vpop.permute.xlu0 %7196 }
0x16e1   :  { %v7199_v50 = vadd.f32 %v7197_v46, %v16853_v26  ;;  %v7200_v40 = vadd.f32 %v7197_v46, %v16856_v23  ;;  %v7070_v13 = vpop.permute.xlu1 %7069  ;;  %v7203_v23 = vsub.f32 1.0, %v13645_v3 }
0x16e3   :  { %13648 = vtanh.f32 %v7199_v50 }
0x16e4   :  { %13650 = vtanh.f32 %v7200_v40  ;;  %v7072_v31 = vpop.permute.xlu0 %7071 }
0x16e5   :  { %13652 = vrcp.f32 %v7062_v20  ;;  %v7073_v55 = vsel %vm3230_vm2, %v7070_v13, %v7072_v31 }
0x16ed   :  { %v13649_v43 = vpop.eup %13648 }
0x16ee   :  { %v13651_v0 = vpop.eup %13650  ;;  %7206 = vrot.lane.b32.xlu1 %v13649_v43, %s14054_s22 }
0x16ef   :  { %v13653_v29 = vpop.eup %13652  ;;  %7208 = vrot.lane.b32.xlu0 %v13651_v0, %s14054_s22 }
0x16f0   :  { %v7075_v48 = vmul.f32 %v13653_v29, %v7073_v55  ;;  %v7094_v31 = vmul.f32 %v13653_v29, %v17227_v5 }
0x16f2   :  { %7077 = vrot.lane.b32.xlu1 %v7075_v48, %s14053_s7 }
0x1760   :  { %v7207_v26 = vpop.permute.xlu1 %7206 }
0x1761   :  { %v7209_v62 = vpop.permute.xlu0 %7208 }
0x1762   :  { %v7210_v61 = vsel %vm5652_vm5, %v7207_v26, %v7209_v62 }
0x1763   :  { %v7212_v56 = vmul.f32 %v7210_v61, %v7203_v23 }
0x1764   :  { %v7078_v4 = vpop.permute.xlu1 %7077 }
0x1765   :  { %v7080_v51 = vadd.f32 %v7078_v4, %v6978_v42  ;;  %v7081_v47 = vadd.f32 %v7078_v4, %v6980_v16  ;;  %v17264_v52 = vadd.f32 %v7213_v36, %v7212_v56  ;;  %v7084_v42 = vsub.f32 1.0, %v13653_v29 }
0x1767   :  { %13654 = vtanh.f32 %v7080_v51  ;;  %7216 = vrot.lane.b32.xlu0 %v17264_v52, %s14054_s22 }
0x1768   :  { %13656 = vtanh.f32 %v7081_v47 }
0x1771   :  { %v13655_v46 = vpop.eup %13654 }
0x1772   :  { %v13657_v20 = vpop.eup %13656  ;;  %7087 = vrot.lane.b32.xlu1 %v13655_v46, %s14054_s22 }
0x1773   :  { %7089 = vrot.lane.b32.xlu0 %v13657_v20, %s14054_s22 }
0x17d9   :  { %v7217_v8 = vpop.permute.xlu0 %7216 }
0x17da   :  { %11552 = vmatmul.mubr.msk.f32.vlgmr.msra.gmra.mrb[28].mxu0 %vm5536_vm6, %v7217_v8 }
0x17db   :  { %12930 = vmatpush1.bf16.msra.mxu0 %v16651_v14  ;;  %7479 = vmatprep.mubr.f32.mxu0 %v18562_v41 }
0x17dc   :  { %12932 = vmatprep.subr.bf16.mxu0 %v16657_v24 }
0x17df   :  { %12934 = vmatpush1.bf16.msra.mxu0 %v16662_v37 }
0x17e0   :  { %12936 = vmatprep.subr.bf16.mxu0 %v16665_v11 }
0x17e3   :  { %12938 = vmatpush1.bf16.msra.mxu0 %v16669_v39 }
0x17e4   :  { %v7088_v21 = vpop.permute.xlu1 %7087  ;;  %12952 = vmatprep.subr.bf16.mxu0 %v16958_v38 }
0x17e5   :  { %v7090_v3 = vpop.permute.xlu0 %7089 }
0x17e6   :  { %11555 = vmatmul.mubr.msk.f32.vlgmr.msra.gmra.mrb[30].mxu0 %vm5536_vm6, %v7217_v8  ;;  %v7091_v50 = vsel %vm5652_vm5, %v7088_v21, %v7090_v3 }
0x17e7   :  { %v7093_v40 = vmul.f32 %v7091_v50, %v7084_v42  ;;  %12954 = vmatpush1.bf16.msra.mxu0 %v16974_v33  ;;  %7669 = vmatprep.mubr.f32.mxu0 %v18562_v41 }
0x17e8   :  { %12956 = vmatprep.subr.bf16.mxu0 %v16976_v58 }
0x17e9   :  { %v17284_v13 = vadd.f32 %v7094_v31, %v7093_v40 }
0x17eb   :  { %7292 = vrot.lane.b32.xlu1 %v17284_v13, %s14054_s22  ;;  %12958 = vmatpush1.bf16.msra.mxu0 %v16981_v59 }
0x17ec   :  { %12960 = vmatprep.subr.bf16.mxu0 %v16985_v17 }
0x17ef   :  { %12962 = vmatpush1.bf16.msra.mxu0 %v16991_v44 }
0x17f0   :  { %12976 = vmatprep.subr.bf16.mxu0 %v16945_v22 }
0x185d   :  { %v7293_v5 = vpop.permute.xlu1 %7292 }
0x185e   :  { %11553 = vmatmul.mubr.msk.f32.vlgmr.msra.gmra.mrb[38].mxu1 %vm5536_vm6, %v7293_v5 }
0x185f   :  { %12942 = vmatpush1.bf16.msra.mxu1 %v16947_v6  ;;  %7593 = vmatprep.mubr.f32.mxu1 %v18562_v41 }
0x1860   :  { %12944 = vmatprep.subr.bf16.mxu1 %v16949_v7 }
0x1863   :  { %12946 = vmatpush1.bf16.msra.mxu1 %v16953_v12 }
0x1864   :  { %12948 = vmatprep.subr.bf16.mxu1 %v16956_v53 }
0x1867   :  { %12950 = vmatpush1.bf16.msra.mxu1 %v16964_v15 }
0x1868   :  { %12964 = vmatprep.subr.bf16.mxu1 %v16637_v9 }
0x18ad   :  { %v7286_v43 = vpop.f32.mrb[28].mxu0 }
0x18ae   :  { %v7288_v55 = vpop.f32.mrb[29].mxu0  ;;  %v7287_v3 = vadd.f32 %v7286_v43, %v17025_v30 }
0x18b9   :  { %v7481_v0 = vpop.f32.mrb[30].mxu0 }
0x18ba   :  { %v7493_v29 = vadd.f32 %v7481_v0, %v16784_v28  ;;  %v7483_v48 = vpop.f32.mrb[31].mxu0  ;;  %v7486_v62 = vadd.f32 %v7481_v0, %v16859_v63 }
0x18bb   :  { %v7494_v26 = vadd.f32 %v7483_v48, %v16784_v28 }
0x18bc   :  { %7497 = vrot.lane.b32.xlu0 %v7493_v29, %s14052_s6  ;;  %v11556_v23 = vmul.f32 -1.442695, %v7486_v62 }
0x18bd   :  { %7499 = vrot.lane.b32.xlu1 %v7494_v26, %s14052_s6 }
0x18be   :  { %13658 = vpow2.f32 %v11556_v23 }
0x18c8   :  { %v13659_v61 = vpop.eup %13658 }
0x18c9   :  { %v7490_v16 = vadd.f32 1.0, %v13659_v61 }
0x18cb   :  { %13660 = vrcp.f32 %v7490_v16 }
0x18d5   :  { %v13661_v4 = vpop.eup %13660 }
0x192e   :  { %v7498_v56 = vpop.permute.xlu0 %7497 }
0x192f   :  { %v7500_v36 = vpop.permute.xlu1 %7499 }
0x1930   :  { %v7501_v51 = vsel %vm3230_vm2, %v7498_v56, %v7500_v36 }
0x1931   :  { %v7503_v47 = vmul.f32 %v13661_v4, %v7501_v51  ;;  %v7362_v46 = vpop.f32.mrb[38].mxu1 }
0x1932   :  { %v7374_v20 = vadd.f32 %v7362_v46, %v17016_v45  ;;  %v7364_v8 = vpop.f32.mrb[39].mxu1  ;;  %v7367_v42 = vadd.f32 %v7362_v46, %v7287_v3 }
0x1933   :  { %v7375_v21 = vadd.f32 %v7364_v8, %v17016_v45  ;;  %7505 = vrot.lane.b32.xlu0 %v7503_v47, %s14053_s7  ;;  %v7512_v47 = vsub.f32 1.0, %v13661_v4 }
0x1934   :  { %7378 = vrot.lane.b32.xlu1 %v7374_v20, %s14052_s6  ;;  %v11554_v50 = vmul.f32 -1.442695, %v7367_v42 }
0x1936   :  { %13662 = vpow2.f32 %v11554_v50 }
0x1937   :  { %7380 = vrot.lane.b32.xlu0 %v7375_v21, %s14052_s6  ;;  %v7522_v21 = vmul.f32 %v13661_v4, %v17264_v52 }
0x1940   :  { %v13663_v40 = vpop.eup %13662 }
0x1941   :  { %v7371_v31 = vadd.f32 1.0, %v13663_v40 }
0x1943   :  { %13664 = vrcp.f32 %v7371_v31 }
0x194d   :  { %v13665_v62 = vpop.eup %13664 }
0x194e   :  { %v7393_v4 = vsub.f32 1.0, %v13665_v62 }
0x19a5   :  { %v7506_v5 = vpop.permute.xlu0 %7505 }
0x19a6   :  { %v7508_v0 = vadd.f32 %v7506_v5, %v16859_v63  ;;  %v7509_v29 = vadd.f32 %v7506_v5, %v16862_v32  ;;  %v7379_v48 = vpop.permute.xlu1 %7378  ;;  %v7289_v63 = vadd.f32 %v7288_v55, %v18696_v27 }
0x19a8   :  { %13666 = vtanh.f32 %v7508_v0  ;;  %v7403_v0 = vmul.f32 %v13665_v62, %v17284_v13 }
0x19a9   :  { %13668 = vtanh.f32 %v7509_v29  ;;  %v7381_v26 = vpop.permute.xlu0 %7380 }
0x19aa   :  { %v7382_v23 = vsel %vm3230_vm2, %v7379_v48, %v7381_v26 }
0x19ab   :  { %v7384_v61 = vmul.f32 %v13665_v62, %v7382_v23 }
0x19ad   :  { %7386 = vrot.lane.b32.xlu1 %v7384_v61, %s14053_s7 }
0x19b2   :  { %v13667_v43 = vpop.eup %13666 }
0x19b3   :  { %v13669_v16 = vpop.eup %13668  ;;  %7515 = vrot.lane.b32.xlu0 %v13667_v43, %s14054_s22 }
0x19b4   :  { %7517 = vrot.lane.b32.xlu1 %v13669_v16, %s14054_s22 }
0x1a1f   :  { %v7387_v56 = vpop.permute.xlu1 %7386 }
0x1a20   :  { %v7389_v32 = vadd.f32 %v7387_v56, %v7287_v3  ;;  %v7390_v36 = vadd.f32 %v7387_v56, %v7289_v63 }
0x1a22   :  { %13670 = vtanh.f32 %v7389_v32 }
0x1a23   :  { %13672 = vtanh.f32 %v7390_v36 }
0x1a25   :  { %v7516_v51 = vpop.permute.xlu0 %7515 }
0x1a26   :  { %v7518_v46 = vpop.permute.xlu1 %7517 }
0x1a27   :  { %v7519_v20 = vsel %vm5652_vm5, %v7516_v51, %v7518_v46 }
0x1a28   :  { %v7521_v8 = vmul.f32 %v7519_v20, %v7512_v47 }
0x1a2a   :  { %v17321_v42 = vadd.f32 %v7522_v21, %v7521_v8 }
0x1a2c   :  { %v13671_v50 = vpop.eup %13670  ;;  %7525 = vrot.lane.b32.xlu0 %v17321_v42, %s14054_s22 }
0x1a2d   :  { %7396 = vrot.lane.b32.xlu1 %v13671_v50, %s14054_s22  ;;  %v13673_v55 = vpop.eup %13672 }
0x1a30   :  { %7398 = vrot.lane.b32.xlu0 %v13673_v55, %s14054_s22 }
0x1a9e   :  { %v7526_v3 = vpop.permute.xlu0 %7525 }
0x1a9f   :  { %11557 = vmatmul.mubr.msk.f32.vlgmr.msra.gmra.mrb[40].mxu1 %vm5536_vm6, %v7526_v3  ;;  %v7397_v52 = vpop.permute.xlu1 %7396 }
0x1aa0   :  { %12966 = vmatpush1.bf16.msra.mxu1 %v16651_v14  ;;  %7788 = vmatprep.mubr.f32.mxu1 %v18562_v41 }
0x1aa1   :  { %12968 = vmatprep.subr.bf16.mxu1 %v16657_v24 }
0x1aa2   :  { %v7399_v40 = vpop.permute.xlu0 %7398 }
0x1aa3   :  { %v7400_v31 = vsel %vm5652_vm5, %v7397_v52, %v7399_v40 }
0x1aa4   :  { %v7402_v5 = vmul.f32 %v7400_v31, %v7393_v4  ;;  %12970 = vmatpush1.bf16.msra.mxu1 %v16662_v37 }
0x1aa5   :  { %12972 = vmatprep.subr.bf16.mxu1 %v16665_v11 }
0x1aa6   :  { %v17335_v29 = vadd.f32 %v7403_v0, %v7402_v5 }
0x1aa8   :  { %12974 = vmatpush1.bf16.msra.mxu1 %v16669_v39  ;;  %7601 = vrot.lane.b32.xlu1 %v17335_v29, %s14054_s22 }
0x1aa9   :  { %12988 = vmatprep.subr.bf16.mxu1 %v16958_v38 }
0x1aab   :  { %11560 = vmatmul.mubr.msk.f32.vlgmr.msra.gmra.mrb[42].mxu1 %vm5536_vm6, %v7526_v3 }
0x1aac   :  { %12990 = vmatpush1.bf16.msra.mxu1 %v16974_v33  ;;  %7978 = vmatprep.mubr.f32.mxu1 %v18562_v41 }
0x1aad   :  { %12992 = vmatprep.subr.bf16.mxu1 %v16976_v58 }
0x1ab0   :  { %12994 = vmatpush1.bf16.msra.mxu1 %v16981_v59 }
0x1ab1   :  { %12996 = vmatprep.subr.bf16.mxu1 %v16985_v17 }
0x1ab4   :  { %12998 = vmatpush1.bf16.msra.mxu1 %v16991_v44 }
0x1ab5   :  { %13012 = vmatprep.subr.bf16.mxu1 %v16945_v22 }
0x1b1a   :  { %v7602_v13 = vpop.permute.xlu1 %7601 }
0x1b1b   :  { %11558 = vmatmul.mubr.msk.f32.vlgmr.msra.gmra.mrb[32].mxu0 %vm5536_vm6, %v7602_v13 }
0x1b1c   :  { %12978 = vmatpush1.bf16.msra.mxu0 %v16947_v6  ;;  %7902 = vmatprep.mubr.f32.mxu0 %v18562_v41 }
0x1b1d   :  { %12980 = vmatprep.subr.bf16.mxu0 %v16949_v7 }
0x1b20   :  { %12982 = vmatpush1.bf16.msra.mxu0 %v16953_v12 }
0x1b21   :  { %12984 = vmatprep.subr.bf16.mxu0 %v16956_v53 }
0x1b24   :  { %12986 = vmatpush1.bf16.msra.mxu0 %v16964_v15 }
0x1b25   :  { %13000 = vmatprep.subr.bf16.mxu0 %v16637_v9 }
0x1b72   :  { %v7595_v48 = vpop.f32.mrb[40].mxu1 }
0x1b73   :  { %v7597_v26 = vpop.f32.mrb[41].mxu1  ;;  %v7596_v3 = vadd.f32 %v7595_v48, %v17025_v30 }
0x1b7e   :  { %v7790_v62 = vpop.f32.mrb[42].mxu1 }
0x1b7f   :  { %v7802_v23 = vadd.f32 %v7790_v62, %v16784_v28  ;;  %v7792_v61 = vpop.f32.mrb[43].mxu1  ;;  %v7795_v16 = vadd.f32 %v7790_v62, %v16865_v18 }
0x1b80   :  { %v7803_v43 = vadd.f32 %v7792_v61, %v16784_v28 }
0x1b81   :  { %7806 = vrot.lane.b32.xlu0 %v7802_v23, %s14052_s6  ;;  %v11561_v63 = vmul.f32 -1.442695, %v7795_v16 }
0x1b82   :  { %7808 = vrot.lane.b32.xlu1 %v7803_v43, %s14052_s6 }
0x1b83   :  { %13674 = vpow2.f32 %v11561_v63 }
0x1b8d   :  { %v13675_v56 = vpop.eup %13674 }
0x1b8e   :  { %v7799_v32 = vadd.f32 1.0, %v13675_v56  ;;  %v7598_v56 = vadd.f32 %v7597_v26, %v18696_v27 }
0x1b90   :  { %13676 = vrcp.f32 %v7799_v32 }
0x1b9a   :  { %v13677_v21 = vpop.eup %13676 }
0x1bee   :  { %v7671_v36 = vpop.f32.mrb[32].mxu0 }
0x1bef   :  { %v7683_v51 = vadd.f32 %v7671_v36, %v17016_v45  ;;  %v7673_v47 = vpop.f32.mrb[33].mxu0  ;;  %v7676_v52 = vadd.f32 %v7671_v36, %v7596_v3 }
0x1bf0   :  { %v7684_v46 = vadd.f32 %v7673_v47, %v17016_v45 }
0x1bf1   :  { %7687 = vrot.lane.b32.xlu0 %v7683_v51, %s14052_s6  ;;  %v11559_v4 = vmul.f32 -1.442695, %v7676_v52 }
0x1bf2   :  { %7689 = vrot.lane.b32.xlu1 %v7684_v46, %s14052_s6 }
0x1bf3   :  { %v7807_v20 = vpop.permute.xlu0 %7806  ;;  %13678 = vpow2.f32 %v11559_v4 }
0x1bf4   :  { %v7809_v8 = vpop.permute.xlu1 %7808 }
0x1bf5   :  { %v7810_v50 = vsel %vm3230_vm2, %v7807_v20, %v7809_v8 }
0x1bf6   :  { %v7812_v55 = vmul.f32 %v13677_v21, %v7810_v50  ;;  %v7831_v50 = vmul.f32 %v13677_v21, %v17321_v42 }
0x1bf8   :  { %7814 = vrot.lane.b32.xlu0 %v7812_v55, %s14053_s7 }
0x1bfd   :  { %v13679_v40 = vpop.eup %13678 }
0x1bfe   :  { %v7680_v31 = vadd.f32 1.0, %v13679_v40 }
0x1c00   :  { %13680 = vrcp.f32 %v7680_v31 }
0x1c0a   :  { %v13681_v13 = vpop.eup %13680 }
0x1c0b   :  { %v7702_v52 = vsub.f32 1.0, %v13681_v13  ;;  %v7712_v31 = vmul.f32 %v13681_v13, %v17335_v29 }
0x1c63   :  { %v7688_v5 = vpop.permute.xlu0 %7687 }
0x1c64   :  { %v7690_v0 = vpop.permute.xlu1 %7689 }
0x1c65   :  { %v7691_v62 = vsel %vm3230_vm2, %v7688_v5, %v7690_v0 }
0x1c66   :  { %v7693_v23 = vmul.f32 %v13681_v13, %v7691_v62 }
0x1c68   :  { %7695 = vrot.lane.b32.xlu1 %v7693_v23, %s14053_s7 }
0x1c6a   :  { %v7815_v61 = vpop.permute.xlu0 %7814 }
0x1c6b   :  { %v7817_v43 = vadd.f32 %v7815_v61, %v16865_v18  ;;  %v7818_v16 = vadd.f32 %v7815_v61, %v16874_v54  ;;  %v7821_v54 = vsub.f32 1.0, %v13677_v21 }
0x1c6d   :  { %13682 = vtanh.f32 %v7817_v43 }
0x1c6e   :  { %13684 = vtanh.f32 %v7818_v16 }
0x1c77   :  { %v13683_v48 = vpop.eup %13682 }
0x1c78   :  { %v13685_v63 = vpop.eup %13684  ;;  %7824 = vrot.lane.b32.xlu0 %v13683_v48, %s14054_s22 }
0x1c79   :  { %7826 = vrot.lane.b32.xlu1 %v13685_v63, %s14054_s22 }
0x1cda   :  { %v7696_v32 = vpop.permute.xlu1 %7695 }
0x1cdb   :  { %v7698_v36 = vadd.f32 %v7696_v32, %v7596_v3  ;;  %v7699_v51 = vadd.f32 %v7696_v32, %v7598_v56 }
0x1cdd   :  { %13686 = vtanh.f32 %v7698_v36 }
0x1cde   :  { %13688 = vtanh.f32 %v7699_v51 }
0x1ce7   :  { %v13687_v47 = vpop.eup %13686 }
0x1ce8   :  { %v13689_v46 = vpop.eup %13688  ;;  %7705 = vrot.lane.b32.xlu0 %v13687_v47, %s14054_s22 }
0x1ce9   :  { %7707 = vrot.lane.b32.xlu1 %v13689_v46, %s14054_s22 }
0x1cea   :  { %v7825_v18 = vpop.permute.xlu0 %7824 }
0x1ceb   :  { %v7827_v20 = vpop.permute.xlu1 %7826 }
0x1cec   :  { %v7828_v8 = vsel %vm5652_vm5, %v7825_v18, %v7827_v20 }
0x1ced   :  { %v7830_v55 = vmul.f32 %v7828_v8, %v7821_v54 }
0x1cef   :  { %v17380_v26 = vadd.f32 %v7831_v50, %v7830_v55 }
0x1cf1   :  { %7834 = vrot.lane.b32.xlu0 %v17380_v26, %s14054_s22 }
0x1d5a   :  { %v7706_v3 = vpop.permute.xlu0 %7705 }
0x1d5b   :  { %v7708_v4 = vpop.permute.xlu1 %7707 }
0x1d5c   :  { %v7709_v40 = vsel %vm5652_vm5, %v7706_v3, %v7708_v4 }
0x1d5d   :  { %v7711_v5 = vmul.f32 %v7709_v40, %v7702_v52 }
0x1d5f   :  { %v17386_v0 = vadd.f32 %v7712_v31, %v7711_v5 }
0x1d61   :  { %7910 = vrot.lane.b32.xlu1 %v17386_v0, %s14054_s22 }
0x1d63   :  { %v7835_v42 = vpop.permute.xlu0 %7834 }
0x1d64   :  { %11562 = vmatmul.mubr.msk.f32.vlgmr.msra.gmra.mrb[34].mxu0 %vm5536_vm6, %v7835_v42 }
0x1d65   :  { %13002 = vmatpush1.bf16.msra.mxu0 %v16651_v14  ;;  %8095 = vmatprep.mubr.f32.mxu0 %v18562_v41 }
0x1d66   :  { %13004 = vmatprep.subr.bf16.mxu0 %v16657_v24 }
0x1d69   :  { %13006 = vmatpush1.bf16.msra.mxu0 %v16662_v37 }
0x1d6a   :  { %13008 = vmatprep.subr.bf16.mxu0 %v16665_v11 }
0x1d6d   :  { %13010 = vmatpush1.bf16.msra.mxu0 %v16669_v39 }
0x1d6e   :  { %13024 = vmatprep.subr.bf16.mxu0 %v16958_v38 }
0x1d70   :  { %11565 = vmatmul.mubr.msk.f32.vlgmr.msra.gmra.mrb[36].mxu0 %vm5536_vm6, %v7835_v42 }
0x1d71   :  { %13026 = vmatpush1.bf16.msra.mxu0 %v16974_v33  ;;  %8285 = vmatprep.mubr.f32.mxu0 %v18562_v41 }
0x1d72   :  { %13028 = vmatprep.subr.bf16.mxu0 %v16976_v58 }
0x1d75   :  { %13030 = vmatpush1.bf16.msra.mxu0 %v16981_v59 }
0x1d76   :  { %13032 = vmatprep.subr.bf16.mxu0 %v16985_v17 }
0x1d79   :  { %13034 = vmatpush1.bf16.msra.mxu0 %v16991_v44 }
0x1d7a   :  { %13048 = vmatprep.subr.bf16.mxu0 %v16945_v22 }
0x1dd3   :  { %v7911_v29 = vpop.permute.xlu1 %7910 }
0x1dd4   :  { %11563 = vmatmul.mubr.msk.f32.vlgmr.msra.gmra.mrb[44].mxu1 %vm5536_vm6, %v7911_v29 }
0x1dd5   :  { %13014 = vmatpush1.bf16.msra.mxu1 %v16947_v6  ;;  %8209 = vmatprep.mubr.f32.mxu1 %v18562_v41 }
0x1dd6   :  { %13016 = vmatprep.subr.bf16.mxu1 %v16949_v7 }
0x1dd9   :  { %13018 = vmatpush1.bf16.msra.mxu1 %v16953_v12 }
0x1dda   :  { %13020 = vmatprep.subr.bf16.mxu1 %v16956_v53 }
0x1ddd   :  { %13022 = vmatpush1.bf16.msra.mxu1 %v16964_v15 }
0x1dde   :  { %13036 = vmatprep.subr.bf16.mxu1 %v16637_v9 }
0x1e37   :  { %v7904_v21 = vpop.f32.mrb[34].mxu0 }
0x1e38   :  { %v7906_v13 = vpop.f32.mrb[35].mxu0  ;;  %v7905_v50 = vadd.f32 %v7904_v21, %v17025_v30 }
0x1e43   :  { %v8097_v62 = vpop.f32.mrb[36].mxu0 }
0x1e44   :  { %v8109_v23 = vadd.f32 %v8097_v62, %v16784_v28  ;;  %v8099_v61 = vpop.f32.mrb[37].mxu0  ;;  %v8102_v16 = vadd.f32 %v8097_v62, %v16878_v57 }
0x1e45   :  { %v8110_v43 = vadd.f32 %v8099_v61, %v16784_v28 }
0x1e46   :  { %8113 = vrot.lane.b32.xlu0 %v8109_v23, %s14052_s6  ;;  %v11566_v48 = vmul.f32 -1.442695, %v8102_v16  ;;  %v7907_v16 = vadd.f32 %v7906_v13, %v18696_v27 }
0x1e47   :  { %8115 = vrot.lane.b32.xlu1 %v8110_v43, %s14052_s6 }
0x1e48   :  { %13690 = vpow2.f32 %v11566_v48 }
0x1e52   :  { %v13691_v36 = vpop.eup %13690 }
0x1e53   :  { %v8106_v47 = vadd.f32 1.0, %v13691_v36 }
0x1e55   :  { %13692 = vrcp.f32 %v8106_v47 }
0x1e5f   :  { %v13693_v54 = vpop.eup %13692 }
0x1ea7   :  { %v7980_v63 = vpop.f32.mrb[44].mxu1 }
0x1ea8   :  { %v7992_v56 = vadd.f32 %v7980_v63, %v17016_v45  ;;  %v7982_v32 = vpop.f32.mrb[45].mxu1  ;;  %v7985_v55 = vadd.f32 %v7980_v63, %v7905_v50 }
0x1ea9   :  { %v7993_v51 = vadd.f32 %v7982_v32, %v17016_v45 }
0x1eaa   :  { %7996 = vrot.lane.b32.xlu0 %v7992_v56, %s14052_s6  ;;  %v11564_v3 = vmul.f32 -1.442695, %v7985_v55 }
0x1eab   :  { %7998 = vrot.lane.b32.xlu1 %v7993_v51, %s14052_s6 }
0x1eac   :  { %13694 = vpow2.f32 %v11564_v3 }
0x1eb6   :  { %v13695_v52 = vpop.eup %13694 }
0x1eb7   :  { %v7989_v4 = vadd.f32 1.0, %v13695_v52 }
0x1eb8   :  { %v8114_v46 = vpop.permute.xlu0 %8113 }
0x1eb9   :  { %v8116_v18 = vpop.permute.xlu1 %8115  ;;  %13696 = vrcp.f32 %v7989_v4 }
0x1eba   :  { %v8117_v20 = vsel %vm3230_vm2, %v8114_v46, %v8116_v18  ;;  %v8138_v46 = vmul.f32 %v13693_v54, %v17380_v26 }
0x1ebb   :  { %v8119_v8 = vmul.f32 %v13693_v54, %v8117_v20 }
0x1ebd   :  { %8121 = vrot.lane.b32.xlu0 %v8119_v8, %s14053_s7 }
0x1ec3   :  { %v13697_v5 = vpop.eup %13696 }
0x1ec4   :  { %v8011_v8 = vsub.f32 1.0, %v13697_v5  ;;  %v8021_v3 = vmul.f32 %v13697_v5, %v17386_v0 }
0x1f1c   :  { %v7997_v40 = vpop.permute.xlu0 %7996 }
0x1f1d   :  { %v7999_v31 = vpop.permute.xlu1 %7998 }
0x1f1e   :  { %v8000_v42 = vsel %vm3230_vm2, %v7997_v40, %v7999_v31 }
0x1f1f   :  { %v8002_v29 = vmul.f32 %v13697_v5, %v8000_v42 }
0x1f21   :  { %8004 = vrot.lane.b32.xlu1 %v8002_v29, %s14053_s7 }
0x1f2f   :  { %v8122_v62 = vpop.permute.xlu0 %8121 }
0x1f30   :  { %v8124_v23 = vadd.f32 %v8122_v62, %v16878_v57  ;;  %v8125_v61 = vadd.f32 %v8122_v62, %v16882_v34  ;;  %v8128_v34 = vsub.f32 1.0, %v13693_v54 }
0x1f32   :  { %13698 = vtanh.f32 %v8124_v23 }
0x1f33   :  { %13700 = vtanh.f32 %v8125_v61 }
0x1f3c   :  { %v13699_v21 = vpop.eup %13698 }
0x1f3d   :  { %v13701_v43 = vpop.eup %13700  ;;  %8131 = vrot.lane.b32.xlu0 %v13699_v21, %s14054_s22 }
0x1f3e   :  { %8133 = vrot.lane.b32.xlu1 %v13701_v43, %s14054_s22 }
0x1f93   :  { %v8005_v48 = vpop.permute.xlu1 %8004 }
0x1f94   :  { %v8007_v63 = vadd.f32 %v8005_v48, %v7905_v50  ;;  %v8008_v56 = vadd.f32 %v8005_v48, %v7907_v16 }
0x1f96   :  { %13702 = vtanh.f32 %v8007_v63 }
0x1f97   :  { %13704 = vtanh.f32 %v8008_v56 }
0x1fa0   :  { %v13703_v32 = vpop.eup %13702 }
0x1fa1   :  { %v13705_v36 = vpop.eup %13704  ;;  %8014 = vrot.lane.b32.xlu0 %v13703_v32, %s14054_s22 }
0x1fa2   :  { %8016 = vrot.lane.b32.xlu1 %v13705_v36, %s14054_s22 }
0x1faf   :  { %v8132_v57 = vpop.permute.xlu0 %8131 }
0x1fb0   :  { %v8134_v51 = vpop.permute.xlu1 %8133 }
0x1fb1   :  { %v8135_v47 = vsel %vm5652_vm5, %v8132_v57, %v8134_v51 }
0x1fb2   :  { %v8137_v18 = vmul.f32 %v8135_v47, %v8128_v34 }
0x1fb4   :  { %v17437_v13 = vadd.f32 %v8138_v46, %v8137_v18 }
0x1fb6   :  { %8141 = vrot.lane.b32.xlu0 %v17437_v13, %s14054_s22 }
0x2013   :  { %v8015_v20 = vpop.permute.xlu0 %8014 }
0x2014   :  { %v8017_v50 = vpop.permute.xlu1 %8016 }
0x2015   :  { %v8018_v55 = vsel %vm5652_vm5, %v8015_v20, %v8017_v50 }
0x2016   :  { %v8020_v52 = vmul.f32 %v8018_v55, %v8011_v8 }
0x2018   :  { %v17443_v4 = vadd.f32 %v8021_v3, %v8020_v52 }
0x201a   :  { %8217 = vrot.lane.b32.xlu1 %v17443_v4, %s14054_s22 }
0x2028   :  { %v8142_v26 = vpop.permute.xlu0 %8141 }
0x2029   :  { %11567 = vmatmul.mubr.msk.f32.vlgmr.msra.gmra.mrb[46].mxu1 %vm5536_vm6, %v8142_v26 }
0x202a   :  { %13038 = vmatpush1.bf16.msra.mxu1 %v16651_v14  ;;  %8402 = vmatprep.mubr.f32.mxu1 %v18562_v41 }
0x202b   :  { %13040 = vmatprep.subr.bf16.mxu1 %v16657_v24 }
0x202e   :  { %13042 = vmatpush1.bf16.msra.mxu1 %v16662_v37 }
0x202f   :  { %13044 = vmatprep.subr.bf16.mxu1 %v16665_v11 }
0x2032   :  { %13046 = vmatpush1.bf16.msra.mxu1 %v16669_v39 }
0x2033   :  { %13060 = vmatprep.subr.bf16.mxu1 %v16958_v38 }
0x2035   :  { %11570 = vmatmul.mubr.msk.f32.vlgmr.msra.gmra.mrb[48].mxu1 %vm5536_vm6, %v8142_v26 }
0x2036   :  { %13062 = vmatpush1.bf16.msra.mxu1 %v16974_v33  ;;  %8592 = vmatprep.mubr.f32.mxu1 %v18562_v41 }
0x2037   :  { %13064 = vmatprep.subr.bf16.mxu1 %v16976_v58 }
0x203a   :  { %13066 = vmatpush1.bf16.msra.mxu1 %v16981_v59 }
0x203b   :  { %13068 = vmatprep.subr.bf16.mxu1 %v16985_v17 }
0x203e   :  { %13070 = vmatpush1.bf16.msra.mxu1 %v16991_v44 }
0x203f   :  { %13084 = vmatprep.subr.bf16.mxu1 %v16945_v22 }
0x208c   :  { %v8218_v0 = vpop.permute.xlu1 %8217 }
0x208d   :  { %11568 = vmatmul.mubr.msk.f32.vlgmr.msra.gmra.mrb[38].mxu0 %vm5536_vm6, %v8218_v0 }
0x208e   :  { %13050 = vmatpush1.bf16.msra.mxu0 %v16947_v6  ;;  %8516 = vmatprep.mubr.f32.mxu0 %v18562_v41 }
0x208f   :  { %13052 = vmatprep.subr.bf16.mxu0 %v16949_v7 }
0x2092   :  { %13054 = vmatpush1.bf16.msra.mxu0 %v16953_v12 }
0x2093   :  { %13056 = vmatprep.subr.bf16.mxu0 %v16956_v53 }
0x2096   :  { %13058 = vmatpush1.bf16.msra.mxu0 %v16964_v15 }
0x2097   :  { %13072 = vmatprep.subr.bf16.mxu0 %v16637_v9 }
0x20fc   :  { %v8211_v54 = vpop.f32.mrb[46].mxu1 }
0x20fd   :  { %v8213_v40 = vpop.f32.mrb[47].mxu1  ;;  %v8212_v51 = vadd.f32 %v8211_v54, %v17025_v30 }
0x2108   :  { %v8404_v31 = vpop.f32.mrb[48].mxu1 }
0x2109   :  { %v8416_v5 = vadd.f32 %v8404_v31, %v16784_v28  ;;  %v8406_v42 = vpop.f32.mrb[49].mxu1  ;;  %v8409_v62 = vadd.f32 %v8404_v31, %v16868_v2 }
0x210a   :  { %v8417_v29 = vadd.f32 %v8406_v42, %v16784_v28  ;;  %v8214_v42 = vadd.f32 %v8213_v40, %v18696_v27 }
0x210b   :  { %8420 = vrot.lane.b32.xlu0 %v8416_v5, %s14052_s6  ;;  %v11571_v23 = vmul.f32 -1.442695, %v8409_v62 }
0x210c   :  { %8422 = vrot.lane.b32.xlu1 %v8417_v29, %s14052_s6 }
0x210d   :  { %13706 = vpow2.f32 %v11571_v23 }
0x2117   :  { %v13707_v48 = vpop.eup %13706 }
0x2118   :  { %v8413_v63 = vadd.f32 1.0, %v13707_v48 }
0x211a   :  { %13708 = vrcp.f32 %v8413_v63 }
0x2124   :  { %v13709_v36 = vpop.eup %13708 }
0x2125   :  { %v8445_v48 = vmul.f32 %v13709_v36, %v17437_v13 }
0x2160   :  { %v8287_v61 = vpop.f32.mrb[38].mxu0 }
0x2161   :  { %v8299_v21 = vadd.f32 %v8287_v61, %v17016_v45  ;;  %v8289_v43 = vpop.f32.mrb[39].mxu0  ;;  %v8292_v47 = vadd.f32 %v8287_v61, %v8212_v51 }
0x2162   :  { %v8300_v16 = vadd.f32 %v8289_v43, %v17016_v45 }
0x2163   :  { %8303 = vrot.lane.b32.xlu0 %v8299_v21, %s14052_s6  ;;  %v11569_v46 = vmul.f32 -1.442695, %v8292_v47 }
0x2164   :  { %8305 = vrot.lane.b32.xlu1 %v8300_v16, %s14052_s6 }
0x2165   :  { %13710 = vpow2.f32 %v11569_v46 }
0x216f   :  { %v13711_v18 = vpop.eup %13710 }
0x2170   :  { %v8296_v20 = vadd.f32 1.0, %v13711_v18 }
0x2172   :  { %13712 = vrcp.f32 %v8296_v20 }
0x217c   :  { %v13713_v55 = vpop.eup %13712 }
0x217d   :  { %v8421_v56 = vpop.permute.xlu0 %8420 }
0x217e   :  { %v8423_v32 = vpop.permute.xlu1 %8422 }
0x217f   :  { %v8424_v57 = vsel %vm3230_vm2, %v8421_v56, %v8423_v32  ;;  %v8318_v32 = vsub.f32 1.0, %v13713_v55 }
0x2180   :  { %v8426_v34 = vmul.f32 %v13709_v36, %v8424_v57 }
0x2182   :  { %8428 = vrot.lane.b32.xlu0 %v8426_v34, %s14053_s7 }
0x21d5   :  { %v8304_v8 = vpop.permute.xlu0 %8303 }
0x21d6   :  { %v8306_v50 = vpop.permute.xlu1 %8305 }
0x21d7   :  { %v8307_v3 = vsel %vm3230_vm2, %v8304_v8, %v8306_v50 }
0x21d8   :  { %v8309_v52 = vmul.f32 %v13713_v55, %v8307_v3 }
0x21da   :  { %8311 = vrot.lane.b32.xlu1 %v8309_v52, %s14053_s7 }
0x21f4   :  { %v8429_v26 = vpop.permute.xlu0 %8428 }
0x21f5   :  { %v8431_v0 = vadd.f32 %v8429_v26, %v16868_v2  ;;  %v8432_v31 = vadd.f32 %v8429_v26, %v16871_v60  ;;  %v8435_v60 = vsub.f32 1.0, %v13709_v36 }
0x21f7   :  { %13714 = vtanh.f32 %v8431_v0 }
0x21f8   :  { %13716 = vtanh.f32 %v8432_v31 }
0x2201   :  { %v13715_v54 = vpop.eup %13714 }
0x2202   :  { %v13717_v5 = vpop.eup %13716  ;;  %8438 = vrot.lane.b32.xlu0 %v13715_v54, %s14054_s22 }
0x2203   :  { %8440 = vrot.lane.b32.xlu1 %v13717_v5, %s14054_s22 }
0x224c   :  { %v8312_v29 = vpop.permute.xlu1 %8311 }
0x224d   :  { %v8314_v62 = vadd.f32 %v8312_v29, %v8212_v51  ;;  %v8315_v23 = vadd.f32 %v8312_v29, %v8214_v42  ;;  %v8328_v51 = vmul.f32 %v13713_v55, %v17443_v4 }
0x224f   :  { %13718 = vtanh.f32 %v8314_v62 }
0x2250   :  { %13720 = vtanh.f32 %v8315_v23 }
0x2259   :  { %v13719_v61 = vpop.eup %13718 }
0x225a   :  { %v13721_v21 = vpop.eup %13720  ;;  %8321 = vrot.lane.b32.xlu0 %v13719_v61, %s14054_s22 }
0x225b   :  { %8323 = vrot.lane.b32.xlu1 %v13721_v21, %s14054_s22 }
0x2274   :  { %v8439_v2 = vpop.permute.xlu0 %8438 }
0x2275   :  { %v8441_v43 = vpop.permute.xlu1 %8440 }
0x2276   :  { %v8442_v16 = vsel %vm5652_vm5, %v8439_v2, %v8441_v43 }
0x2277   :  { %v8444_v63 = vmul.f32 %v8442_v16, %v8435_v60 }
0x2279   :  { %v17494_v40 = vadd.f32 %v8445_v48, %v8444_v63 }
0x227b   :  { %8448 = vrot.lane.b32.xlu0 %v17494_v40, %s14054_s22 }
0x22cc   :  { %v8322_v56 = vpop.permute.xlu0 %8321 }
0x22cd   :  { %v8324_v57 = vpop.permute.xlu1 %8323 }
0x22ce   :  { %v8325_v34 = vsel %vm5652_vm5, %v8322_v56, %v8324_v57 }
0x22cf   :  { %v8327_v47 = vmul.f32 %v8325_v34, %v8318_v32 }
0x22d1   :  { %v17500_v46 = vadd.f32 %v8328_v51, %v8327_v47 }
0x22d3   :  { %8524 = vrot.lane.b32.xlu1 %v17500_v46, %s14054_s22 }
0x22ed   :  { %v8449_v13 = vpop.permute.xlu0 %8448 }
0x22ee   :  { %11572 = vmatmul.mubr.msk.f32.vlgmr.msra.gmra.mrb[40].mxu0 %vm5536_vm6, %v8449_v13 }
0x22ef   :  { %13074 = vmatpush1.bf16.msra.mxu0 %v16651_v14  ;;  %8711 = vmatprep.mubr.f32.mxu0 %v18562_v41 }
0x22f0   :  { %13076 = vmatprep.subr.bf16.mxu0 %v16657_v24 }
0x22f3   :  { %13078 = vmatpush1.bf16.msra.mxu0 %v16662_v37 }
0x22f4   :  { %13080 = vmatprep.subr.bf16.mxu0 %v16665_v11 }
0x22f7   :  { %13082 = vmatpush1.bf16.msra.mxu0 %v16669_v39 }
0x22f8   :  { %13096 = vmatprep.subr.bf16.mxu0 %v16958_v38 }
0x22fa   :  { %11575 = vmatmul.mubr.msk.f32.vlgmr.msra.gmra.mrb[42].mxu0 %vm5536_vm6, %v8449_v13 }
0x22fb   :  { %13098 = vmatpush1.bf16.msra.mxu0 %v16974_v33  ;;  %8901 = vmatprep.mubr.f32.mxu0 %v18562_v41 }
0x22fc   :  { %13100 = vmatprep.subr.bf16.mxu0 %v16976_v58 }
0x22ff   :  { %13102 = vmatpush1.bf16.msra.mxu0 %v16981_v59 }
0x2300   :  { %13104 = vmatprep.subr.bf16.mxu0 %v16985_v17 }
0x2303   :  { %13106 = vmatpush1.bf16.msra.mxu0 %v16991_v44 }
0x2304   :  { %13120 = vmatprep.subr.bf16.mxu0 %v16945_v22 }
0x2345   :  { %v8525_v4 = vpop.permute.xlu1 %8524 }
0x2346   :  { %11573 = vmatmul.mubr.msk.f32.vlgmr.msra.gmra.mrb[50].mxu1 %vm5536_vm6, %v8525_v4 }
0x2347   :  { %13086 = vmatpush1.bf16.msra.mxu1 %v16947_v6  ;;  %8825 = vmatprep.mubr.f32.mxu1 %v18562_v41 }
0x2348   :  { %13088 = vmatprep.subr.bf16.mxu1 %v16949_v7 }
0x234b   :  { %13090 = vmatpush1.bf16.msra.mxu1 %v16953_v12 }
0x234c   :  { %13092 = vmatprep.subr.bf16.mxu1 %v16956_v53 }
0x234f   :  { %13094 = vmatpush1.bf16.msra.mxu1 %v16964_v15 }
0x2350   :  { %13108 = vmatprep.subr.bf16.mxu1 %v16637_v9 }
0x23c1   :  { %v8518_v36 = vpop.f32.mrb[40].mxu0 }
0x23c2   :  { %v8520_v18 = vpop.f32.mrb[41].mxu0  ;;  %v8519_v2 = vadd.f32 %v8518_v36, %v17025_v30 }
0x23cd   :  { %v8713_v20 = vpop.f32.mrb[42].mxu0 }
0x23ce   :  { %v8725_v8 = vadd.f32 %v8713_v20, %v16784_v28  ;;  %v8715_v50 = vpop.f32.mrb[43].mxu0  ;;  %v8718_v31 = vadd.f32 %v8713_v20, %v16887_v1  ;;  %v8521_v20 = vadd.f32 %v8520_v18, %v18696_v27 }
0x23cf   :  { %v8726_v55 = vadd.f32 %v8715_v50, %v16784_v28 }
0x23d0   :  { %8729 = vrot.lane.b32.xlu0 %v8725_v8, %s14052_s6  ;;  %v11576_v54 = vmul.f32 -1.442695, %v8718_v31 }
0x23d1   :  { %8731 = vrot.lane.b32.xlu1 %v8726_v55, %s14052_s6 }
0x23d2   :  { %13722 = vpow2.f32 %v11576_v54 }
0x23dc   :  { %v13723_v5 = vpop.eup %13722 }
0x23dd   :  { %v8722_v42 = vadd.f32 1.0, %v13723_v5 }
0x23df   :  { %13724 = vrcp.f32 %v8722_v42 }
0x23e9   :  { %v13725_v23 = vpop.eup %13724 }
0x23ea   :  { %v8754_v31 = vmul.f32 %v13725_v23, %v17494_v40 }
0x2419   :  { %v8594_v3 = vpop.f32.mrb[50].mxu1 }
0x241a   :  { %v8606_v52 = vadd.f32 %v8594_v3, %v17016_v45  ;;  %v8596_v26 = vpop.f32.mrb[51].mxu1  ;;  %v8599_v60 = vadd.f32 %v8594_v3, %v8519_v2 }
0x241b   :  { %v8607_v0 = vadd.f32 %v8596_v26, %v17016_v45 }
0x241c   :  { %8610 = vrot.lane.b32.xlu0 %v8606_v52, %s14052_s6  ;;  %v11574_v43 = vmul.f32 -1.442695, %v8599_v60 }
0x241d   :  { %8612 = vrot.lane.b32.xlu1 %v8607_v0, %s14052_s6 }
0x241e   :  { %13726 = vpow2.f32 %v11574_v43 }
0x2428   :  { %v13727_v16 = vpop.eup %13726 }
0x2429   :  { %v8603_v48 = vadd.f32 1.0, %v13727_v16 }
0x242b   :  { %13728 = vrcp.f32 %v8603_v48 }
0x2435   :  { %v13729_v32 = vpop.eup %13728 }
0x2436   :  { %v8625_v42 = vsub.f32 1.0, %v13729_v32 }
0x2442   :  { %v8730_v29 = vpop.permute.xlu0 %8729 }
0x2443   :  { %v8732_v62 = vpop.permute.xlu1 %8731 }
0x2444   :  { %v8733_v61 = vsel %vm3230_vm2, %v8730_v29, %v8732_v62 }
0x2445   :  { %v8735_v21 = vmul.f32 %v13725_v23, %v8733_v61  ;;  %v8635_v61 = vmul.f32 %v13729_v32, %v17500_v46 }
0x2447   :  { %8737 = vrot.lane.b32.xlu0 %v8735_v21, %s14053_s7 }
0x248e   :  { %v8611_v63 = vpop.permute.xlu0 %8610 }
0x248f   :  { %v8613_v56 = vpop.permute.xlu1 %8612 }
0x2490   :  { %v8614_v57 = vsel %vm3230_vm2, %v8611_v63, %v8613_v56 }
0x2491   :  { %v8616_v34 = vmul.f32 %v13729_v32, %v8614_v57 }
0x2493   :  { %8618 = vrot.lane.b32.xlu1 %v8616_v34, %s14053_s7 }
0x24b9   :  { %v8738_v51 = vpop.permute.xlu0 %8737 }
0x24ba   :  { %v8740_v47 = vadd.f32 %v8738_v51, %v16887_v1  ;;  %v8741_v13 = vadd.f32 %v8738_v51, %v16890_v35  ;;  %v8744_v35 = vsub.f32 1.0, %v13725_v23 }
0x24bc   :  { %13730 = vtanh.f32 %v8740_v47 }
0x24bd   :  { %13732 = vtanh.f32 %v8741_v13 }
0x24c6   :  { %v13731_v4 = vpop.eup %13730 }
0x24c7   :  { %v13733_v36 = vpop.eup %13732  ;;  %8747 = vrot.lane.b32.xlu0 %v13731_v4, %s14054_s22 }
0x24c8   :  { %8749 = vrot.lane.b32.xlu1 %v13733_v36, %s14054_s22 }
0x2505   :  { %v8619_v8 = vpop.permute.xlu1 %8618 }
0x2506   :  { %v8621_v50 = vadd.f32 %v8619_v8, %v8519_v2  ;;  %v8622_v55 = vadd.f32 %v8619_v8, %v8521_v20 }
0x2508   :  { %13734 = vtanh.f32 %v8621_v50 }
0x2509   :  { %13736 = vtanh.f32 %v8622_v55 }
0x2512   :  { %v13735_v3 = vpop.eup %13734 }
0x2513   :  { %v13737_v52 = vpop.eup %13736  ;;  %8628 = vrot.lane.b32.xlu0 %v13735_v3, %s14054_s22 }
0x2514   :  { %8630 = vrot.lane.b32.xlu1 %v13737_v52, %s14054_s22 }
0x2539   :  { %v8748_v1 = vpop.permute.xlu0 %8747 }
0x253a   :  { %v8750_v26 = vpop.permute.xlu1 %8749 }
0x253b   :  { %v8751_v0 = vsel %vm5652_vm5, %v8748_v1, %v8750_v26 }
0x253c   :  { %v8753_v54 = vmul.f32 %v8751_v0, %v8744_v35 }
0x253e   :  { %v17551_v18 = vadd.f32 %v8754_v31, %v8753_v54 }
0x2540   :  { %8757 = vrot.lane.b32.xlu0 %v17551_v18, %s14054_s22 }
0x2585   :  { %v8629_v5 = vpop.permute.xlu0 %8628 }
0x2586   :  { %v8631_v29 = vpop.permute.xlu1 %8630 }
0x2587   :  { %v8632_v62 = vsel %vm5652_vm5, %v8629_v5, %v8631_v29 }
0x2588   :  { %v8634_v21 = vmul.f32 %v8632_v62, %v8625_v42 }
0x258a   :  { %v17557_v2 = vadd.f32 %v8635_v61, %v8634_v21 }
0x258c   :  { %8833 = vrot.lane.b32.xlu1 %v17557_v2, %s14054_s22 }
0x25b2   :  { %v8758_v40 = vpop.permute.xlu0 %8757 }
0x25b3   :  { %11577 = vmatmul.mubr.msk.f32.vlgmr.msra.gmra.mrb[52].mxu1 %vm5536_vm6, %v8758_v40 }
0x25b4   :  { %13110 = vmatpush1.bf16.msra.mxu1 %v16651_v14  ;;  %9020 = vmatprep.mubr.f32.mxu1 %v18562_v41 }
0x25b5   :  { %13112 = vmatprep.subr.bf16.mxu1 %v16657_v24 }
0x25b8   :  { %13114 = vmatpush1.bf16.msra.mxu1 %v16662_v37 }
0x25b9   :  { %13116 = vmatprep.subr.bf16.mxu1 %v16665_v11 }
0x25bc   :  { %13118 = vmatpush1.bf16.msra.mxu1 %v16669_v39 }
0x25bd   :  { %13132 = vmatprep.subr.bf16.mxu1 %v16958_v38 }
0x25bf   :  { %11580 = vmatmul.mubr.msk.f32.vlgmr.msra.gmra.mrb[54].mxu1 %vm5536_vm6, %v8758_v40 }
0x25c0   :  { %13134 = vmatpush1.bf16.msra.mxu1 %v16974_v33  ;;  %9210 = vmatprep.mubr.f32.mxu1 %v18562_v41 }
0x25c1   :  { %13136 = vmatprep.subr.bf16.mxu1 %v16976_v58 }
0x25c4   :  { %13138 = vmatpush1.bf16.msra.mxu1 %v16981_v59 }
0x25c5   :  { %13140 = vmatprep.subr.bf16.mxu1 %v16985_v17 }
0x25c8   :  { %13142 = vmatpush1.bf16.msra.mxu1 %v16991_v44 }
0x25c9   :  { %13156 = vmatprep.subr.bf16.mxu1 %v16945_v22 }
0x25fe   :  { %v8834_v46 = vpop.permute.xlu1 %8833 }
0x25ff   :  { %11578 = vmatmul.mubr.msk.f32.vlgmr.msra.gmra.mrb[44].mxu0 %vm5536_vm6, %v8834_v46 }
0x2600   :  { %13122 = vmatpush1.bf16.msra.mxu0 %v16947_v6  ;;  %9134 = vmatprep.mubr.f32.mxu0 %v18562_v41 }
0x2601   :  { %13124 = vmatprep.subr.bf16.mxu0 %v16949_v7 }
0x2604   :  { %13126 = vmatpush1.bf16.msra.mxu0 %v16953_v12 }
0x2605   :  { %13128 = vmatprep.subr.bf16.mxu0 %v16956_v53 }
0x2608   :  { %13130 = vmatpush1.bf16.msra.mxu0 %v16964_v15 }
0x2609   :  { %13144 = vmatprep.subr.bf16.mxu0 %v16637_v9 }
0x2686   :  { %v8827_v23 = vpop.f32.mrb[52].mxu1 }
0x2687   :  { %v8829_v60 = vpop.f32.mrb[53].mxu1  ;;  %v8828_v3 = vadd.f32 %v8827_v23, %v17025_v30 }
0x2688   :  { %v8830_v46 = vadd.f32 %v8829_v60, %v18696_v27 }
0x2692   :  { %v9022_v43 = vpop.f32.mrb[54].mxu1 }
0x2693   :  { %v9034_v16 = vadd.f32 %v9022_v43, %v16784_v28  ;;  %v9024_v48 = vpop.f32.mrb[55].mxu1  ;;  %v9027_v51 = vadd.f32 %v9022_v43, %v16895_v25 }
0x2694   :  { %v9035_v63 = vadd.f32 %v9024_v48, %v16784_v28 }
0x2695   :  { %9038 = vrot.lane.b32.xlu0 %v9034_v16, %s14052_s6  ;;  %v11581_v47 = vmul.f32 -1.442695, %v9027_v51 }
0x2696   :  { %9040 = vrot.lane.b32.xlu1 %v9035_v63, %s14052_s6 }
0x2697   :  { %13738 = vpow2.f32 %v11581_v47 }
0x26a1   :  { %v13739_v13 = vpop.eup %13738 }
0x26a2   :  { %v9031_v4 = vadd.f32 1.0, %v13739_v13 }
0x26a4   :  { %13740 = vrcp.f32 %v9031_v4 }
0x26ae   :  { %v13741_v8 = vpop.eup %13740 }
0x26d2   :  { %v8903_v56 = vpop.f32.mrb[44].mxu0 }
0x26d3   :  { %v8915_v32 = vadd.f32 %v8903_v56, %v17016_v45  ;;  %v8905_v57 = vpop.f32.mrb[45].mxu0  ;;  %v8908_v52 = vadd.f32 %v8903_v56, %v8828_v3 }
0x26d4   :  { %v8916_v34 = vadd.f32 %v8905_v57, %v17016_v45  ;;  %v9063_v57 = vmul.f32 %v13741_v8, %v17551_v18 }
0x26d5   :  { %8919 = vrot.lane.b32.xlu0 %v8915_v32, %s14052_s6  ;;  %v11579_v1 = vmul.f32 -1.442695, %v8908_v52 }
0x26d6   :  { %8921 = vrot.lane.b32.xlu1 %v8916_v34, %s14052_s6 }
0x26d7   :  { %13742 = vpow2.f32 %v11579_v1 }
0x26e1   :  { %v13743_v35 = vpop.eup %13742 }
0x26e2   :  { %v8912_v26 = vadd.f32 1.0, %v13743_v35 }
0x26e4   :  { %13744 = vrcp.f32 %v8912_v26 }
0x26ee   :  { %v13745_v54 = vpop.eup %13744 }
0x26ef   :  { %v8934_v47 = vsub.f32 1.0, %v13745_v54 }
0x2707   :  { %v9039_v36 = vpop.permute.xlu0 %9038 }
0x2708   :  { %v9041_v20 = vpop.permute.xlu1 %9040 }
0x2709   :  { %v9042_v50 = vsel %vm3230_vm2, %v9039_v36, %v9041_v20  ;;  %v8944_v36 = vmul.f32 %v13745_v54, %v17557_v2 }
0x270a   :  { %v9044_v55 = vmul.f32 %v13741_v8, %v9042_v50 }
0x270c   :  { %9046 = vrot.lane.b32.xlu0 %v9044_v55, %s14053_s7 }
0x2747   :  { %v8920_v0 = vpop.permute.xlu0 %8919 }
0x2748   :  { %v8922_v31 = vpop.permute.xlu1 %8921 }
0x2749   :  { %v8923_v5 = vsel %vm3230_vm2, %v8920_v0, %v8922_v31 }
0x274a   :  { %v8925_v42 = vmul.f32 %v13745_v54, %v8923_v5 }
0x274c   :  { %8927 = vrot.lane.b32.xlu1 %v8925_v42, %s14053_s7 }
0x277e   :  { %v9047_v29 = vpop.permute.xlu0 %9046 }
0x277f   :  { %v9049_v62 = vadd.f32 %v9047_v29, %v16895_v25  ;;  %v9050_v61 = vadd.f32 %v9047_v29, %v16900_v19  ;;  %v9053_v19 = vsub.f32 1.0, %v13741_v8 }
0x2781   :  { %13746 = vtanh.f32 %v9049_v62 }
0x2782   :  { %13748 = vtanh.f32 %v9050_v61 }
0x278b   :  { %v13747_v21 = vpop.eup %13746 }
0x278c   :  { %v13749_v40 = vpop.eup %13748  ;;  %9056 = vrot.lane.b32.xlu0 %v13747_v21, %s14054_s22 }
0x278d   :  { %9058 = vrot.lane.b32.xlu1 %v13749_v40, %s14054_s22 }
0x27be   :  { %v8928_v23 = vpop.permute.xlu1 %8927 }
0x27bf   :  { %v8930_v43 = vadd.f32 %v8928_v23, %v8828_v3  ;;  %v8931_v16 = vadd.f32 %v8928_v23, %v8830_v46 }
0x27c1   :  { %13750 = vtanh.f32 %v8930_v43 }
0x27c2   :  { %13752 = vtanh.f32 %v8931_v16 }
0x27cb   :  { %v13751_v48 = vpop.eup %13750 }
0x27cc   :  { %v13753_v63 = vpop.eup %13752  ;;  %8937 = vrot.lane.b32.xlu0 %v13751_v48, %s14054_s22 }
0x27cd   :  { %8939 = vrot.lane.b32.xlu1 %v13753_v63, %s14054_s22 }
0x27fe   :  { %v9057_v25 = vpop.permute.xlu0 %9056 }
0x27ff   :  { %v9059_v56 = vpop.permute.xlu1 %9058 }
0x2800   :  { %v9060_v32 = vsel %vm5652_vm5, %v9057_v25, %v9059_v56 }
0x2801   :  { %v9062_v34 = vmul.f32 %v9060_v32, %v9053_v19 }
0x2803   :  { %v17608_v60 = vadd.f32 %v9063_v57, %v9062_v34 }
0x2805   :  { %9066 = vrot.lane.b32.xlu0 %v17608_v60, %s14054_s22 }
0x283e   :  { %v8938_v51 = vpop.permute.xlu0 %8937 }
0x283f   :  { %v8940_v13 = vpop.permute.xlu1 %8939 }
0x2840   :  { %v8941_v4 = vsel %vm5652_vm5, %v8938_v51, %v8940_v13 }
0x2841   :  { %v8943_v20 = vmul.f32 %v8941_v4, %v8934_v47 }
0x2843   :  { %v17614_v50 = vadd.f32 %v8944_v36, %v8943_v20 }
0x2845   :  { %9142 = vrot.lane.b32.xlu1 %v17614_v50, %s14054_s22 }
0x2877   :  { %v9067_v18 = vpop.permute.xlu0 %9066 }
0x2878   :  { %11582 = vmatmul.mubr.msk.f32.vlgmr.msra.gmra.mrb[46].mxu0 %vm5536_vm6, %v9067_v18 }
0x2879   :  { %13146 = vmatpush1.bf16.msra.mxu0 %v16651_v14  ;;  %9329 = vmatprep.mubr.f32.mxu0 %v18562_v41 }
0x287a   :  { %13148 = vmatprep.subr.bf16.mxu0 %v16657_v24 }
0x287d   :  { %13150 = vmatpush1.bf16.msra.mxu0 %v16662_v37 }
0x287e   :  { %13152 = vmatprep.subr.bf16.mxu0 %v16665_v11 }
0x2881   :  { %13154 = vmatpush1.bf16.msra.mxu0 %v16669_v39 }
0x2882   :  { %13168 = vmatprep.subr.bf16.mxu0 %v16958_v38 }
0x2884   :  { %11585 = vmatmul.mubr.msk.f32.vlgmr.msra.gmra.mrb[48].mxu0 %vm5536_vm6, %v9067_v18 }
0x2885   :  { %13170 = vmatpush1.bf16.msra.mxu0 %v16974_v33  ;;  %9519 = vmatprep.mubr.f32.mxu0 %v18562_v41 }
0x2886   :  { %13172 = vmatprep.subr.bf16.mxu0 %v16976_v58 }
0x2889   :  { %13174 = vmatpush1.bf16.msra.mxu0 %v16981_v59 }
0x288a   :  { %13176 = vmatprep.subr.bf16.mxu0 %v16985_v17 }
0x288d   :  { %13178 = vmatpush1.bf16.msra.mxu0 %v16991_v44 }
0x288e   :  { %13192 = vmatprep.subr.bf16.mxu0 %v16945_v22 }
0x28b7   :  { %v9143_v2 = vpop.permute.xlu1 %9142 }
0x28b8   :  { %11583 = vmatmul.mubr.msk.f32.vlgmr.msra.gmra.mrb[56].mxu1 %vm5536_vm6, %v9143_v2 }
0x28b9   :  { %13158 = vmatpush1.bf16.msra.mxu1 %v16947_v6  ;;  %9443 = vmatprep.mubr.f32.mxu1 %v18562_v41 }
0x28ba   :  { %13160 = vmatprep.subr.bf16.mxu1 %v16949_v7 }
0x28bd   :  { %13162 = vmatpush1.bf16.msra.mxu1 %v16953_v12 }
0x28be   :  { %13164 = vmatprep.subr.bf16.mxu1 %v16956_v53 }
0x28c1   :  { %13166 = vmatpush1.bf16.msra.mxu1 %v16964_v15 }
0x28c2   :  { %13180 = vmatprep.subr.bf16.mxu1 %v16637_v9 }
0x294b   :  { %v9136_v8 = vpop.f32.mrb[46].mxu0 }
0x294c   :  { %v9138_v55 = vpop.f32.mrb[47].mxu0  ;;  %v9137_v43 = vadd.f32 %v9136_v8, %v17025_v30 }
0x294d   :  { %v9139_v20 = vadd.f32 %v9138_v55, %v18696_v27 }
0x2957   :  { %v9331_v3 = vpop.f32.mrb[48].mxu0 }
0x2958   :  { %v9343_v52 = vadd.f32 %v9331_v3, %v16784_v28  ;;  %v9333_v1 = vpop.f32.mrb[49].mxu0  ;;  %v9336_v5 = vadd.f32 %v9331_v3, %v16905_v49 }
0x2959   :  { %v9344_v35 = vadd.f32 %v9333_v1, %v16784_v28 }
0x295a   :  { %9347 = vrot.lane.b32.xlu0 %v9343_v52, %s14052_s6  ;;  %v11586_v42 = vmul.f32 -1.442695, %v9336_v5 }
0x295b   :  { %9349 = vrot.lane.b32.xlu1 %v9344_v35, %s14052_s6 }
0x295c   :  { %13754 = vpow2.f32 %v11586_v42 }
0x2966   :  { %v13755_v29 = vpop.eup %13754 }
0x2967   :  { %v9340_v62 = vadd.f32 1.0, %v13755_v29 }
0x2969   :  { %13756 = vrcp.f32 %v9340_v62 }
0x2973   :  { %v13757_v40 = vpop.eup %13756 }
0x298b   :  { %v9212_v26 = vpop.f32.mrb[56].mxu1 }
0x298c   :  { %v9224_v0 = vadd.f32 %v9212_v26, %v17016_v45  ;;  %v9214_v31 = vpop.f32.mrb[57].mxu1  ;;  %v9217_v16 = vadd.f32 %v9212_v26, %v9137_v43  ;;  %v9372_v26 = vmul.f32 %v13757_v40, %v17608_v60 }
0x298d   :  { %v9225_v54 = vadd.f32 %v9214_v31, %v17016_v45 }
0x298e   :  { %9228 = vrot.lane.b32.xlu0 %v9224_v0, %s14052_s6  ;;  %v11584_v48 = vmul.f32 -1.442695, %v9217_v16 }
0x298f   :  { %9230 = vrot.lane.b32.xlu1 %v9225_v54, %s14052_s6 }
0x2990   :  { %13758 = vpow2.f32 %v11584_v48 }
0x299a   :  { %v13759_v63 = vpop.eup %13758 }
0x299b   :  { %v9221_v25 = vadd.f32 1.0, %v13759_v63 }
0x299d   :  { %13760 = vrcp.f32 %v9221_v25 }
0x29a7   :  { %v13761_v32 = vpop.eup %13760 }
0x29a8   :  { %v9243_v54 = vsub.f32 1.0, %v13761_v32  ;;  %v9253_v29 = vmul.f32 %v13761_v32, %v17614_v50 }
0x29cc   :  { %v9348_v61 = vpop.permute.xlu0 %9347 }
0x29cd   :  { %v9350_v21 = vpop.permute.xlu1 %9349 }
0x29ce   :  { %v9351_v46 = vsel %vm3230_vm2, %v9348_v61, %v9350_v21 }
0x29cf   :  { %v9353_v23 = vmul.f32 %v13757_v40, %v9351_v46 }
0x29d1   :  { %9355 = vrot.lane.b32.xlu0 %v9353_v23, %s14053_s7 }
0x2a00   :  { %v9229_v19 = vpop.permute.xlu0 %9228 }
0x2a01   :  { %v9231_v56 = vpop.permute.xlu1 %9230 }
0x2a02   :  { %v9232_v57 = vsel %vm3230_vm2, %v9229_v19, %v9231_v56 }
0x2a03   :  { %v9234_v34 = vmul.f32 %v13761_v32, %v9232_v57  ;;  %v18697_v57 = vld [vmem:[#allocation35_spill] sm:$0xff] }
0x2a05   :  { %9236 = vrot.lane.b32.xlu1 %v9234_v34, %s14053_s7 }
0x2a43   :  { %v9356_v51 = vpop.permute.xlu0 %9355 }
0x2a44   :  { %v9358_v47 = vadd.f32 %v9356_v51, %v16905_v49  ;;  %v9359_v13 = vadd.f32 %v9356_v51, %v16910_v10  ;;  %v9362_v10 = vsub.f32 1.0, %v13757_v40 }
0x2a46   :  { %13762 = vtanh.f32 %v9358_v47 }
0x2a47   :  { %13764 = vtanh.f32 %v9359_v13 }
0x2a50   :  { %v13763_v4 = vpop.eup %13762 }
0x2a51   :  { %v13765_v36 = vpop.eup %13764  ;;  %9365 = vrot.lane.b32.xlu0 %v13763_v4, %s14054_s22 }
0x2a52   :  { %9367 = vrot.lane.b32.xlu1 %v13765_v36, %s14054_s22 }
0x2a77   :  { %v9237_v18 = vpop.permute.xlu1 %9236 }
0x2a78   :  { %v9239_v2 = vadd.f32 %v9237_v18, %v9137_v43  ;;  %v9240_v8 = vadd.f32 %v9237_v18, %v9139_v20 }
0x2a7a   :  { %13766 = vtanh.f32 %v9239_v2 }
0x2a7b   :  { %13768 = vtanh.f32 %v9240_v8 }
0x2a84   :  { %v13767_v3 = vpop.eup %13766 }
0x2a85   :  { %v13769_v52 = vpop.eup %13768  ;;  %9246 = vrot.lane.b32.xlu0 %v13767_v3, %s14054_s22 }
0x2a86   :  { %9248 = vrot.lane.b32.xlu1 %v13769_v52, %s14054_s22 }
0x2ac3   :  { %v9366_v49 = vpop.permute.xlu0 %9365 }
0x2ac4   :  { %v9368_v1 = vpop.permute.xlu1 %9367 }
0x2ac5   :  { %v9369_v35 = vsel %vm5652_vm5, %v9366_v49, %v9368_v1 }
0x2ac6   :  { %v9371_v0 = vmul.f32 %v9369_v35, %v9362_v10 }
0x2ac8   :  { %v17665_v55 = vadd.f32 %v9372_v26, %v9371_v0 }
0x2aca   :  { %9375 = vrot.lane.b32.xlu0 %v17665_v55, %s14054_s22 }
0x2af7   :  { %v9247_v31 = vpop.permute.xlu0 %9246 }
0x2af8   :  { %v9249_v5 = vpop.permute.xlu1 %9248 }
0x2af9   :  { %v9250_v42 = vsel %vm5652_vm5, %v9247_v31, %v9249_v5 }
0x2afa   :  { %v9252_v62 = vmul.f32 %v9250_v42, %v9243_v54 }
0x2afc   :  { %v17671_v61 = vadd.f32 %v9253_v29, %v9252_v62  ;;  %v18698_v62 = vld [vmem:[#allocation36_spill] sm:$0xff] }
0x2afe   :  { %9451 = vrot.lane.b32.xlu1 %v17671_v61, %s14054_s22 }
0x2b3c   :  { %v9376_v60 = vpop.permute.xlu0 %9375 }
0x2b3d   :  { %11587 = vmatmul.mubr.msk.f32.vlgmr.msra.gmra.mrb[58].mxu1 %vm5536_vm6, %v9376_v60 }
0x2b3e   :  { %13182 = vmatpush1.bf16.msra.mxu1 %v16651_v14  ;;  %9638 = vmatprep.mubr.f32.mxu1 %v18562_v41 }
0x2b3f   :  { %13184 = vmatprep.subr.bf16.mxu1 %v16657_v24 }
0x2b42   :  { %13186 = vmatpush1.bf16.msra.mxu1 %v16662_v37 }
0x2b43   :  { %13188 = vmatprep.subr.bf16.mxu1 %v16665_v11 }
0x2b46   :  { %13190 = vmatpush1.bf16.msra.mxu1 %v16669_v39 }
0x2b47   :  { %13204 = vmatprep.subr.bf16.mxu1 %v16958_v38 }
0x2b49   :  { %11590 = vmatmul.mubr.msk.f32.vlgmr.msra.gmra.mrb[60].mxu1 %vm5536_vm6, %v9376_v60 }
0x2b4a   :  { %13206 = vmatpush1.bf16.msra.mxu1 %v16974_v33  ;;  %9828 = vmatprep.mubr.f32.mxu1 %v18562_v41 }
0x2b4b   :  { %13208 = vmatprep.subr.bf16.mxu1 %v16976_v58 }
0x2b4e   :  { %13210 = vmatpush1.bf16.msra.mxu1 %v16981_v59 }
0x2b4f   :  { %13212 = vmatprep.subr.bf16.mxu1 %v16985_v17 }
0x2b52   :  { %13214 = vmatpush1.bf16.msra.mxu1 %v16991_v44 }
0x2b53   :  { %13228 = vmatprep.subr.bf16.mxu1 %v16945_v22 }
0x2b70   :  { %v9452_v50 = vpop.permute.xlu1 %9451 }
0x2b71   :  { %11588 = vmatmul.mubr.msk.f32.vlgmr.msra.gmra.mrb[50].mxu0 %vm5536_vm6, %v9452_v50 }
0x2b72   :  { %13194 = vmatpush1.bf16.msra.mxu0 %v16947_v6  ;;  %9752 = vmatprep.mubr.f32.mxu0 %v18562_v41 }
0x2b73   :  { %13196 = vmatprep.subr.bf16.mxu0 %v16949_v7 }
0x2b76   :  { %13198 = vmatpush1.bf16.msra.mxu0 %v16953_v12 }
0x2b77   :  { %13200 = vmatprep.subr.bf16.mxu0 %v16956_v53 }
0x2b7a   :  { %13202 = vmatpush1.bf16.msra.mxu0 %v16964_v15 }
0x2b7b   :  { %13216 = vmatprep.subr.bf16.mxu0 %v16637_v9 }
0x2c10   :  { %v9445_v21 = vpop.f32.mrb[58].mxu1 }
0x2c11   :  { %v9447_v40 = vpop.f32.mrb[59].mxu1  ;;  %v9446_v56 = vadd.f32 %v9445_v21, %v17025_v30 }
0x2c12   :  { %v9448_v0 = vadd.f32 %v9447_v40, %v18696_v27 }
0x2c1c   :  { %v9640_v46 = vpop.f32.mrb[60].mxu1 }
0x2c1d   :  { %v9642_v23 = vpop.f32.mrb[61].mxu1  ;;  %v9652_v25 = vadd.f32 %v9640_v46, %v16784_v28  ;;  %v9645_v34 = vadd.f32 %v9640_v46, %v18697_v57 }
0x2c1e   :  { %v9653_v19 = vadd.f32 %v9642_v23, %v16784_v28 }
0x2c1f   :  { %v11591_v47 = vmul.f32 -1.442695, %v9645_v34 }
0x2c44   :  { %v9521_v43 = vpop.f32.mrb[50].mxu0 }
0x2c45   :  { %v9533_v16 = vadd.f32 %v9521_v43, %v17016_v45  ;;  %v9523_v48 = vpop.f32.mrb[51].mxu0  ;;  %v9526_v32 = vadd.f32 %v9521_v43, %v9446_v56 }
0x2c46   :  { %v9534_v63 = vadd.f32 %v9523_v48, %v17016_v45 }
0x2c47   :  { %9537 = vrot.lane.b32.xlu0 %v9533_v16, %s14052_s6  ;;  %v11589_v51 = vmul.f32 -1.442695, %v9526_v32 }
0x2c48   :  { %9539 = vrot.lane.b32.xlu1 %v9534_v63, %s14052_s6 }
0x2c49   :  { %13770 = vpow2.f32 %v11589_v51 }
0x2c4a   :  { %13772 = vpow2.f32 %v11591_v47 }
0x2c4b   :  { %9656 = vrot.lane.b32.xlu0 %v9652_v25, %s14052_s6 }
0x2c4c   :  { %9658 = vrot.lane.b32.xlu1 %v9653_v19, %s14052_s6 }
0x2c53   :  { %v13771_v13 = vpop.eup %13770 }
0x2c54   :  { %v9530_v4 = vadd.f32 1.0, %v13771_v13  ;;  %v13773_v36 = vpop.eup %13772 }
0x2c55   :  { %v9649_v20 = vadd.f32 1.0, %v13773_v36 }
0x2c56   :  { %13774 = vrcp.f32 %v9530_v4 }
0x2c57   :  { %13776 = vrcp.f32 %v9649_v20 }
0x2c60   :  { %v13775_v8 = vpop.eup %13774 }
0x2c61   :  { %v13777_v1 = vpop.eup %13776  ;;  %v9552_v43 = vsub.f32 1.0, %v13775_v8  ;;  %v9562_v63 = vmul.f32 %v13775_v8, %v17671_v61 }
0x2c62   :  { %v9671_v32 = vsub.f32 1.0, %v13777_v1  ;;  %v9681_v51 = vmul.f32 %v13777_v1, %v17665_v55 }
0x2cb9   :  { %v9538_v18 = vpop.permute.xlu0 %9537 }
0x2cba   :  { %v9540_v2 = vpop.permute.xlu1 %9539 }
0x2cbb   :  { %v9541_v3 = vsel %vm3230_vm2, %v9538_v18, %v9540_v2 }
0x2cbc   :  { %v9543_v52 = vmul.f32 %v13775_v8, %v9541_v3 }
0x2cbd   :  { %v9657_v49 = vpop.permute.xlu0 %9656 }
0x2cbe   :  { %9545 = vrot.lane.b32.xlu0 %v9543_v52, %s14053_s7  ;;  %v9659_v10 = vpop.permute.xlu1 %9658 }
0x2cbf   :  { %v9660_v35 = vsel %vm3230_vm2, %v9657_v49, %v9659_v10 }
0x2cc0   :  { %v9662_v26 = vmul.f32 %v13777_v1, %v9660_v35  ;;  %v18699_v35 = vld [vmem:[#allocation38_spill] sm:$0xff] }
0x2cc2   :  { %9664 = vrot.lane.b32.xlu1 %v9662_v26, %s14053_s7 }
0x2d30   :  { %v9546_v31 = vpop.permute.xlu0 %9545 }
0x2d31   :  { %v9548_v54 = vadd.f32 %v9546_v31, %v9446_v56  ;;  %v9549_v5 = vadd.f32 %v9546_v31, %v9448_v0 }
0x2d33   :  { %13778 = vtanh.f32 %v9548_v54 }
0x2d34   :  { %13780 = vtanh.f32 %v9549_v5  ;;  %v9665_v42 = vpop.permute.xlu1 %9664 }
0x2d35   :  { %v9667_v29 = vadd.f32 %v9665_v42, %v18697_v57  ;;  %v9668_v60 = vadd.f32 %v9665_v42, %v18698_v62 }
0x2d37   :  { %13782 = vtanh.f32 %v9667_v29 }
0x2d38   :  { %13784 = vtanh.f32 %v9668_v60 }
0x2d3d   :  { %v13779_v50 = vpop.eup %13778 }
0x2d3e   :  { %v13781_v21 = vpop.eup %13780  ;;  %9555 = vrot.lane.b32.xlu0 %v13779_v50, %s14054_s22 }
0x2d3f   :  { %9557 = vrot.lane.b32.xlu1 %v13781_v21, %s14054_s22 }
0x2d41   :  { %v13783_v46 = vpop.eup %13782 }
0x2d42   :  { %v13785_v40 = vpop.eup %13784  ;;  %9674 = vrot.lane.b32.xlu0 %v13783_v46, %s14054_s22 }
0x2d43   :  { %9676 = vrot.lane.b32.xlu1 %v13785_v40, %s14054_s22 }
0x2db0   :  { %v9556_v23 = vpop.permute.xlu0 %9555 }
0x2db1   :  { %v9558_v16 = vpop.permute.xlu1 %9557 }
0x2db2   :  { %v9559_v48 = vsel %vm5652_vm5, %v9556_v23, %v9558_v16 }
0x2db3   :  { %v9561_v25 = vmul.f32 %v9559_v48, %v9552_v43 }
0x2db4   :  { %v9675_v19 = vpop.permute.xlu0 %9674 }
0x2db5   :  { %v17722_v56 = vadd.f32 %v9562_v63, %v9561_v25  ;;  %v9677_v57 = vpop.permute.xlu1 %9676 }
0x2db6   :  { %v9678_v34 = vsel %vm5652_vm5, %v9675_v19, %v9677_v57 }
0x2db7   :  { %v9680_v47 = vmul.f32 %v9678_v34, %v9671_v32  ;;  %9760 = vrot.lane.b32.xlu0 %v17722_v56, %s14054_s22 }
0x2db9   :  { %v17728_v13 = vadd.f32 %v9681_v51, %v9680_v47  ;;  %v18700_v47 = vld [vmem:[#allocation42_spill] sm:$0xff] }
0x2dbb   :  { %9684 = vrot.lane.b32.xlu1 %v17728_v13, %s14054_s22 }
0x2e29   :  { %v9761_v61 = vpop.permute.xlu0 %9760 }
0x2e2a   :  { %11593 = vmatmul.mubr.msk.f32.vlgmr.msra.gmra.mrb[62].mxu1 %vm5536_vm6, %v9761_v61 }
0x2e2b   :  { %13230 = vmatpush1.bf16.msra.mxu1 %v16947_v6  ;;  %10061 = vmatprep.mubr.f32.mxu1 %v18562_v41 }
0x2e2c   :  { %13232 = vmatprep.subr.bf16.mxu1 %v16949_v7 }
0x2e2d   :  { %v9685_v4 = vpop.permute.xlu1 %9684 }
0x2e2e   :  { %11592 = vmatmul.mubr.msk.f32.vlgmr.msra.gmra.mrb[52].mxu0 %vm5536_vm6, %v9685_v4 }
0x2e2f   :  { %13218 = vmatpush1.bf16.msra.mxu0 %v16651_v14  ;;  %9947 = vmatprep.mubr.f32.mxu0 %v18562_v41 }
0x2e30   :  { %13220 = vmatprep.subr.bf16.mxu0 %v16657_v24  ;;  %13234 = vmatpush1.bf16.msra.mxu1 %v16953_v12 }
0x2e31   :  { %13236 = vmatprep.subr.bf16.mxu1 %v16956_v53 }
0x2e33   :  { %13222 = vmatpush1.bf16.msra.mxu0 %v16662_v37 }
0x2e34   :  { %13224 = vmatprep.subr.bf16.mxu0 %v16665_v11  ;;  %13238 = vmatpush1.bf16.msra.mxu1 %v16964_v15 }
0x2e35   :  { %13252 = vmatprep.subr.bf16.mxu1 %v16637_v9 }
0x2e37   :  { %13226 = vmatpush1.bf16.msra.mxu0 %v16669_v39 }
0x2e38   :  { %13240 = vmatprep.subr.bf16.mxu0 %v16958_v38 }
0x2e3a   :  { %11595 = vmatmul.mubr.msk.f32.vlgmr.msra.gmra.mrb[54].mxu0 %vm5536_vm6, %v9685_v4 }
0x2e3b   :  { %13242 = vmatpush1.bf16.msra.mxu0 %v16974_v33  ;;  %10137 = vmatprep.mubr.f32.mxu0 %v18562_v41 }
0x2e3c   :  { %13244 = vmatprep.subr.bf16.mxu0 %v16976_v58 }
0x2e3f   :  { %13246 = vmatpush1.bf16.msra.mxu0 %v16981_v59 }
0x2e40   :  { %13248 = vmatprep.subr.bf16.mxu0 %v16985_v17 }
0x2e43   :  { %13250 = vmatpush1.bf16.msra.mxu0 %v16991_v44 }
0x2e44   :  { %13264 = vmatprep.subr.bf16.mxu0 %v16945_v22 }
0x2efd   :  { %v9830_v9 = vpop.f32.mrb[62].mxu1 }
0x2efe   :  { %v9842_v55 = vadd.f32 %v9830_v9, %v17016_v45  ;;  %v9832_v36 = vpop.f32.mrb[63].mxu1 }
0x2eff   :  { %v9843_v20 = vadd.f32 %v9832_v36, %v17016_v45 }
0x2f00   :  { %9846 = vrot.lane.b32.xlu0 %v9842_v55, %s14052_s6 }
0x2f01   :  { %9848 = vrot.lane.b32.xlu1 %v9843_v20, %s14052_s6  ;;  %v9754_v18 = vpop.f32.mrb[52].mxu0 }
0x2f02   :  { %v9756_v2 = vpop.f32.mrb[53].mxu0  ;;  %v9755_v22 = vadd.f32 %v9754_v18, %v17025_v30 }
0x2f03   :  { %v9757_v48 = vadd.f32 %v9756_v2, %v18696_v27 }
0x2f04   :  { %v9835_v10 = vadd.f32 %v9830_v9, %v9755_v22 }
0x2f06   :  { %v11594_v1 = vmul.f32 -1.442695, %v9835_v10 }
0x2f08   :  { %13786 = vpow2.f32 %v11594_v1 }
0x2f0d   :  { %v9949_v8 = vpop.f32.mrb[54].mxu0 }
0x2f0e   :  { %v9961_v3 = vadd.f32 %v9949_v8, %v16784_v28  ;;  %v9951_v52 = vpop.f32.mrb[55].mxu0  ;;  %v9954_v26 = vadd.f32 %v9949_v8, %v18699_v35 }
0x2f0f   :  { %v9962_v49 = vadd.f32 %v9951_v52, %v16784_v28 }
0x2f10   :  { %9965 = vrot.lane.b32.xlu0 %v9961_v3, %s14052_s6  ;;  %v11596_v31 = vmul.f32 -1.442695, %v9954_v26 }
0x2f11   :  { %9967 = vrot.lane.b32.xlu1 %v9962_v49, %s14052_s6 }
0x2f12   :  { %v13787_v0 = vpop.eup %13786  ;;  %13788 = vpow2.f32 %v11596_v31 }
0x2f13   :  { %v9839_v54 = vadd.f32 1.0, %v13787_v0 }
0x2f15   :  { %13790 = vrcp.f32 %v9839_v54 }
0x2f1c   :  { %v13789_v42 = vpop.eup %13788 }
0x2f1d   :  { %v9958_v21 = vadd.f32 1.0, %v13789_v42 }
0x2f1f   :  { %v13791_v62 = vpop.eup %13790  ;;  %13792 = vrcp.f32 %v9958_v21 }
0x2f20   :  { %v9861_v36 = vsub.f32 1.0, %v13791_v62  ;;  %v9871_v2 = vmul.f32 %v13791_v62, %v17722_v56 }
0x2f29   :  { %v13793_v23 = vpop.eup %13792 }
0x2f2a   :  { %v9980_v49 = vsub.f32 1.0, %v13793_v23  ;;  %v9990_v1 = vmul.f32 %v13793_v23, %v17728_v13 }
0x2f72   :  { %v9847_v5 = vpop.permute.xlu0 %9846 }
0x2f73   :  { %v9849_v29 = vpop.permute.xlu1 %9848 }
0x2f74   :  { %v9850_v60 = vsel %vm3230_vm2, %v9847_v5, %v9849_v29 }
0x2f75   :  { %v9852_v50 = vmul.f32 %v13791_v62, %v9850_v60 }
0x2f77   :  { %9854 = vrot.lane.b32.xlu0 %v9852_v50, %s14053_s7 }
0x2f82   :  { %v9966_v46 = vpop.permute.xlu0 %9965 }
0x2f83   :  { %v9968_v40 = vpop.permute.xlu1 %9967 }
0x2f84   :  { %v9969_v43 = vsel %vm3230_vm2, %v9966_v46, %v9968_v40 }
0x2f85   :  { %v9971_v16 = vmul.f32 %v13793_v23, %v9969_v43 }
0x2f87   :  { %9973 = vrot.lane.b32.xlu1 %v9971_v16, %s14053_s7 }
0x2fe9   :  { %v9855_v63 = vpop.permute.xlu0 %9854 }
0x2fea   :  { %v9857_v25 = vadd.f32 %v9855_v63, %v9755_v22  ;;  %v9858_v19 = vadd.f32 %v9855_v63, %v9757_v48 }
0x2fec   :  { %13794 = vtanh.f32 %v9857_v25 }
0x2fed   :  { %13796 = vtanh.f32 %v9858_v19 }
0x2ff6   :  { %v13795_v32 = vpop.eup %13794 }
0x2ff7   :  { %v13797_v57 = vpop.eup %13796  ;;  %9864 = vrot.lane.b32.xlu0 %v13795_v32, %s14054_s22 }
0x2ff8   :  { %9866 = vrot.lane.b32.xlu1 %v13797_v57, %s14054_s22 }
0x2ff9   :  { %v9974_v34 = vpop.permute.xlu1 %9973 }
0x2ffa   :  { %v9976_v51 = vadd.f32 %v9974_v34, %v18699_v35  ;;  %v9977_v61 = vadd.f32 %v9974_v34, %v18700_v47  ;;  %v18702_v34 = vld [vmem:[#allocation51_spill] sm:$0xff] }
0x2ffc   :  { %13798 = vtanh.f32 %v9976_v51 }
0x2ffd   :  { %13800 = vtanh.f32 %v9977_v61 }
0x3006   :  { %v13799_v4 = vpop.eup %13798 }
0x3007   :  { %v13801_v9 = vpop.eup %13800  ;;  %9983 = vrot.lane.b32.xlu0 %v13799_v4, %s14054_s22 }
0x3008   :  { %9985 = vrot.lane.b32.xlu1 %v13801_v9, %s14054_s22 }
0x3069   :  { %v9865_v55 = vpop.permute.xlu0 %9864 }
0x306a   :  { %v9867_v20 = vpop.permute.xlu1 %9866 }
0x306b   :  { %v9868_v18 = vsel %vm5652_vm5, %v9865_v55, %v9867_v20 }
0x306c   :  { %v9870_v8 = vmul.f32 %v9868_v18, %v9861_v36 }
0x306e   :  { %v17779_v3 = vadd.f32 %v9871_v2, %v9870_v8 }
0x3070   :  { %10069 = vrot.lane.b32.xlu0 %v17779_v3, %s14054_s22 }
0x3079   :  { %v9984_v52 = vpop.permute.xlu0 %9983 }
0x307a   :  { %v9986_v22 = vpop.permute.xlu1 %9985 }
0x307b   :  { %v9987_v10 = vsel %vm5652_vm5, %v9984_v52, %v9986_v22 }
0x307c   :  { %v9989_v35 = vmul.f32 %v9987_v10, %v9980_v49 }
0x307e   :  { %v17785_v26 = vadd.f32 %v9990_v1, %v9989_v35 }
0x3080   :  { %9993 = vrot.lane.b32.xlu1 %v17785_v26, %s14054_s22 }
0x30e2   :  { %v10070_v56 = vpop.permute.xlu0 %10069 }
0x30e3   :  { %11598 = vmatmul.mubr.msk.f32.vlgmr.msra.gmra.mrb[56].mxu0 %vm5536_vm6, %v10070_v56 }
0x30e4   :  { %13266 = vmatpush1.bf16.msra.mxu0 %v16947_v6  ;;  %10370 = vmatprep.mubr.f32.mxu0 %v18562_v41 }
0x30e5   :  { %13268 = vmatprep.subr.bf16.mxu0 %v16949_v7 }
0x30e8   :  { %13270 = vmatpush1.bf16.msra.mxu0 %v16953_v12 }
0x30e9   :  { %13272 = vmatprep.subr.bf16.mxu0 %v16956_v53 }
0x30ec   :  { %13274 = vmatpush1.bf16.msra.mxu0 %v16964_v15 }
0x30f2   :  { %v9994_v13 = vpop.permute.xlu1 %9993 }
0x30f3   :  { %11597 = vmatmul.mubr.msk.f32.vlgmr.msra.gmra.mrb[64].mxu1 %vm5536_vm6, %v9994_v13 }
0x30f4   :  { %13254 = vmatpush1.bf16.msra.mxu1 %v16651_v14  ;;  %10256 = vmatprep.mubr.f32.mxu1 %v18562_v41 }
0x30f5   :  { %13256 = vmatprep.subr.bf16.mxu1 %v16657_v24 }
0x30f8   :  { %13258 = vmatpush1.bf16.msra.mxu1 %v16662_v37 }
0x30f9   :  { %13260 = vmatprep.subr.bf16.mxu1 %v16665_v11 }
0x30fc   :  { %13262 = vmatpush1.bf16.msra.mxu1 %v16669_v39 }
0x30fd   :  { %13276 = vmatprep.subr.bf16.mxu1 %v16958_v38 }
0x30ff   :  { %11600 = vmatmul.mubr.msk.f32.vlgmr.msra.gmra.mrb[66].mxu1 %vm5536_vm6, %v9994_v13 }
0x3100   :  { %13278 = vmatpush1.bf16.msra.mxu1 %v16974_v33  ;;  %10446 = vmatprep.mubr.f32.mxu1 %v18562_v41 }
0x3101   :  { %13280 = vmatprep.subr.bf16.mxu1 %v16976_v58 }
0x3104   :  { %13282 = vmatpush1.bf16.msra.mxu1 %v16981_v59 }
0x3105   :  { %13284 = vmatprep.subr.bf16.mxu1 %v16985_v17 }
0x3108   :  { %13286 = vmatpush1.bf16.msra.mxu1 %v16991_v44  ;;  %v18701_v44 = vld [vmem:[#allocation50_spill] sm:$0xff] }
0x31b6   :  { %v10139_v14 = vpop.f32.mrb[56].mxu0 }
0x31b7   :  { %v10151_v24 = vadd.f32 %v10139_v14, %v17016_v45  ;;  %v10141_v37 = vpop.f32.mrb[57].mxu0 }
0x31b8   :  { %v10152_v11 = vadd.f32 %v10141_v37, %v17016_v45 }
0x31b9   :  { %10155 = vrot.lane.b32.xlu0 %v10151_v24, %s14052_s6 }
0x31ba   :  { %10157 = vrot.lane.b32.xlu1 %v10152_v11, %s14052_s6 }
0x31c6   :  { %v10063_v39 = vpop.f32.mrb[64].mxu1 }
0x31c7   :  { %v10065_v6 = vpop.f32.mrb[65].mxu1  ;;  %v10064_v15 = vadd.f32 %v10063_v39, %v17025_v30 }
0x31c8   :  { %v10066_v43 = vadd.f32 %v10065_v6, %v18696_v27 }
0x31c9   :  { %v10144_v33 = vadd.f32 %v10139_v14, %v10064_v15 }
0x31cb   :  { %v11599_v58 = vmul.f32 -1.442695, %v10144_v33 }
0x31cd   :  { %13802 = vpow2.f32 %v11599_v58 }
0x31d2   :  { %v10258_v7 = vpop.f32.mrb[66].mxu1 }
0x31d3   :  { %v10270_v12 = vadd.f32 %v10258_v7, %v16784_v28  ;;  %v10260_v53 = vpop.f32.mrb[67].mxu1  ;;  %v10263_v0 = vadd.f32 %v10258_v7, %v18701_v44 }
0x31d4   :  { %v10271_v38 = vadd.f32 %v10260_v53, %v16784_v28 }
0x31d5   :  { %10274 = vrot.lane.b32.xlu0 %v10270_v12, %s14052_s6  ;;  %v11601_v31 = vmul.f32 -1.442695, %v10263_v0 }
0x31d6   :  { %10276 = vrot.lane.b32.xlu1 %v10271_v38, %s14052_s6 }
0x31d7   :  { %v13803_v59 = vpop.eup %13802 }
0x31d8   :  { %v10148_v17 = vadd.f32 1.0, %v13803_v59 }
0x31da   :  { %13804 = vrcp.f32 %v10148_v17 }
0x31db   :  { %13806 = vpow2.f32 %v11601_v31  ;;  %v10492_v31 = vld [vmem:[%s17983_s14 + $0x8] sm:$0xff] }
0x31e4   :  { %v13805_v42 = vpop.eup %13804 }
0x31e5   :  { %v13807_v62 = vpop.eup %13806  ;;  %v10170_v9 = vsub.f32 1.0, %v13805_v42  ;;  %v10180_v20 = vmul.f32 %v13805_v42, %v17779_v3 }
0x31e6   :  { %v10267_v60 = vadd.f32 1.0, %v13807_v62 }
0x31e8   :  { %13808 = vrcp.f32 %v10267_v60 }
0x31f2   :  { %v13809_v46 = vpop.eup %13808 }
0x31f3   :  { %v10289_v52 = vsub.f32 1.0, %v13809_v46  ;;  %v10299_v10 = vmul.f32 %v13809_v46, %v17785_v26 }
0x322b   :  { %v10156_v54 = vpop.permute.xlu0 %10155 }
0x322c   :  { %v10158_v5 = vpop.permute.xlu1 %10157 }
0x322d   :  { %v10159_v28 = vsel %vm3230_vm2, %v10156_v54, %v10158_v5  ;;  %v14055_v54 = vmov 0.0|0.0  }
0x322e   :  { %v10161_v29 = vmul.f32 %v13805_v42, %v10159_v28  ;;  %13287 = vmatprep.subr.bf16.mxu0 %v14055_v54  ;;  %v10513_v42 = vand.u32 4294901760, %v10492_v31  ;;  %13344 = vmatprep.subr.bf16.mxu1 %v14055_v54 }
0x3230   :  { %10163 = vrot.lane.b32.xlu0 %v10161_v29, %s14053_s7  ;;  %v17863_v29 = vsub.f32 %v10492_v31, %v10513_v42 }
0x3247   :  { %v10275_v50 = vpop.permute.xlu0 %10274 }
0x3248   :  { %v10277_v21 = vpop.permute.xlu1 %10276 }
0x3249   :  { %v10278_v40 = vsel %vm3230_vm2, %v10275_v50, %v10277_v21  ;;  %v10493_v50 = vld [vmem:[%s17983_s14 + $0x10] sm:$0xff]  ;;  %v10494_v21 = vld [vmem:[%s17983_s14 + $0x18] sm:$0xff] }
0x324a   :  { %v10280_v23 = vmul.f32 %v13809_v46, %v10278_v40  ;;  %v10516_v46 = vand.u32 4294901760, %v10493_v50  ;;  %v10519_v40 = vand.u32 4294901760, %v10494_v21 }
0x324c   :  { %10282 = vrot.lane.b32.xlu1 %v10280_v23, %s14053_s7  ;;  %v17875_v23 = vpack.c.bf16 %v10519_v40, %v10516_v46 }
0x32a2   :  { %v10164_v16 = vpop.permute.xlu0 %10163 }
0x32a3   :  { %v10166_v48 = vadd.f32 %v10164_v16, %v10064_v15  ;;  %v10167_v63 = vadd.f32 %v10164_v16, %v10066_v43  ;;  %v10495_v43 = vld [vmem:[%s17983_s14 + $0x20] sm:$0xff]  ;;  %v10496_v16 = vld [vmem:[%s17983_s14 + $0x28] sm:$0xff] }
0x32a5   :  { %13810 = vtanh.f32 %v10166_v48 }
0x32a6   :  { %13812 = vtanh.f32 %v10167_v63  ;;  %v10522_v63 = vand.u32 4294901760, %v10495_v43 }
0x32af   :  { %v13811_v25 = vpop.eup %13810 }
0x32b0   :  { %v13813_v19 = vpop.eup %13812  ;;  %10173 = vrot.lane.b32.xlu0 %v13811_v25, %s14054_s22  ;;  %v10525_v25 = vand.u32 4294901760, %v10496_v16 }
0x32b1   :  { %10175 = vrot.lane.b32.xlu1 %v13813_v19, %s14054_s22 }
0x32be   :  { %v10283_v32 = vpop.permute.xlu1 %10282 }
0x32bf   :  { %v10285_v57 = vadd.f32 %v10283_v32, %v18701_v44  ;;  %v10286_v51 = vadd.f32 %v10283_v32, %v18702_v34  ;;  %v10600_v32 = vand.u32 4294901760, %v17863_v29 }
0x32c1   :  { %13814 = vtanh.f32 %v10285_v57 }
0x32c2   :  { %13816 = vtanh.f32 %v10286_v51 }
0x32cb   :  { %v13815_v47 = vpop.eup %13814 }
0x32cc   :  { %v13817_v61 = vpop.eup %13816  ;;  %10292 = vrot.lane.b32.xlu0 %v13815_v47, %s14054_s22 }
0x32cd   :  { %10294 = vrot.lane.b32.xlu1 %v13817_v61, %s14054_s22  ;;  %v10606_v61 = vsub.f32 %v10493_v50, %v10516_v46 }
0x3322   :  { %v10174_v4 = vpop.permute.xlu0 %10173 }
0x3323   :  { %v10176_v55 = vpop.permute.xlu1 %10175 }
0x3324   :  { %v10177_v36 = vsel %vm5652_vm5, %v10174_v4, %v10176_v55  ;;  %v10613_v4 = vsub.f32 %v10494_v21, %v10519_v40 }
0x3325   :  { %v10179_v18 = vmul.f32 %v10177_v36, %v10170_v9  ;;  %v17889_v9 = vpack.c.bf16 %v10525_v25, %v10522_v63  ;;  %v10620_v36 = vsub.f32 %v10495_v43, %v10522_v63 }
0x3327   :  { %v17834_v2 = vadd.f32 %v10180_v20, %v10179_v18  ;;  %v10627_v20 = vsub.f32 %v10496_v16, %v10525_v25  ;;  %v11605_v25 = vld [vmem:[#allocation13] ss:$0 sm:$0xff] }
0x3329   :  { %10378 = vrot.lane.b32.xlu0 %v17834_v2, %s14054_s22 }
0x333e   :  { %v10293_v8 = vpop.permute.xlu0 %10292 }
0x333f   :  { %v10295_v49 = vpop.permute.xlu1 %10294 }
0x3340   :  { %v10296_v22 = vsel %vm5652_vm5, %v10293_v8, %v10295_v49  ;;  %v10607_v8 = vand.u32 4294901760, %v10606_v61 }
0x3341   :  { %v10298_v1 = vmul.f32 %v10296_v22, %v10289_v52  ;;  %v10614_v52 = vand.u32 4294901760, %v10613_v4 }
0x3343   :  { %v10300_v35 = vadd.f32 %v10299_v10, %v10298_v1  ;;  %v10608_v1 = vsub.f32 %v10606_v61, %v10607_v8 }
0x3345   :  { %10302 = vrot.lane.b32.xlu1 %v10300_v35, %s14054_s22  ;;  %v10615_v35 = vsub.f32 %v10613_v4, %v10614_v52 }
0x339b   :  { %v10379_v56 = vpop.permute.xlu0 %10378 }
0x339c   :  { %11603 = vmatmul.mubr.msk.f32.vlgmr.msra.gmra.mrb[68].mxu1 %vm5536_vm6, %v10379_v56 }
0x339d   :  { %11768 = vmatprep.mubr.msk.f32.mxu1 %vm14056_vm7, %v18562_v41 }
0x33b7   :  { %v10303_v3 = vpop.permute.xlu1 %10302 }
0x33b8   :  { %11602 = vmatmul.mubr.msk.f32.vlgmr.msra.gmra.mrb[58].mxu0 %vm5536_vm6, %v10303_v3  ;;  %v10609_v3 = vand.u32 4294901760, %v10608_v1 }
0x33b9   :  { %11679 = vmatprep.mubr.msk.f32.mxu0 %vm14056_vm7, %v18562_v41 }
0x346f   :  { %v10448_v13 = vpop.f32.mrb[68].mxu1 }
0x3470   :  { %v10460_v14 = vadd.f32 %v10448_v13, %v17016_v45  ;;  %v10450_v24 = vpop.f32.mrb[69].mxu1 }
0x3471   :  { %v10461_v37 = vadd.f32 %v10450_v24, %v17016_v45  ;;  %v10628_v24 = vand.u32 4294901760, %v10627_v20 }
0x3472   :  { %10464 = vrot.lane.b32.xlu0 %v10460_v14, %s14052_s6  ;;  %v10621_v14 = vand.u32 4294901760, %v10620_v36 }
0x3473   :  { %10466 = vrot.lane.b32.xlu1 %v10461_v37, %s14052_s6 }
0x348b   :  { %v10372_v26 = vpop.f32.mrb[58].mxu0 }
0x348c   :  { %v10374_v11 = vpop.f32.mrb[59].mxu0  ;;  %v10373_v39 = vadd.f32 %v10372_v26, %v17025_v30  ;;  %v10491_v30 = vld [vmem:[%s17983_s14] sm:$0xff]  ;;  %v10622_v26 = vsub.f32 %v10620_v36, %v10621_v14 }
0x348d   :  { %v10375_v59 = vadd.f32 %v10374_v11, %v18696_v27  ;;  %v10510_v5 = vand.u32 4294901760, %v10491_v30  ;;  %v10629_v11 = vsub.f32 %v10627_v20, %v10628_v24 }
0x348e   :  { %v10453_v6 = vadd.f32 %v10448_v13, %v10373_v39  ;;  %v10616_v13 = vand.u32 4294901760, %v10615_v35 }
0x348f   :  { %v17859_v27 = vpack.c.bf16 %v10513_v42, %v10510_v5  ;;  %v17861_v28 = vsub.f32 %v10491_v30, %v10510_v5  ;;  %v11021_v5 = vld [vmem:[%s17985_s16] sm:$0xff]  ;;  %v11022_v42 = vld [vmem:[%s17985_s16 + $0x8] sm:$0xff]  ;;  %s14057_s16 = smov [#allocation16]  }
0x3490   :  { %v11604_v7 = vmul.f32 -1.442695, %v10453_v6  ;;  %v13300_v37 = vpack.c.bf16 %v10616_v13, %v10609_v3  ;;  %v10630_v6 = vand.u32 4294901760, %v10629_v11  ;;  %s11512_s17 = sshll.u32 %s14057_s16, 4  ;;  %s11513_s17 = int_to_ptr.vmem [resolvable:$true] %s11512_s17 }
0x3491   :  { %13289 = vmatpush3.bf16.msra.mxu0 %v17859_v27  ;;  %v10593_v19 = vand.u32 4294901760, %v17861_v28  ;;  %s14006_s27 = scalar_lea.vmem %s11513_s17, 32  ;;  %p14011_p9 = scmp.lt.s32.totalorder %s11513_s17, %s11513_s17 }
0x3492   :  { %13818 = vpow2.f32 %v11604_v7  ;;  %13290 = vmatprep.subr.bf16.mxu0 %v14055_v54  ;;  %p14007_p8 = scmp.ne.s32.totalorder %s11513_s17, %s14006_s27  ;;  %p14012_p10 = scmp.lt.s32.totalorder %s14006_s27, %s14006_s27 }
0x3493   :  { %v10594_v18 = vsub.f32 %v17861_v28, %v10593_v19 }
0x3494   :  { %p14013_p11 = por %p14012_p10, %p14011_p9 }
0x3495   :  { %13292 = vmatpush3.bf16.msra.mxu0 %v17875_v23  ;;  %v10595_v22 = vand.u32 4294901760, %v10594_v18  ;;  %v11606_v18 = vld [vmem:[#allocation14] ss:$0 sm:$0xff] }
0x3496   :  { %13293 = vmatprep.subr.bf16.mxu0 %v14055_v54  ;;  %p14014_p12 = pnand %p14013_p11, %p14007_p8 }
0x3499   :  { %13295 = vmatpush3.bf16.msra.mxu0 %v17889_v9 }
0x349a   :  { %13296 = vmatprep.subr.bf16.mxu0 %v14055_v54 }
0x349c   :  { %v13819_v12 = vpop.eup %13818 }
0x349d   :  { %v10457_v53 = vadd.f32 1.0, %v13819_v12  ;;  %v13306_v12 = vpack.c.bf16 %v17863_v29, %v17861_v28  ;;  %v11038_v28 = vand.u32 4294901760, %v11022_v42 }
0x349f   :  { %13820 = vrcp.f32 %v10457_v53  ;;  %v13309_v53 = vpack.c.bf16 %v10613_v4, %v10606_v61 }
0x34a9   :  { %v13821_v33 = vpop.eup %13820 }
0x34aa   :  { %v10479_v34 = vsub.f32 1.0, %v13821_v33  ;;  %v10489_v51 = vmul.f32 %v13821_v33, %v17834_v2  ;;  %v10601_v2 = vsub.f32 %v17863_v29, %v10600_v32 }
0x34ac   :  { %v10602_v10 = vand.u32 4294901760, %v10601_v2 }
0x34ae   :  { %v13297_v56 = vpack.c.bf16 %v10602_v10, %v10595_v22 }
0x34e4   :  { %v10465_v38 = vpop.permute.xlu0 %10464 }
0x34e5   :  { %v10467_v15 = vpop.permute.xlu1 %10466 }
0x34e6   :  { %v10468_v58 = vsel %vm3230_vm2, %v10465_v38, %v10467_v15  ;;  %v13312_v38 = vpack.c.bf16 %v10627_v20, %v10620_v36  ;;  %v13324_v15 = vpack.c.bf16 %v10600_v32, %v10593_v19 }
0x34e7   :  { %v10470_v45 = vmul.f32 %v13821_v33, %v10468_v58  ;;  %v13327_v33 = vpack.c.bf16 %v10614_v52, %v10607_v8  ;;  %v13330_v58 = vpack.c.bf16 %v10628_v24, %v10621_v14 }
0x34e9   :  { %10472 = vrot.lane.b32.xlu0 %v10470_v45, %s14053_s7 }
0x355b   :  { %v10473_v17 = vpop.permute.xlu0 %10472 }
0x355c   :  { %v10475_v44 = vadd.f32 %v10473_v17, %v10373_v39  ;;  %v10476_v0 = vadd.f32 %v10473_v17, %v10375_v59  ;;  %v10623_v39 = vand.u32 4294901760, %v10622_v26 }
0x355e   :  { %13822 = vtanh.f32 %v10475_v44  ;;  %v13303_v7 = vpack.c.bf16 %v10630_v6, %v10623_v39 }
0x355f   :  { %13824 = vtanh.f32 %v10476_v0 }
0x3568   :  { %v13823_v62 = vpop.eup %13822 }
0x3569   :  { %v13825_v60 = vpop.eup %13824  ;;  %10482 = vrot.lane.b32.xlu1 %v13823_v62, %s14054_s22  ;;  %v11120_v62 = vsub.f32 %v11022_v42, %v11038_v28 }
0x356a   :  { %10484 = vrot.lane.b32.xlu0 %v13825_v60, %s14054_s22 }
0x356b   :  { %v11121_v50 = vand.u32 4294901760, %v11120_v62 }
0x356d   :  { %v11122_v46 = vsub.f32 %v11120_v62, %v11121_v50 }
0x35db   :  { %v10483_v48 = vpop.permute.xlu1 %10482 }
0x35dc   :  { %v10485_v57 = vpop.permute.xlu0 %10484 }
0x35dd   :  { %v10486_v47 = vsel %vm5652_vm5, %v10483_v48, %v10485_v57 }
0x35de   :  { %v10488_v55 = vmul.f32 %v10486_v47, %v10479_v34 }
0x35e0   :  { %v10490_v49 = vadd.f32 %v10489_v51, %v10488_v55 }
0x35e2   :  { %10505 = vrot.lane.b32.xlu1 %v10490_v49, %s14054_s22 }
0x3654   :  { %v10506_v45 = vpop.permute.xlu1 %10505 }
0x3655   :  { %v10507_v59 = vsel %vm5536_vm6, %v10506_v45, 0 }
0x3656   :  { %v10580_v17 = vand.u32 4294901760, %v10507_v59 }
0x3658   :  { %v10581_v44 = vsub.f32 %v10507_v59, %v10580_v17 }
0x365a   :  { %v10582_v0 = vand.u32 4294901760, %v10581_v44 }
0x365c   :  { %v10583_v30 = vsub.f32 %v10581_v44, %v10582_v0 }
0x365e   :  { %v10584_v31 = vand.u32 4294901760, %v10583_v30 }
0x3660   :  { %11680 = vmatmul.mubr.f32.vlgmr.msra.gmra.mrb[60].mxu0 %v10584_v31 }
0x3661   :  { %13298 = vmatpush3.bf16.msra.mxu0 %v13297_v56  ;;  %11694 = vmatprep.mubr.msk.f32.mxu0 %vm14056_vm7, %v18562_v41 }
0x3662   :  { %13299 = vmatprep.subr.bf16.mxu0 %v14055_v54 }
0x3665   :  { %13301 = vmatpush3.bf16.msra.mxu0 %v13300_v37 }
0x3666   :  { %13302 = vmatprep.subr.bf16.mxu0 %v14055_v54 }
0x3669   :  { %13304 = vmatpush3.bf16.msra.mxu0 %v13303_v7 }
0x366a   :  { %13305 = vmatprep.subr.bf16.mxu0 %v14055_v54 }
0x366c   :  { %11695 = vmatmul.mubr.f32.vlgmr.msra.gmra.mrb[60].mxu0 %v10580_v17 }
0x366d   :  { %13307 = vmatpush3.bf16.msra.mxu0 %v13306_v12  ;;  %11709 = vmatprep.mubr.msk.f32.mxu0 %vm14056_vm7, %v18562_v41 }
0x366e   :  { %13308 = vmatprep.subr.bf16.mxu0 %v14055_v54 }
0x3671   :  { %13310 = vmatpush3.bf16.msra.mxu0 %v13309_v53 }
0x3672   :  { %13311 = vmatprep.subr.bf16.mxu0 %v14055_v54 }
0x3675   :  { %13313 = vmatpush3.bf16.msra.mxu0 %v13312_v38 }
0x3676   :  { %13314 = vmatprep.subr.bf16.mxu0 %v14055_v54 }
0x3678   :  { %11710 = vmatmul.mubr.f32.vlgmr.msra.gmra.mrb[60].mxu0 %v10581_v44 }
0x3679   :  { %13316 = vmatpush3.bf16.msra.mxu0 %v17859_v27  ;;  %11724 = vmatprep.mubr.msk.f32.mxu0 %vm14056_vm7, %v18562_v41 }
0x367a   :  { %13317 = vmatprep.subr.bf16.mxu0 %v14055_v54 }
0x367d   :  { %13319 = vmatpush3.bf16.msra.mxu0 %v17875_v23 }
0x367e   :  { %13320 = vmatprep.subr.bf16.mxu0 %v14055_v54 }
0x3681   :  { %13322 = vmatpush3.bf16.msra.mxu0 %v17889_v9 }
0x3682   :  { %13323 = vmatprep.subr.bf16.mxu0 %v14055_v54 }
0x3684   :  { %11725 = vmatmul.mubr.f32.vlgmr.msra.gmra.mrb[60].mxu0 %v10582_v0 }
0x3685   :  { %13325 = vmatpush3.bf16.msra.mxu0 %v13324_v15  ;;  %11739 = vmatprep.mubr.msk.f32.mxu0 %vm14056_vm7, %v18562_v41 }
0x3686   :  { %13326 = vmatprep.subr.bf16.mxu0 %v14055_v54 }
0x3689   :  { %13328 = vmatpush3.bf16.msra.mxu0 %v13327_v33 }
0x368a   :  { %13329 = vmatprep.subr.bf16.mxu0 %v14055_v54 }
0x368d   :  { %13331 = vmatpush3.bf16.msra.mxu0 %v13330_v58 }
0x368e   :  { %13332 = vmatprep.subr.bf16.mxu0 %v14055_v54 }
0x3690   :  { %11740 = vmatmul.mubr.f32.vlgmr.msra.gmra.mrb[60].mxu0 %v10580_v17 }
0x3691   :  { %13334 = vmatpush3.bf16.msra.mxu0 %v17859_v27  ;;  %11754 = vmatprep.mubr.msk.f32.mxu0 %vm14056_vm7, %v18562_v41  ;;  %v11035_v27 = vand.u32 4294901760, %v11021_v5 }
0x3692   :  { %13335 = vmatprep.subr.bf16.mxu0 %v14055_v54 }
0x3693   :  { %v11113_v29 = vsub.f32 %v11021_v5, %v11035_v27  ;;  %v13342_v16 = vpack.c.bf16 %v11038_v28, %v11035_v27 }
0x3695   :  { %13337 = vmatpush3.bf16.msra.mxu0 %v17875_v23  ;;  %v11114_v60 = vand.u32 4294901760, %v11113_v29  ;;  %v11123_v23 = vand.u32 4294901760, %v11122_v46  ;;  %v13348_v48 = vpack.c.bf16 %v11120_v62, %v11113_v29 }
0x3696   :  { %13338 = vmatprep.subr.bf16.mxu0 %v14055_v54 }
0x3697   :  { %v11115_v21 = vsub.f32 %v11113_v29, %v11114_v60  ;;  %v13354_v63 = vpack.c.bf16 %v11121_v50, %v11114_v60 }
0x3699   :  { %13340 = vmatpush3.bf16.msra.mxu0 %v17889_v9  ;;  %v11116_v40 = vand.u32 4294901760, %v11115_v21 }
0x369a   :  { %13341 = vmatprep.subr.bf16.mxu0 %v14055_v54 }
0x369b   :  { %v13345_v43 = vpack.c.bf16 %v11123_v23, %v11116_v40 }
0x369c   :  { %11755 = vmatmul.mubr.f32.vlgmr.msra.gmra.mrb[60].mxu0 %v10580_v17 }
0x369d   :  { %11761 = vmatprep.mubr.msk.f32.mxu0 %vm14056_vm7, %v18562_v41  ;;  %13346 = vmatpush3.bf16.msra.mxu1 %v13345_v43 }
0x369e   :  { %13347 = vmatprep.subr.bf16.mxu1 %v14055_v54  ;;  %13343 = vmatpush3.bf16.msra.mxu0 %v13342_v16 }
0x376f   :  { %v11016_v19 = vpop.f32.mrb[60].mxu0 }
0x3770   :  { %v13383_v32 = vadd.f32 %v11605_v25, %v11016_v19  ;;  %v11756_v57 = vpop.f32.mrb[61].mxu0 }
0x3772   :  { %v11020_v34 = vmax.f32 %v13383_v32, 0.0 }
0x3774   :  { %v11032_v51 = vsel %vm11030_vm8, %v11020_v34, 0 }
0x3775   :  { %v11101_v47 = vand.u32 4294901760, %v11032_v51 }
0x3777   :  { %v11102_v61 = vsub.f32 %v11032_v51, %v11101_v47  ;;  %11769 = vmatmul.mubr.f32.vlgmr.msra.gmra.mrb[70].mxu1 %v11101_v47 }
0x3778   :  { %13349 = vmatpush3.bf16.msra.mxu1 %v13348_v48  ;;  %11775 = vmatprep.mubr.msk.f32.mxu1 %vm14056_vm7, %v18562_v41 }
0x3779   :  { %v11103_v4 = vand.u32 4294901760, %v11102_v61  ;;  %13350 = vmatprep.subr.bf16.mxu1 %v14055_v54 }
0x377b   :  { %v11104_v9 = vsub.f32 %v11102_v61, %v11103_v4 }
0x377d   :  { %v11105_v55 = vand.u32 4294901760, %v11104_v9 }
0x377f   :  { %11762 = vmatmul.mubr.f32.vlgmr.msra.gmra.mrb[62].mxu0 %v11105_v55  ;;  %11776 = vmatmul.mubr.f32.vlgmr.msra.gmra.mrb[70].mxu1 %v11102_v61 }
0x3780   :  { %13352 = vmatpush3.bf16.msra.mxu1 %v13342_v16  ;;  %11782 = vmatprep.mubr.msk.f32.mxu1 %vm14056_vm7, %v18562_v41 }
0x3781   :  { %13353 = vmatprep.subr.bf16.mxu1 %v14055_v54 }
0x3787   :  { %11783 = vmatmul.mubr.f32.vlgmr.msra.gmra.mrb[70].mxu1 %v11103_v4 }
0x3788   :  { %13355 = vmatpush3.bf16.msra.mxu1 %v13354_v63  ;;  %11789 = vmatprep.mubr.msk.f32.mxu1 %vm14056_vm7, %v18562_v41 }
0x3789   :  { %13356 = vmatprep.subr.bf16.mxu1 %v14055_v54 }
0x378f   :  { %11790 = vmatmul.mubr.f32.vlgmr.msra.gmra.mrb[70].mxu1 %v11101_v47 }
0x3790   :  { %13358 = vmatpush3.bf16.msra.mxu1 %v13342_v16  ;;  %11796 = vmatprep.mubr.msk.f32.mxu1 %vm14056_vm7, %v18562_v41 }
0x3797   :  { %11797 = vmatmul.mubr.f32.vlgmr.msra.gmra.mrb[70].mxu1 %v11101_v47 }
0x3852   :  { %v11107_v36 = vpop.f32.mrb[62].mxu0 }
0x3853   :  { %v11763_v20 = vpop.f32.mrb[63].mxu0  ;;  %v11108_v2 = vadd.f32 %v11606_v18, %v11107_v36 }
0x386a   :  { %v11489_v8 = vpop.f32.mrb[70].mxu1 }
0x386b   :  { %v13385_v52 = vadd.f32 %v11489_v8, %v11108_v2  ;;  %v11798_v49 = vpop.f32.mrb[71].mxu1 }
0x386d   :  { %v11494_v22 = vsel %vm11493_vm9, %v13385_v52, -inf }
0x386e   :  { %11495 = vmax.xlane.f32.xlu0 %v11494_v22 }
0x38fb   :  { %v11496_v10 = vpop.xlane.xlu0 %11495 }
0x38fc   :  { %v11497_v1 = vsub.f32 %v13385_v52, %v11496_v10 }
0x38fe   :  { %v11498_v54 = vmul.f32 1.442695, %v11497_v1 }
0x3900   :  { %13826 = vpow2.f32 %v11498_v54 }
0x390a   :  { %v13827_v35 = vpop.eup %13826 }
0x390b   :  { %v11500_v56 = vsel %vm11493_vm9, %v13827_v35, 0.0 }
0x390c   :  { %11501 = vadd.xlane.f32.xlu1 %v11500_v56 }
0x3999   :  { %v11502_v41 = vpop.xlane.xlu1 %11501 }
0x399a   :  { %13828 = vrcp.f32 %v11502_v41 }
0x39a4   :  { %v13829_v3 = vpop.eup %13828 }
0x39a5   :  { %v11504_v13 = vmul.f32 %v13829_v3, %v13827_v35 }
0x39a7   :  { %11505 = vst.msk [vmem:[#allocation16] sm:$0x3] %vm11493_vm9, %v11504_v13 }
0x39a8   :  { %14017 = shalt.err (!%p14014_p12)
}
0x39a9   :  { %s14018_s12 = scalar_lea.hbm %s17987_s18, 32 }
0x39aa   :  { %p14019_p13 = scmp.ne.s32.totalorder %s17987_s18, %s14018_s12  ;;  %p14022_p0 = scmp.lt.u32.totalorder %s14018_s12, %s17987_s18 }
0x39ac   :  { %p14024_p1 = pnand %p14022_p0, %p14019_p13 }
0x39ae   :  { %14027 = shalt.err (!%p14024_p1)
}
0x39af   :  { %11515 = dma.vmem_to_hbm [thread:$0]  %s11513_s17, 32, %s17987_s18, [#allocation4]  }
0x39b0   :  { %14038 = dma.done.wait [#allocation4], 32  }
0x39b1   :  { %14039 = vsyncadd [#allocation4], 4294967264 }
0x39b2   :  { %11519 = vsyncpa [#allocation3], 1 }
0x39b3   :  { %11520 = vsyncpa [#allocation6], 1 }
0x39b4   :  { %11521 = vsyncpa [#allocation9], 1 }
0x39b5   :  { %11522 = vsyncpa [#allocation12], 1 }
0x39b6   :  { %11523 = vsyncpa [#allocation15], 1 }
0x39b7   :  { %11524 = vsyncpa [#allocation4], 1 }

</bundles_post_ra>
